<compile_context>
chip_gen: v7x
topology: tpu7x:2x2x1
jax: 0.10.0
libtpu: 0.0.40
codegen_flags: <defaults>
</compile_context>

<pallas_src>
import math
import functools

import jax
import jax.numpy as jnp
from jax import lax
from jax.experimental import pallas as pl
from jax.experimental.pallas import tpu as pltpu


# ----------------------------------------------------------------------------
# The fused kernel: projections -> 2x co-attention + mean pool -> fc1/BN/Exchange/fc2
# ----------------------------------------------------------------------------

def _attention_classifier_kernel(n_img, n_txt, img_ref, txt_ref, wimg_ref, wtxt_ref,
                                 pb_ref, w1_ref, w2_ref, hv_ref, out_ref):
    f32, bf16 = jnp.float32, jnp.bfloat16
    Bblk, n_img_pad, image_dim = img_ref.shape
    _, n_txt_pad, language_dim = txt_ref.shape
    H = wimg_ref.shape[1] // 3            # attention hidden dim = 256

    # --- fused projections, batch*token merged into the matmul M dimension -------------------
    # image columns = [Wq1/sqrt(H) | Wk2 | Wv2], text columns = [Wk1 | Wv1 | Wq2/sqrt(H)].
    img_flat = img_ref[...].reshape(Bblk * n_img_pad, image_dim)
    txt_flat = txt_ref[...].reshape(Bblk * n_txt_pad, language_dim)
    img_p = (jnp.dot(img_flat, wimg_ref[...], preferred_element_type=f32)
             + pb_ref[0:1, :]).astype(bf16).reshape(Bblk, n_img_pad, 3 * H)
    txt_p = (jnp.dot(txt_flat, wtxt_ref[...], preferred_element_type=f32)
             + pb_ref[1:2, :]).astype(bf16).reshape(Bblk, n_txt_pad, 3 * H)
    q1, k2, v2 = img_p[:, :, :H], img_p[:, :, H:2 * H], img_p[:, :, 2 * H:]
    k1, v1, q2 = txt_p[:, :, :H], txt_p[:, :, H:2 * H], txt_p[:, :, 2 * H:]

    # --- pad-token masks (token axes were padded to multiples of 8 in the wrapper) ------------
    def query_mean_weights(n_pad, n_valid):
        idx = lax.broadcasted_iota(jnp.int32, (1, n_pad, 1), 1)
        return jnp.where(idx < n_valid, 1.0 / n_valid, 0.0).astype(f32)

    def key_bias(n_pad, n_valid):
        if n_pad == n_valid:
            return None
        idx = lax.broadcasted_iota(jnp.int32, (1, 1, n_pad), 2)
        return jnp.where(idx < n_valid, 0.0, -1e30).astype(f32)

    def coattn_mean(q, k, v, kbias, qw):
        # mean_q[ softmax(q k^T) v ]; the 1/sqrt(H) scale is prefolded into q's projection.
        s = jnp.einsum('bqd,bkd->bqk', q, k, preferred_element_type=f32)
        if kbias is not None:
            s = s + kbias                                            # mask pad keys
        s = s - jnp.max(s, axis=-1, keepdims=True)                   # f32 softmax
        p = jnp.exp(s)
        p = p * pl.reciprocal(jnp.sum(p, axis=-1, keepdims=True), approx=True)
        pbar = jnp.sum(p * qw, axis=1, keepdims=True)                # mean over valid queries
        o = jnp.einsum('bqk,bkd->bqd', pbar.astype(bf16), v,
                       preferred_element_type=f32)                   # (Bblk, 1, H)
        return o[:, 0, :]                                            # (Bblk, H)

    x1 = coattn_mean(q1, k1, v1, key_bias(n_txt_pad, n_txt),
                     query_mean_weights(n_img_pad, n_img))           # CoAttention(img, txt).mean
    x2 = coattn_mean(q2, k2, v2, key_bias(n_img_pad, n_img),
                     query_mean_weights(n_txt_pad, n_txt))           # CoAttention(txt, img).mean

    # --- head: shared fc1 -> BN(eval) -> Exchange -> fc2, batched over the whole block --------
    # hv_ref rows: 0=fc1_b, 1=bn scale1, 2=bn shift1, 3=scale2, 4=shift2,
    #              5=keep1 mask, 6=keep2 mask, 7=fc2_b (zero padded to 128 lanes).
    x12 = jnp.concatenate([x1, x2], axis=0).astype(bf16)                           # (2*Bblk, 256)
    y = jnp.dot(x12, w1_ref[...], preferred_element_type=f32) + hv_ref[0:1, :]     # shared fc1
    n1 = y[:Bblk, :] * hv_ref[1:2, :] + hv_ref[2:3, :]        # BatchNorm1d (eval), branch 1
    n2 = y[Bblk:, :] * hv_ref[3:4, :] + hv_ref[4:5, :]        # BatchNorm1d (eval), branch 2
    z1 = jnp.where(hv_ref[5:6, :] > 0.5, n1, n2)              # Exchange (|g1| >= threshold)
    z2 = jnp.where(hv_ref[6:7, :] > 0.5, n2, n1)              # Exchange (|g2| >= threshold)
    z = jnp.concatenate([z1, z2], axis=1).astype(bf16)                             # (Bblk, 256)
    logits = jnp.dot(z, w2_ref[...], preferred_element_type=f32) + hv_ref[7:8, :]  # (Bblk, 128)
    out_ref[0] = logits.astype(out_ref.dtype)


def attention_classifier_forward(prepared, image_embedding, text_embedding, text_mask=None,
                                 *, block_b=8):
    # text_mask is unused by the 'simple' attention model (matches the PyTorch forward).
    del text_mask
    B, n_img, image_dim = image_embedding.shape
    L, language_dim = text_embedding.shape[1], text_embedding.shape[2]

    rup = lambda x, m: (x + m - 1) // m * m
    n_img_pad = rup(n_img, 8)                        # 49 -> 56: layout-free batch*token merge
    n_txt_pad = rup(max(L, 1), 8)
    Bblk = max(1, min(block_b, (B + 1) // 2))        # keep >= 2 grid steps for v7x's 2 TCs
    B_pad = rup(B, Bblk)
    n_blocks = B_pad // Bblk

    img = jnp.zeros((B_pad, n_img_pad, image_dim), jnp.bfloat16)
    img = img.at[:B, :n_img, :].set(image_embedding.astype(jnp.bfloat16))
    txt = jnp.zeros((B_pad, n_txt_pad, language_dim), jnp.bfloat16)
    txt = txt.at[:B, :L, :].set(text_embedding.astype(jnp.bfloat16))

    out = pl.pallas_call(
        functools.partial(_attention_classifier_kernel, n_img, L),
        out_shape=jax.ShapeDtypeStruct((n_blocks, Bblk, 128), jnp.float32),
        grid=(n_blocks,),
        in_specs=[
            pl.BlockSpec((Bblk, n_img_pad, image_dim), lambda b: (b, 0, 0)),
            pl.BlockSpec((Bblk, n_txt_pad, language_dim), lambda b: (b, 0, 0)),
            pl.BlockSpec(prepared["w_img"].shape, lambda b: (0, 0)),    # weights: constant
            pl.BlockSpec(prepared["w_txt"].shape, lambda b: (0, 0)),    # index_map -> stay
            pl.BlockSpec(prepared["proj_b"].shape, lambda b: (0, 0)),   # resident in VMEM
            pl.BlockSpec(prepared["fc1_wT"].shape, lambda b: (0, 0)),
            pl.BlockSpec(prepared["fc2_wT"].shape, lambda b: (0, 0)),
            pl.BlockSpec(prepared["head_vec"].shape, lambda b: (0, 0)),
        ],
        out_specs=pl.BlockSpec((1, Bblk, 128), lambda b: (b, 0, 0)),
        compiler_params=pltpu.CompilerParams(
            dimension_semantics=("parallel",),
            vmem_limit_bytes=48 * 1024 * 1024,       # fits v7x's 64 MiB/TC with headroom
        ),
    )(img, txt, prepared["w_img"], prepared["w_txt"], prepared["proj_b"],
      prepared["fc1_wT"], prepared["fc2_wT"], prepared["head_vec"])

    return out.reshape(B_pad, 128)[:B, :2]           # lane-dense slab -> (B, 2)


# ----------------------------------------------------------------------------
# Parameters: torch-layout init, then one-time prep (transpose / merge / bf16 / fold)
# ----------------------------------------------------------------------------

def init_params(key, *, image_dim=2048, language_dim=768, attention_dim=256, bn_threshold=0.02):
    ks = iter(jax.random.split(key, 32))

    def nrm(shape, std=0.02):
        return std * jax.random.normal(next(ks), shape, jnp.float32)

    p = {"bn_threshold": bn_threshold}
    p["coattn1"] = dict(  # CoAttention(q_dim=image_dim, kv_dim=language_dim), torch (out, in)
        Wq_w=nrm((attention_dim, image_dim)), Wq_b=nrm((attention_dim,)),
        Wk_w=nrm((attention_dim, language_dim)), Wk_b=nrm((attention_dim,)),
        Wv_w=nrm((attention_dim, language_dim)), Wv_b=nrm((attention_dim,)))
    p["coattn2"] = dict(  # CoAttention(q_dim=language_dim, kv_dim=image_dim)
        Wq_w=nrm((attention_dim, language_dim)), Wq_b=nrm((attention_dim,)),
        Wk_w=nrm((attention_dim, image_dim)), Wk_b=nrm((attention_dim,)),
        Wv_w=nrm((attention_dim, image_dim)), Wv_b=nrm((attention_dim,)))
    half = attention_dim // 2
    p["fc1_w"] = nrm((half, attention_dim))
    p["fc1_b"] = nrm((half,))
    # BatchNorm1dParallel(128, 2), eval mode.  Default torch init (weight=1) would make Exchange
    # a no-op; |weight| spread around the 0.02 threshold exercises the channel swap.
    p["bn"] = dict(
        g1=0.04 * jax.random.uniform(next(ks), (half,), jnp.float32), b1=nrm((half,)),
        m1=nrm((half,)), v1=1.0 + 0.1 * jax.random.uniform(next(ks), (half,), jnp.float32),
        g2=0.04 * jax.random.uniform(next(ks), (half,), jnp.float32), b2=nrm((half,)),
        m2=nrm((half,)), v2=1.0 + 0.1 * jax.random.uniform(next(ks), (half,), jnp.float32))
    p["fc2_w"] = nrm((2, attention_dim))
    p["fc2_b"] = nrm((2,))
    return p


def prepare_params(p, eps=1e-5):
    """One-time: transpose to (K, N), merge shared-input projections, fold 1/sqrt(H) into Wq,
    cast matmul weights to bf16, fold BN(eval) into scale/shift, precompute Exchange keep masks,
    zero-pad fc2 to 128 output lanes."""
    bf16 = jnp.bfloat16
    c1, c2 = p["coattn1"], p["coattn2"]
    H = c1["Wq_w"].shape[0]
    s = 1.0 / math.sqrt(H)                                     # exact power of two (1/16)
    w_img = jnp.concatenate([c1["Wq_w"].T * s, c2["Wk_w"].T, c2["Wv_w"].T], axis=1).astype(bf16)
    w_txt = jnp.concatenate([c1["Wk_w"].T, c1["Wv_w"].T, c2["Wq_w"].T * s], axis=1).astype(bf16)
    proj_b = jnp.stack([jnp.concatenate([c1["Wq_b"] * s, c2["Wk_b"], c2["Wv_b"]]),
                        jnp.concatenate([c1["Wk_b"], c1["Wv_b"], c2["Wq_b"] * s])], axis=0)

    fc1_wT = p["fc1_w"].T.astype(bf16)                                    # (256, 128)
    bn = p["bn"]
    scale1 = bn["g1"] / jnp.sqrt(bn["v1"] + eps)
    shift1 = bn["b1"] - bn["m1"] * scale1
    scale2 = bn["g2"] / jnp.sqrt(bn["v2"] + eps)
    shift2 = bn["b2"] - bn["m2"] * scale2
    keep1 = (jnp.abs(bn["g1"]) >= p["bn_threshold"]).astype(jnp.float32)
    keep2 = (jnp.abs(bn["g2"]) >= p["bn_threshold"]).astype(jnp.float32)

    n_cls = p["fc2_w"].shape[0]
    fc2_wT = jnp.zeros((p["fc2_w"].shape[1], 128), jnp.float32)
    fc2_wT = fc2_wT.at[:, :n_cls].set(p["fc2_w"].T).astype(bf16)          # (256, 128), zero pad
    fc2_b = jnp.zeros((128,), jnp.float32).at[:n_cls].set(p["fc2_b"])

    head_vec = jnp.stack([p["fc1_b"], scale1, shift1, scale2, shift2, keep1, keep2, fc2_b],
                         axis=0).astype(jnp.float32)                      # (8, 128) f32 tile
    return dict(w_img=w_img, w_txt=w_txt, proj_b=proj_b.astype(jnp.float32),
                fc1_wT=fc1_wT, fc2_wT=fc2_wT, head_vec=head_vec)


# ----------------------------------------------------------------------------
# Pure-JAX f32 reference (gold semantics of the torch module, eval mode)
# ----------------------------------------------------------------------------

def reference_forward(p, image_embedding, text_embedding):
    def lin(x, w, b):
        return x @ w.T + b

    h = p["coattn1"]["Wq_w"].shape[0]
    c1, c2 = p["coattn1"], p["coattn2"]
    q1 = lin(image_embedding, c1["Wq_w"], c1["Wq_b"])
    k1 = lin(text_embedding, c1["Wk_w"], c1["Wk_b"])
    v1 = lin(text_embedding, c1["Wv_w"], c1["Wv_b"])
    s1 = jax.nn.softmax(jnp.einsum("bqd,bkd->bqk", q1, k1) / math.sqrt(h), axis=-1)
    x1 = jnp.einsum("bqk,bkd->bqd", s1, v1).mean(axis=1)
    q2 = lin(text_embedding, c2["Wq_w"], c2["Wq_b"])
    k2 = lin(image_embedding, c2["Wk_w"], c2["Wk_b"])
    v2 = lin(image_embedding, c2["Wv_w"], c2["Wv_b"])
    s2 = jax.nn.softmax(jnp.einsum("bqd,bkd->bqk", q2, k2) / math.sqrt(h), axis=-1)
    x2 = jnp.einsum("bqk,bkd->bqd", s2, v2).mean(axis=1)

    y1 = lin(x1, p["fc1_w"], p["fc1_b"])
    y2 = lin(x2, p["fc1_w"], p["fc1_b"])
    bn, eps = p["bn"], 1e-5
    n1 = (y1 - bn["m1"]) / jnp.sqrt(bn["v1"] + eps) * bn["g1"] + bn["b1"]
    n2 = (y2 - bn["m2"]) / jnp.sqrt(bn["v2"] + eps) * bn["g2"] + bn["b2"]
    keep1 = jnp.abs(bn["g1"]) >= p["bn_threshold"]
    keep2 = jnp.abs(bn["g2"]) >= p["bn_threshold"]
    z1 = jnp.where(keep1, n1, n2)
    z2 = jnp.where(keep2, n2, n1)
    return lin(jnp.concatenate([z1, z2], axis=-1), p["fc2_w"], p["fc2_b"])


if __name__ == "__main__":
    key = jax.random.PRNGKey(0)
    k_params, k_img, k_txt = jax.random.split(key, 3)

    B, N_IMG, L = 8, 49, 8                # ResNet50 7x7 tokens, short text sequence
    IMAGE_DIM, LANGUAGE_DIM = 2048, 768   # module defaults

    params = init_params(k_params, image_dim=IMAGE_DIM, language_dim=LANGUAGE_DIM)
    prepared = prepare_params(params)

    image_embedding = 0.1 * jax.random.normal(k_img, (B, N_IMG, IMAGE_DIM), jnp.float32)
    text_embedding = 0.1 * jax.random.normal(k_txt, (B, L, LANGUAGE_DIM), jnp.float32)
    text_mask = jnp.ones((B, L), jnp.float32)   # unused by attention_model='simple'

    # block_b=8 with B=8 -> Bblk=4, grid=(2,): exercises batch blocking and a >=2-step grid.
    fwd = jax.jit(functools.partial(attention_classifier_forward, prepared, block_b=8))
    logits = fwd(image_embedding, text_embedding, text_mask)
    jax.block_until_ready(logits)

    assert logits.shape == (B, 2) and logits.dtype == jnp.float32

    # Loose correctness check against the f32 reference (kernel runs bf16 matmuls).
    ref = reference_forward(params, image_embedding, text_embedding)
    diff = float(jnp.max(jnp.abs(logits - ref)))
    scale_ref = float(jnp.max(jnp.abs(ref)))
    assert diff <= 0.1 * scale_ref + 1e-4, (diff, scale_ref)

    print("KERNEL_OK")
</pallas_src>

<mosaic_0001>
module attributes {stable_mosaic.version = 11 : i64} {
  func.func @_attention_classifier_kernel(%arg0: i32, %arg1: memref<4x56x2048xbf16, #tpu.memory_space<vmem>>, %arg2: memref<4x8x768xbf16, #tpu.memory_space<vmem>>, %arg3: memref<2048x768xbf16, #tpu.memory_space<vmem>>, %arg4: memref<768x768xbf16, #tpu.memory_space<vmem>>, %arg5: memref<2x768xf32, #tpu.memory_space<vmem>>, %arg6: memref<256x128xbf16, #tpu.memory_space<vmem>>, %arg7: memref<256x128xbf16, #tpu.memory_space<vmem>>, %arg8: memref<8x128xf32, #tpu.memory_space<vmem>>, %arg9: memref<1x4x128xf32, #tpu.memory_space<vmem>>) attributes {dimension_semantics = [#tpu.dimension_semantics<parallel>], iteration_bounds = array<i64: 2>, scalar_prefetch = 0 : i64, scratch_operands = 0 : i64, tpu.core_type = #tpu.core_type<tc>, window_params = [{transform_indices = @transform_0, window_bounds = array<i64: 4, 56, 2048>}, {transform_indices = @transform_1, window_bounds = array<i64: 4, 8, 768>}, {pipeline_mode = #tpu.pipeline_mode<synchronous>, transform_indices = @transform_2, window_bounds = array<i64: 2048, 768>}, {pipeline_mode = #tpu.pipeline_mode<synchronous>, transform_indices = @transform_3, window_bounds = array<i64: 768, 768>}, {pipeline_mode = #tpu.pipeline_mode<synchronous>, transform_indices = @transform_4, window_bounds = array<i64: 2, 768>}, {pipeline_mode = #tpu.pipeline_mode<synchronous>, transform_indices = @transform_5, window_bounds = array<i64: 256, 128>}, {pipeline_mode = #tpu.pipeline_mode<synchronous>, transform_indices = @transform_6, window_bounds = array<i64: 256, 128>}, {pipeline_mode = #tpu.pipeline_mode<synchronous>, transform_indices = @transform_7, window_bounds = array<i64: 8, 128>}, {transform_indices = @transform_8, window_bounds = array<i64: 1, 4, 128>}]} {
    %c0 = arith.constant 0 : index
    %c0_0 = arith.constant 0 : index
    %c0_1 = arith.constant 0 : index
    %0 = vector.load %arg1[%c0, %c0_0, %c0_1] : memref<4x56x2048xbf16, #tpu.memory_space<vmem>>, vector<4x56x2048xbf16>
    %1 = vector.shape_cast %0 : vector<4x56x2048xbf16> to vector<224x2048xbf16>
    %c0_2 = arith.constant 0 : index
    %c0_3 = arith.constant 0 : index
    %c0_4 = arith.constant 0 : index
    %2 = vector.load %arg2[%c0_2, %c0_3, %c0_4] : memref<4x8x768xbf16, #tpu.memory_space<vmem>>, vector<4x8x768xbf16>
    %3 = vector.shape_cast %2 : vector<4x8x768xbf16> to vector<32x768xbf16>
    %c0_5 = arith.constant 0 : index
    %c0_6 = arith.constant 0 : index
    %4 = vector.load %arg3[%c0_5, %c0_6] : memref<2048x768xbf16, #tpu.memory_space<vmem>>, vector<2048x768xbf16>
    %cst = arith.constant dense<0.000000e+00> : vector<224x768xf32>
    %5 = tpu.matmul %1, %4, %cst {dimension_numbers = #tpu.dot_dimension_numbers<[1], [0], [0], [1], [0, 0, 1, 1], [], []>} : vector<224x2048xbf16>, vector<2048x768xbf16>, vector<224x768xf32> -> vector<224x768xf32>
    %c0_7 = arith.constant 0 : index
    %c0_8 = arith.constant 0 : index
    %6 = vector.load %arg5[%c0_7, %c0_8] : memref<2x768xf32, #tpu.memory_space<vmem>>, vector<1x768xf32>
    %7 = vector.broadcast %6 : vector<1x768xf32> to vector<224x768xf32>
    %8 = arith.addf %5, %7 : vector<224x768xf32>
    %9 = arith.truncf %8 : vector<224x768xf32> to vector<224x768xbf16>
    %10 = vector.shape_cast %9 : vector<224x768xbf16> to vector<4x56x768xbf16>
    %c0_9 = arith.constant 0 : index
    %c0_10 = arith.constant 0 : index
    %11 = vector.load %arg4[%c0_9, %c0_10] : memref<768x768xbf16, #tpu.memory_space<vmem>>, vector<768x768xbf16>
    %cst_11 = arith.constant dense<0.000000e+00> : vector<32x768xf32>
    %12 = tpu.matmul %3, %11, %cst_11 {dimension_numbers = #tpu.dot_dimension_numbers<[1], [0], [0], [1], [0, 0, 1, 1], [], []>} : vector<32x768xbf16>, vector<768x768xbf16>, vector<32x768xf32> -> vector<32x768xf32>
    %c1 = arith.constant 1 : index
    %c0_12 = arith.constant 0 : index
    %13 = vector.load %arg5[%c1, %c0_12] : memref<2x768xf32, #tpu.memory_space<vmem>>, vector<1x768xf32>
    %14 = vector.broadcast %13 : vector<1x768xf32> to vector<32x768xf32>
    %15 = arith.addf %12, %14 : vector<32x768xf32>
    %16 = arith.truncf %15 : vector<32x768xf32> to vector<32x768xbf16>
    %17 = vector.shape_cast %16 : vector<32x768xbf16> to vector<4x8x768xbf16>
    %18 = vector.extract_strided_slice %10 {offsets = [0, 0, 0], sizes = [4, 56, 256], strides = [1, 1, 1]} : vector<4x56x768xbf16> to vector<4x56x256xbf16>
    %19 = vector.extract_strided_slice %10 {offsets = [0, 0, 256], sizes = [4, 56, 256], strides = [1, 1, 1]} : vector<4x56x768xbf16> to vector<4x56x256xbf16>
    %20 = vector.extract_strided_slice %10 {offsets = [0, 0, 512], sizes = [4, 56, 256], strides = [1, 1, 1]} : vector<4x56x768xbf16> to vector<4x56x256xbf16>
    %21 = vector.extract_strided_slice %17 {offsets = [0, 0, 0], sizes = [4, 8, 256], strides = [1, 1, 1]} : vector<4x8x768xbf16> to vector<4x8x256xbf16>
    %22 = vector.extract_strided_slice %17 {offsets = [0, 0, 256], sizes = [4, 8, 256], strides = [1, 1, 1]} : vector<4x8x768xbf16> to vector<4x8x256xbf16>
    %23 = vector.extract_strided_slice %17 {offsets = [0, 0, 512], sizes = [4, 8, 256], strides = [1, 1, 1]} : vector<4x8x768xbf16> to vector<4x8x256xbf16>
    %24 = tpu.iota {dimensions = array<i32: 1>} : vector<1x56x1xi32>
    %c49_i32 = arith.constant 49 : i32
    %25 = vector.broadcast %c49_i32 : i32 to vector<1x56x1xi32>
    %26 = arith.cmpi slt, %24, %25 : vector<1x56x1xi32>
    %cst_13 = arith.constant 0.0204081628 : f32
    %cst_14 = arith.constant 0.000000e+00 : f32
    %27 = vector.broadcast %cst_13 : f32 to vector<1x56x1xf32>
    %28 = vector.broadcast %cst_14 : f32 to vector<1x56x1xf32>
    %29 = arith.select %26, %27, %28 : vector<1x56x1xi1>, vector<1x56x1xf32>
    "tpu.trace_start"() <{level = 10 : i32, message = "bqd,bkd->bqk"}> : () -> ()
    %cst_15 = arith.constant dense<0.000000e+00> : vector<4x56x8xf32>
    %30 = tpu.matmul %18, %21, %cst_15 {dimension_numbers = #tpu.dot_dimension_numbers<[2], [2], [1], [1], [0, 0, 0, 1, 1, 1], [0], [0]>} : vector<4x56x256xbf16>, vector<4x8x256xbf16>, vector<4x56x8xf32> -> vector<4x56x8xf32>
    "tpu.trace_stop"() : () -> ()
    %cst_16 = arith.constant dense<0xFF800000> : vector<4x56xf32>
    %31 = vector.multi_reduction <maximumf>, %30, %cst_16 [2] : vector<4x56x8xf32> to vector<4x56xf32>
    %32 = vector.shape_cast %31 : vector<4x56xf32> to vector<4x56x1xf32>
    %33 = vector.broadcast %32 : vector<4x56x1xf32> to vector<4x56x8xf32>
    %34 = arith.subf %30, %33 : vector<4x56x8xf32>
    %35 = math.exp %34 : vector<4x56x8xf32>
    %cst_17 = arith.constant dense<0.000000e+00> : vector<4x56xf32>
    %36 = vector.multi_reduction <add>, %35, %cst_17 [2] : vector<4x56x8xf32> to vector<4x56xf32>
    %37 = vector.shape_cast %36 : vector<4x56xf32> to vector<4x56x1xf32>
    %38 = tpu.reciprocal %37 {approx = true} : vector<4x56x1xf32> -> vector<4x56x1xf32>
    %39 = vector.broadcast %38 : vector<4x56x1xf32> to vector<4x56x8xf32>
    %40 = arith.mulf %35, %39 : vector<4x56x8xf32>
    %41 = vector.broadcast %29 : vector<1x56x1xf32> to vector<4x56x8xf32>
    %42 = arith.mulf %40, %41 : vector<4x56x8xf32>
    %cst_18 = arith.constant dense<0.000000e+00> : vector<4x8xf32>
    %43 = vector.multi_reduction <add>, %42, %cst_18 [1] : vector<4x56x8xf32> to vector<4x8xf32>
    %44 = vector.shape_cast %43 : vector<4x8xf32> to vector<4x1x8xf32>
    %45 = arith.truncf %44 : vector<4x1x8xf32> to vector<4x1x8xbf16>
    "tpu.trace_start"() <{level = 10 : i32, message = "bqk,bkd->bqd"}> : () -> ()
    %cst_19 = arith.constant dense<0.000000e+00> : vector<4x1x256xf32>
    %46 = tpu.matmul %45, %22, %cst_19 {dimension_numbers = #tpu.dot_dimension_numbers<[2], [1], [1], [2], [0, 0, 0, 1, 1, 2], [0], [0]>} : vector<4x1x8xbf16>, vector<4x8x256xbf16>, vector<4x1x256xf32> -> vector<4x1x256xf32>
    "tpu.trace_stop"() : () -> ()
    %47 = vector.shape_cast %46 : vector<4x1x256xf32> to vector<4x256xf32>
    %48 = tpu.iota {dimensions = array<i32: 2>} : vector<1x1x56xi32>
    %c49_i32_20 = arith.constant 49 : i32
    %49 = vector.broadcast %c49_i32_20 : i32 to vector<1x1x56xi32>
    %50 = arith.cmpi slt, %48, %49 : vector<1x1x56xi32>
    %cst_21 = arith.constant 0.000000e+00 : f32
    %cst_22 = arith.constant -1.000000e+30 : f32
    %51 = vector.broadcast %cst_21 : f32 to vector<1x1x56xf32>
    %52 = vector.broadcast %cst_22 : f32 to vector<1x1x56xf32>
    %53 = arith.select %50, %51, %52 : vector<1x1x56xi1>, vector<1x1x56xf32>
    %54 = tpu.iota {dimensions = array<i32: 1>} : vector<1x8x1xi32>
    %c8_i32 = arith.constant 8 : i32
    %55 = vector.broadcast %c8_i32 : i32 to vector<1x8x1xi32>
    %56 = arith.cmpi slt, %54, %55 : vector<1x8x1xi32>
    %cst_23 = arith.constant 1.250000e-01 : f32
    %cst_24 = arith.constant 0.000000e+00 : f32
    %57 = vector.broadcast %cst_23 : f32 to vector<1x8x1xf32>
    %58 = vector.broadcast %cst_24 : f32 to vector<1x8x1xf32>
    %59 = arith.select %56, %57, %58 : vector<1x8x1xi1>, vector<1x8x1xf32>
    "tpu.trace_start"() <{level = 10 : i32, message = "bqd,bkd->bqk"}> : () -> ()
    %cst_25 = arith.constant dense<0.000000e+00> : vector<4x8x56xf32>
    %60 = tpu.matmul %23, %19, %cst_25 {dimension_numbers = #tpu.dot_dimension_numbers<[2], [2], [1], [1], [0, 0, 0, 1, 1, 1], [0], [0]>} : vector<4x8x256xbf16>, vector<4x56x256xbf16>, vector<4x8x56xf32> -> vector<4x8x56xf32>
    "tpu.trace_stop"() : () -> ()
    %61 = vector.broadcast %53 : vector<1x1x56xf32> to vector<4x8x56xf32>
    %62 = arith.addf %60, %61 : vector<4x8x56xf32>
    %cst_26 = arith.constant dense<0xFF800000> : vector<4x8xf32>
    %63 = vector.multi_reduction <maximumf>, %62, %cst_26 [2] : vector<4x8x56xf32> to vector<4x8xf32>
    %64 = vector.shape_cast %63 : vector<4x8xf32> to vector<4x8x1xf32>
    %65 = vector.broadcast %64 : vector<4x8x1xf32> to vector<4x8x56xf32>
    %66 = arith.subf %62, %65 : vector<4x8x56xf32>
    %67 = math.exp %66 : vector<4x8x56xf32>
    %cst_27 = arith.constant dense<0.000000e+00> : vector<4x8xf32>
    %68 = vector.multi_reduction <add>, %67, %cst_27 [2] : vector<4x8x56xf32> to vector<4x8xf32>
    %69 = vector.shape_cast %68 : vector<4x8xf32> to vector<4x8x1xf32>
    %70 = tpu.reciprocal %69 {approx = true} : vector<4x8x1xf32> -> vector<4x8x1xf32>
    %71 = vector.broadcast %70 : vector<4x8x1xf32> to vector<4x8x56xf32>
    %72 = arith.mulf %67, %71 : vector<4x8x56xf32>
    %73 = vector.broadcast %59 : vector<1x8x1xf32> to vector<4x8x56xf32>
    %74 = arith.mulf %72, %73 : vector<4x8x56xf32>
    %cst_28 = arith.constant dense<0.000000e+00> : vector<4x56xf32>
    %75 = vector.multi_reduction <add>, %74, %cst_28 [1] : vector<4x8x56xf32> to vector<4x56xf32>
    %76 = vector.shape_cast %75 : vector<4x56xf32> to vector<4x1x56xf32>
    %77 = arith.truncf %76 : vector<4x1x56xf32> to vector<4x1x56xbf16>
    "tpu.trace_start"() <{level = 10 : i32, message = "bqk,bkd->bqd"}> : () -> ()
    %cst_29 = arith.constant dense<0.000000e+00> : vector<4x1x256xf32>
    %78 = tpu.matmul %77, %20, %cst_29 {dimension_numbers = #tpu.dot_dimension_numbers<[2], [1], [1], [2], [0, 0, 0, 1, 1, 2], [0], [0]>} : vector<4x1x56xbf16>, vector<4x56x256xbf16>, vector<4x1x256xf32> -> vector<4x1x256xf32>
    "tpu.trace_stop"() : () -> ()
    %79 = vector.shape_cast %78 : vector<4x1x256xf32> to vector<4x256xf32>
    %80 = tpu.concatenate %47, %79 in 0 : vector<4x256xf32>, vector<4x256xf32> -> vector<8x256xf32>
    %81 = arith.truncf %80 : vector<8x256xf32> to vector<8x256xbf16>
    %c0_30 = arith.constant 0 : index
    %c0_31 = arith.constant 0 : index
    %82 = vector.load %arg6[%c0_30, %c0_31] : memref<256x128xbf16, #tpu.memory_space<vmem>>, vector<256x128xbf16>
    %cst_32 = arith.constant dense<0.000000e+00> : vector<8x128xf32>
    %83 = tpu.matmul %81, %82, %cst_32 {dimension_numbers = #tpu.dot_dimension_numbers<[1], [0], [0], [1], [0, 0, 1, 1], [], []>} : vector<8x256xbf16>, vector<256x128xbf16>, vector<8x128xf32> -> vector<8x128xf32>
    %c0_33 = arith.constant 0 : index
    %c0_34 = arith.constant 0 : index
    %84 = vector.load %arg8[%c0_33, %c0_34] : memref<8x128xf32, #tpu.memory_space<vmem>>, vector<1x128xf32>
    %85 = vector.broadcast %84 : vector<1x128xf32> to vector<8x128xf32>
    %86 = arith.addf %83, %85 : vector<8x128xf32>
    %87 = vector.extract_strided_slice %86 {offsets = [0, 0], sizes = [4, 128], strides = [1, 1]} : vector<8x128xf32> to vector<4x128xf32>
    %c1_35 = arith.constant 1 : index
    %c0_36 = arith.constant 0 : index
    %88 = vector.load %arg8[%c1_35, %c0_36] : memref<8x128xf32, #tpu.memory_space<vmem>>, vector<1x128xf32>
    %89 = vector.broadcast %88 : vector<1x128xf32> to vector<4x128xf32>
    %90 = arith.mulf %87, %89 : vector<4x128xf32>
    %c2 = arith.constant 2 : index
    %c0_37 = arith.constant 0 : index
    %91 = vector.load %arg8[%c2, %c0_37] : memref<8x128xf32, #tpu.memory_space<vmem>>, vector<1x128xf32>
    %92 = vector.broadcast %91 : vector<1x128xf32> to vector<4x128xf32>
    %93 = arith.addf %90, %92 : vector<4x128xf32>
    %94 = vector.extract_strided_slice %86 {offsets = [4, 0], sizes = [4, 128], strides = [1, 1]} : vector<8x128xf32> to vector<4x128xf32>
    %c3 = arith.constant 3 : index
    %c0_38 = arith.constant 0 : index
    %95 = vector.load %arg8[%c3, %c0_38] : memref<8x128xf32, #tpu.memory_space<vmem>>, vector<1x128xf32>
    %96 = vector.broadcast %95 : vector<1x128xf32> to vector<4x128xf32>
    %97 = arith.mulf %94, %96 : vector<4x128xf32>
    %c4 = arith.constant 4 : index
    %c0_39 = arith.constant 0 : index
    %98 = vector.load %arg8[%c4, %c0_39] : memref<8x128xf32, #tpu.memory_space<vmem>>, vector<1x128xf32>
    %99 = vector.broadcast %98 : vector<1x128xf32> to vector<4x128xf32>
    %100 = arith.addf %97, %99 : vector<4x128xf32>
    %c5 = arith.constant 5 : index
    %c0_40 = arith.constant 0 : index
    %101 = vector.load %arg8[%c5, %c0_40] : memref<8x128xf32, #tpu.memory_space<vmem>>, vector<1x128xf32>
    %cst_41 = arith.constant 5.000000e-01 : f32
    %102 = vector.broadcast %cst_41 : f32 to vector<1x128xf32>
    %103 = arith.cmpf ogt, %101, %102 : vector<1x128xf32>
    %104 = vector.shape_cast %103 : vector<1x128xi1> to vector<1x128xi1>
    %105 = vector.broadcast %104 : vector<1x128xi1> to vector<4x128xi1>
    %106 = arith.select %105, %93, %100 : vector<4x128xi1>, vector<4x128xf32>
    %c6 = arith.constant 6 : index
    %c0_42 = arith.constant 0 : index
    %107 = vector.load %arg8[%c6, %c0_42] : memref<8x128xf32, #tpu.memory_space<vmem>>, vector<1x128xf32>
    %cst_43 = arith.constant 5.000000e-01 : f32
    %108 = vector.broadcast %cst_43 : f32 to vector<1x128xf32>
    %109 = arith.cmpf ogt, %107, %108 : vector<1x128xf32>
    %110 = vector.shape_cast %109 : vector<1x128xi1> to vector<1x128xi1>
    %111 = vector.broadcast %110 : vector<1x128xi1> to vector<4x128xi1>
    %112 = arith.select %111, %100, %93 : vector<4x128xi1>, vector<4x128xf32>
    %113 = tpu.concatenate %106, %112 in 1 : vector<4x128xf32>, vector<4x128xf32> -> vector<4x256xf32>
    %114 = arith.truncf %113 : vector<4x256xf32> to vector<4x256xbf16>
    %c0_44 = arith.constant 0 : index
    %c0_45 = arith.constant 0 : index
    %115 = vector.load %arg7[%c0_44, %c0_45] : memref<256x128xbf16, #tpu.memory_space<vmem>>, vector<256x128xbf16>
    %cst_46 = arith.constant dense<0.000000e+00> : vector<4x128xf32>
    %116 = tpu.matmul %114, %115, %cst_46 {dimension_numbers = #tpu.dot_dimension_numbers<[1], [0], [0], [1], [0, 0, 1, 1], [], []>} : vector<4x256xbf16>, vector<256x128xbf16>, vector<4x128xf32> -> vector<4x128xf32>
    %c7 = arith.constant 7 : index
    %c0_47 = arith.constant 0 : index
    %117 = vector.load %arg8[%c7, %c0_47] : memref<8x128xf32, #tpu.memory_space<vmem>>, vector<1x128xf32>
    %118 = vector.broadcast %117 : vector<1x128xf32> to vector<4x128xf32>
    %119 = arith.addf %116, %118 : vector<4x128xf32>
    %c0_48 = arith.constant 0 : index
    %c0_49 = arith.constant 0 : index
    %c0_50 = arith.constant 0 : index
    %120 = vector.load %arg9[%c0_48, %c0_49, %c0_50] : memref<1x4x128xf32, #tpu.memory_space<vmem>>, vector<1x4x128xf32>
    %121 = vector.shape_cast %120 : vector<1x4x128xf32> to vector<4x128xf32>
    %122 = vector.shape_cast %119 : vector<4x128xf32> to vector<1x4x128xf32>
    tpu.vector_store %arg9[%c0_48, %c0_49, %c0_50], %122 {strides = array<i32>} : memref<1x4x128xf32, #tpu.memory_space<vmem>>, vector<1x4x128xf32>,
    return
  }
  func.func @transform_0(%arg0: i32) -> (i32, i32, i32) {
    %c0_i32 = arith.constant 0 : i32
    %c0_i32_0 = arith.constant 0 : i32
    %c0_i32_1 = arith.constant 0 : i32
    return %arg0, %c0_i32, %c0_i32_0 : i32, i32, i32
  }
  func.func @transform_1(%arg0: i32) -> (i32, i32, i32) {
    %c0_i32 = arith.constant 0 : i32
    %c0_i32_0 = arith.constant 0 : i32
    %c0_i32_1 = arith.constant 0 : i32
    return %arg0, %c0_i32, %c0_i32_0 : i32, i32, i32
  }
  func.func @transform_2(%arg0: i32) -> (i32, i32) {
    %c0_i32 = arith.constant 0 : i32
    %c0_i32_0 = arith.constant 0 : i32
    %c0_i32_1 = arith.constant 0 : i32
    return %c0_i32, %c0_i32_0 : i32, i32
  }
  func.func @transform_3(%arg0: i32) -> (i32, i32) {
    %c0_i32 = arith.constant 0 : i32
    %c0_i32_0 = arith.constant 0 : i32
    %c0_i32_1 = arith.constant 0 : i32
    return %c0_i32, %c0_i32_0 : i32, i32
  }
  func.func @transform_4(%arg0: i32) -> (i32, i32) {
    %c0_i32 = arith.constant 0 : i32
    %c0_i32_0 = arith.constant 0 : i32
    %c0_i32_1 = arith.constant 0 : i32
    return %c0_i32, %c0_i32_0 : i32, i32
  }
  func.func @transform_5(%arg0: i32) -> (i32, i32) {
    %c0_i32 = arith.constant 0 : i32
    %c0_i32_0 = arith.constant 0 : i32
    %c0_i32_1 = arith.constant 0 : i32
    return %c0_i32, %c0_i32_0 : i32, i32
  }
  func.func @transform_6(%arg0: i32) -> (i32, i32) {
    %c0_i32 = arith.constant 0 : i32
    %c0_i32_0 = arith.constant 0 : i32
    %c0_i32_1 = arith.constant 0 : i32
    return %c0_i32, %c0_i32_0 : i32, i32
  }
  func.func @transform_7(%arg0: i32) -> (i32, i32) {
    %c0_i32 = arith.constant 0 : i32
    %c0_i32_0 = arith.constant 0 : i32
    %c0_i32_1 = arith.constant 0 : i32
    return %c0_i32, %c0_i32_0 : i32, i32
  }
  func.func @transform_8(%arg0: i32) -> (i32, i32, i32) {
    %c0_i32 = arith.constant 0 : i32
    %c0_i32_0 = arith.constant 0 : i32
    %c0_i32_1 = arith.constant 0 : i32
    return %arg0, %c0_i32, %c0_i32_0 : i32, i32, i32
  }
}

</mosaic_0001>

<bundles_post_ra>
// kernel: attention_classifier_forward.1
= control target key start
LH: loop header
LB: loop body
LE: loop exit
PB: predicated region body
PF: predicated region fallthrough
CT: control target
= control target key end

     0   :  { %s20013_s27 = smov 0   ;;  %s26095_s0 = inlined_call_operand.vmem [shape: bf16[8,56,2048], index: 0, kind: input, shape index: {}]   ;;  %s26096_s1 = inlined_call_operand.vmem [shape: bf16[8,8,768], index: 1, kind: input, shape index: {}]   ;;  %s26097_s2 = inlined_call_operand.vmem [shape: bf16[2048,768], index: 2, kind: input, shape index: {}]   ;;  %s26098_s3 = inlined_call_operand.vmem [shape: bf16[768,768], index: 3, kind: input, shape index: {}]   ;;  %s26099_s4 = inlined_call_operand.vmem [shape: f32[2,768], index: 4, kind: input, shape index: {}]   ;;  %s26100_s5 = inlined_call_operand.vmem [shape: bf16[256,128], index: 5, kind: input, shape index: {}]   ;;  %s26101_s6 = inlined_call_operand.vmem [shape: bf16[256,128], index: 6, kind: input, shape index: {}]   ;;  %s26102_s7 = inlined_call_operand.vmem [shape: f32[8,128], index: 7, kind: input, shape index: {}]   ;;  %s26103_s8 = inlined_call_operand.vmem [shape: f32[2,4,128], index: 8, kind: output, shape index: {}]  }
   0x1 LB: > { %s20019_s28 = sadd.s32 4294967295, %s19963_s27   ;;  %p15257_p0 = scmp.ge.s32.totalorder %s19963_s27, 1  ;;  %s19963_s27 = sphi %s20013_s27, %s18_s27  }
   0x2   : > { %p276_p1 = scmp.lt.s32.totalorder %s19963_s27, 3 }
   0x4   : > { %p277_p2 = pnand %p15257_p0, %p276_p1 }
   0x6   : > { %280 = sbr.rel (%p277_p2) target bundleno = 3508 (0xdb4), region = 52 }
   0xd   : > { %v18181_v0 = vld [vmem:[%s26097_s2 + $0x4] ss:$24 sps:$4 sm:$0xff]   ;;  %v18185_v2 = vld [vmem:[%s26097_s2] ss:$24 sps:$4 sm:$0xff]   ;;  %v18187_v4 = vld [vmem:[%s26097_s2 + $0x34] ss:$24 sps:$4 sm:$0xff]  }
   0xe   : > { %v18183_v1 = vld [vmem:[%s26097_s2 + $0xc] ss:$24 sps:$4 sm:$0xff]   ;;  %6331 = vmatprep.subr.bf16.mxu0 %v18181_v0  ;;  %v18186_v3 = vld [vmem:[%s26097_s2 + $0x8] ss:$24 sps:$4 sm:$0xff]   ;;  %v18189_v5 = vld [vmem:[%s26097_s2 + $0x3c] ss:$24 sps:$4 sm:$0xff]  }
   0xf   : > { %7715 = vmatprep.subr.bf16.mxu1 %v18183_v1  ;;  %6332 = vmatpush1.bf16.msra.mxu0 %v18185_v2  ;;  %v18191_v6 = vld [vmem:[%s26097_s2 + $0x30] ss:$24 sps:$4 sm:$0xff]   ;;  %v18193_v8 = vld [vmem:[%s26097_s2 + $0x64] ss:$24 sps:$4 sm:$0xff]   ;;  %v18197_v10 = vld [vmem:[%s26097_s2 + $0x60] ss:$24 sps:$4 sm:$0xff]  }
  0x10   : > { %7716 = vmatpush1.bf16.msra.mxu1 %v18186_v3  ;;  %6333 = vmatprep.subr.bf16.mxu0 %v18187_v4  ;;  %v18192_v7 = vld [vmem:[%s26097_s2 + $0x38] ss:$24 sps:$4 sm:$0xff]   ;;  %v18195_v9 = vld [vmem:[%s26097_s2 + $0x6c] ss:$24 sps:$4 sm:$0xff]   ;;  %v18198_v11 = vld [vmem:[%s26097_s2 + $0x68] ss:$24 sps:$4 sm:$0xff]  }
  0x11   : > { %7717 = vmatprep.subr.bf16.mxu1 %v18189_v5  ;;  %v18199_v12 = vld [vmem:[%s26097_s2 + $0x94] ss:$24 sps:$4 sm:$0xff]   ;;  %v18203_v14 = vld [vmem:[%s26097_s2 + $0x90] ss:$24 sps:$4 sm:$0xff]   ;;  %v18205_v16 = vld [vmem:[%s26097_s2 + $0xc4] ss:$24 sps:$4 sm:$0xff]  }
  0x12   : > { %v18201_v13 = vld [vmem:[%s26097_s2 + $0x9c] ss:$24 sps:$4 sm:$0xff]   ;;  %v18204_v15 = vld [vmem:[%s26097_s2 + $0x98] ss:$24 sps:$4 sm:$0xff]   ;;  %v18207_v17 = vld [vmem:[%s26097_s2 + $0xcc] ss:$24 sps:$4 sm:$0xff]  }
  0x13   : > { %6334 = vmatpush1.bf16.msra.mxu0 %v18191_v6  ;;  %v18209_v18 = vld [vmem:[%s26097_s2 + $0xc0] ss:$24 sps:$4 sm:$0xff]   ;;  %v18211_v20 = vld [vmem:[%s26097_s2 + $0xf4] ss:$24 sps:$4 sm:$0xff]   ;;  %v18215_v22 = vld [vmem:[%s26097_s2 + $0xf0] ss:$24 sps:$4 sm:$0xff]  }
  0x14   : > { %7718 = vmatpush1.bf16.msra.mxu1 %v18192_v7  ;;  %6335 = vmatprep.subr.bf16.mxu0 %v18193_v8  ;;  %v18210_v19 = vld [vmem:[%s26097_s2 + $0xc8] ss:$24 sps:$4 sm:$0xff]   ;;  %v18213_v21 = vld [vmem:[%s26097_s2 + $0xfc] ss:$24 sps:$4 sm:$0xff]   ;;  %v18216_v23 = vld [vmem:[%s26097_s2 + $0xf8] ss:$24 sps:$4 sm:$0xff]  }
  0x15   : > { %7719 = vmatprep.subr.bf16.mxu1 %v18195_v9  ;;  %v18217_v24 = vld [vmem:[%s26097_s2 + $0x124] ss:$24 sps:$4 sm:$0xff]   ;;  %v18221_v26 = vld [vmem:[%s26097_s2 + $0x120] ss:$24 sps:$4 sm:$0xff]   ;;  %v18223_v28 = vld [vmem:[%s26097_s2 + $0x154] ss:$24 sps:$4 sm:$0xff]  }
  0x16   : > { %v18219_v25 = vld [vmem:[%s26097_s2 + $0x12c] ss:$24 sps:$4 sm:$0xff]   ;;  %v18222_v27 = vld [vmem:[%s26097_s2 + $0x128] ss:$24 sps:$4 sm:$0xff]   ;;  %s15258_s25 = sshll.u32 %s20019_s28, 2  ;;  %vm13945_vm0 = vcmask 1043456  }
  0x17   : > { %6336 = vmatpush1.bf16.msra.mxu0 %v18197_v10  ;;  %v18225_v29 = vld [vmem:[%s26097_s2 + $0x15c] ss:$24 sps:$4 sm:$0xff]   ;;  %v18227_v30 = vld [vmem:[%s26097_s2 + $0x150] ss:$24 sps:$4 sm:$0xff]   ;;  %p317_p3 = scmp.lt.s32.totalorder %s15258_s25, 7  ;;  %vm13523_vm1 = vcmask 64512  }
  0x18   : > { %7720 = vmatpush1.bf16.msra.mxu1 %v18198_v11  ;;  %6337 = vmatprep.subr.bf16.mxu0 %v18199_v12  ;;  %v18228_v31 = vld [vmem:[%s26097_s2 + $0x158] ss:$24 sps:$4 sm:$0xff]   ;;  %v18229_v32 = vld [vmem:[%s26097_s2 + $0x184] ss:$24 sps:$4 sm:$0xff]   ;;  %v18234_v35 = vld [vmem:[%s26097_s2 + $0x188] ss:$24 sps:$4 sm:$0xff]  }
  0x19   : > { %7721 = vmatprep.subr.bf16.mxu1 %v18201_v13  ;;  %v18231_v33 = vld [vmem:[%s26097_s2 + $0x18c] ss:$24 sps:$4 sm:$0xff]   ;;  %v18233_v34 = vld [vmem:[%s26097_s2 + $0x180] ss:$24 sps:$4 sm:$0xff]   ;;  %s26936_s25 = smov (!%p317_p3, %s15258_s25), 7  ;;  %vm14741_vm3 = vcmask 1041409  }
  0x1a   : > { %v18235_v36 = vld [vmem:[%s26097_s2 + $0x1b4] ss:$24 sps:$4 sm:$0xff]   ;;  %v18239_v38 = vld [vmem:[%s26097_s2 + $0x1b0] ss:$24 sps:$4 sm:$0xff]   ;;  %s18168_s29 = smul.u32 448, %s26936_s25  ;;  %vm14744_vm4 = vcmask 1042434  }
  0x1b   : > { %6338 = vmatpush1.bf16.msra.mxu0 %v18203_v14  ;;  %v18237_v37 = vld [vmem:[%s26097_s2 + $0x1bc] ss:$24 sps:$4 sm:$0xff]   ;;  %v18240_v39 = vld [vmem:[%s26097_s2 + $0x1b8] ss:$24 sps:$4 sm:$0xff]   ;;  %v18243_v41 = vld [vmem:[%s26097_s2 + $0x1ec] ss:$24 sps:$4 sm:$0xff]  }
  0x1c   : > { %7722 = vmatpush1.bf16.msra.mxu1 %v18204_v15  ;;  %6339 = vmatprep.subr.bf16.mxu0 %v18205_v16  ;;  %v18241_v40 = vld [vmem:[%s26097_s2 + $0x1e4] ss:$24 sps:$4 sm:$0xff]   ;;  %v18245_v42 = vld [vmem:[%s26097_s2 + $0x1e0] ss:$24 sps:$4 sm:$0xff]   ;;  %s20162_s20 = scalar_lea.vmem %s26095_s0, %s18168_s29  ;;  %v18247_v44 = vld [vmem:[%s26097_s2 + $0x214] ss:$24 sps:$4 sm:$0xff]  }
  0x1d   : > { %7723 = vmatprep.subr.bf16.mxu1 %v18207_v17  ;;  %v18246_v43 = vld [vmem:[%s26097_s2 + $0x1e8] ss:$24 sps:$4 sm:$0xff]   ;;  %v18249_v45 = vld [vmem:[%s26097_s2 + $0x21c] ss:$24 sps:$4 sm:$0xff]   ;;  %v18252_v49 = vld [vmem:[%s26097_s2 + $0x218] ss:$24 sps:$4 sm:$0xff]  }
  0x1e   : > { %v335_v46 = vld [vmem:[%s20162_s20] sm:$0xff]  ;;  %v18251_v48 = vld [vmem:[%s26097_s2 + $0x210] ss:$24 sps:$4 sm:$0xff]   ;;  %v18259_v55 = vld [vmem:[%s26097_s2 + $0x274] ss:$24 sps:$4 sm:$0xff]   ;;  %s18169_s26 = smul.u32 24, %s26936_s25 }
  0x1f   : > { %6340 = vmatpush1.bf16.msra.mxu0 %v18209_v18  ;;  %v343_v47 = vld [vmem:[%s20162_s20 + $0x40] sm:$0xff]  ;;  %v18261_v56 = vld [vmem:[%s26097_s2 + $0x27c] ss:$24 sps:$4 sm:$0xff]   ;;  %v18263_v57 = vld [vmem:[%s26097_s2 + $0x270] ss:$24 sps:$4 sm:$0xff]   ;;  %vm14747_vm5 = vcmask 1043459  }
  0x20   : > { %7724 = vmatpush1.bf16.msra.mxu1 %v18210_v19  ;;  %6341 = vmatprep.subr.bf16.mxu0 %v18211_v20  ;;  %v18253_v50 = vld [vmem:[%s26097_s2 + $0x244] ss:$24 sps:$4 sm:$0xff]   ;;  %v20181_v51 = vcombine.high %v335_v46, %v343_v47  ;;  %v18257_v53 = vld [vmem:[%s26097_s2 + $0x240] ss:$24 sps:$4 sm:$0xff]   ;;  %v18271_v63 = vld [vmem:[%s26097_s2 + $0x2d4] ss:$24 sps:$4 sm:$0xff]   ;;  %v20238_v7 = vcombine.low %v335_v46, %v343_v47  ;;  %s22546_s9 = scalar_lea.vmem %s26096_s1, %s18169_s26 }
  0x21   : > { %7725 = vmatprep.subr.bf16.mxu1 %v18213_v21  ;;  %v18255_v52 = vld [vmem:[%s26097_s2 + $0x24c] ss:$24 sps:$4 sm:$0xff]   ;;  %v18258_v54 = vld [vmem:[%s26097_s2 + $0x248] ss:$24 sps:$4 sm:$0xff]   ;;  %v18264_v58 = vld [vmem:[%s26097_s2 + $0x278] ss:$24 sps:$4 sm:$0xff]  }
  0x22   : > { %6363 = vmatprep.mubr.bf16.mxu0 %v20181_v51  ;;  %7747 = vmatprep.mubr.bf16.mxu1 %v20181_v51  ;;  %v18265_v59 = vld [vmem:[%s26097_s2 + $0x2a4] ss:$24 sps:$4 sm:$0xff]   ;;  %v18269_v61 = vld [vmem:[%s26097_s2 + $0x2a0] ss:$24 sps:$4 sm:$0xff]   ;;  %v18275_v1 = vld [vmem:[%s26097_s2 + $0x2d0] ss:$24 sps:$4 sm:$0xff]  }
  0x23   : > { %6342 = vmatpush1.bf16.msra.mxu0 %v18215_v22  ;;  %v18267_v60 = vld [vmem:[%s26097_s2 + $0x2ac] ss:$24 sps:$4 sm:$0xff]   ;;  %v18270_v62 = vld [vmem:[%s26097_s2 + $0x2a8] ss:$24 sps:$4 sm:$0xff]   ;;  %v18273_v0 = vld [vmem:[%s26097_s2 + $0x2dc] ss:$24 sps:$4 sm:$0xff]  }
  0x24   : > { %7726 = vmatpush1.bf16.msra.mxu1 %v18216_v23  ;;  %6343 = vmatprep.subr.bf16.mxu0 %v18217_v24  ;;  %v18276_v2 = vld [vmem:[%s26097_s2 + $0x2d8] ss:$24 sps:$4 sm:$0xff]   ;;  %v18279_v3 = vld [vmem:[%s26097_s2 + $0x30c] ss:$24 sps:$4 sm:$0xff]   ;;  %v18277_v8 = vld [vmem:[%s26097_s2 + $0x308] ss:$24 sps:$4 sm:$0xff]  }
  0x25   : > { %7727 = vmatprep.subr.bf16.mxu1 %v18219_v25  ;;  %v351_v4 = vld [vmem:[%s20162_s20 + $0x80] sm:$0xff]  ;;  %v18282_v10 = vld [vmem:[%s26097_s2 + $0x33c] ss:$24 sps:$4 sm:$0xff]   ;;  %v18280_v13 = vld [vmem:[%s26097_s2 + $0x338] ss:$24 sps:$4 sm:$0xff]   ;;  %vm14395_vm7 = vcmask 457728  }
  0x26   : > { %v359_v5 = vld [vmem:[%s20162_s20 + $0xc0] sm:$0xff]  ;;  %v18303_v12 = vld [vmem:[%s26097_s2 + $0x334] ss:$24 sps:$4 sm:$0xff]   ;;  %v18301_v17 = vld [vmem:[%s26097_s2 + $0x330] ss:$24 sps:$4 sm:$0xff]   ;;  %vm14767_vm8 = vcmask 1045509  }
  0x27   : > { %6344 = vmatpush1.bf16.msra.mxu0 %v18221_v26  ;;  %v18300_v6 = vld [vmem:[%s26097_s2 + $0x304] ss:$24 sps:$4 sm:$0xff]   ;;  %v20243_v9 = vcombine.high %v351_v4, %v359_v5  ;;  %v18298_v11 = vld [vmem:[%s26097_s2 + $0x300] ss:$24 sps:$4 sm:$0xff]   ;;  %v20269_v18 = vcombine.low %v351_v4, %v359_v5  ;;  %v18312_v24 = vld [vmem:[%s26097_s2 + $0x394] ss:$24 sps:$4 sm:$0xff]  }
  0x28   : > { %7728 = vmatpush1.bf16.msra.mxu1 %v18222_v27  ;;  %6345 = vmatprep.subr.bf16.mxu0 %v18223_v28  ;;  %v367_v14 = vld [vmem:[%s20162_s20 + $0x100] sm:$0xff]  ;;  %v18288_v22 = vld [vmem:[%s26097_s2 + $0x39c] ss:$24 sps:$4 sm:$0xff]   ;;  %v18286_v27 = vld [vmem:[%s26097_s2 + $0x398] ss:$24 sps:$4 sm:$0xff]   ;;  %vm14770_vm9 = vcmask 1046534  }
  0x29   : > { %7729 = vmatprep.subr.bf16.mxu1 %v18225_v29  ;;  %v375_v15 = vld [vmem:[%s20162_s20 + $0x140] sm:$0xff]  ;;  %v18310_v29 = vld [vmem:[%s26097_s2 + $0x390] ss:$24 sps:$4 sm:$0xff]   ;;  %v18306_v46 = vld [vmem:[%s26097_s2 + $0x45c] ss:$24 sps:$4 sm:$0xff]   ;;  %vm14773_vm10 = vcmask 1047559  }
  0x2a   : > { %v18285_v16 = vld [vmem:[%s26097_s2 + $0x36c] ss:$24 sps:$4 sm:$0xff]   ;;  %v20271_v19 = vcombine.high %v367_v14, %v375_v15  ;;  %v18283_v20 = vld [vmem:[%s26097_s2 + $0x368] ss:$24 sps:$4 sm:$0xff]   ;;  %p330_p4 = scmp.lt.s32.totalorder %s20019_s28, 1 }
  0x2b   : > { %6346 = vmatpush1.bf16.msra.mxu0 %v18227_v30  ;;  %v18309_v21 = vld [vmem:[%s26097_s2 + $0x364] ss:$24 sps:$4 sm:$0xff]   ;;  %v18307_v23 = vld [vmem:[%s26097_s2 + $0x360] ss:$24 sps:$4 sm:$0xff]   ;;  %v20303_v30 = vcombine.low %v367_v14, %v375_v15 }
  0x2c   : > { %7730 = vmatpush1.bf16.msra.mxu1 %v18228_v31  ;;  %6347 = vmatprep.subr.bf16.mxu0 %v18229_v32  ;;  %v383_v25 = vld [vmem:[%s20162_s20 + $0x180] sm:$0xff]  ;;  %v18337_v14 = vld [vmem:[%s26097_s2 + $0x518] ss:$24 sps:$4 sm:$0xff]   ;;  %s26938_s28 = smov (!%p330_p4, %s20019_s28), 1 }
  0x2d   : > { %7731 = vmatprep.subr.bf16.mxu1 %v18231_v33  ;;  %v391_v26 = vld [vmem:[%s20162_s20 + $0x1c0] sm:$0xff]  ;;  %s15262_s19 = sshll.u32 %s26938_s28, 2 }
  0x2e   : > { %v18291_v28 = vld [vmem:[%s26097_s2 + $0x3cc] ss:$24 sps:$4 sm:$0xff]   ;;  %v20305_v31 = vcombine.high %v383_v25, %v391_v26  ;;  %v18289_v32 = vld [vmem:[%s26097_s2 + $0x3c8] ss:$24 sps:$4 sm:$0xff]   ;;  %s333_s26 = scalar_lea.vmem %s26103_s8, %s15262_s19 }
  0x2f   : > { %6348 = vmatpush1.bf16.msra.mxu0 %v18233_v34  ;;  %v18318_v33 = vld [vmem:[%s26097_s2 + $0x3c4] ss:$24 sps:$4 sm:$0xff]   ;;  %v18325_v47 = vld [vmem:[%s26097_s2 + $0x420] ss:$24 sps:$4 sm:$0xff]  }
  0x30   : > { %7732 = vmatpush1.bf16.msra.mxu1 %v18234_v35  ;;  %6349 = vmatprep.subr.bf16.mxu0 %v18235_v36  ;;  %v18294_v34 = vld [vmem:[%s26097_s2 + $0x3fc] ss:$24 sps:$4 sm:$0xff]   ;;  %v18316_v35 = vld [vmem:[%s26097_s2 + $0x3c0] ss:$24 sps:$4 sm:$0xff]   ;;  %v18348_v15 = vld [vmem:[%s26097_s2 + $0x54c] ss:$24 sps:$4 sm:$0xff]  }
  0x31   : > { %7733 = vmatprep.subr.bf16.mxu1 %v18237_v37  ;;  %v18321_v36 = vld [vmem:[%s26097_s2 + $0x3f4] ss:$24 sps:$4 sm:$0xff]   ;;  %v399_v37 = vld [vmem:[%s20162_s20 + $0x200] sm:$0xff] }
  0x32   : > { %v18328_v5 = vld [vmem:[%s26097_s2 + $0x4e8] ss:$24 sps:$4 sm:$0xff]  }
  0x33   : > { %6350 = vmatpush1.bf16.msra.mxu0 %v18239_v38  ;;  %v407_v38 = vld [vmem:[%s20162_s20 + $0x240] sm:$0xff] }
  0x34   : > { %7734 = vmatpush1.bf16.msra.mxu1 %v18240_v39  ;;  %6351 = vmatprep.subr.bf16.mxu0 %v18241_v40  ;;  %v18292_v39 = vld [vmem:[%s26097_s2 + $0x3f8] ss:$24 sps:$4 sm:$0xff]   ;;  %v18297_v40 = vld [vmem:[%s26097_s2 + $0x42c] ss:$24 sps:$4 sm:$0xff]  }
  0x35   : > { %7735 = vmatprep.subr.bf16.mxu1 %v18243_v41  ;;  %v18319_v41 = vld [vmem:[%s26097_s2 + $0x3f0] ss:$24 sps:$4 sm:$0xff]  }
  0x37   : > { %6352 = vmatpush1.bf16.msra.mxu0 %v18245_v42  ;;  %v20337_v42 = vcombine.low %v383_v25, %v391_v26  ;;  %v18360_v25 = vld [vmem:[%s26097_s2 + $0x574] ss:$24 sps:$4 sm:$0xff]   ;;  %v463_v26 = vld [vmem:[%s20162_s20 + $0x400] sm:$0xff] }
  0x38   : > { %7736 = vmatpush1.bf16.msra.mxu1 %v18246_v43  ;;  %6353 = vmatprep.subr.bf16.mxu0 %v18247_v44  ;;  %v20339_v43 = vcombine.high %v399_v37, %v407_v38  ;;  %v18295_v44 = vld [vmem:[%s26097_s2 + $0x428] ss:$24 sps:$4 sm:$0xff]  }
  0x39   : > { %7737 = vmatprep.subr.bf16.mxu1 %v18249_v45  ;;  %v18327_v45 = vld [vmem:[%s26097_s2 + $0x424] ss:$24 sps:$4 sm:$0xff]  }
  0x3b   : > { %6354 = vmatpush1.bf16.msra.mxu0 %v18251_v48  ;;  %v415_v48 = vld [vmem:[%s20162_s20 + $0x280] sm:$0xff] }
  0x3c   : > { %7738 = vmatpush1.bf16.msra.mxu1 %v18252_v49  ;;  %6355 = vmatprep.subr.bf16.mxu0 %v18253_v50  ;;  %v18333_v49 = vld [vmem:[%s26097_s2 + $0x454] ss:$24 sps:$4 sm:$0xff]   ;;  %v423_v50 = vld [vmem:[%s20162_s20 + $0x2c0] sm:$0xff] }
  0x3d   : > { %7739 = vmatprep.subr.bf16.mxu1 %v18255_v52  ;;  %v18304_v52 = vld [vmem:[%s26097_s2 + $0x458] ss:$24 sps:$4 sm:$0xff]  }
  0x3f   : > { %6356 = vmatpush1.bf16.msra.mxu0 %v18257_v53  ;;  %v18315_v53 = vld [vmem:[%s26097_s2 + $0x48c] ss:$24 sps:$4 sm:$0xff]  }
  0x40   : > { %7740 = vmatpush1.bf16.msra.mxu1 %v18258_v54  ;;  %6357 = vmatprep.subr.bf16.mxu0 %v18259_v55  ;;  %v18331_v54 = vld [vmem:[%s26097_s2 + $0x450] ss:$24 sps:$4 sm:$0xff]   ;;  %v20371_v55 = vcombine.low %v399_v37, %v407_v38  ;;  %v18364_v37 = vld [vmem:[%s26097_s2 + $0x5a0] ss:$24 sps:$4 sm:$0xff]   ;;  %v18372_v38 = vld [vmem:[%s26097_s2 + $0x5dc] ss:$24 sps:$4 sm:$0xff]  }
  0x41   : > { %7741 = vmatprep.subr.bf16.mxu1 %v18261_v56  ;;  %v20373_v56 = vcombine.high %v415_v48, %v423_v50 }
  0x43   : > { %6358 = vmatpush1.bf16.msra.mxu0 %v18263_v57  ;;  %v18313_v57 = vld [vmem:[%s26097_s2 + $0x488] ss:$24 sps:$4 sm:$0xff]  }
  0x44   : > { %7742 = vmatpush1.bf16.msra.mxu1 %v18264_v58  ;;  %6359 = vmatprep.subr.bf16.mxu0 %v18265_v59  ;;  %v18336_v58 = vld [vmem:[%s26097_s2 + $0x484] ss:$24 sps:$4 sm:$0xff]  }
  0x45   : > { %7743 = vmatprep.subr.bf16.mxu1 %v18267_v60  ;;  %v18324_v59 = vld [vmem:[%s26097_s2 + $0x4bc] ss:$24 sps:$4 sm:$0xff]   ;;  %v18334_v60 = vld [vmem:[%s26097_s2 + $0x480] ss:$24 sps:$4 sm:$0xff]  }
  0x47   : > { %6360 = vmatpush1.bf16.msra.mxu0 %v18269_v61  ;;  %v18342_v61 = vld [vmem:[%s26097_s2 + $0x4b4] ss:$24 sps:$4 sm:$0xff]  }
  0x48   : > { %7744 = vmatpush1.bf16.msra.mxu1 %v18270_v62  ;;  %6361 = vmatprep.subr.bf16.mxu0 %v18271_v63  ;;  %v431_v62 = vld [vmem:[%s20162_s20 + $0x300] sm:$0xff] }
  0x49   : > { %7745 = vmatprep.subr.bf16.mxu1 %v18273_v0  ;;  %v439_v63 = vld [vmem:[%s20162_s20 + $0x340] sm:$0xff]  ;;  %v18322_v0 = vld [vmem:[%s26097_s2 + $0x4b8] ss:$24 sps:$4 sm:$0xff]  }
  0x4a   : > { %v20407_v4 = vcombine.high %v431_v62, %v439_v63 }
  0x4b   : > { %6362 = vmatpush1.bf16.msra.mxu0 %v18275_v1  ;;  %v18330_v1 = vld [vmem:[%s26097_s2 + $0x4ec] ss:$24 sps:$4 sm:$0xff]  }
  0x4c   : > { %7746 = vmatpush1.bf16.msra.mxu1 %v18276_v2  ;;  %6504 = vmatprep.subr.bf16.mxu0 %v18300_v6  ;;  %v18340_v2 = vld [vmem:[%s26097_s2 + $0x4b0] ss:$24 sps:$4 sm:$0xff]   ;;  %v18345_v6 = vld [vmem:[%s26097_s2 + $0x4e4] ss:$24 sps:$4 sm:$0xff]  }
  0x4d   : > { %7888 = vmatprep.subr.bf16.mxu1 %v18279_v3  ;;  %v20405_v3 = vcombine.low %v415_v48, %v423_v50  ;;  %v495_v50 = vld [vmem:[%s20162_s20 + $0x500] sm:$0xff] }
  0x4e   : > { %6364 = vmatmul.mubr.bf16.vlgmr.msra.gmra.mrb[0].mxu0 %v20238_v7 }
  0x4f   : > { %7748 = vmatmul.mubr.bf16.vlgmr.msra.gmra.mrb[0].mxu1 %v20238_v7  ;;  %6373 = vmatprep.mubr.bf16.mxu0 %v20243_v9 }
  0x50   : > { %7889 = vmatpush1.bf16.msra.mxu1 %v18277_v8  ;;  %7757 = vmatprep.mubr.bf16.mxu1 %v20243_v9  ;;  %v18339_v8 = vld [vmem:[%s26097_s2 + $0x51c] ss:$24 sps:$4 sm:$0xff]  }
  0x51   : > { %7890 = vmatprep.subr.bf16.mxu1 %v18282_v10  ;;  %6505 = vmatpush1.bf16.msra.mxu0 %v18298_v11  ;;  %v18343_v10 = vld [vmem:[%s26097_s2 + $0x4e0] ss:$24 sps:$4 sm:$0xff]   ;;  %v18351_v11 = vld [vmem:[%s26097_s2 + $0x514] ss:$24 sps:$4 sm:$0xff]  }
  0x52   : > { %6506 = vmatprep.subr.bf16.mxu0 %v18303_v12  ;;  %v447_v12 = vld [vmem:[%s20162_s20 + $0x380] sm:$0xff] }
  0x54   : > { %7891 = vmatpush1.bf16.msra.mxu1 %v18280_v13  ;;  %v455_v13 = vld [vmem:[%s20162_s20 + $0x3c0] sm:$0xff] }
  0x55   : > { %7892 = vmatprep.subr.bf16.mxu1 %v18285_v16  ;;  %6507 = vmatpush1.bf16.msra.mxu0 %v18301_v17  ;;  %v18349_v16 = vld [vmem:[%s26097_s2 + $0x510] ss:$24 sps:$4 sm:$0xff]   ;;  %v20439_v17 = vcombine.low %v431_v62, %v439_v63  ;;  %v535_v62 = vld [vmem:[%s20162_s20 + $0x640] sm:$0xff] }
  0x56   : > { %6374 = vmatmul.mubr.bf16.gmra.mrb[4].mxu0 %v20269_v18  ;;  %6508 = vmatprep.subr.bf16.mxu0 %v18309_v21  ;;  %v18346_v21 = vld [vmem:[%s26097_s2 + $0x548] ss:$24 sps:$4 sm:$0xff]  }
  0x57   : > { %7758 = vmatmul.mubr.bf16.gmra.mrb[4].mxu1 %v20269_v18  ;;  %6383 = vmatprep.mubr.bf16.mxu0 %v20271_v19 }
  0x58   : > { %7767 = vmatprep.mubr.bf16.mxu1 %v20271_v19  ;;  %7893 = vmatpush1.bf16.msra.mxu1 %v18283_v20  ;;  %v20441_v20 = vcombine.high %v447_v12, %v455_v13 }
  0x59   : > { %7894 = vmatprep.subr.bf16.mxu1 %v18288_v22  ;;  %6509 = vmatpush1.bf16.msra.mxu0 %v18307_v23  ;;  %v18354_v22 = vld [vmem:[%s26097_s2 + $0x544] ss:$24 sps:$4 sm:$0xff]   ;;  %v18352_v23 = vld [vmem:[%s26097_s2 + $0x540] ss:$24 sps:$4 sm:$0xff]  }
  0x5a   : > { %6510 = vmatprep.subr.bf16.mxu0 %v18312_v24  ;;  %v18357_v24 = vld [vmem:[%s26097_s2 + $0x57c] ss:$24 sps:$4 sm:$0xff]  }
  0x5c   : > { %7895 = vmatpush1.bf16.msra.mxu1 %v18286_v27  ;;  %v471_v27 = vld [vmem:[%s20162_s20 + $0x440] sm:$0xff] }
  0x5d   : > { %7896 = vmatprep.subr.bf16.mxu1 %v18291_v28  ;;  %6511 = vmatpush1.bf16.msra.mxu0 %v18310_v29  ;;  %v18355_v28 = vld [vmem:[%s26097_s2 + $0x578] ss:$24 sps:$4 sm:$0xff]  }
  0x5e   : > { %6384 = vmatmul.mubr.bf16.gmra.mrb[8].mxu0 %v20303_v30  ;;  %6512 = vmatprep.subr.bf16.mxu0 %v18318_v33  ;;  %v18358_v29 = vld [vmem:[%s26097_s2 + $0x570] ss:$24 sps:$4 sm:$0xff]   ;;  %v20473_v33 = vcombine.low %v447_v12, %v455_v13 }
  0x5f   : > { %7768 = vmatmul.mubr.bf16.gmra.mrb[8].mxu1 %v20303_v30  ;;  %6393 = vmatprep.mubr.bf16.mxu0 %v20305_v31  ;;  %v352_v13 = vld [vmem:[%s20162_s20 + $0x88] sm:$0xff] }
  0x60   : > { %7777 = vmatprep.mubr.bf16.mxu1 %v20305_v31  ;;  %7897 = vmatpush1.bf16.msra.mxu1 %v18289_v32  ;;  %v18363_v32 = vld [vmem:[%s26097_s2 + $0x5ac] ss:$24 sps:$4 sm:$0xff]  }
  0x61   : > { %7898 = vmatprep.subr.bf16.mxu1 %v18294_v34  ;;  %6513 = vmatpush1.bf16.msra.mxu0 %v18316_v35  ;;  %v20475_v34 = vcombine.high %v463_v26, %v471_v27  ;;  %v18361_v35 = vld [vmem:[%s26097_s2 + $0x5a8] ss:$24 sps:$4 sm:$0xff]  }
  0x62   : > { %6514 = vmatprep.subr.bf16.mxu0 %v18321_v36  ;;  %v18366_v36 = vld [vmem:[%s26097_s2 + $0x5a4] ss:$24 sps:$4 sm:$0xff]  }
  0x64   : > { %7899 = vmatpush1.bf16.msra.mxu1 %v18292_v39  ;;  %v479_v39 = vld [vmem:[%s20162_s20 + $0x480] sm:$0xff] }
  0x65   : > { %7900 = vmatprep.subr.bf16.mxu1 %v18297_v40  ;;  %6515 = vmatpush1.bf16.msra.mxu0 %v18319_v41  ;;  %v18369_v40 = vld [vmem:[%s26097_s2 + $0x5d4] ss:$24 sps:$4 sm:$0xff]   ;;  %v487_v41 = vld [vmem:[%s20162_s20 + $0x4c0] sm:$0xff] }
  0x66   : > { %6394 = vmatmul.mubr.bf16.gmra.mrb[12].mxu0 %v20337_v42  ;;  %6516 = vmatprep.subr.bf16.mxu0 %v18327_v45  ;;  %v18367_v45 = vld [vmem:[%s26097_s2 + $0x5d0] ss:$24 sps:$4 sm:$0xff]   ;;  %v20509_v48 = vcombine.high %v479_v39, %v487_v41 }
  0x67   : > { %7778 = vmatmul.mubr.bf16.gmra.mrb[12].mxu1 %v20337_v42  ;;  %6403 = vmatprep.mubr.bf16.mxu0 %v20339_v43 }
  0x68   : > { %7787 = vmatprep.mubr.bf16.mxu1 %v20339_v43  ;;  %7901 = vmatpush1.bf16.msra.mxu1 %v18295_v44  ;;  %v18370_v44 = vld [vmem:[%s26097_s2 + $0x5d8] ss:$24 sps:$4 sm:$0xff]  }
  0x69   : > { %7902 = vmatprep.subr.bf16.mxu1 %v18306_v46  ;;  %6517 = vmatpush1.bf16.msra.mxu0 %v18325_v47  ;;  %v18375_v46 = vld [vmem:[%s26097_s2 + $0x60c] ss:$24 sps:$4 sm:$0xff]   ;;  %v20507_v47 = vcombine.low %v463_v26, %v471_v27 }
  0x6a   : > { %6518 = vmatprep.subr.bf16.mxu0 %v18333_v49  ;;  %v18396_v49 = vld [vmem:[%s26097_s2 + $0x604] ss:$24 sps:$4 sm:$0xff]   ;;  %v376_v26 = vld [vmem:[%s20162_s20 + $0x148] sm:$0xff] }
  0x6b   : > { %v18381_v27 = vld [vmem:[%s26097_s2 + $0x66c] ss:$24 sps:$4 sm:$0xff]  }
  0x6c   : > { %7903 = vmatpush1.bf16.msra.mxu1 %v18304_v52  ;;  %v503_v52 = vld [vmem:[%s20162_s20 + $0x540] sm:$0xff] }
  0x6d   : > { %7904 = vmatprep.subr.bf16.mxu1 %v18315_v53  ;;  %6519 = vmatpush1.bf16.msra.mxu0 %v18331_v54  ;;  %v20520_v53 = vcombine.low %v479_v39, %v487_v41  ;;  %v20522_v54 = vcombine.high %v495_v50, %v503_v52  ;;  %v18403_v39 = vld [vmem:[%s26097_s2 + $0x660] ss:$24 sps:$4 sm:$0xff]   ;;  %v392_v41 = vld [vmem:[%s20162_s20 + $0x1c8] sm:$0xff] }
  0x6e   : > { %6404 = vmatmul.mubr.bf16.gmra.mrb[16].mxu0 %v20371_v55  ;;  %6520 = vmatprep.subr.bf16.mxu0 %v18336_v58  ;;  %v519_v58 = vld [vmem:[%s20162_s20 + $0x5c0] sm:$0xff] }
  0x6f   : > { %7788 = vmatmul.mubr.bf16.gmra.mrb[16].mxu1 %v20371_v55  ;;  %6413 = vmatprep.mubr.bf16.mxu0 %v20373_v56 }
  0x70   : > { %7797 = vmatprep.mubr.bf16.mxu1 %v20373_v56  ;;  %7905 = vmatpush1.bf16.msra.mxu1 %v18313_v57  ;;  %v511_v57 = vld [vmem:[%s20162_s20 + $0x580] sm:$0xff] }
  0x71   : > { %7906 = vmatprep.subr.bf16.mxu1 %v18324_v59  ;;  %6521 = vmatpush1.bf16.msra.mxu0 %v18334_v60  ;;  %v20530_v59 = vcombine.low %v495_v50, %v503_v52  ;;  %v20532_v60 = vcombine.high %v511_v57, %v519_v58  ;;  %v20540_v63 = vcombine.low %v511_v57, %v519_v58  ;;  %v18385_v52 = vld [vmem:[%s26097_s2 + $0x6c8] ss:$24 sps:$4 sm:$0xff]   ;;  %v18414_v57 = vld [vmem:[%s26097_s2 + $0x6c4] ss:$24 sps:$4 sm:$0xff]  }
  0x72   : > { %6522 = vmatprep.subr.bf16.mxu0 %v18342_v61  ;;  %v527_v61 = vld [vmem:[%s20162_s20 + $0x600] sm:$0xff] }
  0x74   : > { %7907 = vmatpush1.bf16.msra.mxu1 %v18322_v0  ;;  %v20542_v0 = vcombine.high %v527_v61, %v535_v62 }
  0x75   : > { %7908 = vmatprep.subr.bf16.mxu1 %v18330_v1  ;;  %6523 = vmatpush1.bf16.msra.mxu0 %v18340_v2  ;;  %v543_v1 = vld [vmem:[%s20162_s20 + $0x680] sm:$0xff] }
  0x76   : > { %6414 = vmatmul.mubr.bf16.gmra.mrb[20].mxu0 %v20405_v3  ;;  %6524 = vmatprep.subr.bf16.mxu0 %v18345_v6  ;;  %v551_v2 = vld [vmem:[%s20162_s20 + $0x6c0] sm:$0xff] }
  0x77   : > { %7798 = vmatmul.mubr.bf16.gmra.mrb[20].mxu1 %v20405_v3  ;;  %6423 = vmatprep.mubr.bf16.mxu0 %v20407_v4  ;;  %v20552_v6 = vcombine.high %v543_v1, %v551_v2 }
  0x78   : > { %7807 = vmatprep.mubr.bf16.mxu1 %v20407_v4  ;;  %7909 = vmatpush1.bf16.msra.mxu1 %v18328_v5  ;;  %v20550_v5 = vcombine.low %v527_v61, %v535_v62  ;;  %v18390_v61 = vld [vmem:[%s26097_s2 + $0x6fc] ss:$24 sps:$4 sm:$0xff]   ;;  %v18412_v62 = vld [vmem:[%s26097_s2 + $0x6c0] ss:$24 sps:$4 sm:$0xff]  }
  0x79   : > { %7910 = vmatprep.subr.bf16.mxu1 %v18339_v8  ;;  %6525 = vmatpush1.bf16.msra.mxu0 %v18343_v10  ;;  %v336_v8 = vld [vmem:[%s20162_s20 + $0x8] sm:$0xff] }
  0x7a   : > { %6526 = vmatprep.subr.bf16.mxu0 %v18351_v11  ;;  %v344_v10 = vld [vmem:[%s20162_s20 + $0x48] sm:$0xff]  ;;  %v20560_v11 = vcombine.low %v543_v1, %v551_v2 }
  0x7b   : > { %v20562_v12 = vcombine.high %v336_v8, %v344_v10  ;;  %v400_v1 = vld [vmem:[%s20162_s20 + $0x208] sm:$0xff] }
  0x7c   : > { %7911 = vmatpush1.bf16.msra.mxu1 %v18337_v14  ;;  %v360_v14 = vld [vmem:[%s20162_s20 + $0xc8] sm:$0xff] }
  0x7d   : > { %7912 = vmatprep.subr.bf16.mxu1 %v18348_v15  ;;  %6527 = vmatpush1.bf16.msra.mxu0 %v18349_v16  ;;  %v18373_v15 = vld [vmem:[%s26097_s2 + $0x608] ss:$24 sps:$4 sm:$0xff]   ;;  %v20573_v16 = vcombine.low %v336_v8, %v344_v10  ;;  %v18388_v8 = vld [vmem:[%s26097_s2 + $0x6f8] ss:$24 sps:$4 sm:$0xff]   ;;  %v18417_v10 = vld [vmem:[%s26097_s2 + $0x6f4] ss:$24 sps:$4 sm:$0xff]  }
  0x7e   : > { %6424 = vmatmul.mubr.bf16.gmra.mrb[24].mxu0 %v20439_v17  ;;  %6528 = vmatprep.subr.bf16.mxu0 %v18354_v22  ;;  %v20578_v22 = vcombine.high %v352_v13, %v360_v14  ;;  %v408_v2 = vld [vmem:[%s20162_s20 + $0x248] sm:$0xff] }
  0x7f   : > { %7808 = vmatmul.mubr.bf16.gmra.mrb[24].mxu1 %v20439_v17  ;;  %6433 = vmatprep.mubr.bf16.mxu0 %v20441_v20 }
  0x80   : > { %7817 = vmatprep.mubr.bf16.mxu1 %v20441_v20  ;;  %7913 = vmatpush1.bf16.msra.mxu1 %v18346_v21  ;;  %v18378_v21 = vld [vmem:[%s26097_s2 + $0x63c] ss:$24 sps:$4 sm:$0xff]  }
  0x81   : > { %7914 = vmatprep.subr.bf16.mxu1 %v18357_v24  ;;  %6529 = vmatpush1.bf16.msra.mxu0 %v18352_v23  ;;  %v18394_v23 = vld [vmem:[%s26097_s2 + $0x600] ss:$24 sps:$4 sm:$0xff]  }
  0x82   : > { %6530 = vmatprep.subr.bf16.mxu0 %v18360_v25  ;;  %v18376_v24 = vld [vmem:[%s26097_s2 + $0x638] ss:$24 sps:$4 sm:$0xff]   ;;  %v368_v25 = vld [vmem:[%s20162_s20 + $0x108] sm:$0xff] }
  0x83   : > { %v20635_v50 = vcombine.low %v368_v25, %v376_v26 }
  0x84   : > { %7915 = vmatpush1.bf16.msra.mxu1 %v18355_v28  ;;  %v18399_v28 = vld [vmem:[%s26097_s2 + $0x634] ss:$24 sps:$4 sm:$0xff]  }
  0x85   : > { %6531 = vmatpush1.bf16.msra.mxu0 %v18358_v29  ;;  %7916 = vmatprep.subr.bf16.mxu1 %v18363_v32  ;;  %v18397_v29 = vld [vmem:[%s26097_s2 + $0x630] ss:$24 sps:$4 sm:$0xff]   ;;  %v20601_v32 = vcombine.low %v352_v13, %v360_v14  ;;  %v18393_v13 = vld [vmem:[%s26097_s2 + $0x72c] ss:$24 sps:$4 sm:$0xff]  }
  0x86   : > { %6434 = vmatmul.mubr.bf16.gmra.mrb[28].mxu0 %v20473_v33  ;;  %6532 = vmatprep.subr.bf16.mxu0 %v18366_v36  ;;  %v18405_v36 = vld [vmem:[%s26097_s2 + $0x664] ss:$24 sps:$4 sm:$0xff]   ;;  %v18415_v14 = vld [vmem:[%s26097_s2 + $0x6f0] ss:$24 sps:$4 sm:$0xff]  }
  0x87   : > { %7818 = vmatmul.mubr.bf16.gmra.mrb[28].mxu1 %v20473_v33  ;;  %6443 = vmatprep.mubr.bf16.mxu0 %v20475_v34 }
  0x88   : > { %7827 = vmatprep.mubr.bf16.mxu1 %v20475_v34  ;;  %7917 = vmatpush1.bf16.msra.mxu1 %v18361_v35  ;;  %v18379_v35 = vld [vmem:[%s26097_s2 + $0x668] ss:$24 sps:$4 sm:$0xff]  }
  0x89   : > { %6533 = vmatpush1.bf16.msra.mxu0 %v18364_v37  ;;  %7918 = vmatprep.subr.bf16.mxu1 %v18372_v38  ;;  %v20609_v37 = vcombine.high %v368_v25, %v376_v26  ;;  %v18384_v38 = vld [vmem:[%s26097_s2 + $0x69c] ss:$24 sps:$4 sm:$0xff]   ;;  %v18421_v26 = vld [vmem:[%s26097_s2 + $0x720] ss:$24 sps:$4 sm:$0xff]  }
  0x8a   : > { %6534 = vmatprep.subr.bf16.mxu0 %v18369_v40  ;;  %v384_v40 = vld [vmem:[%s20162_s20 + $0x188] sm:$0xff]  ;;  %v18402_v25 = vld [vmem:[%s26097_s2 + $0x75c] ss:$24 sps:$4 sm:$0xff]  }
  0x8b   : > { %v20643_v58 = vcombine.high %v384_v40, %v392_v41 }
  0x8c   : > { %7919 = vmatpush1.bf16.msra.mxu1 %v18370_v44  ;;  %v18382_v44 = vld [vmem:[%s26097_s2 + $0x698] ss:$24 sps:$4 sm:$0xff]  }
  0x8d   : > { %6535 = vmatpush1.bf16.msra.mxu0 %v18367_v45  ;;  %8061 = vmatprep.subr.bf16.mxu1 %v18375_v46  ;;  %v18408_v45 = vld [vmem:[%s26097_s2 + $0x694] ss:$24 sps:$4 sm:$0xff]  }
  0x8e   : > { %6444 = vmatmul.mubr.bf16.gmra.mrb[32].mxu0 %v20507_v47  ;;  %6677 = vmatprep.subr.bf16.mxu0 %v18396_v49  ;;  %v18387_v46 = vld [vmem:[%s26097_s2 + $0x6cc] ss:$24 sps:$4 sm:$0xff]   ;;  %v18406_v49 = vld [vmem:[%s26097_s2 + $0x690] ss:$24 sps:$4 sm:$0xff]  }
  0x8f   : > { %7828 = vmatmul.mubr.bf16.gmra.mrb[32].mxu1 %v20507_v47  ;;  %6453 = vmatprep.mubr.bf16.mxu0 %v20509_v48 }
  0x90   : > { %7837 = vmatprep.mubr.bf16.mxu1 %v20509_v48 }
  0x96   : > { %6454 = vmatmul.mubr.bf16.gmra.mrb[36].mxu0 %v20520_v53 }
  0x97   : > { %7838 = vmatmul.mubr.bf16.gmra.mrb[36].mxu1 %v20520_v53  ;;  %6463 = vmatprep.mubr.bf16.mxu0 %v20522_v54 }
  0x98   : > { %7847 = vmatprep.mubr.bf16.mxu1 %v20522_v54 }
  0x9e   : > { %6464 = vmatmul.mubr.bf16.gmra.mrb[40].mxu0 %v20530_v59 }
  0x9f   : > { %7848 = vmatmul.mubr.bf16.gmra.mrb[40].mxu1 %v20530_v59  ;;  %6473 = vmatprep.mubr.bf16.mxu0 %v20532_v60 }
  0xa0   : > { %7857 = vmatprep.mubr.bf16.mxu1 %v20532_v60 }
  0xa6   : > { %6474 = vmatmul.mubr.bf16.gmra.mrb[44].mxu0 %v20540_v63 }
  0xa7   : > { %7858 = vmatmul.mubr.bf16.gmra.mrb[44].mxu1 %v20540_v63  ;;  %6483 = vmatprep.mubr.bf16.mxu0 %v20542_v0 }
  0xa8   : > { %7867 = vmatprep.mubr.bf16.mxu1 %v20542_v0 }
  0xae   : > { %6484 = vmatmul.mubr.bf16.gmra.mrb[48].mxu0 %v20550_v5 }
  0xaf   : > { %7868 = vmatmul.mubr.bf16.gmra.mrb[48].mxu1 %v20550_v5  ;;  %6493 = vmatprep.mubr.bf16.mxu0 %v20552_v6 }
  0xb0   : > { %7877 = vmatprep.mubr.bf16.mxu1 %v20552_v6 }
  0xb6   : > { %6494 = vmatmul.mubr.bf16.gmra.mrb[52].mxu0 %v20560_v11 }
  0xb7   : > { %7878 = vmatmul.mubr.bf16.gmra.mrb[52].mxu1 %v20560_v11  ;;  %6536 = vmatprep.mubr.bf16.mxu0 %v20562_v12 }
  0xb8   : > { %7920 = vmatprep.mubr.bf16.mxu1 %v20562_v12 }
  0xbe   : > { %6537 = vmatmul.mubr.bf16.vlgmr.msra.gmra.mrb[0].mxu0 %v20573_v16 }
  0xbf   : > { %7921 = vmatmul.mubr.bf16.vlgmr.msra.gmra.mrb[0].mxu1 %v20573_v16  ;;  %6546 = vmatprep.mubr.bf16.mxu0 %v20578_v22 }
  0xc0   : > { %8062 = vmatpush1.bf16.msra.mxu1 %v18373_v15  ;;  %7930 = vmatprep.mubr.bf16.mxu1 %v20578_v22  ;;  %v20669_v15 = vcombine.low %v384_v40, %v392_v41  ;;  %v18409_v40 = vld [vmem:[%s26097_s2 + $0x788] ss:$24 sps:$4 sm:$0xff]  }
  0xc1   : > { %8063 = vmatprep.subr.bf16.mxu1 %v18378_v21  ;;  %6678 = vmatpush1.bf16.msra.mxu0 %v18394_v23  ;;  %v18391_v21 = vld [vmem:[%s26097_s2 + $0x728] ss:$24 sps:$4 sm:$0xff]   ;;  %v18423_v23 = vld [vmem:[%s26097_s2 + $0x724] ss:$24 sps:$4 sm:$0xff]  }
  0xc2   : > { %6679 = vmatprep.subr.bf16.mxu0 %v18399_v28  ;;  %v424_v28 = vld [vmem:[%s20162_s20 + $0x2c8] sm:$0xff] }
  0xc4   : > { %8064 = vmatpush1.bf16.msra.mxu1 %v18376_v24  ;;  %v20677_v24 = vcombine.high %v400_v1, %v408_v2 }
  0xc5   : > { %8065 = vmatprep.subr.bf16.mxu1 %v18381_v27  ;;  %6680 = vmatpush1.bf16.msra.mxu0 %v18397_v29  ;;  %v416_v27 = vld [vmem:[%s20162_s20 + $0x288] sm:$0xff] }
  0xc6   : > { %6547 = vmatmul.mubr.bf16.gmra.mrb[4].mxu0 %v20601_v32  ;;  %6681 = vmatprep.subr.bf16.mxu0 %v18405_v36  ;;  %v18429_v29 = vld [vmem:[%s26097_s2 + $0x754] ss:$24 sps:$4 sm:$0xff]   ;;  %v20708_v41 = vcombine.high %v416_v27, %v424_v28 }
  0xc7   : > { %7931 = vmatmul.mubr.bf16.gmra.mrb[4].mxu1 %v20601_v32  ;;  %6556 = vmatprep.mubr.bf16.mxu0 %v20609_v37  ;;  %v18411_v36 = vld [vmem:[%s26097_s2 + $0x78c] ss:$24 sps:$4 sm:$0xff]  }
  0xc8   : > { %7940 = vmatprep.mubr.bf16.mxu1 %v20609_v37  ;;  %8066 = vmatpush1.bf16.msra.mxu1 %v18379_v35  ;;  %v18400_v35 = vld [vmem:[%s26097_s2 + $0x758] ss:$24 sps:$4 sm:$0xff]  }
  0xc9   : > { %8067 = vmatprep.subr.bf16.mxu1 %v18384_v38  ;;  %6682 = vmatpush1.bf16.msra.mxu0 %v18403_v39  ;;  %v18427_v38 = vld [vmem:[%s26097_s2 + $0x750] ss:$24 sps:$4 sm:$0xff]   ;;  %v20703_v39 = vcombine.low %v400_v1, %v408_v2  ;;  %v20737_v2 = vcombine.low %v416_v27, %v424_v28  ;;  %v18444_v28 = vld [vmem:[%s26097_s2 + $0x84c] ss:$24 sps:$4 sm:$0xff]  }
  0xca   : > { %6683 = vmatprep.subr.bf16.mxu0 %v18408_v45  ;;  %v18432_v45 = vld [vmem:[%s26097_s2 + $0x784] ss:$24 sps:$4 sm:$0xff]   ;;  %v18436_v1 = vld [vmem:[%s26097_s2 + $0x7b0] ss:$24 sps:$4 sm:$0xff]  }
  0xcb   : > { %v18433_v27 = vld [vmem:[%s26097_s2 + $0x818] ss:$24 sps:$4 sm:$0xff]  }
  0xcc   : > { %8068 = vmatpush1.bf16.msra.mxu1 %v18382_v44  ;;  %v18420_v44 = vld [vmem:[%s26097_s2 + $0x7bc] ss:$24 sps:$4 sm:$0xff]  }
  0xcd   : > { %8069 = vmatprep.subr.bf16.mxu1 %v18387_v46  ;;  %6684 = vmatpush1.bf16.msra.mxu0 %v18406_v49  ;;  %v18430_v46 = vld [vmem:[%s26097_s2 + $0x780] ss:$24 sps:$4 sm:$0xff]   ;;  %v432_v49 = vld [vmem:[%s20162_s20 + $0x308] sm:$0xff] }
  0xce   : > { %6557 = vmatmul.mubr.bf16.gmra.mrb[8].mxu0 %v20635_v50  ;;  %6685 = vmatprep.subr.bf16.mxu0 %v18414_v57  ;;  %v18438_v57 = vld [vmem:[%s26097_s2 + $0x7b4] ss:$24 sps:$4 sm:$0xff]  }
  0xcf   : > { %7941 = vmatmul.mubr.bf16.gmra.mrb[8].mxu1 %v20635_v50  ;;  %6566 = vmatprep.mubr.bf16.mxu0 %v20643_v58 }
  0xd0   : > { %7950 = vmatprep.mubr.bf16.mxu1 %v20643_v58  ;;  %8070 = vmatpush1.bf16.msra.mxu1 %v18385_v52  ;;  %v440_v52 = vld [vmem:[%s20162_s20 + $0x348] sm:$0xff] }
  0xd1   : > { %8071 = vmatprep.subr.bf16.mxu1 %v18390_v61  ;;  %6686 = vmatpush1.bf16.msra.mxu0 %v18412_v62  ;;  %v18418_v61 = vld [vmem:[%s26097_s2 + $0x7b8] ss:$24 sps:$4 sm:$0xff]   ;;  %v18426_v62 = vld [vmem:[%s26097_s2 + $0x7ec] ss:$24 sps:$4 sm:$0xff]  }
  0xd2   : > { %6687 = vmatprep.subr.bf16.mxu0 %v18417_v10  ;;  %v20742_v10 = vcombine.high %v432_v49, %v440_v52 }
  0xd4   : > { %8072 = vmatpush1.bf16.msra.mxu1 %v18388_v8  ;;  %v18424_v8 = vld [vmem:[%s26097_s2 + $0x7e8] ss:$24 sps:$4 sm:$0xff]  }
  0xd5   : > { %8073 = vmatprep.subr.bf16.mxu1 %v18393_v13  ;;  %6688 = vmatpush1.bf16.msra.mxu0 %v18415_v14  ;;  %v18435_v13 = vld [vmem:[%s26097_s2 + $0x81c] ss:$24 sps:$4 sm:$0xff]  }
  0xd6   : > { %6567 = vmatmul.mubr.bf16.gmra.mrb[12].mxu0 %v20669_v15  ;;  %6689 = vmatprep.subr.bf16.mxu0 %v18423_v23  ;;  %v18441_v14 = vld [vmem:[%s26097_s2 + $0x7e4] ss:$24 sps:$4 sm:$0xff]   ;;  %v448_v23 = vld [vmem:[%s20162_s20 + $0x388] sm:$0xff] }
  0xd7   : > { %7951 = vmatmul.mubr.bf16.gmra.mrb[12].mxu1 %v20669_v15  ;;  %6576 = vmatprep.mubr.bf16.mxu0 %v20677_v24 }
  0xd8   : > { %7960 = vmatprep.mubr.bf16.mxu1 %v20677_v24  ;;  %8074 = vmatpush1.bf16.msra.mxu1 %v18391_v21  ;;  %v18439_v21 = vld [vmem:[%s26097_s2 + $0x7e0] ss:$24 sps:$4 sm:$0xff]  }
  0xd9   : > { %8075 = vmatprep.subr.bf16.mxu1 %v18402_v25  ;;  %6690 = vmatpush1.bf16.msra.mxu0 %v18421_v26  ;;  %v456_v25 = vld [vmem:[%s20162_s20 + $0x3c8] sm:$0xff] }
  0xda   : > { %6691 = vmatprep.subr.bf16.mxu0 %v18429_v29  ;;  %v18447_v26 = vld [vmem:[%s26097_s2 + $0x814] ss:$24 sps:$4 sm:$0xff]   ;;  %v18445_v29 = vld [vmem:[%s26097_s2 + $0x810] ss:$24 sps:$4 sm:$0xff]  }
  0xdc   : > { %8076 = vmatpush1.bf16.msra.mxu1 %v18400_v35  ;;  %v20771_v35 = vcombine.low %v432_v49, %v440_v52  ;;  %v472_v49 = vld [vmem:[%s20162_s20 + $0x448] sm:$0xff] }
  0xdd   : > { %8077 = vmatprep.subr.bf16.mxu1 %v18411_v36  ;;  %6692 = vmatpush1.bf16.msra.mxu0 %v18427_v38  ;;  %v18442_v36 = vld [vmem:[%s26097_s2 + $0x848] ss:$24 sps:$4 sm:$0xff]   ;;  %v18450_v38 = vld [vmem:[%s26097_s2 + $0x844] ss:$24 sps:$4 sm:$0xff]   ;;  %v18456_v52 = vld [vmem:[%s26097_s2 + $0x874] ss:$24 sps:$4 sm:$0xff]  }
  0xde   : > { %6577 = vmatmul.mubr.bf16.gmra.mrb[16].mxu0 %v20703_v39  ;;  %6693 = vmatprep.subr.bf16.mxu0 %v18432_v45  ;;  %v18453_v45 = vld [vmem:[%s26097_s2 + $0x87c] ss:$24 sps:$4 sm:$0xff]  }
  0xdf   : > { %7961 = vmatmul.mubr.bf16.gmra.mrb[16].mxu1 %v20703_v39  ;;  %6586 = vmatprep.mubr.bf16.mxu0 %v20708_v41 }
  0xe0   : > { %7970 = vmatprep.mubr.bf16.mxu1 %v20708_v41  ;;  %8078 = vmatpush1.bf16.msra.mxu1 %v18409_v40  ;;  %v20779_v40 = vcombine.high %v448_v23, %v456_v25 }
  0xe1   : > { %8079 = vmatprep.subr.bf16.mxu1 %v18420_v44  ;;  %6694 = vmatpush1.bf16.msra.mxu0 %v18430_v46  ;;  %v18448_v44 = vld [vmem:[%s26097_s2 + $0x840] ss:$24 sps:$4 sm:$0xff]   ;;  %v464_v46 = vld [vmem:[%s20162_s20 + $0x408] sm:$0xff] }
  0xe2   : > { %6695 = vmatprep.subr.bf16.mxu0 %v18438_v57  ;;  %v18451_v57 = vld [vmem:[%s26097_s2 + $0x878] ss:$24 sps:$4 sm:$0xff]  }
  0xe4   : > { %8080 = vmatpush1.bf16.msra.mxu1 %v18418_v61  ;;  %v18454_v61 = vld [vmem:[%s26097_s2 + $0x870] ss:$24 sps:$4 sm:$0xff]  }
  0xe5   : > { %8081 = vmatprep.subr.bf16.mxu1 %v18426_v62  ;;  %6696 = vmatpush1.bf16.msra.mxu0 %v18436_v1  ;;  %v18459_v62 = vld [vmem:[%s26097_s2 + $0x8ac] ss:$24 sps:$4 sm:$0xff]   ;;  %v20805_v1 = vcombine.low %v448_v23, %v456_v25  ;;  %v18468_v23 = vld [vmem:[%s26097_s2 + $0x8dc] ss:$24 sps:$4 sm:$0xff]  }
  0xe6   : > { %6587 = vmatmul.mubr.bf16.gmra.mrb[20].mxu0 %v20737_v2  ;;  %6697 = vmatprep.subr.bf16.mxu0 %v18441_v14  ;;  %v20813_v14 = vcombine.high %v464_v46, %v472_v49  ;;  %v480_v25 = vld [vmem:[%s20162_s20 + $0x488] sm:$0xff] }
  0xe7   : > { %7971 = vmatmul.mubr.bf16.gmra.mrb[20].mxu1 %v20737_v2  ;;  %6596 = vmatprep.mubr.bf16.mxu0 %v20742_v10 }
  0xe8   : > { %7980 = vmatprep.mubr.bf16.mxu1 %v20742_v10  ;;  %8082 = vmatpush1.bf16.msra.mxu1 %v18424_v8  ;;  %v18457_v8 = vld [vmem:[%s26097_s2 + $0x8a8] ss:$24 sps:$4 sm:$0xff]  }
  0xe9   : > { %8083 = vmatprep.subr.bf16.mxu1 %v18435_v13  ;;  %6698 = vmatpush1.bf16.msra.mxu0 %v18439_v21  ;;  %v18462_v13 = vld [vmem:[%s26097_s2 + $0x8a4] ss:$24 sps:$4 sm:$0xff]   ;;  %v18460_v21 = vld [vmem:[%s26097_s2 + $0x8a0] ss:$24 sps:$4 sm:$0xff]  }
  0xea   : > { %6699 = vmatprep.subr.bf16.mxu0 %v18447_v26  ;;  %v488_v26 = vld [vmem:[%s20162_s20 + $0x4c8] sm:$0xff] }
  0xec   : > { %8084 = vmatpush1.bf16.msra.mxu1 %v18433_v27  ;;  %v18465_v27 = vld [vmem:[%s26097_s2 + $0x8d4] ss:$24 sps:$4 sm:$0xff]  }
  0xed   : > { %8085 = vmatprep.subr.bf16.mxu1 %v18444_v28  ;;  %6700 = vmatpush1.bf16.msra.mxu0 %v18445_v29  ;;  %v18463_v28 = vld [vmem:[%s26097_s2 + $0x8d0] ss:$24 sps:$4 sm:$0xff]  }
  0xee   : > { %6597 = vmatmul.mubr.bf16.gmra.mrb[24].mxu0 %v20771_v35  ;;  %6701 = vmatprep.subr.bf16.mxu0 %v18450_v38  ;;  %v18466_v29 = vld [vmem:[%s26097_s2 + $0x8d8] ss:$24 sps:$4 sm:$0xff]   ;;  %v20839_v38 = vcombine.low %v464_v46, %v472_v49  ;;  %v496_v46 = vld [vmem:[%s20162_s20 + $0x508] sm:$0xff] }
  0xef   : > { %7981 = vmatmul.mubr.bf16.gmra.mrb[24].mxu1 %v20771_v35  ;;  %6606 = vmatprep.mubr.bf16.mxu0 %v20779_v40  ;;  %v504_v49 = vld [vmem:[%s20162_s20 + $0x548] sm:$0xff] }
  0xf0   : > { %7990 = vmatprep.mubr.bf16.mxu1 %v20779_v40  ;;  %8086 = vmatpush1.bf16.msra.mxu1 %v18442_v36  ;;  %v18471_v36 = vld [vmem:[%s26097_s2 + $0x90c] ss:$24 sps:$4 sm:$0xff]  }
  0xf1   : > { %8087 = vmatprep.subr.bf16.mxu1 %v18453_v45  ;;  %6702 = vmatpush1.bf16.msra.mxu0 %v18448_v44  ;;  %v20841_v44 = vcombine.high %v480_v25, %v488_v26  ;;  %v18492_v45 = vld [vmem:[%s26097_s2 + $0x904] ss:$24 sps:$4 sm:$0xff]  }
  0xf2   : > { %6703 = vmatprep.subr.bf16.mxu0 %v18456_v52  ;;  %v20852_v52 = vcombine.low %v480_v25, %v488_v26 }
  0xf4   : > { %8088 = vmatpush1.bf16.msra.mxu1 %v18451_v57  ;;  %v20854_v57 = vcombine.high %v496_v46, %v504_v49 }
  0xf5   : > { %6704 = vmatpush1.bf16.msra.mxu0 %v18454_v61  ;;  %8089 = vmatprep.subr.bf16.mxu1 %v18459_v62  ;;  %v512_v61 = vld [vmem:[%s20162_s20 + $0x588] sm:$0xff] }
  0xf6   : > { %6607 = vmatmul.mubr.bf16.gmra.mrb[28].mxu0 %v20805_v1  ;;  %6705 = vmatprep.subr.bf16.mxu0 %v18462_v13  ;;  %26358 = vst [vmem:[#allocation2_spill] sm:$0xff] %v20854_v57  ;;  %v520_v62 = vld [vmem:[%s20162_s20 + $0x5c8] sm:$0xff] }
  0xf7   : > { %7991 = vmatmul.mubr.bf16.gmra.mrb[28].mxu1 %v20805_v1  ;;  %6616 = vmatprep.mubr.bf16.mxu0 %v20813_v14  ;;  %v20864_v13 = vcombine.high %v512_v61, %v520_v62  ;;  %v20872_v25 = vcombine.low %v512_v61, %v520_v62  ;;  %v353_v62 = vld [vmem:[%s20162_s20 + $0x90] sm:$0xff] }
  0xf8   : > { %8000 = vmatprep.mubr.bf16.mxu1 %v20813_v14  ;;  %8090 = vmatpush1.bf16.msra.mxu1 %v18457_v8  ;;  %v20862_v8 = vcombine.low %v496_v46, %v504_v49  ;;  %v345_v46 = vld [vmem:[%s20162_s20 + $0x50] sm:$0xff] }
  0xf9   : > { %6706 = vmatpush1.bf16.msra.mxu0 %v18460_v21  ;;  %8091 = vmatprep.subr.bf16.mxu1 %v18468_v23  ;;  %26360 = vst [vmem:[#allocation4_spill] sm:$0xff] %v20864_v13  ;;  %v528_v21 = vld [vmem:[%s20162_s20 + $0x608] sm:$0xff]  ;;  %26361 = vst [vmem:[#allocation5_spill] sm:$0xff] %v20872_v25 }
  0xfa   : > { %6707 = vmatprep.subr.bf16.mxu0 %v18465_v27  ;;  %26359 = vst [vmem:[#allocation3_spill] sm:$0xff] %v20862_v8  ;;  %v536_v23 = vld [vmem:[%s20162_s20 + $0x648] sm:$0xff] }
  0xfb   : > { %v20874_v26 = vcombine.high %v528_v21, %v536_v23  ;;  %v544_v27 = vld [vmem:[%s20162_s20 + $0x688] sm:$0xff] }
  0xfc   : > { %8092 = vmatpush1.bf16.msra.mxu1 %v18466_v29  ;;  %v20882_v29 = vcombine.low %v528_v21, %v536_v23  ;;  %v361_v21 = vld [vmem:[%s20162_s20 + $0xd0] sm:$0xff]  ;;  %v18469_v23 = vld [vmem:[%s26097_s2 + $0x908] ss:$24 sps:$4 sm:$0xff]  }
  0xfd   : > { %6708 = vmatpush1.bf16.msra.mxu0 %v18463_v28  ;;  %8234 = vmatprep.subr.bf16.mxu1 %v18471_v36  ;;  %26362 = vst [vmem:[#allocation6_spill] sm:$0xff] %v20874_v26  ;;  %v552_v28 = vld [vmem:[%s20162_s20 + $0x6c8] sm:$0xff] }
  0xfe   : > { %6617 = vmatmul.mubr.bf16.gmra.mrb[32].mxu0 %v20839_v38  ;;  %6850 = vmatprep.subr.bf16.mxu0 %v18492_v45  ;;  %26363 = vst [vmem:[#allocation7_spill] sm:$0xff] %v20882_v29  ;;  %v20884_v36 = vcombine.high %v544_v27, %v552_v28  ;;  %v337_v45 = vld [vmem:[%s20162_s20 + $0x10] sm:$0xff]  ;;  %v20892_v49 = vcombine.low %v544_v27, %v552_v28 }
  0xff   : > { %8001 = vmatmul.mubr.bf16.gmra.mrb[32].mxu1 %v20839_v38  ;;  %6626 = vmatprep.mubr.bf16.mxu0 %v20841_v44  ;;  %v20894_v61 = vcombine.high %v337_v45, %v345_v46  ;;  %v20905_v27 = vcombine.low %v337_v45, %v345_v46  ;;  %v18474_v28 = vld [vmem:[%s26097_s2 + $0x93c] ss:$24 sps:$4 sm:$0xff]  }
 0x100   : > { %8010 = vmatprep.mubr.bf16.mxu1 %v20841_v44  ;;  %26364 = vst [vmem:[#allocation8_spill] sm:$0xff] %v20884_v36  ;;  %26365 = vst [vmem:[#allocation9_spill] sm:$0xff] %v20892_v49  ;;  %v369_v45 = vld [vmem:[%s20162_s20 + $0x110] sm:$0xff] }
 0x101   : > { %26366 = vst [vmem:[#allocation10_spill] sm:$0xff] %v20894_v61  ;;  %26367 = vst [vmem:[#allocation11_spill] sm:$0xff] %v20905_v27  ;;  %v377_v46 = vld [vmem:[%s20162_s20 + $0x150] sm:$0xff] }
 0x106   : > { %6627 = vmatmul.mubr.bf16.gmra.mrb[36].mxu0 %v20852_v52 }
 0x107   : > { %8011 = vmatmul.mubr.bf16.gmra.mrb[36].mxu1 %v20852_v52  ;;  %6636 = vmatprep.mubr.bf16.mxu0 %v20854_v57 }
 0x108   : > { %8020 = vmatprep.mubr.bf16.mxu1 %v20854_v57 }
 0x10e   : > { %6637 = vmatmul.mubr.bf16.gmra.mrb[40].mxu0 %v20862_v8 }
 0x10f   : > { %8021 = vmatmul.mubr.bf16.gmra.mrb[40].mxu1 %v20862_v8  ;;  %6646 = vmatprep.mubr.bf16.mxu0 %v20864_v13  ;;  %v20941_v8 = vcombine.high %v369_v45, %v377_v46 }
 0x110   : > { %8030 = vmatprep.mubr.bf16.mxu1 %v20864_v13  ;;  %v18475_v13 = vld [vmem:[%s26097_s2 + $0x968] ss:$24 sps:$4 sm:$0xff]  }
 0x111   : > { %26370 = vst [vmem:[#allocation14_spill] sm:$0xff] %v20941_v8 }
 0x116   : > { %6647 = vmatmul.mubr.bf16.gmra.mrb[44].mxu0 %v20872_v25 }
 0x117   : > { %8031 = vmatmul.mubr.bf16.gmra.mrb[44].mxu1 %v20872_v25  ;;  %6656 = vmatprep.mubr.bf16.mxu0 %v20874_v26  ;;  %v18493_v25 = vld [vmem:[%s26097_s2 + $0x930] ss:$24 sps:$4 sm:$0xff]  }
 0x118   : > { %8040 = vmatprep.mubr.bf16.mxu1 %v20874_v26  ;;  %v18495_v26 = vld [vmem:[%s26097_s2 + $0x934] ss:$24 sps:$4 sm:$0xff]  }
 0x11e   : > { %6657 = vmatmul.mubr.bf16.gmra.mrb[48].mxu0 %v20882_v29 }
 0x11f   : > { %8041 = vmatmul.mubr.bf16.gmra.mrb[48].mxu1 %v20882_v29  ;;  %6666 = vmatprep.mubr.bf16.mxu0 %v20884_v36  ;;  %v18477_v29 = vld [vmem:[%s26097_s2 + $0x96c] ss:$24 sps:$4 sm:$0xff]  }
 0x120   : > { %8050 = vmatprep.mubr.bf16.mxu1 %v20884_v36  ;;  %v20910_v36 = vcombine.high %v353_v62, %v361_v21 }
 0x122   : > { %26368 = vst [vmem:[#allocation12_spill] sm:$0xff] %v20910_v36 }
 0x126   : > { %6667 = vmatmul.mubr.bf16.gmra.mrb[52].mxu0 %v20892_v49 }
 0x127   : > { %8051 = vmatmul.mubr.bf16.gmra.mrb[52].mxu1 %v20892_v49  ;;  %6709 = vmatprep.mubr.bf16.mxu0 %v20894_v61  ;;  %v18490_v49 = vld [vmem:[%s26097_s2 + $0x900] ss:$24 sps:$4 sm:$0xff]  }
 0x128   : > { %8093 = vmatprep.mubr.bf16.mxu1 %v20894_v61  ;;  %v18472_v61 = vld [vmem:[%s26097_s2 + $0x938] ss:$24 sps:$4 sm:$0xff]  }
 0x12e   : > { %6710 = vmatmul.mubr.bf16.vlgmr.msra.gmra.mrb[0].mxu0 %v20905_v27 }
 0x12f   : > { %8094 = vmatmul.mubr.bf16.vlgmr.msra.gmra.mrb[0].mxu1 %v20905_v27  ;;  %6719 = vmatprep.mubr.bf16.mxu0 %v20910_v36  ;;  %v20933_v27 = vcombine.low %v353_v62, %v361_v21  ;;  %v393_v62 = vld [vmem:[%s20162_s20 + $0x1d0] sm:$0xff] }
 0x130   : > { %8235 = vmatpush1.bf16.msra.mxu1 %v18469_v23  ;;  %8103 = vmatprep.mubr.bf16.mxu1 %v20910_v36  ;;  %v18501_v23 = vld [vmem:[%s26097_s2 + $0x964] ss:$24 sps:$4 sm:$0xff]   ;;  %v18504_v21 = vld [vmem:[%s26097_s2 + $0x994] ss:$24 sps:$4 sm:$0xff]  }
 0x131   : > { %8236 = vmatprep.subr.bf16.mxu1 %v18474_v28  ;;  %6851 = vmatpush1.bf16.msra.mxu0 %v18490_v49  ;;  %26369 = vst [vmem:[#allocation13_spill] sm:$0xff] %v20933_v27  ;;  %v18480_v36 = vld [vmem:[%s26097_s2 + $0x99c] ss:$24 sps:$4 sm:$0xff]   ;;  %v18499_v49 = vld [vmem:[%s26097_s2 + $0x960] ss:$24 sps:$4 sm:$0xff]   ;;  %v20967_v28 = vcombine.low %v369_v45, %v377_v46 }
 0x132   : > { %6852 = vmatprep.subr.bf16.mxu0 %v18495_v26  ;;  %v385_v26 = vld [vmem:[%s20162_s20 + $0x190] sm:$0xff] }
 0x133   : > { %26371 = vst [vmem:[#allocation15_spill] sm:$0xff] %v20967_v28  ;;  %v20975_v57 = vcombine.high %v385_v26, %v393_v62  ;;  %v401_v45 = vld [vmem:[%s20162_s20 + $0x210] sm:$0xff] }
 0x134   : > { %8237 = vmatpush1.bf16.msra.mxu1 %v18472_v61  ;;  %v18478_v61 = vld [vmem:[%s26097_s2 + $0x998] ss:$24 sps:$4 sm:$0xff]  }
 0x135   : > { %8238 = vmatprep.subr.bf16.mxu1 %v18477_v29  ;;  %6853 = vmatpush1.bf16.msra.mxu0 %v18493_v25  ;;  %v18483_v25 = vld [vmem:[%s26097_s2 + $0x9cc] ss:$24 sps:$4 sm:$0xff]   ;;  %v18502_v29 = vld [vmem:[%s26097_s2 + $0x990] ss:$24 sps:$4 sm:$0xff]   ;;  %26372 = vst [vmem:[#allocation16_spill] sm:$0xff] %v20975_v57 }
 0x136   : > { %6720 = vmatmul.mubr.bf16.gmra.mrb[4].mxu0 %v20933_v27  ;;  %6854 = vmatprep.subr.bf16.mxu0 %v18501_v23  ;;  %v409_v46 = vld [vmem:[%s20162_s20 + $0x250] sm:$0xff] }
 0x137   : > { %8104 = vmatmul.mubr.bf16.gmra.mrb[4].mxu1 %v20933_v27  ;;  %6729 = vmatprep.mubr.bf16.mxu0 %v20941_v8  ;;  %v18510_v27 = vld [vmem:[%s26097_s2 + $0x9c4] ss:$24 sps:$4 sm:$0xff]   ;;  %v18484_v23 = vld [vmem:[%s26097_s2 + $0x9f8] ss:$24 sps:$4 sm:$0xff]  }
 0x138   : > { %8113 = vmatprep.mubr.bf16.mxu1 %v20941_v8  ;;  %8239 = vmatpush1.bf16.msra.mxu1 %v18475_v13  ;;  %v18481_v8 = vld [vmem:[%s26097_s2 + $0x9c8] ss:$24 sps:$4 sm:$0xff]   ;;  %v18486_v13 = vld [vmem:[%s26097_s2 + $0x9fc] ss:$24 sps:$4 sm:$0xff]  }
 0x139   : > { %8240 = vmatprep.subr.bf16.mxu1 %v18480_v36  ;;  %6855 = vmatpush1.bf16.msra.mxu0 %v18499_v49  ;;  %v18508_v36 = vld [vmem:[%s26097_s2 + $0x9c0] ss:$24 sps:$4 sm:$0xff]   ;;  %v18513_v49 = vld [vmem:[%s26097_s2 + $0x9f4] ss:$24 sps:$4 sm:$0xff]  }
 0x13a   : > { %6856 = vmatprep.subr.bf16.mxu0 %v18504_v21  ;;  %v18511_v21 = vld [vmem:[%s26097_s2 + $0x9f0] ss:$24 sps:$4 sm:$0xff]  }
 0x13c   : > { %8241 = vmatpush1.bf16.msra.mxu1 %v18478_v61  ;;  %v18489_v61 = vld [vmem:[%s26097_s2 + $0xa2c] ss:$24 sps:$4 sm:$0xff]  }
 0x13d   : > { %8242 = vmatprep.subr.bf16.mxu1 %v18483_v25  ;;  %6857 = vmatpush1.bf16.msra.mxu0 %v18502_v29  ;;  %v21001_v25 = vcombine.low %v385_v26, %v393_v62  ;;  %v18487_v29 = vld [vmem:[%s26097_s2 + $0xa28] ss:$24 sps:$4 sm:$0xff]   ;;  %v417_v26 = vld [vmem:[%s20162_s20 + $0x290] sm:$0xff] }
 0x13e   : > { %6730 = vmatmul.mubr.bf16.gmra.mrb[8].mxu0 %v20967_v28  ;;  %6858 = vmatprep.subr.bf16.mxu0 %v18510_v27  ;;  %v18517_v27 = vld [vmem:[%s26097_s2 + $0xa20] ss:$24 sps:$4 sm:$0xff]   ;;  %v425_v62 = vld [vmem:[%s20162_s20 + $0x2d0] sm:$0xff] }
 0x13f   : > { %8114 = vmatmul.mubr.bf16.gmra.mrb[8].mxu1 %v20967_v28  ;;  %6739 = vmatprep.mubr.bf16.mxu0 %v20975_v57  ;;  %26373 = vst [vmem:[#allocation17_spill] sm:$0xff] %v21001_v25  ;;  %v21009_v28 = vcombine.high %v401_v45, %v409_v46 }
 0x140   : > { %8123 = vmatprep.mubr.bf16.mxu1 %v20975_v57  ;;  %8243 = vmatpush1.bf16.msra.mxu1 %v18481_v8  ;;  %v18519_v57 = vld [vmem:[%s26097_s2 + $0xa24] ss:$24 sps:$4 sm:$0xff]  }
 0x141   : > { %8244 = vmatprep.subr.bf16.mxu1 %v18486_v13  ;;  %6859 = vmatpush1.bf16.msra.mxu0 %v18508_v36  ;;  %26374 = vst [vmem:[#allocation18_spill] sm:$0xff] %v21009_v28  ;;  %v18498_v8 = vld [vmem:[%s26097_s2 + $0xa5c] ss:$24 sps:$4 sm:$0xff]   ;;  %v18496_v36 = vld [vmem:[%s26097_s2 + $0xa58] ss:$24 sps:$4 sm:$0xff]  }
 0x142   : > { %6860 = vmatprep.subr.bf16.mxu0 %v18513_v49  ;;  %v18525_v13 = vld [vmem:[%s26097_s2 + $0xa54] ss:$24 sps:$4 sm:$0xff]   ;;  %v18523_v49 = vld [vmem:[%s26097_s2 + $0xa50] ss:$24 sps:$4 sm:$0xff]  }
 0x144   : > { %8245 = vmatpush1.bf16.msra.mxu1 %v18484_v23  ;;  %v18507_v23 = vld [vmem:[%s26097_s2 + $0xa8c] ss:$24 sps:$4 sm:$0xff]  }
 0x145   : > { %8246 = vmatprep.subr.bf16.mxu1 %v18489_v61  ;;  %6861 = vmatpush1.bf16.msra.mxu0 %v18511_v21  ;;  %v21035_v61 = vcombine.low %v401_v45, %v409_v46  ;;  %v18505_v21 = vld [vmem:[%s26097_s2 + $0xa88] ss:$24 sps:$4 sm:$0xff]   ;;  %v433_v46 = vld [vmem:[%s20162_s20 + $0x310] sm:$0xff] }
 0x146   : > { %6740 = vmatmul.mubr.bf16.gmra.mrb[12].mxu0 %v21001_v25  ;;  %6862 = vmatprep.subr.bf16.mxu0 %v18519_v57  ;;  %v18528_v57 = vld [vmem:[%s26097_s2 + $0xa84] ss:$24 sps:$4 sm:$0xff]   ;;  %v18526_v45 = vld [vmem:[%s26097_s2 + $0xa80] ss:$24 sps:$4 sm:$0xff]  }
 0x147   : > { %8124 = vmatmul.mubr.bf16.gmra.mrb[12].mxu1 %v21001_v25  ;;  %6749 = vmatprep.mubr.bf16.mxu0 %v21009_v28  ;;  %26375 = vst [vmem:[#allocation19_spill] sm:$0xff] %v21035_v61  ;;  %v18516_v25 = vld [vmem:[%s26097_s2 + $0xabc] ss:$24 sps:$4 sm:$0xff]  }
 0x148   : > { %8133 = vmatprep.mubr.bf16.mxu1 %v21009_v28  ;;  %8247 = vmatpush1.bf16.msra.mxu1 %v18487_v29  ;;  %v21040_v28 = vcombine.high %v417_v26, %v425_v62  ;;  %v441_v29 = vld [vmem:[%s20162_s20 + $0x350] sm:$0xff] }
 0x149   : > { %8248 = vmatprep.subr.bf16.mxu1 %v18498_v8  ;;  %6863 = vmatpush1.bf16.msra.mxu0 %v18517_v27  ;;  %v18534_v8 = vld [vmem:[%s26097_s2 + $0xab4] ss:$24 sps:$4 sm:$0xff]   ;;  %v18514_v27 = vld [vmem:[%s26097_s2 + $0xab8] ss:$24 sps:$4 sm:$0xff]  }
 0x14a   : > { %6864 = vmatprep.subr.bf16.mxu0 %v18525_v13  ;;  %26376 = vst [vmem:[#allocation20_spill] sm:$0xff] %v21040_v28  ;;  %v18522_v13 = vld [vmem:[%s26097_s2 + $0xaec] ss:$24 sps:$4 sm:$0xff]  }
 0x14c   : > { %8249 = vmatpush1.bf16.msra.mxu1 %v18496_v36  ;;  %v18532_v36 = vld [vmem:[%s26097_s2 + $0xab0] ss:$24 sps:$4 sm:$0xff]  }
 0x14d   : > { %8250 = vmatprep.subr.bf16.mxu1 %v18507_v23  ;;  %6865 = vmatpush1.bf16.msra.mxu0 %v18523_v49  ;;  %v21069_v23 = vcombine.low %v417_v26, %v425_v62  ;;  %v18520_v49 = vld [vmem:[%s26097_s2 + $0xae8] ss:$24 sps:$4 sm:$0xff]   ;;  %v449_v26 = vld [vmem:[%s20162_s20 + $0x390] sm:$0xff] }
 0x14e   : > { %6750 = vmatmul.mubr.bf16.gmra.mrb[16].mxu0 %v21035_v61  ;;  %6866 = vmatprep.subr.bf16.mxu0 %v18528_v57  ;;  %v457_v62 = vld [vmem:[%s20162_s20 + $0x3d0] sm:$0xff] }
 0x14f   : > { %8134 = vmatmul.mubr.bf16.gmra.mrb[16].mxu1 %v21035_v61  ;;  %6759 = vmatprep.mubr.bf16.mxu0 %v21040_v28  ;;  %26377 = vst [vmem:[#allocation21_spill] sm:$0xff] %v21069_v23  ;;  %v18531_v61 = vld [vmem:[%s26097_s2 + $0xb1c] ss:$24 sps:$4 sm:$0xff]  }
 0x150   : > { %8143 = vmatprep.mubr.bf16.mxu1 %v21040_v28  ;;  %8251 = vmatpush1.bf16.msra.mxu1 %v18505_v21  ;;  %v21074_v28 = vcombine.high %v433_v46, %v441_v29  ;;  %v18537_v21 = vld [vmem:[%s26097_s2 + $0xae4] ss:$24 sps:$4 sm:$0xff]   ;;  %v18543_v57 = vld [vmem:[%s26097_s2 + $0xb14] ss:$24 sps:$4 sm:$0xff]  }
 0x151   : > { %8252 = vmatprep.subr.bf16.mxu1 %v18516_v25  ;;  %6867 = vmatpush1.bf16.msra.mxu0 %v18526_v45  ;;  %v18535_v25 = vld [vmem:[%s26097_s2 + $0xae0] ss:$24 sps:$4 sm:$0xff]  }
 0x152   : > { %6868 = vmatprep.subr.bf16.mxu0 %v18534_v8  ;;  %26378 = vst [vmem:[#allocation22_spill] sm:$0xff] %v21074_v28  ;;  %v18529_v45 = vld [vmem:[%s26097_s2 + $0xb18] ss:$24 sps:$4 sm:$0xff]   ;;  %v18540_v8 = vld [vmem:[%s26097_s2 + $0xb4c] ss:$24 sps:$4 sm:$0xff]  }
 0x154   : > { %8253 = vmatpush1.bf16.msra.mxu1 %v18514_v27  ;;  %v18541_v27 = vld [vmem:[%s26097_s2 + $0xb10] ss:$24 sps:$4 sm:$0xff]  }
 0x155   : > { %8254 = vmatprep.subr.bf16.mxu1 %v18522_v13  ;;  %6869 = vmatpush1.bf16.msra.mxu0 %v18532_v36  ;;  %v21103_v13 = vcombine.low %v433_v46, %v441_v29  ;;  %v18538_v36 = vld [vmem:[%s26097_s2 + $0xb48] ss:$24 sps:$4 sm:$0xff]   ;;  %v465_v46 = vld [vmem:[%s20162_s20 + $0x410] sm:$0xff] }
 0x156   : > { %6760 = vmatmul.mubr.bf16.gmra.mrb[20].mxu0 %v21069_v23  ;;  %6870 = vmatprep.subr.bf16.mxu0 %v18537_v21  ;;  %v473_v29 = vld [vmem:[%s20162_s20 + $0x450] sm:$0xff] }
 0x157   : > { %8144 = vmatmul.mubr.bf16.gmra.mrb[20].mxu1 %v21069_v23  ;;  %6769 = vmatprep.mubr.bf16.mxu0 %v21074_v28  ;;  %26379 = vst [vmem:[#allocation23_spill] sm:$0xff] %v21103_v13  ;;  %v21111_v23 = vcombine.high %v449_v26, %v457_v62  ;;  %v18552_v21 = vld [vmem:[%s26097_s2 + $0xb74] ss:$24 sps:$4 sm:$0xff]  }
 0x158   : > { %8153 = vmatprep.mubr.bf16.mxu1 %v21074_v28  ;;  %8255 = vmatpush1.bf16.msra.mxu1 %v18520_v49  ;;  %v18546_v28 = vld [vmem:[%s26097_s2 + $0xb44] ss:$24 sps:$4 sm:$0xff]   ;;  %v18544_v49 = vld [vmem:[%s26097_s2 + $0xb40] ss:$24 sps:$4 sm:$0xff]  }
 0x159   : > { %8256 = vmatprep.subr.bf16.mxu1 %v18531_v61  ;;  %6871 = vmatpush1.bf16.msra.mxu0 %v18535_v25  ;;  %26380 = vst [vmem:[#allocation24_spill] sm:$0xff] %v21111_v23  ;;  %v18549_v61 = vld [vmem:[%s26097_s2 + $0xb7c] ss:$24 sps:$4 sm:$0xff]   ;;  %v18547_v25 = vld [vmem:[%s26097_s2 + $0xb78] ss:$24 sps:$4 sm:$0xff]  }
 0x15a   : > { %6872 = vmatprep.subr.bf16.mxu0 %v18543_v57  ;;  %v18550_v57 = vld [vmem:[%s26097_s2 + $0xb70] ss:$24 sps:$4 sm:$0xff]  }
 0x15c   : > { %8257 = vmatpush1.bf16.msra.mxu1 %v18529_v45  ;;  %v18555_v45 = vld [vmem:[%s26097_s2 + $0xbac] ss:$24 sps:$4 sm:$0xff]  }
 0x15d   : > { %8258 = vmatprep.subr.bf16.mxu1 %v18540_v8  ;;  %6873 = vmatpush1.bf16.msra.mxu0 %v18541_v27  ;;  %v21137_v8 = vcombine.low %v449_v26, %v457_v62  ;;  %v18553_v27 = vld [vmem:[%s26097_s2 + $0xba8] ss:$24 sps:$4 sm:$0xff]   ;;  %v18564_v26 = vld [vmem:[%s26097_s2 + $0xbdc] ss:$24 sps:$4 sm:$0xff]  }
 0x15e   : > { %6770 = vmatmul.mubr.bf16.gmra.mrb[24].mxu0 %v21103_v13  ;;  %6874 = vmatprep.subr.bf16.mxu0 %v18546_v28  ;;  %v18556_v28 = vld [vmem:[%s26097_s2 + $0xba0] ss:$24 sps:$4 sm:$0xff]   ;;  %v481_v62 = vld [vmem:[%s20162_s20 + $0x490] sm:$0xff] }
 0x15f   : > { %8154 = vmatmul.mubr.bf16.gmra.mrb[24].mxu1 %v21103_v13  ;;  %6779 = vmatprep.mubr.bf16.mxu0 %v21111_v23  ;;  %26381 = vst [vmem:[#allocation25_spill] sm:$0xff] %v21137_v8  ;;  %v21145_v13 = vcombine.high %v465_v46, %v473_v29 }
 0x160   : > { %8163 = vmatprep.mubr.bf16.mxu1 %v21111_v23  ;;  %8259 = vmatpush1.bf16.msra.mxu1 %v18538_v36  ;;  %v18558_v23 = vld [vmem:[%s26097_s2 + $0xba4] ss:$24 sps:$4 sm:$0xff]   ;;  %v489_v36 = vld [vmem:[%s20162_s20 + $0x4d0] sm:$0xff] }
 0x161   : > { %8260 = vmatprep.subr.bf16.mxu1 %v18549_v61  ;;  %6875 = vmatpush1.bf16.msra.mxu0 %v18544_v49  ;;  %26382 = vst [vmem:[#allocation26_spill] sm:$0xff] %v21145_v13  ;;  %v18561_v49 = vld [vmem:[%s26097_s2 + $0xbd4] ss:$24 sps:$4 sm:$0xff]   ;;  %v18559_v61 = vld [vmem:[%s26097_s2 + $0xbd0] ss:$24 sps:$4 sm:$0xff]  }
 0x162   : > { %6876 = vmatprep.subr.bf16.mxu0 %v18552_v21  ;;  %v18562_v21 = vld [vmem:[%s26097_s2 + $0xbd8] ss:$24 sps:$4 sm:$0xff]  }
 0x164   : > { %8261 = vmatpush1.bf16.msra.mxu1 %v18547_v25  ;;  %v18567_v25 = vld [vmem:[%s26097_s2 + $0xc0c] ss:$24 sps:$4 sm:$0xff]  }
 0x165   : > { %6877 = vmatpush1.bf16.msra.mxu0 %v18550_v57  ;;  %8262 = vmatprep.subr.bf16.mxu1 %v18555_v45  ;;  %v21171_v57 = vcombine.low %v465_v46, %v473_v29  ;;  %v21173_v45 = vcombine.high %v481_v62, %v489_v36  ;;  %v505_v46 = vld [vmem:[%s20162_s20 + $0x550] sm:$0xff]  ;;  %v21184_v29 = vcombine.low %v481_v62, %v489_v36 }
 0x166   : > { %6780 = vmatmul.mubr.bf16.gmra.mrb[28].mxu0 %v21137_v8  ;;  %6878 = vmatprep.subr.bf16.mxu0 %v18558_v23  ;;  %v497_v23 = vld [vmem:[%s20162_s20 + $0x510] sm:$0xff] }
 0x167   : > { %8164 = vmatmul.mubr.bf16.gmra.mrb[28].mxu1 %v21137_v8  ;;  %6789 = vmatprep.mubr.bf16.mxu0 %v21145_v13  ;;  %26383 = vst [vmem:[#allocation27_spill] sm:$0xff] %v21171_v57  ;;  %26384 = vst [vmem:[#allocation28_spill] sm:$0xff] %v21173_v45  ;;  %v529_v62 = vld [vmem:[%s20162_s20 + $0x610] sm:$0xff] }
 0x168   : > { %8173 = vmatprep.mubr.bf16.mxu1 %v21145_v13  ;;  %8263 = vmatpush1.bf16.msra.mxu1 %v18553_v27  ;;  %v18588_v13 = vld [vmem:[%s26097_s2 + $0xc04] ss:$24 sps:$4 sm:$0xff]   ;;  %26385 = vst [vmem:[#allocation29_spill] sm:$0xff] %v21184_v29  ;;  %v21186_v27 = vcombine.high %v497_v23, %v505_v46  ;;  %v537_v36 = vld [vmem:[%s20162_s20 + $0x650] sm:$0xff] }
 0x169   : > { %6879 = vmatpush1.bf16.msra.mxu0 %v18556_v28  ;;  %8264 = vmatprep.subr.bf16.mxu1 %v18564_v26  ;;  %v513_v28 = vld [vmem:[%s20162_s20 + $0x590] sm:$0xff] }
 0x16a   : > { %6880 = vmatprep.subr.bf16.mxu0 %v18561_v49  ;;  %26386 = vst [vmem:[#allocation30_spill] sm:$0xff] %v21186_v27  ;;  %v521_v26 = vld [vmem:[%s20162_s20 + $0x5d0] sm:$0xff]  ;;  %v21194_v49 = vcombine.low %v497_v23, %v505_v46  ;;  %v21214_v46 = vcombine.low %v529_v62, %v537_v36 }
 0x16b   : > { %v553_v23 = vld [vmem:[%s20162_s20 + $0x6d0] sm:$0xff] }
 0x16c   : > { %8265 = vmatpush1.bf16.msra.mxu1 %v18562_v21  ;;  %26387 = vst [vmem:[#allocation31_spill] sm:$0xff] %v21194_v49  ;;  %v21206_v21 = vcombine.high %v529_v62, %v537_v36  ;;  %26391 = vst [vmem:[#allocation35_spill] sm:$0xff] %v21214_v46  ;;  %v354_v62 = vld [vmem:[%s20162_s20 + $0x98] sm:$0xff] }
 0x16d   : > { %6881 = vmatpush1.bf16.msra.mxu0 %v18559_v61  ;;  %8407 = vmatprep.subr.bf16.mxu1 %v18567_v25  ;;  %v21204_v61 = vcombine.low %v513_v28, %v521_v26  ;;  %v545_v25 = vld [vmem:[%s20162_s20 + $0x690] sm:$0xff]  ;;  %v362_v36 = vld [vmem:[%s20162_s20 + $0xd8] sm:$0xff] }
 0x16e   : > { %6790 = vmatmul.mubr.bf16.gmra.mrb[32].mxu0 %v21171_v57  ;;  %7023 = vmatprep.subr.bf16.mxu0 %v18588_v13  ;;  %v21196_v13 = vcombine.high %v513_v28, %v521_v26  ;;  %26390 = vst [vmem:[#allocation34_spill] sm:$0xff] %v21206_v21  ;;  %v338_v28 = vld [vmem:[%s20162_s20 + $0x18] sm:$0xff] }
 0x16f   : > { %8174 = vmatmul.mubr.bf16.gmra.mrb[32].mxu1 %v21171_v57  ;;  %6799 = vmatprep.mubr.bf16.mxu0 %v21173_v45  ;;  %26389 = vst [vmem:[#allocation33_spill] sm:$0xff] %v21204_v61  ;;  %v346_v26 = vld [vmem:[%s20162_s20 + $0x58] sm:$0xff] }
 0x170   : > { %8183 = vmatprep.mubr.bf16.mxu1 %v21173_v45  ;;  %26388 = vst [vmem:[#allocation32_spill] sm:$0xff] %v21196_v13  ;;  %v18571_v45 = vld [vmem:[%s26097_s2 + $0xc68] ss:$24 sps:$4 sm:$0xff]  }
 0x176   : > { %6800 = vmatmul.mubr.bf16.gmra.mrb[36].mxu0 %v21184_v29 }
 0x177   : > { %8184 = vmatmul.mubr.bf16.gmra.mrb[36].mxu1 %v21184_v29  ;;  %6809 = vmatprep.mubr.bf16.mxu0 %v21186_v27  ;;  %v18589_v29 = vld [vmem:[%s26097_s2 + $0xc30] ss:$24 sps:$4 sm:$0xff]  }
 0x178   : > { %8193 = vmatprep.mubr.bf16.mxu1 %v21186_v27  ;;  %v18591_v27 = vld [vmem:[%s26097_s2 + $0xc34] ss:$24 sps:$4 sm:$0xff]  }
 0x17e   : > { %6810 = vmatmul.mubr.bf16.gmra.mrb[40].mxu0 %v21194_v49 }
 0x17f   : > { %8194 = vmatmul.mubr.bf16.gmra.mrb[40].mxu1 %v21194_v49  ;;  %6819 = vmatprep.mubr.bf16.mxu0 %v21196_v13  ;;  %v18573_v49 = vld [vmem:[%s26097_s2 + $0xc6c] ss:$24 sps:$4 sm:$0xff]  }
 0x180   : > { %8203 = vmatprep.mubr.bf16.mxu1 %v21196_v13  ;;  %v21216_v13 = vcombine.high %v545_v25, %v553_v23 }
 0x182   : > { %26392 = vst [vmem:[#allocation36_spill] sm:$0xff] %v21216_v13 }
 0x186   : > { %6820 = vmatmul.mubr.bf16.gmra.mrb[44].mxu0 %v21204_v61 }
 0x187   : > { %8204 = vmatmul.mubr.bf16.gmra.mrb[44].mxu1 %v21204_v61  ;;  %6829 = vmatprep.mubr.bf16.mxu0 %v21206_v21  ;;  %v21224_v61 = vcombine.low %v545_v25, %v553_v23  ;;  %v21237_v25 = vcombine.low %v338_v28, %v346_v26  ;;  %v18570_v23 = vld [vmem:[%s26097_s2 + $0xc3c] ss:$24 sps:$4 sm:$0xff]  }
 0x188   : > { %8213 = vmatprep.mubr.bf16.mxu1 %v21206_v21  ;;  %v21226_v21 = vcombine.high %v338_v28, %v346_v26  ;;  %v370_v28 = vld [vmem:[%s20162_s20 + $0x118] sm:$0xff] }
 0x189   : > { %26393 = vst [vmem:[#allocation37_spill] sm:$0xff] %v21224_v61  ;;  %26395 = vst [vmem:[#allocation39_spill] sm:$0xff] %v21237_v25  ;;  %v378_v26 = vld [vmem:[%s20162_s20 + $0x158] sm:$0xff] }
 0x18a   : > { %26394 = vst [vmem:[#allocation38_spill] sm:$0xff] %v21226_v21  ;;  %v21273_v57 = vcombine.high %v370_v28, %v378_v26 }
 0x18c   : > { %26398 = vst [vmem:[#allocation42_spill] sm:$0xff] %v21273_v57 }
 0x18e   : > { %6830 = vmatmul.mubr.bf16.gmra.mrb[48].mxu0 %v21214_v46 }
 0x18f   : > { %8214 = vmatmul.mubr.bf16.gmra.mrb[48].mxu1 %v21214_v46  ;;  %6839 = vmatprep.mubr.bf16.mxu0 %v21216_v13  ;;  %v21242_v46 = vcombine.high %v354_v62, %v362_v36 }
 0x190   : > { %8223 = vmatprep.mubr.bf16.mxu1 %v21216_v13  ;;  %v18565_v13 = vld [vmem:[%s26097_s2 + $0xc08] ss:$24 sps:$4 sm:$0xff]  }
 0x191   : > { %26396 = vst [vmem:[#allocation40_spill] sm:$0xff] %v21242_v46 }
 0x196   : > { %6840 = vmatmul.mubr.bf16.gmra.mrb[52].mxu0 %v21224_v61 }
 0x197   : > { %8224 = vmatmul.mubr.bf16.gmra.mrb[52].mxu1 %v21224_v61  ;;  %6882 = vmatprep.mubr.bf16.mxu0 %v21226_v21  ;;  %v18586_v61 = vld [vmem:[%s26097_s2 + $0xc00] ss:$24 sps:$4 sm:$0xff]  }
 0x198   : > { %8266 = vmatprep.mubr.bf16.mxu1 %v21226_v21  ;;  %v18568_v21 = vld [vmem:[%s26097_s2 + $0xc38] ss:$24 sps:$4 sm:$0xff]  }
 0x19e   : > { %6883 = vmatmul.mubr.bf16.vlgmr.msra.gmra.mrb[0].mxu0 %v21237_v25 }
 0x19f   : > { %8267 = vmatmul.mubr.bf16.vlgmr.msra.gmra.mrb[0].mxu1 %v21237_v25  ;;  %6892 = vmatprep.mubr.bf16.mxu0 %v21242_v46  ;;  %v21265_v25 = vcombine.low %v354_v62, %v362_v36  ;;  %v394_v62 = vld [vmem:[%s20162_s20 + $0x1d8] sm:$0xff]  ;;  %v18600_v36 = vld [vmem:[%s26097_s2 + $0xc94] ss:$24 sps:$4 sm:$0xff]  }
 0x1a0   : > { %8408 = vmatpush1.bf16.msra.mxu1 %v18565_v13  ;;  %8276 = vmatprep.mubr.bf16.mxu1 %v21242_v46  ;;  %v18597_v13 = vld [vmem:[%s26097_s2 + $0xc64] ss:$24 sps:$4 sm:$0xff]  }
 0x1a1   : > { %8409 = vmatprep.subr.bf16.mxu1 %v18570_v23  ;;  %7024 = vmatpush1.bf16.msra.mxu0 %v18586_v61  ;;  %26397 = vst [vmem:[#allocation41_spill] sm:$0xff] %v21265_v25  ;;  %v18576_v46 = vld [vmem:[%s26097_s2 + $0xc9c] ss:$24 sps:$4 sm:$0xff]   ;;  %v18595_v61 = vld [vmem:[%s26097_s2 + $0xc60] ss:$24 sps:$4 sm:$0xff]   ;;  %v21299_v23 = vcombine.low %v370_v28, %v378_v26 }
 0x1a2   : > { %7025 = vmatprep.subr.bf16.mxu0 %v18591_v27  ;;  %v386_v27 = vld [vmem:[%s20162_s20 + $0x198] sm:$0xff] }
 0x1a3   : > { %26399 = vst [vmem:[#allocation43_spill] sm:$0xff] %v21299_v23  ;;  %v21307_v8 = vcombine.high %v386_v27, %v394_v62  ;;  %v402_v28 = vld [vmem:[%s20162_s20 + $0x218] sm:$0xff] }
 0x1a4   : > { %8410 = vmatpush1.bf16.msra.mxu1 %v18568_v21  ;;  %v18574_v21 = vld [vmem:[%s26097_s2 + $0xc98] ss:$24 sps:$4 sm:$0xff]  }
 0x1a5   : > { %8411 = vmatprep.subr.bf16.mxu1 %v18573_v49  ;;  %7026 = vmatpush1.bf16.msra.mxu0 %v18589_v29  ;;  %v18579_v29 = vld [vmem:[%s26097_s2 + $0xccc] ss:$24 sps:$4 sm:$0xff]   ;;  %v18598_v49 = vld [vmem:[%s26097_s2 + $0xc90] ss:$24 sps:$4 sm:$0xff]   ;;  %26400 = vst [vmem:[#allocation44_spill] sm:$0xff] %v21307_v8  ;;  %v410_v26 = vld [vmem:[%s20162_s20 + $0x258] sm:$0xff] }
 0x1a6   : > { %6893 = vmatmul.mubr.bf16.gmra.mrb[4].mxu0 %v21265_v25  ;;  %7027 = vmatprep.subr.bf16.mxu0 %v18597_v13  ;;  %v18580_v13 = vld [vmem:[%s26097_s2 + $0xcf8] ss:$24 sps:$4 sm:$0xff]  }
 0x1a7   : > { %8277 = vmatmul.mubr.bf16.gmra.mrb[4].mxu1 %v21265_v25  ;;  %6902 = vmatprep.mubr.bf16.mxu0 %v21273_v57  ;;  %v18606_v25 = vld [vmem:[%s26097_s2 + $0xcc4] ss:$24 sps:$4 sm:$0xff]  }
 0x1a8   : > { %8286 = vmatprep.mubr.bf16.mxu1 %v21273_v57  ;;  %8412 = vmatpush1.bf16.msra.mxu1 %v18571_v45  ;;  %v18577_v57 = vld [vmem:[%s26097_s2 + $0xcc8] ss:$24 sps:$4 sm:$0xff]   ;;  %v18582_v45 = vld [vmem:[%s26097_s2 + $0xcfc] ss:$24 sps:$4 sm:$0xff]  }
 0x1a9   : > { %8413 = vmatprep.subr.bf16.mxu1 %v18576_v46  ;;  %7028 = vmatpush1.bf16.msra.mxu0 %v18595_v61  ;;  %v18604_v46 = vld [vmem:[%s26097_s2 + $0xcc0] ss:$24 sps:$4 sm:$0xff]   ;;  %v18609_v61 = vld [vmem:[%s26097_s2 + $0xcf4] ss:$24 sps:$4 sm:$0xff]  }
 0x1aa   : > { %7029 = vmatprep.subr.bf16.mxu0 %v18600_v36  ;;  %v18607_v36 = vld [vmem:[%s26097_s2 + $0xcf0] ss:$24 sps:$4 sm:$0xff]  }
 0x1ac   : > { %8414 = vmatpush1.bf16.msra.mxu1 %v18574_v21  ;;  %v18585_v21 = vld [vmem:[%s26097_s2 + $0xd2c] ss:$24 sps:$4 sm:$0xff]  }
 0x1ad   : > { %8415 = vmatprep.subr.bf16.mxu1 %v18579_v29  ;;  %7030 = vmatpush1.bf16.msra.mxu0 %v18598_v49  ;;  %v21333_v29 = vcombine.low %v386_v27, %v394_v62  ;;  %v18583_v49 = vld [vmem:[%s26097_s2 + $0xd28] ss:$24 sps:$4 sm:$0xff]   ;;  %v418_v27 = vld [vmem:[%s20162_s20 + $0x298] sm:$0xff] }
 0x1ae   : > { %6903 = vmatmul.mubr.bf16.gmra.mrb[8].mxu0 %v21299_v23  ;;  %7031 = vmatprep.subr.bf16.mxu0 %v18606_v25  ;;  %v18613_v25 = vld [vmem:[%s26097_s2 + $0xd20] ss:$24 sps:$4 sm:$0xff]  }
 0x1af   : > { %8287 = vmatmul.mubr.bf16.gmra.mrb[8].mxu1 %v21299_v23  ;;  %6912 = vmatprep.mubr.bf16.mxu0 %v21307_v8  ;;  %26401 = vst [vmem:[#allocation45_spill] sm:$0xff] %v21333_v29  ;;  %v21341_v23 = vcombine.high %v402_v28, %v410_v26  ;;  %v426_v62 = vld [vmem:[%s20162_s20 + $0x2d8] sm:$0xff] }
 0x1b0   : > { %8296 = vmatprep.mubr.bf16.mxu1 %v21307_v8  ;;  %8416 = vmatpush1.bf16.msra.mxu1 %v18577_v57  ;;  %v18615_v8 = vld [vmem:[%s26097_s2 + $0xd24] ss:$24 sps:$4 sm:$0xff]  }
 0x1b1   : > { %8417 = vmatprep.subr.bf16.mxu1 %v18582_v45  ;;  %7032 = vmatpush1.bf16.msra.mxu0 %v18604_v46  ;;  %26402 = vst [vmem:[#allocation46_spill] sm:$0xff] %v21341_v23  ;;  %v18594_v57 = vld [vmem:[%s26097_s2 + $0xd5c] ss:$24 sps:$4 sm:$0xff]   ;;  %v18592_v46 = vld [vmem:[%s26097_s2 + $0xd58] ss:$24 sps:$4 sm:$0xff]  }
 0x1b2   : > { %7033 = vmatprep.subr.bf16.mxu0 %v18609_v61  ;;  %v18621_v45 = vld [vmem:[%s26097_s2 + $0xd54] ss:$24 sps:$4 sm:$0xff]   ;;  %v18619_v61 = vld [vmem:[%s26097_s2 + $0xd50] ss:$24 sps:$4 sm:$0xff]  }
 0x1b4   : > { %8418 = vmatpush1.bf16.msra.mxu1 %v18580_v13  ;;  %v18603_v13 = vld [vmem:[%s26097_s2 + $0xd8c] ss:$24 sps:$4 sm:$0xff]  }
 0x1b5   : > { %8419 = vmatprep.subr.bf16.mxu1 %v18585_v21  ;;  %7034 = vmatpush1.bf16.msra.mxu0 %v18607_v36  ;;  %v21367_v21 = vcombine.low %v402_v28, %v410_v26  ;;  %v18601_v36 = vld [vmem:[%s26097_s2 + $0xd88] ss:$24 sps:$4 sm:$0xff]   ;;  %v434_v26 = vld [vmem:[%s20162_s20 + $0x318] sm:$0xff] }
 0x1b6   : > { %6913 = vmatmul.mubr.bf16.gmra.mrb[12].mxu0 %v21333_v29  ;;  %7035 = vmatprep.subr.bf16.mxu0 %v18615_v8  ;;  %v18624_v8 = vld [vmem:[%s26097_s2 + $0xd84] ss:$24 sps:$4 sm:$0xff]   ;;  %v18622_v28 = vld [vmem:[%s26097_s2 + $0xd80] ss:$24 sps:$4 sm:$0xff]  }
 0x1b7   : > { %8297 = vmatmul.mubr.bf16.gmra.mrb[12].mxu1 %v21333_v29  ;;  %6922 = vmatprep.mubr.bf16.mxu0 %v21341_v23  ;;  %26403 = vst [vmem:[#allocation47_spill] sm:$0xff] %v21367_v21  ;;  %v18612_v29 = vld [vmem:[%s26097_s2 + $0xdbc] ss:$24 sps:$4 sm:$0xff]  }
 0x1b8   : > { %8306 = vmatprep.mubr.bf16.mxu1 %v21341_v23  ;;  %8420 = vmatpush1.bf16.msra.mxu1 %v18583_v49  ;;  %v21372_v23 = vcombine.high %v418_v27, %v426_v62  ;;  %v442_v49 = vld [vmem:[%s20162_s20 + $0x358] sm:$0xff] }
 0x1b9   : > { %8421 = vmatprep.subr.bf16.mxu1 %v18594_v57  ;;  %7036 = vmatpush1.bf16.msra.mxu0 %v18613_v25  ;;  %v18630_v57 = vld [vmem:[%s26097_s2 + $0xdb4] ss:$24 sps:$4 sm:$0xff]   ;;  %v18610_v25 = vld [vmem:[%s26097_s2 + $0xdb8] ss:$24 sps:$4 sm:$0xff]  }
 0x1ba   : > { %7037 = vmatprep.subr.bf16.mxu0 %v18621_v45  ;;  %26404 = vst [vmem:[#allocation48_spill] sm:$0xff] %v21372_v23  ;;  %v18618_v45 = vld [vmem:[%s26097_s2 + $0xdec] ss:$24 sps:$4 sm:$0xff]  }
 0x1bc   : > { %8422 = vmatpush1.bf16.msra.mxu1 %v18592_v46  ;;  %v18628_v46 = vld [vmem:[%s26097_s2 + $0xdb0] ss:$24 sps:$4 sm:$0xff]  }
 0x1bd   : > { %8423 = vmatprep.subr.bf16.mxu1 %v18603_v13  ;;  %7038 = vmatpush1.bf16.msra.mxu0 %v18619_v61  ;;  %v21401_v13 = vcombine.low %v418_v27, %v426_v62  ;;  %v18616_v61 = vld [vmem:[%s26097_s2 + $0xde8] ss:$24 sps:$4 sm:$0xff]   ;;  %v450_v27 = vld [vmem:[%s20162_s20 + $0x398] sm:$0xff] }
 0x1be   : > { %6923 = vmatmul.mubr.bf16.gmra.mrb[16].mxu0 %v21367_v21  ;;  %7039 = vmatprep.subr.bf16.mxu0 %v18624_v8  ;;  %v458_v62 = vld [vmem:[%s20162_s20 + $0x3d8] sm:$0xff]  ;;  %v18639_v8 = vld [vmem:[%s26097_s2 + $0xe14] ss:$24 sps:$4 sm:$0xff]  }
 0x1bf   : > { %8307 = vmatmul.mubr.bf16.gmra.mrb[16].mxu1 %v21367_v21  ;;  %6932 = vmatprep.mubr.bf16.mxu0 %v21372_v23  ;;  %26405 = vst [vmem:[#allocation49_spill] sm:$0xff] %v21401_v13  ;;  %v18627_v21 = vld [vmem:[%s26097_s2 + $0xe1c] ss:$24 sps:$4 sm:$0xff]  }
 0x1c0   : > { %8316 = vmatprep.mubr.bf16.mxu1 %v21372_v23  ;;  %8424 = vmatpush1.bf16.msra.mxu1 %v18601_v36  ;;  %v21406_v23 = vcombine.high %v434_v26, %v442_v49  ;;  %v18633_v36 = vld [vmem:[%s26097_s2 + $0xde4] ss:$24 sps:$4 sm:$0xff]  }
 0x1c1   : > { %8425 = vmatprep.subr.bf16.mxu1 %v18612_v29  ;;  %7040 = vmatpush1.bf16.msra.mxu0 %v18622_v28  ;;  %v18631_v29 = vld [vmem:[%s26097_s2 + $0xde0] ss:$24 sps:$4 sm:$0xff]  }
 0x1c2   : > { %7041 = vmatprep.subr.bf16.mxu0 %v18630_v57  ;;  %26406 = vst [vmem:[#allocation50_spill] sm:$0xff] %v21406_v23  ;;  %v18625_v28 = vld [vmem:[%s26097_s2 + $0xe18] ss:$24 sps:$4 sm:$0xff]   ;;  %v18636_v57 = vld [vmem:[%s26097_s2 + $0xe4c] ss:$24 sps:$4 sm:$0xff]  }
 0x1c4   : > { %8426 = vmatpush1.bf16.msra.mxu1 %v18610_v25  ;;  %v18637_v25 = vld [vmem:[%s26097_s2 + $0xe10] ss:$24 sps:$4 sm:$0xff]  }
 0x1c5   : > { %8427 = vmatprep.subr.bf16.mxu1 %v18618_v45  ;;  %7042 = vmatpush1.bf16.msra.mxu0 %v18628_v46  ;;  %v21435_v45 = vcombine.low %v434_v26, %v442_v49  ;;  %v18634_v46 = vld [vmem:[%s26097_s2 + $0xe48] ss:$24 sps:$4 sm:$0xff]   ;;  %v466_v26 = vld [vmem:[%s20162_s20 + $0x418] sm:$0xff] }
 0x1c6   : > { %6933 = vmatmul.mubr.bf16.gmra.mrb[20].mxu0 %v21401_v13  ;;  %7043 = vmatprep.subr.bf16.mxu0 %v18633_v36  ;;  %v474_v49 = vld [vmem:[%s20162_s20 + $0x458] sm:$0xff]  ;;  %v18648_v36 = vld [vmem:[%s26097_s2 + $0xe74] ss:$24 sps:$4 sm:$0xff]  }
 0x1c7   : > { %8317 = vmatmul.mubr.bf16.gmra.mrb[20].mxu1 %v21401_v13  ;;  %6942 = vmatprep.mubr.bf16.mxu0 %v21406_v23  ;;  %26407 = vst [vmem:[#allocation51_spill] sm:$0xff] %v21435_v45  ;;  %v21443_v13 = vcombine.high %v450_v27, %v458_v62 }
 0x1c8   : > { %8326 = vmatprep.mubr.bf16.mxu1 %v21406_v23  ;;  %8428 = vmatpush1.bf16.msra.mxu1 %v18616_v61  ;;  %v18642_v23 = vld [vmem:[%s26097_s2 + $0xe44] ss:$24 sps:$4 sm:$0xff]   ;;  %v18640_v61 = vld [vmem:[%s26097_s2 + $0xe40] ss:$24 sps:$4 sm:$0xff]  }
 0x1c9   : > { %8429 = vmatprep.subr.bf16.mxu1 %v18627_v21  ;;  %7044 = vmatpush1.bf16.msra.mxu0 %v18631_v29  ;;  %26408 = vst [vmem:[#allocation52_spill] sm:$0xff] %v21443_v13  ;;  %v18645_v21 = vld [vmem:[%s26097_s2 + $0xe7c] ss:$24 sps:$4 sm:$0xff]   ;;  %v18643_v29 = vld [vmem:[%s26097_s2 + $0xe78] ss:$24 sps:$4 sm:$0xff]  }
 0x1ca   : > { %7045 = vmatprep.subr.bf16.mxu0 %v18639_v8  ;;  %v18646_v8 = vld [vmem:[%s26097_s2 + $0xe70] ss:$24 sps:$4 sm:$0xff]  }
 0x1cc   : > { %8430 = vmatpush1.bf16.msra.mxu1 %v18625_v28  ;;  %v18651_v28 = vld [vmem:[%s26097_s2 + $0xeac] ss:$24 sps:$4 sm:$0xff]  }
 0x1cd   : > { %8431 = vmatprep.subr.bf16.mxu1 %v18636_v57  ;;  %7046 = vmatpush1.bf16.msra.mxu0 %v18637_v25  ;;  %v21469_v57 = vcombine.low %v450_v27, %v458_v62  ;;  %v18649_v25 = vld [vmem:[%s26097_s2 + $0xea8] ss:$24 sps:$4 sm:$0xff]   ;;  %v18660_v27 = vld [vmem:[%s26097_s2 + $0xedc] ss:$24 sps:$4 sm:$0xff]  }
 0x1ce   : > { %6943 = vmatmul.mubr.bf16.gmra.mrb[24].mxu0 %v21435_v45  ;;  %7047 = vmatprep.subr.bf16.mxu0 %v18642_v23  ;;  %v18652_v23 = vld [vmem:[%s26097_s2 + $0xea0] ss:$24 sps:$4 sm:$0xff]  }
 0x1cf   : > { %8327 = vmatmul.mubr.bf16.gmra.mrb[24].mxu1 %v21435_v45  ;;  %6952 = vmatprep.mubr.bf16.mxu0 %v21443_v13  ;;  %26409 = vst [vmem:[#allocation53_spill] sm:$0xff] %v21469_v57  ;;  %v21477_v45 = vcombine.high %v466_v26, %v474_v49  ;;  %v482_v62 = vld [vmem:[%s20162_s20 + $0x498] sm:$0xff] }
 0x1d0   : > { %8336 = vmatprep.mubr.bf16.mxu1 %v21443_v13  ;;  %8432 = vmatpush1.bf16.msra.mxu1 %v18634_v46  ;;  %v18654_v13 = vld [vmem:[%s26097_s2 + $0xea4] ss:$24 sps:$4 sm:$0xff]  }
 0x1d1   : > { %8433 = vmatprep.subr.bf16.mxu1 %v18645_v21  ;;  %7048 = vmatpush1.bf16.msra.mxu0 %v18640_v61  ;;  %26410 = vst [vmem:[#allocation54_spill] sm:$0xff] %v21477_v45  ;;  %v490_v46 = vld [vmem:[%s20162_s20 + $0x4d8] sm:$0xff]  ;;  %v18657_v61 = vld [vmem:[%s26097_s2 + $0xed4] ss:$24 sps:$4 sm:$0xff]   ;;  %v18655_v21 = vld [vmem:[%s26097_s2 + $0xed0] ss:$24 sps:$4 sm:$0xff]  }
 0x1d2   : > { %7049 = vmatprep.subr.bf16.mxu0 %v18648_v36  ;;  %v18658_v36 = vld [vmem:[%s26097_s2 + $0xed8] ss:$24 sps:$4 sm:$0xff]  }
 0x1d4   : > { %8434 = vmatpush1.bf16.msra.mxu1 %v18643_v29  ;;  %v18663_v29 = vld [vmem:[%s26097_s2 + $0xf0c] ss:$24 sps:$4 sm:$0xff]  }
 0x1d5   : > { %7050 = vmatpush1.bf16.msra.mxu0 %v18646_v8  ;;  %8435 = vmatprep.subr.bf16.mxu1 %v18651_v28  ;;  %v21503_v8 = vcombine.low %v466_v26, %v474_v49  ;;  %v21505_v28 = vcombine.high %v482_v62, %v490_v46  ;;  %v506_v26 = vld [vmem:[%s20162_s20 + $0x558] sm:$0xff]  ;;  %v21516_v49 = vcombine.low %v482_v62, %v490_v46 }
 0x1d6   : > { %6953 = vmatmul.mubr.bf16.gmra.mrb[28].mxu0 %v21469_v57  ;;  %7051 = vmatprep.subr.bf16.mxu0 %v18654_v13  ;;  %v498_v13 = vld [vmem:[%s20162_s20 + $0x518] sm:$0xff] }
 0x1d7   : > { %8337 = vmatmul.mubr.bf16.gmra.mrb[28].mxu1 %v21469_v57  ;;  %6962 = vmatprep.mubr.bf16.mxu0 %v21477_v45  ;;  %26411 = vst [vmem:[#allocation55_spill] sm:$0xff] %v21503_v8  ;;  %26412 = vst [vmem:[#allocation56_spill] sm:$0xff] %v21505_v28  ;;  %v530_v62 = vld [vmem:[%s20162_s20 + $0x618] sm:$0xff] }
 0x1d8   : > { %8346 = vmatprep.mubr.bf16.mxu1 %v21477_v45  ;;  %8436 = vmatpush1.bf16.msra.mxu1 %v18649_v25  ;;  %v18684_v45 = vld [vmem:[%s26097_s2 + $0xf04] ss:$24 sps:$4 sm:$0xff]   ;;  %26413 = vst [vmem:[#allocation57_spill] sm:$0xff] %v21516_v49  ;;  %v21518_v25 = vcombine.high %v498_v13, %v506_v26 }
 0x1d9   : > { %7052 = vmatpush1.bf16.msra.mxu0 %v18652_v23  ;;  %8437 = vmatprep.subr.bf16.mxu1 %v18660_v27  ;;  %v514_v23 = vld [vmem:[%s20162_s20 + $0x598] sm:$0xff] }
 0x1da   : > { %7053 = vmatprep.subr.bf16.mxu0 %v18657_v61  ;;  %26414 = vst [vmem:[#allocation58_spill] sm:$0xff] %v21518_v25  ;;  %v522_v27 = vld [vmem:[%s20162_s20 + $0x5d8] sm:$0xff]  ;;  %v21526_v61 = vcombine.low %v498_v13, %v506_v26 }
 0x1db   : > { %v538_v46 = vld [vmem:[%s20162_s20 + $0x658] sm:$0xff] }
 0x1dc   : > { %8438 = vmatpush1.bf16.msra.mxu1 %v18658_v36  ;;  %26415 = vst [vmem:[#allocation59_spill] sm:$0xff] %v21526_v61  ;;  %v21538_v36 = vcombine.high %v530_v62, %v538_v46  ;;  %v554_v13 = vld [vmem:[%s20162_s20 + $0x6d8] sm:$0xff]  ;;  %v21546_v26 = vcombine.low %v530_v62, %v538_v46  ;;  %v355_v62 = vld [vmem:[%s20162_s20 + $0xa0] sm:$0xff] }
 0x1dd   : > { %7054 = vmatpush1.bf16.msra.mxu0 %v18655_v21  ;;  %8580 = vmatprep.subr.bf16.mxu1 %v18663_v29  ;;  %v21536_v21 = vcombine.low %v514_v23, %v522_v27  ;;  %v546_v29 = vld [vmem:[%s20162_s20 + $0x698] sm:$0xff]  ;;  %v363_v46 = vld [vmem:[%s20162_s20 + $0xe0] sm:$0xff] }
 0x1de   : > { %6963 = vmatmul.mubr.bf16.gmra.mrb[32].mxu0 %v21503_v8  ;;  %7196 = vmatprep.subr.bf16.mxu0 %v18684_v45  ;;  %v21528_v45 = vcombine.high %v514_v23, %v522_v27  ;;  %26418 = vst [vmem:[#allocation62_spill] sm:$0xff] %v21538_v36  ;;  %26419 = vst [vmem:[#allocation63_spill] sm:$0xff] %v21546_v26  ;;  %v339_v23 = vld [vmem:[%s20162_s20 + $0x20] sm:$0xff] }
 0x1df   : > { %8347 = vmatmul.mubr.bf16.gmra.mrb[32].mxu1 %v21503_v8  ;;  %6972 = vmatprep.mubr.bf16.mxu0 %v21505_v28  ;;  %26417 = vst [vmem:[#allocation61_spill] sm:$0xff] %v21536_v21  ;;  %v347_v27 = vld [vmem:[%s20162_s20 + $0x60] sm:$0xff] }
 0x1e0   : > { %8356 = vmatprep.mubr.bf16.mxu1 %v21505_v28  ;;  %26416 = vst [vmem:[#allocation60_spill] sm:$0xff] %v21528_v45  ;;  %v18667_v28 = vld [vmem:[%s26097_s2 + $0xf68] ss:$24 sps:$4 sm:$0xff]  }
 0x1e6   : > { %6973 = vmatmul.mubr.bf16.gmra.mrb[36].mxu0 %v21516_v49 }
 0x1e7   : > { %8357 = vmatmul.mubr.bf16.gmra.mrb[36].mxu1 %v21516_v49  ;;  %6982 = vmatprep.mubr.bf16.mxu0 %v21518_v25  ;;  %v18685_v49 = vld [vmem:[%s26097_s2 + $0xf30] ss:$24 sps:$4 sm:$0xff]  }
 0x1e8   : > { %8366 = vmatprep.mubr.bf16.mxu1 %v21518_v25  ;;  %v18687_v25 = vld [vmem:[%s26097_s2 + $0xf34] ss:$24 sps:$4 sm:$0xff]  }
 0x1ee   : > { %6983 = vmatmul.mubr.bf16.gmra.mrb[40].mxu0 %v21526_v61 }
 0x1ef   : > { %8367 = vmatmul.mubr.bf16.gmra.mrb[40].mxu1 %v21526_v61  ;;  %6992 = vmatprep.mubr.bf16.mxu0 %v21528_v45  ;;  %v18669_v61 = vld [vmem:[%s26097_s2 + $0xf6c] ss:$24 sps:$4 sm:$0xff]  }
 0x1f0   : > { %8376 = vmatprep.mubr.bf16.mxu1 %v21528_v45  ;;  %v21548_v45 = vcombine.high %v546_v29, %v554_v13 }
 0x1f2   : > { %26420 = vst [vmem:[#allocation64_spill] sm:$0xff] %v21548_v45 }
 0x1f6   : > { %6993 = vmatmul.mubr.bf16.gmra.mrb[44].mxu0 %v21536_v21 }
 0x1f7   : > { %8377 = vmatmul.mubr.bf16.gmra.mrb[44].mxu1 %v21536_v21  ;;  %7002 = vmatprep.mubr.bf16.mxu0 %v21538_v36  ;;  %v21556_v21 = vcombine.low %v546_v29, %v554_v13  ;;  %v21569_v29 = vcombine.low %v339_v23, %v347_v27  ;;  %v18666_v13 = vld [vmem:[%s26097_s2 + $0xf3c] ss:$24 sps:$4 sm:$0xff]  }
 0x1f8   : > { %8386 = vmatprep.mubr.bf16.mxu1 %v21538_v36  ;;  %v21558_v36 = vcombine.high %v339_v23, %v347_v27  ;;  %v371_v23 = vld [vmem:[%s20162_s20 + $0x120] sm:$0xff] }
 0x1f9   : > { %26421 = vst [vmem:[#allocation65_spill] sm:$0xff] %v21556_v21  ;;  %26423 = vst [vmem:[#allocation67_spill] sm:$0xff] %v21569_v29  ;;  %v379_v27 = vld [vmem:[%s20162_s20 + $0x160] sm:$0xff] }
 0x1fa   : > { %26422 = vst [vmem:[#allocation66_spill] sm:$0xff] %v21558_v36  ;;  %v21605_v8 = vcombine.high %v371_v23, %v379_v27 }
 0x1fc   : > { %26426 = vst [vmem:[#allocation70_spill] sm:$0xff] %v21605_v8 }
 0x1fe   : > { %7003 = vmatmul.mubr.bf16.gmra.mrb[48].mxu0 %v21546_v26 }
 0x1ff   : > { %8387 = vmatmul.mubr.bf16.gmra.mrb[48].mxu1 %v21546_v26  ;;  %7012 = vmatprep.mubr.bf16.mxu0 %v21548_v45  ;;  %v21574_v26 = vcombine.high %v355_v62, %v363_v46 }
 0x200   : > { %8396 = vmatprep.mubr.bf16.mxu1 %v21548_v45  ;;  %v18661_v45 = vld [vmem:[%s26097_s2 + $0xf08] ss:$24 sps:$4 sm:$0xff]  }
 0x201   : > { %26424 = vst [vmem:[#allocation68_spill] sm:$0xff] %v21574_v26 }
 0x206   : > { %7013 = vmatmul.mubr.bf16.gmra.mrb[52].mxu0 %v21556_v21 }
 0x207   : > { %8397 = vmatmul.mubr.bf16.gmra.mrb[52].mxu1 %v21556_v21  ;;  %7055 = vmatprep.mubr.bf16.mxu0 %v21558_v36  ;;  %v18682_v21 = vld [vmem:[%s26097_s2 + $0xf00] ss:$24 sps:$4 sm:$0xff]  }
 0x208   : > { %8439 = vmatprep.mubr.bf16.mxu1 %v21558_v36  ;;  %v18664_v36 = vld [vmem:[%s26097_s2 + $0xf38] ss:$24 sps:$4 sm:$0xff]  }
 0x20e   : > { %7056 = vmatmul.mubr.bf16.vlgmr.msra.gmra.mrb[0].mxu0 %v21569_v29 }
 0x20f   : > { %8440 = vmatmul.mubr.bf16.vlgmr.msra.gmra.mrb[0].mxu1 %v21569_v29  ;;  %7065 = vmatprep.mubr.bf16.mxu0 %v21574_v26  ;;  %v21597_v29 = vcombine.low %v355_v62, %v363_v46  ;;  %v395_v62 = vld [vmem:[%s20162_s20 + $0x1e0] sm:$0xff]  ;;  %v18696_v46 = vld [vmem:[%s26097_s2 + $0xf94] ss:$24 sps:$4 sm:$0xff]  }
 0x210   : > { %8581 = vmatpush1.bf16.msra.mxu1 %v18661_v45  ;;  %8449 = vmatprep.mubr.bf16.mxu1 %v21574_v26  ;;  %v18693_v45 = vld [vmem:[%s26097_s2 + $0xf64] ss:$24 sps:$4 sm:$0xff]  }
 0x211   : > { %8582 = vmatprep.subr.bf16.mxu1 %v18666_v13  ;;  %7197 = vmatpush1.bf16.msra.mxu0 %v18682_v21  ;;  %26425 = vst [vmem:[#allocation69_spill] sm:$0xff] %v21597_v29  ;;  %v18672_v26 = vld [vmem:[%s26097_s2 + $0xf9c] ss:$24 sps:$4 sm:$0xff]   ;;  %v18691_v21 = vld [vmem:[%s26097_s2 + $0xf60] ss:$24 sps:$4 sm:$0xff]   ;;  %v21631_v13 = vcombine.low %v371_v23, %v379_v27 }
 0x212   : > { %7198 = vmatprep.subr.bf16.mxu0 %v18687_v25  ;;  %v387_v25 = vld [vmem:[%s20162_s20 + $0x1a0] sm:$0xff] }
 0x213   : > { %26427 = vst [vmem:[#allocation71_spill] sm:$0xff] %v21631_v13  ;;  %v21639_v57 = vcombine.high %v387_v25, %v395_v62  ;;  %v403_v23 = vld [vmem:[%s20162_s20 + $0x220] sm:$0xff] }
 0x214   : > { %8583 = vmatpush1.bf16.msra.mxu1 %v18664_v36  ;;  %v18670_v36 = vld [vmem:[%s26097_s2 + $0xf98] ss:$24 sps:$4 sm:$0xff]   ;;  %v411_v27 = vld [vmem:[%s20162_s20 + $0x260] sm:$0xff] }
 0x215   : > { %8584 = vmatprep.subr.bf16.mxu1 %v18669_v61  ;;  %7199 = vmatpush1.bf16.msra.mxu0 %v18685_v49  ;;  %v18675_v49 = vld [vmem:[%s26097_s2 + $0xfcc] ss:$24 sps:$4 sm:$0xff]   ;;  %v18694_v61 = vld [vmem:[%s26097_s2 + $0xf90] ss:$24 sps:$4 sm:$0xff]   ;;  %26428 = vst [vmem:[#allocation72_spill] sm:$0xff] %v21639_v57 }
 0x216   : > { %7066 = vmatmul.mubr.bf16.gmra.mrb[4].mxu0 %v21597_v29  ;;  %7200 = vmatprep.subr.bf16.mxu0 %v18693_v45  ;;  %v18676_v45 = vld [vmem:[%s26097_s2 + $0xff8] ss:$24 sps:$4 sm:$0xff]  }
 0x217   : > { %8450 = vmatmul.mubr.bf16.gmra.mrb[4].mxu1 %v21597_v29  ;;  %7075 = vmatprep.mubr.bf16.mxu0 %v21605_v8  ;;  %v18702_v29 = vld [vmem:[%s26097_s2 + $0xfc4] ss:$24 sps:$4 sm:$0xff]  }
 0x218   : > { %8459 = vmatprep.mubr.bf16.mxu1 %v21605_v8  ;;  %8585 = vmatpush1.bf16.msra.mxu1 %v18667_v28  ;;  %v18673_v8 = vld [vmem:[%s26097_s2 + $0xfc8] ss:$24 sps:$4 sm:$0xff]   ;;  %v18678_v28 = vld [vmem:[%s26097_s2 + $0xffc] ss:$24 sps:$4 sm:$0xff]  }
 0x219   : > { %8586 = vmatprep.subr.bf16.mxu1 %v18672_v26  ;;  %7201 = vmatpush1.bf16.msra.mxu0 %v18691_v21  ;;  %v18700_v26 = vld [vmem:[%s26097_s2 + $0xfc0] ss:$24 sps:$4 sm:$0xff]   ;;  %v18705_v21 = vld [vmem:[%s26097_s2 + $0xff4] ss:$24 sps:$4 sm:$0xff]  }
 0x21a   : > { %7202 = vmatprep.subr.bf16.mxu0 %v18696_v46  ;;  %v18703_v46 = vld [vmem:[%s26097_s2 + $0xff0] ss:$24 sps:$4 sm:$0xff]  }
 0x21c   : > { %8587 = vmatpush1.bf16.msra.mxu1 %v18670_v36  ;;  %v18681_v36 = vld [vmem:[%s26097_s2 + $0x102c] ss:$24 sps:$4 sm:$0xff]  }
 0x21d   : > { %8588 = vmatprep.subr.bf16.mxu1 %v18675_v49  ;;  %7203 = vmatpush1.bf16.msra.mxu0 %v18694_v61  ;;  %v21665_v49 = vcombine.low %v387_v25, %v395_v62  ;;  %v18679_v61 = vld [vmem:[%s26097_s2 + $0x1028] ss:$24 sps:$4 sm:$0xff]  }
 0x21e   : > { %7076 = vmatmul.mubr.bf16.gmra.mrb[8].mxu0 %v21631_v13  ;;  %7204 = vmatprep.subr.bf16.mxu0 %v18702_v29  ;;  %v18709_v29 = vld [vmem:[%s26097_s2 + $0x1020] ss:$24 sps:$4 sm:$0xff]  }
 0x21f   : > { %8460 = vmatmul.mubr.bf16.gmra.mrb[8].mxu1 %v21631_v13  ;;  %7085 = vmatprep.mubr.bf16.mxu0 %v21639_v57  ;;  %26429 = vst [vmem:[#allocation73_spill] sm:$0xff] %v21665_v49  ;;  %v21673_v13 = vcombine.high %v403_v23, %v411_v27  ;;  %v419_v25 = vld [vmem:[%s20162_s20 + $0x2a0] sm:$0xff] }
 0x220   : > { %8469 = vmatprep.mubr.bf16.mxu1 %v21639_v57  ;;  %8589 = vmatpush1.bf16.msra.mxu1 %v18673_v8  ;;  %v18711_v57 = vld [vmem:[%s26097_s2 + $0x1024] ss:$24 sps:$4 sm:$0xff]  }
 0x221   : > { %8590 = vmatprep.subr.bf16.mxu1 %v18678_v28  ;;  %7205 = vmatpush1.bf16.msra.mxu0 %v18700_v26  ;;  %26430 = vst [vmem:[#allocation74_spill] sm:$0xff] %v21673_v13  ;;  %v18690_v8 = vld [vmem:[%s26097_s2 + $0x105c] ss:$24 sps:$4 sm:$0xff]   ;;  %v427_v62 = vld [vmem:[%s20162_s20 + $0x2e0] sm:$0xff]  ;;  %v18688_v26 = vld [vmem:[%s26097_s2 + $0x1058] ss:$24 sps:$4 sm:$0xff]  }
 0x222   : > { %7206 = vmatprep.subr.bf16.mxu0 %v18705_v21  ;;  %v18717_v28 = vld [vmem:[%s26097_s2 + $0x1054] ss:$24 sps:$4 sm:$0xff]   ;;  %v18715_v21 = vld [vmem:[%s26097_s2 + $0x1050] ss:$24 sps:$4 sm:$0xff]  }
 0x224   : > { %8591 = vmatpush1.bf16.msra.mxu1 %v18676_v45  ;;  %v18699_v45 = vld [vmem:[%s26097_s2 + $0x108c] ss:$24 sps:$4 sm:$0xff]  }
 0x225   : > { %8592 = vmatprep.subr.bf16.mxu1 %v18681_v36  ;;  %7207 = vmatpush1.bf16.msra.mxu0 %v18703_v46  ;;  %v21699_v36 = vcombine.low %v403_v23, %v411_v27  ;;  %v18697_v46 = vld [vmem:[%s26097_s2 + $0x1088] ss:$24 sps:$4 sm:$0xff]  }
 0x226   : > { %7086 = vmatmul.mubr.bf16.gmra.mrb[12].mxu0 %v21665_v49  ;;  %7208 = vmatprep.subr.bf16.mxu0 %v18711_v57  ;;  %v18720_v57 = vld [vmem:[%s26097_s2 + $0x1084] ss:$24 sps:$4 sm:$0xff]   ;;  %v18718_v23 = vld [vmem:[%s26097_s2 + $0x1080] ss:$24 sps:$4 sm:$0xff]  }
 0x227   : > { %8470 = vmatmul.mubr.bf16.gmra.mrb[12].mxu1 %v21665_v49  ;;  %7095 = vmatprep.mubr.bf16.mxu0 %v21673_v13  ;;  %26431 = vst [vmem:[#allocation75_spill] sm:$0xff] %v21699_v36  ;;  %v18708_v49 = vld [vmem:[%s26097_s2 + $0x10bc] ss:$24 sps:$4 sm:$0xff]   ;;  %v435_v27 = vld [vmem:[%s20162_s20 + $0x320] sm:$0xff] }
 0x228   : > { %8479 = vmatprep.mubr.bf16.mxu1 %v21673_v13  ;;  %8593 = vmatpush1.bf16.msra.mxu1 %v18679_v61  ;;  %v21704_v13 = vcombine.high %v419_v25, %v427_v62  ;;  %v443_v61 = vld [vmem:[%s20162_s20 + $0x360] sm:$0xff] }
 0x229   : > { %8594 = vmatprep.subr.bf16.mxu1 %v18690_v8  ;;  %7209 = vmatpush1.bf16.msra.mxu0 %v18709_v29  ;;  %v18726_v8 = vld [vmem:[%s26097_s2 + $0x10b4] ss:$24 sps:$4 sm:$0xff]   ;;  %v18706_v29 = vld [vmem:[%s26097_s2 + $0x10b8] ss:$24 sps:$4 sm:$0xff]  }
 0x22a   : > { %7210 = vmatprep.subr.bf16.mxu0 %v18717_v28  ;;  %26432 = vst [vmem:[#allocation76_spill] sm:$0xff] %v21704_v13  ;;  %v18714_v28 = vld [vmem:[%s26097_s2 + $0x10ec] ss:$24 sps:$4 sm:$0xff]  }
 0x22c   : > { %8595 = vmatpush1.bf16.msra.mxu1 %v18688_v26  ;;  %v18724_v26 = vld [vmem:[%s26097_s2 + $0x10b0] ss:$24 sps:$4 sm:$0xff]  }
 0x22d   : > { %8596 = vmatprep.subr.bf16.mxu1 %v18699_v45  ;;  %7211 = vmatpush1.bf16.msra.mxu0 %v18715_v21  ;;  %v21733_v45 = vcombine.low %v419_v25, %v427_v62  ;;  %v18712_v21 = vld [vmem:[%s26097_s2 + $0x10e8] ss:$24 sps:$4 sm:$0xff]  }
 0x22e   : > { %7096 = vmatmul.mubr.bf16.gmra.mrb[16].mxu0 %v21699_v36  ;;  %7212 = vmatprep.subr.bf16.mxu0 %v18720_v57  ;;  %v451_v25 = vld [vmem:[%s20162_s20 + $0x3a0] sm:$0xff]  ;;  %v18735_v57 = vld [vmem:[%s26097_s2 + $0x1114] ss:$24 sps:$4 sm:$0xff]  }
 0x22f   : > { %8480 = vmatmul.mubr.bf16.gmra.mrb[16].mxu1 %v21699_v36  ;;  %7105 = vmatprep.mubr.bf16.mxu0 %v21704_v13  ;;  %26433 = vst [vmem:[#allocation77_spill] sm:$0xff] %v21733_v45  ;;  %v18723_v36 = vld [vmem:[%s26097_s2 + $0x111c] ss:$24 sps:$4 sm:$0xff]   ;;  %v459_v62 = vld [vmem:[%s20162_s20 + $0x3e0] sm:$0xff] }
 0x230   : > { %8489 = vmatprep.mubr.bf16.mxu1 %v21704_v13  ;;  %8597 = vmatpush1.bf16.msra.mxu1 %v18697_v46  ;;  %v21738_v13 = vcombine.high %v435_v27, %v443_v61  ;;  %v18729_v46 = vld [vmem:[%s26097_s2 + $0x10e4] ss:$24 sps:$4 sm:$0xff]  }
 0x231   : > { %8598 = vmatprep.subr.bf16.mxu1 %v18708_v49  ;;  %7213 = vmatpush1.bf16.msra.mxu0 %v18718_v23  ;;  %v18727_v49 = vld [vmem:[%s26097_s2 + $0x10e0] ss:$24 sps:$4 sm:$0xff]  }
 0x232   : > { %7214 = vmatprep.subr.bf16.mxu0 %v18726_v8  ;;  %26434 = vst [vmem:[#allocation78_spill] sm:$0xff] %v21738_v13  ;;  %v18721_v23 = vld [vmem:[%s26097_s2 + $0x1118] ss:$24 sps:$4 sm:$0xff]   ;;  %v18732_v8 = vld [vmem:[%s26097_s2 + $0x114c] ss:$24 sps:$4 sm:$0xff]  }
 0x234   : > { %8599 = vmatpush1.bf16.msra.mxu1 %v18706_v29  ;;  %v18733_v29 = vld [vmem:[%s26097_s2 + $0x1110] ss:$24 sps:$4 sm:$0xff]  }
 0x235   : > { %8600 = vmatprep.subr.bf16.mxu1 %v18714_v28  ;;  %7215 = vmatpush1.bf16.msra.mxu0 %v18724_v26  ;;  %v21767_v28 = vcombine.low %v435_v27, %v443_v61  ;;  %v18730_v26 = vld [vmem:[%s26097_s2 + $0x1148] ss:$24 sps:$4 sm:$0xff]   ;;  %v18741_v27 = vld [vmem:[%s26097_s2 + $0x117c] ss:$24 sps:$4 sm:$0xff]  }
 0x236   : > { %7106 = vmatmul.mubr.bf16.gmra.mrb[20].mxu0 %v21733_v45  ;;  %7216 = vmatprep.subr.bf16.mxu0 %v18729_v46  ;;  %v18744_v61 = vld [vmem:[%s26097_s2 + $0x1174] ss:$24 sps:$4 sm:$0xff]   ;;  %v475_v46 = vld [vmem:[%s20162_s20 + $0x460] sm:$0xff] }
 0x237   : > { %8490 = vmatmul.mubr.bf16.gmra.mrb[20].mxu1 %v21733_v45  ;;  %7115 = vmatprep.mubr.bf16.mxu0 %v21738_v13  ;;  %v21775_v45 = vcombine.high %v451_v25, %v459_v62 }
 0x238   : > { %8499 = vmatprep.mubr.bf16.mxu1 %v21738_v13  ;;  %8601 = vmatpush1.bf16.msra.mxu1 %v18712_v21  ;;  %v18738_v13 = vld [vmem:[%s26097_s2 + $0x1144] ss:$24 sps:$4 sm:$0xff]  }
 0x239   : > { %8602 = vmatprep.subr.bf16.mxu1 %v18723_v36  ;;  %7217 = vmatpush1.bf16.msra.mxu0 %v18727_v49  ;;  %v18736_v36 = vld [vmem:[%s26097_s2 + $0x1140] ss:$24 sps:$4 sm:$0xff]  }
 0x23a   : > { %7218 = vmatprep.subr.bf16.mxu0 %v18735_v57  ;;  %v467_v21 = vld [vmem:[%s20162_s20 + $0x420] sm:$0xff]  ;;  %v18739_v49 = vld [vmem:[%s26097_s2 + $0x1178] ss:$24 sps:$4 sm:$0xff]  }
 0x23b   : > { %v18742_v57 = vld [vmem:[%s26097_s2 + $0x1170] ss:$24 sps:$4 sm:$0xff]  }
 0x23c   : > { %8603 = vmatpush1.bf16.msra.mxu1 %v18721_v23  ;;  %v18747_v23 = vld [vmem:[%s26097_s2 + $0x11ac] ss:$24 sps:$4 sm:$0xff]  }
 0x23d   : > { %8604 = vmatprep.subr.bf16.mxu1 %v18732_v8  ;;  %7219 = vmatpush1.bf16.msra.mxu0 %v18733_v29  ;;  %v21801_v8 = vcombine.low %v451_v25, %v459_v62  ;;  %v18745_v29 = vld [vmem:[%s26097_s2 + $0x11a8] ss:$24 sps:$4 sm:$0xff]   ;;  %v18756_v62 = vld [vmem:[%s26097_s2 + $0x11dc] ss:$24 sps:$4 sm:$0xff]  }
 0x23e   : > { %7116 = vmatmul.mubr.bf16.gmra.mrb[24].mxu0 %v21767_v28  ;;  %7220 = vmatprep.subr.bf16.mxu0 %v18738_v13  ;;  %v21803_v13 = vcombine.high %v467_v21, %v475_v46  ;;  %v18748_v25 = vld [vmem:[%s26097_s2 + $0x11a0] ss:$24 sps:$4 sm:$0xff]  }
 0x23f   : > { %8500 = vmatmul.mubr.bf16.gmra.mrb[24].mxu1 %v21767_v28  ;;  %7125 = vmatprep.mubr.bf16.mxu0 %v21775_v45 }
 0x240   : > { %8509 = vmatprep.mubr.bf16.mxu1 %v21775_v45  ;;  %8605 = vmatpush1.bf16.msra.mxu1 %v18730_v26  ;;  %26435 = vst [vmem:[#allocation79_spill] sm:$0xff] %v21803_v13  ;;  %v18750_v26 = vld [vmem:[%s26097_s2 + $0x11a4] ss:$24 sps:$4 sm:$0xff]  }
 0x241   : > { %8606 = vmatprep.subr.bf16.mxu1 %v18741_v27  ;;  %7221 = vmatpush1.bf16.msra.mxu0 %v18736_v36  ;;  %v18753_v36 = vld [vmem:[%s26097_s2 + $0x11d4] ss:$24 sps:$4 sm:$0xff]   ;;  %v483_v27 = vld [vmem:[%s20162_s20 + $0x4a0] sm:$0xff] }
 0x242   : > { %7222 = vmatprep.subr.bf16.mxu0 %v18744_v61  ;;  %v491_v61 = vld [vmem:[%s20162_s20 + $0x4e0] sm:$0xff] }
 0x244   : > { %8607 = vmatpush1.bf16.msra.mxu1 %v18739_v49  ;;  %v18754_v49 = vld [vmem:[%s26097_s2 + $0x11d8] ss:$24 sps:$4 sm:$0xff]  }
 0x245   : > { %7223 = vmatpush1.bf16.msra.mxu0 %v18742_v57  ;;  %8608 = vmatprep.subr.bf16.mxu1 %v18747_v23  ;;  %v18751_v57 = vld [vmem:[%s26097_s2 + $0x11d0] ss:$24 sps:$4 sm:$0xff]   ;;  %v18759_v23 = vld [vmem:[%s26097_s2 + $0x120c] ss:$24 sps:$4 sm:$0xff]  }
 0x246   : > { %7126 = vmatmul.mubr.bf16.gmra.mrb[28].mxu0 %v21801_v8  ;;  %7224 = vmatprep.subr.bf16.mxu0 %v18750_v26  ;;  %v18780_v26 = vld [vmem:[%s26097_s2 + $0x1204] ss:$24 sps:$4 sm:$0xff]  }
 0x247   : > { %8510 = vmatmul.mubr.bf16.gmra.mrb[28].mxu1 %v21801_v8  ;;  %7135 = vmatprep.mubr.bf16.mxu0 %v21803_v13 }
 0x248   : > { %8519 = vmatprep.mubr.bf16.mxu1 %v21803_v13  ;;  %8609 = vmatpush1.bf16.msra.mxu1 %v18745_v29  ;;  %v21835_v13 = vcombine.low %v467_v21, %v475_v46  ;;  %v21837_v29 = vcombine.high %v483_v27, %v491_v61  ;;  %v499_v21 = vld [vmem:[%s20162_s20 + $0x520] sm:$0xff] }
 0x249   : > { %7225 = vmatpush1.bf16.msra.mxu0 %v18748_v25  ;;  %8610 = vmatprep.subr.bf16.mxu1 %v18756_v62  ;;  %v507_v46 = vld [vmem:[%s20162_s20 + $0x560] sm:$0xff]  ;;  %v21848_v25 = vcombine.low %v483_v27, %v491_v61 }
 0x24a   : > { %26436 = vst [vmem:[#allocation80_spill] sm:$0xff] %v21835_v13  ;;  %7226 = vmatprep.subr.bf16.mxu0 %v18753_v36  ;;  %26437 = vst [vmem:[#allocation81_spill] sm:$0xff] %v21837_v29  ;;  %v21850_v62 = vcombine.high %v499_v21, %v507_v46  ;;  %v515_v36 = vld [vmem:[%s20162_s20 + $0x5a0] sm:$0xff] }
 0x24b   : > { %26438 = vst [vmem:[#allocation82_spill] sm:$0xff] %v21848_v25  ;;  %v531_v27 = vld [vmem:[%s20162_s20 + $0x620] sm:$0xff] }
 0x24c   : > { %8611 = vmatpush1.bf16.msra.mxu1 %v18754_v49  ;;  %26439 = vst [vmem:[#allocation83_spill] sm:$0xff] %v21850_v62  ;;  %v523_v49 = vld [vmem:[%s20162_s20 + $0x5e0] sm:$0xff] }
 0x24d   : > { %7227 = vmatpush1.bf16.msra.mxu0 %v18751_v57  ;;  %8753 = vmatprep.subr.bf16.mxu1 %v18759_v23  ;;  %v21858_v57 = vcombine.low %v499_v21, %v507_v46  ;;  %v21860_v23 = vcombine.high %v515_v36, %v523_v49  ;;  %v539_v61 = vld [vmem:[%s20162_s20 + $0x660] sm:$0xff] }
 0x24e   : > { %7136 = vmatmul.mubr.bf16.gmra.mrb[32].mxu0 %v21835_v13  ;;  %7369 = vmatprep.subr.bf16.mxu0 %v18780_v26  ;;  %v21868_v26 = vcombine.low %v515_v36, %v523_v49  ;;  %v547_v21 = vld [vmem:[%s20162_s20 + $0x6a0] sm:$0xff]  ;;  %v340_v36 = vld [vmem:[%s20162_s20 + $0x28] sm:$0xff] }
 0x24f   : > { %8520 = vmatmul.mubr.bf16.gmra.mrb[32].mxu1 %v21835_v13  ;;  %7145 = vmatprep.mubr.bf16.mxu0 %v21837_v29  ;;  %26440 = vst [vmem:[#allocation84_spill] sm:$0xff] %v21858_v57  ;;  %26441 = vst [vmem:[#allocation85_spill] sm:$0xff] %v21860_v23  ;;  %v555_v46 = vld [vmem:[%s20162_s20 + $0x6e0] sm:$0xff]  ;;  %v348_v49 = vld [vmem:[%s20162_s20 + $0x68] sm:$0xff] }
 0x250   : > { %8529 = vmatprep.mubr.bf16.mxu1 %v21837_v29  ;;  %26442 = vst [vmem:[#allocation86_spill] sm:$0xff] %v21868_v26 }
 0x256   : > { %7146 = vmatmul.mubr.bf16.gmra.mrb[36].mxu0 %v21848_v25 }
 0x257   : > { %8530 = vmatmul.mubr.bf16.gmra.mrb[36].mxu1 %v21848_v25  ;;  %7155 = vmatprep.mubr.bf16.mxu0 %v21850_v62  ;;  %v380_v25 = vld [vmem:[%s20162_s20 + $0x168] sm:$0xff] }
 0x258   : > { %8539 = vmatprep.mubr.bf16.mxu1 %v21850_v62  ;;  %v21870_v62 = vcombine.high %v531_v27, %v539_v61 }
 0x25a   : > { %26443 = vst [vmem:[#allocation87_spill] sm:$0xff] %v21870_v62 }
 0x25e   : > { %7156 = vmatmul.mubr.bf16.gmra.mrb[40].mxu0 %v21858_v57 }
 0x25f   : > { %8540 = vmatmul.mubr.bf16.gmra.mrb[40].mxu1 %v21858_v57  ;;  %7165 = vmatprep.mubr.bf16.mxu0 %v21860_v23  ;;  %v21880_v57 = vcombine.high %v547_v21, %v555_v46 }
 0x260   : > { %8549 = vmatprep.mubr.bf16.mxu1 %v21860_v23  ;;  %v21878_v23 = vcombine.low %v531_v27, %v539_v61  ;;  %v356_v27 = vld [vmem:[%s20162_s20 + $0xa8] sm:$0xff] }
 0x261   : > { %26445 = vst [vmem:[#allocation89_spill] sm:$0xff] %v21880_v57  ;;  %v364_v61 = vld [vmem:[%s20162_s20 + $0xe8] sm:$0xff] }
 0x262   : > { %26444 = vst [vmem:[#allocation88_spill] sm:$0xff] %v21878_v23  ;;  %v21929_v29 = vcombine.low %v356_v27, %v364_v61 }
 0x264   : > { %26450 = vst [vmem:[#allocation94_spill] sm:$0xff] %v21929_v29 }
 0x266   : > { %7166 = vmatmul.mubr.bf16.gmra.mrb[44].mxu0 %v21868_v26 }
 0x267   : > { %8550 = vmatmul.mubr.bf16.gmra.mrb[44].mxu1 %v21868_v26  ;;  %7175 = vmatprep.mubr.bf16.mxu0 %v21870_v62  ;;  %v21888_v26 = vcombine.low %v547_v21, %v555_v46  ;;  %v18757_v21 = vld [vmem:[%s26097_s2 + $0x1208] ss:$24 sps:$4 sm:$0xff]   ;;  %v21903_v46 = vcombine.high %v356_v27, %v364_v61  ;;  %v18768_v27 = vld [vmem:[%s26097_s2 + $0x129c] ss:$24 sps:$4 sm:$0xff]  }
 0x268   : > { %8559 = vmatprep.mubr.bf16.mxu1 %v21870_v62  ;;  %v21890_v62 = vcombine.high %v340_v36, %v348_v49  ;;  %v18787_v61 = vld [vmem:[%s26097_s2 + $0x1260] ss:$24 sps:$4 sm:$0xff]  }
 0x269   : > { %26446 = vst [vmem:[#allocation90_spill] sm:$0xff] %v21888_v26  ;;  %26449 = vst [vmem:[#allocation93_spill] sm:$0xff] %v21903_v46 }
 0x26a   : > { %26447 = vst [vmem:[#allocation91_spill] sm:$0xff] %v21890_v62 }
 0x26e   : > { %7176 = vmatmul.mubr.bf16.gmra.mrb[48].mxu0 %v21878_v23 }
 0x26f   : > { %8560 = vmatmul.mubr.bf16.gmra.mrb[48].mxu1 %v21878_v23  ;;  %7185 = vmatprep.mubr.bf16.mxu0 %v21880_v57  ;;  %v21898_v23 = vcombine.low %v340_v36, %v348_v49  ;;  %v18783_v36 = vld [vmem:[%s26097_s2 + $0x1234] ss:$24 sps:$4 sm:$0xff]   ;;  %v18760_v49 = vld [vmem:[%s26097_s2 + $0x1238] ss:$24 sps:$4 sm:$0xff]  }
 0x270   : > { %8569 = vmatprep.mubr.bf16.mxu1 %v21880_v57  ;;  %v372_v57 = vld [vmem:[%s20162_s20 + $0x128] sm:$0xff] }
 0x271   : > { %26448 = vst [vmem:[#allocation92_spill] sm:$0xff] %v21898_v23  ;;  %v21931_v13 = vcombine.high %v372_v57, %v380_v25 }
 0x273   : > { %26451 = vst [vmem:[#allocation95_spill] sm:$0xff] %v21931_v13 }
 0x276   : > { %7186 = vmatmul.mubr.bf16.gmra.mrb[52].mxu0 %v21888_v26 }
 0x277   : > { %8570 = vmatmul.mubr.bf16.gmra.mrb[52].mxu1 %v21888_v26  ;;  %7228 = vmatprep.mubr.bf16.mxu0 %v21890_v62  ;;  %v18762_v26 = vld [vmem:[%s26097_s2 + $0x123c] ss:$24 sps:$4 sm:$0xff]  }
 0x278   : > { %8612 = vmatprep.mubr.bf16.mxu1 %v21890_v62  ;;  %v18778_v62 = vld [vmem:[%s26097_s2 + $0x1200] ss:$24 sps:$4 sm:$0xff]  }
 0x27e   : > { %7229 = vmatmul.mubr.bf16.vlgmr.msra.gmra.mrb[0].mxu0 %v21898_v23 }
 0x27f   : > { %8613 = vmatmul.mubr.bf16.vlgmr.msra.gmra.mrb[0].mxu1 %v21898_v23  ;;  %7238 = vmatprep.mubr.bf16.mxu0 %v21903_v46  ;;  %v18765_v23 = vld [vmem:[%s26097_s2 + $0x126c] ss:$24 sps:$4 sm:$0xff]  }
 0x280   : > { %8754 = vmatpush1.bf16.msra.mxu1 %v18757_v21  ;;  %8622 = vmatprep.mubr.bf16.mxu1 %v21903_v46  ;;  %v18781_v21 = vld [vmem:[%s26097_s2 + $0x1230] ss:$24 sps:$4 sm:$0xff]  }
 0x281   : > { %8755 = vmatprep.subr.bf16.mxu1 %v18762_v26  ;;  %7370 = vmatpush1.bf16.msra.mxu0 %v18778_v62  ;;  %v18763_v26 = vld [vmem:[%s26097_s2 + $0x1268] ss:$24 sps:$4 sm:$0xff]   ;;  %v18789_v62 = vld [vmem:[%s26097_s2 + $0x1264] ss:$24 sps:$4 sm:$0xff]  }
 0x282   : > { %7371 = vmatprep.subr.bf16.mxu0 %v18783_v36  ;;  %v388_v36 = vld [vmem:[%s20162_s20 + $0x1a8] sm:$0xff] }
 0x283   : > { %v18790_v46 = vld [vmem:[%s26097_s2 + $0x1290] ss:$24 sps:$4 sm:$0xff]  }
 0x284   : > { %8756 = vmatpush1.bf16.msra.mxu1 %v18760_v49  ;;  %v396_v49 = vld [vmem:[%s20162_s20 + $0x1e8] sm:$0xff] }
 0x285   : > { %8757 = vmatprep.subr.bf16.mxu1 %v18765_v23  ;;  %7372 = vmatpush1.bf16.msra.mxu0 %v18781_v21  ;;  %v18792_v23 = vld [vmem:[%s26097_s2 + $0x1294] ss:$24 sps:$4 sm:$0xff]   ;;  %v18766_v21 = vld [vmem:[%s26097_s2 + $0x1298] ss:$24 sps:$4 sm:$0xff]  }
 0x286   : > { %7239 = vmatmul.mubr.bf16.gmra.mrb[4].mxu0 %v21929_v29  ;;  %7373 = vmatprep.subr.bf16.mxu0 %v18789_v62  ;;  %v18769_v62 = vld [vmem:[%s26097_s2 + $0x12c8] ss:$24 sps:$4 sm:$0xff]  }
 0x287   : > { %8623 = vmatmul.mubr.bf16.gmra.mrb[4].mxu1 %v21929_v29  ;;  %7248 = vmatprep.mubr.bf16.mxu0 %v21931_v13  ;;  %v18771_v29 = vld [vmem:[%s26097_s2 + $0x12cc] ss:$24 sps:$4 sm:$0xff]  }
 0x288   : > { %8632 = vmatprep.mubr.bf16.mxu1 %v21931_v13  ;;  %8758 = vmatpush1.bf16.msra.mxu1 %v18763_v26  ;;  %v21963_v13 = vcombine.low %v372_v57, %v380_v25  ;;  %v21965_v26 = vcombine.high %v388_v36, %v396_v49  ;;  %v18796_v25 = vld [vmem:[%s26097_s2 + $0x12c0] ss:$24 sps:$4 sm:$0xff]   ;;  %v18801_v57 = vld [vmem:[%s26097_s2 + $0x12f4] ss:$24 sps:$4 sm:$0xff]  }
 0x289   : > { %8759 = vmatprep.subr.bf16.mxu1 %v18768_v27  ;;  %7374 = vmatpush1.bf16.msra.mxu0 %v18787_v61  ;;  %v18798_v27 = vld [vmem:[%s26097_s2 + $0x12c4] ss:$24 sps:$4 sm:$0xff]  }
 0x28a   : > { %26452 = vst [vmem:[#allocation96_spill] sm:$0xff] %v21963_v13  ;;  %7375 = vmatprep.subr.bf16.mxu0 %v18792_v23  ;;  %26453 = vst [vmem:[#allocation97_spill] sm:$0xff] %v21965_v26  ;;  %v18774_v61 = vld [vmem:[%s26097_s2 + $0x12fc] ss:$24 sps:$4 sm:$0xff]   ;;  %v412_v23 = vld [vmem:[%s20162_s20 + $0x268] sm:$0xff] }
 0x28c   : > { %8760 = vmatpush1.bf16.msra.mxu1 %v18766_v21  ;;  %v18777_v21 = vld [vmem:[%s26097_s2 + $0x132c] ss:$24 sps:$4 sm:$0xff]  }
 0x28d   : > { %8761 = vmatprep.subr.bf16.mxu1 %v18771_v29  ;;  %7376 = vmatpush1.bf16.msra.mxu0 %v18790_v46  ;;  %v404_v29 = vld [vmem:[%s20162_s20 + $0x228] sm:$0xff]  ;;  %v18772_v46 = vld [vmem:[%s26097_s2 + $0x12f8] ss:$24 sps:$4 sm:$0xff]  }
 0x28e   : > { %7249 = vmatmul.mubr.bf16.gmra.mrb[8].mxu0 %v21963_v13  ;;  %7377 = vmatprep.subr.bf16.mxu0 %v18798_v27  ;;  %v18775_v27 = vld [vmem:[%s26097_s2 + $0x1328] ss:$24 sps:$4 sm:$0xff]  }
 0x28f   : > { %8633 = vmatmul.mubr.bf16.gmra.mrb[8].mxu1 %v21963_v13  ;;  %7258 = vmatprep.mubr.bf16.mxu0 %v21965_v26  ;;  %v18799_v13 = vld [vmem:[%s26097_s2 + $0x12f0] ss:$24 sps:$4 sm:$0xff]  }
 0x290   : > { %8642 = vmatprep.mubr.bf16.mxu1 %v21965_v26  ;;  %8762 = vmatpush1.bf16.msra.mxu1 %v18769_v62  ;;  %v21997_v26 = vcombine.low %v388_v36, %v396_v49  ;;  %v21999_v62 = vcombine.high %v404_v29, %v412_v23  ;;  %v18805_v36 = vld [vmem:[%s26097_s2 + $0x1320] ss:$24 sps:$4 sm:$0xff]   ;;  %v18813_v49 = vld [vmem:[%s26097_s2 + $0x1354] ss:$24 sps:$4 sm:$0xff]  }
 0x291   : > { %8763 = vmatprep.subr.bf16.mxu1 %v18774_v61  ;;  %7378 = vmatpush1.bf16.msra.mxu0 %v18796_v25  ;;  %v18807_v61 = vld [vmem:[%s26097_s2 + $0x1324] ss:$24 sps:$4 sm:$0xff]  }
 0x292   : > { %26454 = vst [vmem:[#allocation98_spill] sm:$0xff] %v21997_v26  ;;  %7379 = vmatprep.subr.bf16.mxu0 %v18801_v57  ;;  %26455 = vst [vmem:[#allocation99_spill] sm:$0xff] %v21999_v62  ;;  %v18786_v25 = vld [vmem:[%s26097_s2 + $0x135c] ss:$24 sps:$4 sm:$0xff]   ;;  %v420_v57 = vld [vmem:[%s20162_s20 + $0x2a8] sm:$0xff] }
 0x294   : > { %8764 = vmatpush1.bf16.msra.mxu1 %v18772_v46  ;;  %v428_v46 = vld [vmem:[%s20162_s20 + $0x2e8] sm:$0xff] }
 0x295   : > { %8765 = vmatprep.subr.bf16.mxu1 %v18777_v21  ;;  %7380 = vmatpush1.bf16.msra.mxu0 %v18799_v13  ;;  %v18784_v13 = vld [vmem:[%s26097_s2 + $0x1358] ss:$24 sps:$4 sm:$0xff]   ;;  %v18795_v21 = vld [vmem:[%s26097_s2 + $0x138c] ss:$24 sps:$4 sm:$0xff]  }
 0x296   : > { %7259 = vmatmul.mubr.bf16.gmra.mrb[12].mxu0 %v21997_v26  ;;  %7381 = vmatprep.subr.bf16.mxu0 %v18807_v61  ;;  %v18793_v61 = vld [vmem:[%s26097_s2 + $0x1388] ss:$24 sps:$4 sm:$0xff]  }
 0x297   : > { %8643 = vmatmul.mubr.bf16.gmra.mrb[12].mxu1 %v21997_v26  ;;  %7268 = vmatprep.mubr.bf16.mxu0 %v21999_v62  ;;  %v18811_v26 = vld [vmem:[%s26097_s2 + $0x1350] ss:$24 sps:$4 sm:$0xff]  }
 0x298   : > { %8652 = vmatprep.mubr.bf16.mxu1 %v21999_v62  ;;  %8766 = vmatpush1.bf16.msra.mxu1 %v18775_v27  ;;  %v22031_v62 = vcombine.low %v404_v29, %v412_v23  ;;  %v22033_v27 = vcombine.high %v420_v57, %v428_v46  ;;  %v18814_v29 = vld [vmem:[%s26097_s2 + $0x1380] ss:$24 sps:$4 sm:$0xff]   ;;  %v18822_v23 = vld [vmem:[%s26097_s2 + $0x13b4] ss:$24 sps:$4 sm:$0xff]  }
 0x299   : > { %8767 = vmatprep.subr.bf16.mxu1 %v18786_v25  ;;  %7382 = vmatpush1.bf16.msra.mxu0 %v18805_v36  ;;  %v18816_v25 = vld [vmem:[%s26097_s2 + $0x1384] ss:$24 sps:$4 sm:$0xff]  }
 0x29a   : > { %26456 = vst [vmem:[#allocation100_spill] sm:$0xff] %v22031_v62  ;;  %7383 = vmatprep.subr.bf16.mxu0 %v18813_v49  ;;  %26457 = vst [vmem:[#allocation101_spill] sm:$0xff] %v22033_v27  ;;  %v18804_v36 = vld [vmem:[%s26097_s2 + $0x13bc] ss:$24 sps:$4 sm:$0xff]   ;;  %v436_v49 = vld [vmem:[%s20162_s20 + $0x328] sm:$0xff] }
 0x29c   : > { %8768 = vmatpush1.bf16.msra.mxu1 %v18784_v13  ;;  %v444_v13 = vld [vmem:[%s20162_s20 + $0x368] sm:$0xff] }
 0x29d   : > { %8769 = vmatprep.subr.bf16.mxu1 %v18795_v21  ;;  %7384 = vmatpush1.bf16.msra.mxu0 %v18811_v26  ;;  %v18802_v26 = vld [vmem:[%s26097_s2 + $0x13b8] ss:$24 sps:$4 sm:$0xff]   ;;  %v18810_v21 = vld [vmem:[%s26097_s2 + $0x13ec] ss:$24 sps:$4 sm:$0xff]  }
 0x29e   : > { %7269 = vmatmul.mubr.bf16.gmra.mrb[16].mxu0 %v22031_v62  ;;  %7385 = vmatprep.subr.bf16.mxu0 %v18816_v25  ;;  %v18808_v25 = vld [vmem:[%s26097_s2 + $0x13e8] ss:$24 sps:$4 sm:$0xff]  }
 0x29f   : > { %8653 = vmatmul.mubr.bf16.gmra.mrb[16].mxu1 %v22031_v62  ;;  %7278 = vmatprep.mubr.bf16.mxu0 %v22033_v27  ;;  %v18820_v62 = vld [vmem:[%s26097_s2 + $0x13b0] ss:$24 sps:$4 sm:$0xff]  }
 0x2a0   : > { %8662 = vmatprep.mubr.bf16.mxu1 %v22033_v27  ;;  %8770 = vmatpush1.bf16.msra.mxu1 %v18793_v61  ;;  %v22065_v27 = vcombine.low %v420_v57, %v428_v46  ;;  %v22067_v61 = vcombine.high %v436_v49, %v444_v13  ;;  %v18823_v57 = vld [vmem:[%s26097_s2 + $0x13e0] ss:$24 sps:$4 sm:$0xff]   ;;  %v18831_v46 = vld [vmem:[%s26097_s2 + $0x1414] ss:$24 sps:$4 sm:$0xff]  }
 0x2a1   : > { %8771 = vmatprep.subr.bf16.mxu1 %v18804_v36  ;;  %7386 = vmatpush1.bf16.msra.mxu0 %v18814_v29  ;;  %v18825_v36 = vld [vmem:[%s26097_s2 + $0x13e4] ss:$24 sps:$4 sm:$0xff]  }
 0x2a2   : > { %26458 = vst [vmem:[#allocation102_spill] sm:$0xff] %v22065_v27  ;;  %7387 = vmatprep.subr.bf16.mxu0 %v18822_v23  ;;  %26459 = vst [vmem:[#allocation103_spill] sm:$0xff] %v22067_v61  ;;  %v18819_v29 = vld [vmem:[%s26097_s2 + $0x141c] ss:$24 sps:$4 sm:$0xff]   ;;  %v452_v23 = vld [vmem:[%s20162_s20 + $0x3a8] sm:$0xff] }
 0x2a4   : > { %8772 = vmatpush1.bf16.msra.mxu1 %v18802_v26  ;;  %v460_v26 = vld [vmem:[%s20162_s20 + $0x3e8] sm:$0xff] }
 0x2a5   : > { %8773 = vmatprep.subr.bf16.mxu1 %v18810_v21  ;;  %7388 = vmatpush1.bf16.msra.mxu0 %v18820_v62  ;;  %v18817_v62 = vld [vmem:[%s26097_s2 + $0x1418] ss:$24 sps:$4 sm:$0xff]   ;;  %v18828_v21 = vld [vmem:[%s26097_s2 + $0x144c] ss:$24 sps:$4 sm:$0xff]  }
 0x2a6   : > { %7279 = vmatmul.mubr.bf16.gmra.mrb[20].mxu0 %v22065_v27  ;;  %7389 = vmatprep.subr.bf16.mxu0 %v18825_v36  ;;  %v18826_v36 = vld [vmem:[%s26097_s2 + $0x1448] ss:$24 sps:$4 sm:$0xff]  }
 0x2a7   : > { %8663 = vmatmul.mubr.bf16.gmra.mrb[20].mxu1 %v22065_v27  ;;  %7288 = vmatprep.mubr.bf16.mxu0 %v22067_v61  ;;  %v18829_v27 = vld [vmem:[%s26097_s2 + $0x1410] ss:$24 sps:$4 sm:$0xff]  }
 0x2a8   : > { %8672 = vmatprep.mubr.bf16.mxu1 %v22067_v61  ;;  %8774 = vmatpush1.bf16.msra.mxu1 %v18808_v25  ;;  %v22099_v61 = vcombine.low %v436_v49, %v444_v13  ;;  %v22101_v25 = vcombine.high %v452_v23, %v460_v26  ;;  %v18832_v49 = vld [vmem:[%s26097_s2 + $0x1440] ss:$24 sps:$4 sm:$0xff]   ;;  %v18837_v13 = vld [vmem:[%s26097_s2 + $0x147c] ss:$24 sps:$4 sm:$0xff]  }
 0x2a9   : > { %8775 = vmatprep.subr.bf16.mxu1 %v18819_v29  ;;  %7390 = vmatpush1.bf16.msra.mxu0 %v18823_v57  ;;  %v18834_v29 = vld [vmem:[%s26097_s2 + $0x1444] ss:$24 sps:$4 sm:$0xff]   ;;  %v18840_v57 = vld [vmem:[%s26097_s2 + $0x1474] ss:$24 sps:$4 sm:$0xff]  }
 0x2aa   : > { %26460 = vst [vmem:[#allocation104_spill] sm:$0xff] %v22099_v61  ;;  %7391 = vmatprep.subr.bf16.mxu0 %v18831_v46  ;;  %26461 = vst [vmem:[#allocation105_spill] sm:$0xff] %v22101_v25  ;;  %v476_v46 = vld [vmem:[%s20162_s20 + $0x468] sm:$0xff] }
 0x2ac   : > { %8776 = vmatpush1.bf16.msra.mxu1 %v18817_v62  ;;  %v18835_v62 = vld [vmem:[%s26097_s2 + $0x1478] ss:$24 sps:$4 sm:$0xff]  }
 0x2ad   : > { %8777 = vmatprep.subr.bf16.mxu1 %v18828_v21  ;;  %7392 = vmatpush1.bf16.msra.mxu0 %v18829_v27  ;;  %v468_v27 = vld [vmem:[%s20162_s20 + $0x428] sm:$0xff] }
 0x2ae   : > { %7289 = vmatmul.mubr.bf16.gmra.mrb[24].mxu0 %v22099_v61  ;;  %7393 = vmatprep.subr.bf16.mxu0 %v18834_v29  ;;  %v18838_v21 = vld [vmem:[%s26097_s2 + $0x1470] ss:$24 sps:$4 sm:$0xff]  }
 0x2af   : > { %8673 = vmatmul.mubr.bf16.gmra.mrb[24].mxu1 %v22099_v61  ;;  %7298 = vmatprep.mubr.bf16.mxu0 %v22101_v25  ;;  %v18843_v61 = vld [vmem:[%s26097_s2 + $0x14ac] ss:$24 sps:$4 sm:$0xff]   ;;  %v18841_v29 = vld [vmem:[%s26097_s2 + $0x14a8] ss:$24 sps:$4 sm:$0xff]  }
 0x2b0   : > { %8682 = vmatprep.mubr.bf16.mxu1 %v22101_v25  ;;  %8778 = vmatpush1.bf16.msra.mxu1 %v18826_v36  ;;  %v22133_v25 = vcombine.low %v452_v23, %v460_v26  ;;  %v22135_v36 = vcombine.high %v468_v27, %v476_v46  ;;  %v18844_v23 = vld [vmem:[%s26097_s2 + $0x14a0] ss:$24 sps:$4 sm:$0xff]   ;;  %v18852_v26 = vld [vmem:[%s26097_s2 + $0x14dc] ss:$24 sps:$4 sm:$0xff]  }
 0x2b1   : > { %8779 = vmatprep.subr.bf16.mxu1 %v18837_v13  ;;  %7394 = vmatpush1.bf16.msra.mxu0 %v18832_v49  ;;  %v18846_v49 = vld [vmem:[%s26097_s2 + $0x14a4] ss:$24 sps:$4 sm:$0xff]   ;;  %v18849_v13 = vld [vmem:[%s26097_s2 + $0x14d4] ss:$24 sps:$4 sm:$0xff]  }
 0x2b2   : > { %26462 = vst [vmem:[#allocation106_spill] sm:$0xff] %v22133_v25  ;;  %7395 = vmatprep.subr.bf16.mxu0 %v18840_v57  ;;  %26463 = vst [vmem:[#allocation107_spill] sm:$0xff] %v22135_v36  ;;  %v492_v57 = vld [vmem:[%s20162_s20 + $0x4e8] sm:$0xff] }
 0x2b4   : > { %8780 = vmatpush1.bf16.msra.mxu1 %v18835_v62  ;;  %v18850_v62 = vld [vmem:[%s26097_s2 + $0x14d8] ss:$24 sps:$4 sm:$0xff]  }
 0x2b5   : > { %7396 = vmatpush1.bf16.msra.mxu0 %v18838_v21  ;;  %8781 = vmatprep.subr.bf16.mxu1 %v18843_v61  ;;  %v484_v61 = vld [vmem:[%s20162_s20 + $0x4a8] sm:$0xff] }
 0x2b6   : > { %7299 = vmatmul.mubr.bf16.gmra.mrb[28].mxu0 %v22133_v25  ;;  %7397 = vmatprep.subr.bf16.mxu0 %v18846_v49  ;;  %v18847_v21 = vld [vmem:[%s26097_s2 + $0x14d0] ss:$24 sps:$4 sm:$0xff]   ;;  %v18876_v49 = vld [vmem:[%s26097_s2 + $0x1504] ss:$24 sps:$4 sm:$0xff]  }
 0x2b7   : > { %8683 = vmatmul.mubr.bf16.gmra.mrb[28].mxu1 %v22133_v25  ;;  %7308 = vmatprep.mubr.bf16.mxu0 %v22135_v36  ;;  %v22167_v25 = vcombine.low %v468_v27, %v476_v46  ;;  %v500_v27 = vld [vmem:[%s20162_s20 + $0x528] sm:$0xff] }
 0x2b8   : > { %8692 = vmatprep.mubr.bf16.mxu1 %v22135_v36  ;;  %8782 = vmatpush1.bf16.msra.mxu1 %v18841_v29  ;;  %v18855_v36 = vld [vmem:[%s26097_s2 + $0x150c] ss:$24 sps:$4 sm:$0xff]   ;;  %v22169_v29 = vcombine.high %v484_v61, %v492_v57 }
 0x2b9   : > { %7398 = vmatpush1.bf16.msra.mxu0 %v18844_v23  ;;  %8783 = vmatprep.subr.bf16.mxu1 %v18852_v26  ;;  %26464 = vst [vmem:[#allocation108_spill] sm:$0xff] %v22167_v25  ;;  %v508_v46 = vld [vmem:[%s20162_s20 + $0x568] sm:$0xff]  ;;  %v22180_v23 = vcombine.low %v484_v61, %v492_v57 }
 0x2ba   : > { %7399 = vmatprep.subr.bf16.mxu0 %v18849_v13  ;;  %26465 = vst [vmem:[#allocation109_spill] sm:$0xff] %v22169_v29  ;;  %v22182_v26 = vcombine.high %v500_v27, %v508_v46  ;;  %v524_v13 = vld [vmem:[%s20162_s20 + $0x5e8] sm:$0xff] }
 0x2bb   : > { %26466 = vst [vmem:[#allocation110_spill] sm:$0xff] %v22180_v23  ;;  %v532_v61 = vld [vmem:[%s20162_s20 + $0x628] sm:$0xff] }
 0x2bc   : > { %8784 = vmatpush1.bf16.msra.mxu1 %v18850_v62  ;;  %26467 = vst [vmem:[#allocation111_spill] sm:$0xff] %v22182_v26  ;;  %v22190_v62 = vcombine.low %v500_v27, %v508_v46  ;;  %v540_v57 = vld [vmem:[%s20162_s20 + $0x668] sm:$0xff] }
 0x2bd   : > { %7400 = vmatpush1.bf16.msra.mxu0 %v18847_v21  ;;  %8926 = vmatprep.subr.bf16.mxu1 %v18855_v36  ;;  %v516_v36 = vld [vmem:[%s20162_s20 + $0x5a8] sm:$0xff] }
 0x2be   : > { %7309 = vmatmul.mubr.bf16.gmra.mrb[32].mxu0 %v22167_v25  ;;  %7542 = vmatprep.subr.bf16.mxu0 %v18876_v49  ;;  %26468 = vst [vmem:[#allocation112_spill] sm:$0xff] %v22190_v62  ;;  %v22192_v21 = vcombine.high %v516_v36, %v524_v13  ;;  %v22200_v49 = vcombine.low %v516_v36, %v524_v13  ;;  %v548_v27 = vld [vmem:[%s20162_s20 + $0x6a8] sm:$0xff]  ;;  %v341_v36 = vld [vmem:[%s20162_s20 + $0x30] sm:$0xff] }
 0x2bf   : > { %8693 = vmatmul.mubr.bf16.gmra.mrb[32].mxu1 %v22167_v25  ;;  %7318 = vmatprep.mubr.bf16.mxu0 %v22169_v29  ;;  %v556_v46 = vld [vmem:[%s20162_s20 + $0x6e8] sm:$0xff]  ;;  %v349_v13 = vld [vmem:[%s20162_s20 + $0x70] sm:$0xff] }
 0x2c0   : > { %8702 = vmatprep.mubr.bf16.mxu1 %v22169_v29  ;;  %26469 = vst [vmem:[#allocation113_spill] sm:$0xff] %v22192_v21  ;;  %26470 = vst [vmem:[#allocation114_spill] sm:$0xff] %v22200_v49 }
 0x2c6   : > { %7319 = vmatmul.mubr.bf16.gmra.mrb[36].mxu0 %v22180_v23 }
 0x2c7   : > { %8703 = vmatmul.mubr.bf16.gmra.mrb[36].mxu1 %v22180_v23  ;;  %7328 = vmatprep.mubr.bf16.mxu0 %v22182_v26  ;;  %v381_v23 = vld [vmem:[%s20162_s20 + $0x170] sm:$0xff] }
 0x2c8   : > { %8712 = vmatprep.mubr.bf16.mxu1 %v22182_v26  ;;  %v22202_v26 = vcombine.high %v532_v61, %v540_v57 }
 0x2ca   : > { %26471 = vst [vmem:[#allocation115_spill] sm:$0xff] %v22202_v26 }
 0x2ce   : > { %7329 = vmatmul.mubr.bf16.gmra.mrb[40].mxu0 %v22190_v62 }
 0x2cf   : > { %8713 = vmatmul.mubr.bf16.gmra.mrb[40].mxu1 %v22190_v62  ;;  %7338 = vmatprep.mubr.bf16.mxu0 %v22192_v21  ;;  %v22212_v62 = vcombine.high %v548_v27, %v556_v46 }
 0x2d0   : > { %8722 = vmatprep.mubr.bf16.mxu1 %v22192_v21  ;;  %v22210_v21 = vcombine.low %v532_v61, %v540_v57  ;;  %v357_v61 = vld [vmem:[%s20162_s20 + $0xb0] sm:$0xff] }
 0x2d1   : > { %26473 = vst [vmem:[#allocation117_spill] sm:$0xff] %v22212_v62  ;;  %v365_v57 = vld [vmem:[%s20162_s20 + $0xf0] sm:$0xff] }
 0x2d2   : > { %26472 = vst [vmem:[#allocation116_spill] sm:$0xff] %v22210_v21  ;;  %v22261_v29 = vcombine.low %v357_v61, %v365_v57 }
 0x2d4   : > { %26478 = vst [vmem:[#allocation122_spill] sm:$0xff] %v22261_v29 }
 0x2d6   : > { %7339 = vmatmul.mubr.bf16.gmra.mrb[44].mxu0 %v22200_v49 }
 0x2d7   : > { %8723 = vmatmul.mubr.bf16.gmra.mrb[44].mxu1 %v22200_v49  ;;  %7348 = vmatprep.mubr.bf16.mxu0 %v22202_v26  ;;  %v22220_v49 = vcombine.low %v548_v27, %v556_v46  ;;  %v18853_v27 = vld [vmem:[%s26097_s2 + $0x1508] ss:$24 sps:$4 sm:$0xff]   ;;  %v22235_v46 = vcombine.high %v357_v61, %v365_v57  ;;  %v18864_v61 = vld [vmem:[%s26097_s2 + $0x159c] ss:$24 sps:$4 sm:$0xff]  }
 0x2d8   : > { %8732 = vmatprep.mubr.bf16.mxu1 %v22202_v26  ;;  %v22222_v26 = vcombine.high %v341_v36, %v349_v13  ;;  %v18883_v57 = vld [vmem:[%s26097_s2 + $0x1560] ss:$24 sps:$4 sm:$0xff]  }
 0x2d9   : > { %26474 = vst [vmem:[#allocation118_spill] sm:$0xff] %v22220_v49  ;;  %26477 = vst [vmem:[#allocation121_spill] sm:$0xff] %v22235_v46 }
 0x2da   : > { %26475 = vst [vmem:[#allocation119_spill] sm:$0xff] %v22222_v26 }
 0x2de   : > { %7349 = vmatmul.mubr.bf16.gmra.mrb[48].mxu0 %v22210_v21 }
 0x2df   : > { %8733 = vmatmul.mubr.bf16.gmra.mrb[48].mxu1 %v22210_v21  ;;  %7358 = vmatprep.mubr.bf16.mxu0 %v22212_v62  ;;  %v22230_v21 = vcombine.low %v341_v36, %v349_v13  ;;  %v18879_v36 = vld [vmem:[%s26097_s2 + $0x1534] ss:$24 sps:$4 sm:$0xff]   ;;  %v18856_v13 = vld [vmem:[%s26097_s2 + $0x1538] ss:$24 sps:$4 sm:$0xff]  }
 0x2e0   : > { %8742 = vmatprep.mubr.bf16.mxu1 %v22212_v62  ;;  %v373_v62 = vld [vmem:[%s20162_s20 + $0x130] sm:$0xff] }
 0x2e1   : > { %26476 = vst [vmem:[#allocation120_spill] sm:$0xff] %v22230_v21  ;;  %v22263_v25 = vcombine.high %v373_v62, %v381_v23 }
 0x2e3   : > { %26479 = vst [vmem:[#allocation123_spill] sm:$0xff] %v22263_v25 }
 0x2e6   : > { %7359 = vmatmul.mubr.bf16.gmra.mrb[52].mxu0 %v22220_v49 }
 0x2e7   : > { %8743 = vmatmul.mubr.bf16.gmra.mrb[52].mxu1 %v22220_v49  ;;  %7401 = vmatprep.mubr.bf16.mxu0 %v22222_v26  ;;  %v18858_v49 = vld [vmem:[%s26097_s2 + $0x153c] ss:$24 sps:$4 sm:$0xff]  }
 0x2e8   : > { %8785 = vmatprep.mubr.bf16.mxu1 %v22222_v26  ;;  %v18874_v26 = vld [vmem:[%s26097_s2 + $0x1500] ss:$24 sps:$4 sm:$0xff]  }
 0x2ee   : > { %7402 = vmatmul.mubr.bf16.vlgmr.msra.gmra.mrb[0].mxu0 %v22230_v21 }
 0x2ef   : > { %8786 = vmatmul.mubr.bf16.vlgmr.msra.gmra.mrb[0].mxu1 %v22230_v21  ;;  %7411 = vmatprep.mubr.bf16.mxu0 %v22235_v46  ;;  %v18861_v21 = vld [vmem:[%s26097_s2 + $0x156c] ss:$24 sps:$4 sm:$0xff]  }
 0x2f0   : > { %8927 = vmatpush1.bf16.msra.mxu1 %v18853_v27  ;;  %8795 = vmatprep.mubr.bf16.mxu1 %v22235_v46  ;;  %v18877_v27 = vld [vmem:[%s26097_s2 + $0x1530] ss:$24 sps:$4 sm:$0xff]  }
 0x2f1   : > { %8928 = vmatprep.subr.bf16.mxu1 %v18858_v49  ;;  %7543 = vmatpush1.bf16.msra.mxu0 %v18874_v26  ;;  %v18859_v49 = vld [vmem:[%s26097_s2 + $0x1568] ss:$24 sps:$4 sm:$0xff]   ;;  %v18885_v26 = vld [vmem:[%s26097_s2 + $0x1564] ss:$24 sps:$4 sm:$0xff]  }
 0x2f2   : > { %7544 = vmatprep.subr.bf16.mxu0 %v18879_v36  ;;  %v389_v36 = vld [vmem:[%s20162_s20 + $0x1b0] sm:$0xff] }
 0x2f3   : > { %v18886_v46 = vld [vmem:[%s26097_s2 + $0x1590] ss:$24 sps:$4 sm:$0xff]  }
 0x2f4   : > { %8929 = vmatpush1.bf16.msra.mxu1 %v18856_v13  ;;  %v397_v13 = vld [vmem:[%s20162_s20 + $0x1f0] sm:$0xff] }
 0x2f5   : > { %8930 = vmatprep.subr.bf16.mxu1 %v18861_v21  ;;  %7545 = vmatpush1.bf16.msra.mxu0 %v18877_v27  ;;  %v18888_v21 = vld [vmem:[%s26097_s2 + $0x1594] ss:$24 sps:$4 sm:$0xff]   ;;  %v18862_v27 = vld [vmem:[%s26097_s2 + $0x1598] ss:$24 sps:$4 sm:$0xff]  }
 0x2f6   : > { %7412 = vmatmul.mubr.bf16.gmra.mrb[4].mxu0 %v22261_v29  ;;  %7546 = vmatprep.subr.bf16.mxu0 %v18885_v26  ;;  %v18865_v26 = vld [vmem:[%s26097_s2 + $0x15c8] ss:$24 sps:$4 sm:$0xff]  }
 0x2f7   : > { %8796 = vmatmul.mubr.bf16.gmra.mrb[4].mxu1 %v22261_v29  ;;  %7421 = vmatprep.mubr.bf16.mxu0 %v22263_v25  ;;  %v18867_v29 = vld [vmem:[%s26097_s2 + $0x15cc] ss:$24 sps:$4 sm:$0xff]  }
 0x2f8   : > { %8805 = vmatprep.mubr.bf16.mxu1 %v22263_v25  ;;  %8931 = vmatpush1.bf16.msra.mxu1 %v18859_v49  ;;  %v22295_v25 = vcombine.low %v373_v62, %v381_v23  ;;  %v22297_v49 = vcombine.high %v389_v36, %v397_v13  ;;  %v18892_v23 = vld [vmem:[%s26097_s2 + $0x15c0] ss:$24 sps:$4 sm:$0xff]   ;;  %v18897_v62 = vld [vmem:[%s26097_s2 + $0x15f4] ss:$24 sps:$4 sm:$0xff]  }
 0x2f9   : > { %8932 = vmatprep.subr.bf16.mxu1 %v18864_v61  ;;  %7547 = vmatpush1.bf16.msra.mxu0 %v18883_v57  ;;  %v18894_v61 = vld [vmem:[%s26097_s2 + $0x15c4] ss:$24 sps:$4 sm:$0xff]  }
 0x2fa   : > { %26480 = vst [vmem:[#allocation124_spill] sm:$0xff] %v22295_v25  ;;  %7548 = vmatprep.subr.bf16.mxu0 %v18888_v21  ;;  %26481 = vst [vmem:[#allocation125_spill] sm:$0xff] %v22297_v49  ;;  %v18870_v57 = vld [vmem:[%s26097_s2 + $0x15fc] ss:$24 sps:$4 sm:$0xff]  }
 0x2fb   : > { %v413_v21 = vld [vmem:[%s20162_s20 + $0x270] sm:$0xff] }
 0x2fc   : > { %8933 = vmatpush1.bf16.msra.mxu1 %v18862_v27  ;;  %v18873_v27 = vld [vmem:[%s26097_s2 + $0x162c] ss:$24 sps:$4 sm:$0xff]  }
 0x2fd   : > { %8934 = vmatprep.subr.bf16.mxu1 %v18867_v29  ;;  %7549 = vmatpush1.bf16.msra.mxu0 %v18886_v46  ;;  %v405_v29 = vld [vmem:[%s20162_s20 + $0x230] sm:$0xff] }
 0x2fe   : > { %7422 = vmatmul.mubr.bf16.gmra.mrb[8].mxu0 %v22295_v25  ;;  %v18868_v46 = vld [vmem:[%s26097_s2 + $0x15f8] ss:$24 sps:$4 sm:$0xff]   ;;  %7550 = vmatprep.subr.bf16.mxu0 %v18894_v61  ;;  %v18871_v61 = vld [vmem:[%s26097_s2 + $0x1628] ss:$24 sps:$4 sm:$0xff]  }
 0x2ff   : > { %8806 = vmatmul.mubr.bf16.gmra.mrb[8].mxu1 %v22295_v25  ;;  %7431 = vmatprep.mubr.bf16.mxu0 %v22297_v49  ;;  %v18895_v25 = vld [vmem:[%s26097_s2 + $0x15f0] ss:$24 sps:$4 sm:$0xff]  }
 0x300   : > { %8815 = vmatprep.mubr.bf16.mxu1 %v22297_v49  ;;  %8935 = vmatpush1.bf16.msra.mxu1 %v18865_v26  ;;  %v22329_v49 = vcombine.low %v389_v36, %v397_v13  ;;  %v22331_v26 = vcombine.high %v405_v29, %v413_v21  ;;  %v18901_v36 = vld [vmem:[%s26097_s2 + $0x1620] ss:$24 sps:$4 sm:$0xff]   ;;  %v18909_v13 = vld [vmem:[%s26097_s2 + $0x1654] ss:$24 sps:$4 sm:$0xff]  }
 0x301   : > { %8936 = vmatprep.subr.bf16.mxu1 %v18870_v57  ;;  %7551 = vmatpush1.bf16.msra.mxu0 %v18892_v23  ;;  %v18903_v57 = vld [vmem:[%s26097_s2 + $0x1624] ss:$24 sps:$4 sm:$0xff]  }
 0x302   : > { %26482 = vst [vmem:[#allocation126_spill] sm:$0xff] %v22329_v49  ;;  %7552 = vmatprep.subr.bf16.mxu0 %v18897_v62  ;;  %26483 = vst [vmem:[#allocation127_spill] sm:$0xff] %v22331_v26  ;;  %v18882_v23 = vld [vmem:[%s26097_s2 + $0x165c] ss:$24 sps:$4 sm:$0xff]  }
 0x303   : > { %v421_v62 = vld [vmem:[%s20162_s20 + $0x2b0] sm:$0xff] }
 0x304   : > { %8937 = vmatpush1.bf16.msra.mxu1 %v18868_v46  ;;  %v429_v46 = vld [vmem:[%s20162_s20 + $0x2f0] sm:$0xff] }
 0x305   : > { %8938 = vmatprep.subr.bf16.mxu1 %v18873_v27  ;;  %7553 = vmatpush1.bf16.msra.mxu0 %v18895_v25  ;;  %v18880_v25 = vld [vmem:[%s26097_s2 + $0x1658] ss:$24 sps:$4 sm:$0xff]   ;;  %v18891_v27 = vld [vmem:[%s26097_s2 + $0x168c] ss:$24 sps:$4 sm:$0xff]  }
 0x306   : > { %7432 = vmatmul.mubr.bf16.gmra.mrb[12].mxu0 %v22329_v49  ;;  %7554 = vmatprep.subr.bf16.mxu0 %v18903_v57  ;;  %v18889_v57 = vld [vmem:[%s26097_s2 + $0x1688] ss:$24 sps:$4 sm:$0xff]  }
 0x307   : > { %8816 = vmatmul.mubr.bf16.gmra.mrb[12].mxu1 %v22329_v49  ;;  %7441 = vmatprep.mubr.bf16.mxu0 %v22331_v26  ;;  %v18907_v49 = vld [vmem:[%s26097_s2 + $0x1650] ss:$24 sps:$4 sm:$0xff]  }
 0x308   : > { %8825 = vmatprep.mubr.bf16.mxu1 %v22331_v26  ;;  %8939 = vmatpush1.bf16.msra.mxu1 %v18871_v61  ;;  %v22363_v26 = vcombine.low %v405_v29, %v413_v21  ;;  %v22365_v61 = vcombine.high %v421_v62, %v429_v46  ;;  %v18910_v29 = vld [vmem:[%s26097_s2 + $0x1680] ss:$24 sps:$4 sm:$0xff]   ;;  %v18918_v21 = vld [vmem:[%s26097_s2 + $0x16b4] ss:$24 sps:$4 sm:$0xff]  }
 0x309   : > { %8940 = vmatprep.subr.bf16.mxu1 %v18882_v23  ;;  %7555 = vmatpush1.bf16.msra.mxu0 %v18901_v36  ;;  %v18912_v23 = vld [vmem:[%s26097_s2 + $0x1684] ss:$24 sps:$4 sm:$0xff]  }
 0x30a   : > { %26484 = vst [vmem:[#allocation128_spill] sm:$0xff] %v22363_v26  ;;  %7556 = vmatprep.subr.bf16.mxu0 %v18909_v13  ;;  %26485 = vst [vmem:[#allocation129_spill] sm:$0xff] %v22365_v61  ;;  %v18900_v36 = vld [vmem:[%s26097_s2 + $0x16bc] ss:$24 sps:$4 sm:$0xff]  }
 0x30b   : > { %v437_v13 = vld [vmem:[%s20162_s20 + $0x330] sm:$0xff] }
 0x30c   : > { %8941 = vmatpush1.bf16.msra.mxu1 %v18880_v25  ;;  %v445_v25 = vld [vmem:[%s20162_s20 + $0x370] sm:$0xff] }
 0x30d   : > { %8942 = vmatprep.subr.bf16.mxu1 %v18891_v27  ;;  %7557 = vmatpush1.bf16.msra.mxu0 %v18907_v49  ;;  %v18898_v49 = vld [vmem:[%s26097_s2 + $0x16b8] ss:$24 sps:$4 sm:$0xff]   ;;  %v18906_v27 = vld [vmem:[%s26097_s2 + $0x16ec] ss:$24 sps:$4 sm:$0xff]  }
 0x30e   : > { %7442 = vmatmul.mubr.bf16.gmra.mrb[16].mxu0 %v22363_v26  ;;  %7558 = vmatprep.subr.bf16.mxu0 %v18912_v23  ;;  %v18904_v23 = vld [vmem:[%s26097_s2 + $0x16e8] ss:$24 sps:$4 sm:$0xff]  }
 0x30f   : > { %8826 = vmatmul.mubr.bf16.gmra.mrb[16].mxu1 %v22363_v26  ;;  %7451 = vmatprep.mubr.bf16.mxu0 %v22365_v61  ;;  %v18916_v26 = vld [vmem:[%s26097_s2 + $0x16b0] ss:$24 sps:$4 sm:$0xff]  }
 0x310   : > { %8835 = vmatprep.mubr.bf16.mxu1 %v22365_v61  ;;  %8943 = vmatpush1.bf16.msra.mxu1 %v18889_v57  ;;  %v22397_v61 = vcombine.low %v421_v62, %v429_v46  ;;  %v22399_v57 = vcombine.high %v437_v13, %v445_v25  ;;  %v18919_v62 = vld [vmem:[%s26097_s2 + $0x16e0] ss:$24 sps:$4 sm:$0xff]   ;;  %v18927_v46 = vld [vmem:[%s26097_s2 + $0x1714] ss:$24 sps:$4 sm:$0xff]  }
 0x311   : > { %8944 = vmatprep.subr.bf16.mxu1 %v18900_v36  ;;  %7559 = vmatpush1.bf16.msra.mxu0 %v18910_v29  ;;  %v18921_v36 = vld [vmem:[%s26097_s2 + $0x16e4] ss:$24 sps:$4 sm:$0xff]  }
 0x312   : > { %26486 = vst [vmem:[#allocation130_spill] sm:$0xff] %v22397_v61  ;;  %7560 = vmatprep.subr.bf16.mxu0 %v18918_v21  ;;  %26487 = vst [vmem:[#allocation131_spill] sm:$0xff] %v22399_v57  ;;  %v18915_v29 = vld [vmem:[%s26097_s2 + $0x171c] ss:$24 sps:$4 sm:$0xff]  }
 0x313   : > { %v453_v21 = vld [vmem:[%s20162_s20 + $0x3b0] sm:$0xff] }
 0x314   : > { %8945 = vmatpush1.bf16.msra.mxu1 %v18898_v49  ;;  %v461_v49 = vld [vmem:[%s20162_s20 + $0x3f0] sm:$0xff] }
 0x315   : > { %8946 = vmatprep.subr.bf16.mxu1 %v18906_v27  ;;  %7561 = vmatpush1.bf16.msra.mxu0 %v18916_v26  ;;  %v18913_v26 = vld [vmem:[%s26097_s2 + $0x1718] ss:$24 sps:$4 sm:$0xff]   ;;  %v18924_v27 = vld [vmem:[%s26097_s2 + $0x174c] ss:$24 sps:$4 sm:$0xff]  }
 0x316   : > { %7452 = vmatmul.mubr.bf16.gmra.mrb[20].mxu0 %v22397_v61  ;;  %7562 = vmatprep.subr.bf16.mxu0 %v18921_v36  ;;  %v18922_v36 = vld [vmem:[%s26097_s2 + $0x1748] ss:$24 sps:$4 sm:$0xff]  }
 0x317   : > { %8836 = vmatmul.mubr.bf16.gmra.mrb[20].mxu1 %v22397_v61  ;;  %7461 = vmatprep.mubr.bf16.mxu0 %v22399_v57  ;;  %v18925_v61 = vld [vmem:[%s26097_s2 + $0x1710] ss:$24 sps:$4 sm:$0xff]  }
 0x318   : > { %8845 = vmatprep.mubr.bf16.mxu1 %v22399_v57  ;;  %8947 = vmatpush1.bf16.msra.mxu1 %v18904_v23  ;;  %v22431_v57 = vcombine.low %v437_v13, %v445_v25  ;;  %v22433_v23 = vcombine.high %v453_v21, %v461_v49  ;;  %v18928_v13 = vld [vmem:[%s26097_s2 + $0x1740] ss:$24 sps:$4 sm:$0xff]   ;;  %v18933_v25 = vld [vmem:[%s26097_s2 + $0x177c] ss:$24 sps:$4 sm:$0xff]  }
 0x319   : > { %8948 = vmatprep.subr.bf16.mxu1 %v18915_v29  ;;  %7563 = vmatpush1.bf16.msra.mxu0 %v18919_v62  ;;  %v18930_v29 = vld [vmem:[%s26097_s2 + $0x1744] ss:$24 sps:$4 sm:$0xff]   ;;  %v18936_v62 = vld [vmem:[%s26097_s2 + $0x1774] ss:$24 sps:$4 sm:$0xff]  }
 0x31a   : > { %26488 = vst [vmem:[#allocation132_spill] sm:$0xff] %v22431_v57  ;;  %7564 = vmatprep.subr.bf16.mxu0 %v18927_v46  ;;  %26489 = vst [vmem:[#allocation133_spill] sm:$0xff] %v22433_v23  ;;  %v477_v46 = vld [vmem:[%s20162_s20 + $0x470] sm:$0xff] }
 0x31c   : > { %8949 = vmatpush1.bf16.msra.mxu1 %v18913_v26  ;;  %v18931_v26 = vld [vmem:[%s26097_s2 + $0x1778] ss:$24 sps:$4 sm:$0xff]  }
 0x31d   : > { %8950 = vmatprep.subr.bf16.mxu1 %v18924_v27  ;;  %7565 = vmatpush1.bf16.msra.mxu0 %v18925_v61  ;;  %v469_v61 = vld [vmem:[%s20162_s20 + $0x430] sm:$0xff] }
 0x31e   : > { %7462 = vmatmul.mubr.bf16.gmra.mrb[24].mxu0 %v22431_v57  ;;  %7566 = vmatprep.subr.bf16.mxu0 %v18930_v29  ;;  %v18934_v27 = vld [vmem:[%s26097_s2 + $0x1770] ss:$24 sps:$4 sm:$0xff]  }
 0x31f   : > { %8846 = vmatmul.mubr.bf16.gmra.mrb[24].mxu1 %v22431_v57  ;;  %7471 = vmatprep.mubr.bf16.mxu0 %v22433_v23  ;;  %v18939_v57 = vld [vmem:[%s26097_s2 + $0x17ac] ss:$24 sps:$4 sm:$0xff]   ;;  %v18937_v29 = vld [vmem:[%s26097_s2 + $0x17a8] ss:$24 sps:$4 sm:$0xff]  }
 0x320   : > { %8855 = vmatprep.mubr.bf16.mxu1 %v22433_v23  ;;  %8951 = vmatpush1.bf16.msra.mxu1 %v18922_v36  ;;  %v22465_v23 = vcombine.low %v453_v21, %v461_v49  ;;  %v22467_v36 = vcombine.high %v469_v61, %v477_v46  ;;  %v18940_v21 = vld [vmem:[%s26097_s2 + $0x17a0] ss:$24 sps:$4 sm:$0xff]   ;;  %v18948_v49 = vld [vmem:[%s26097_s2 + $0x17dc] ss:$24 sps:$4 sm:$0xff]  }
 0x321   : > { %8952 = vmatprep.subr.bf16.mxu1 %v18933_v25  ;;  %7567 = vmatpush1.bf16.msra.mxu0 %v18928_v13  ;;  %v18942_v13 = vld [vmem:[%s26097_s2 + $0x17a4] ss:$24 sps:$4 sm:$0xff]   ;;  %v18945_v25 = vld [vmem:[%s26097_s2 + $0x17d4] ss:$24 sps:$4 sm:$0xff]  }
 0x322   : > { %26490 = vst [vmem:[#allocation134_spill] sm:$0xff] %v22465_v23  ;;  %7568 = vmatprep.subr.bf16.mxu0 %v18936_v62  ;;  %26491 = vst [vmem:[#allocation135_spill] sm:$0xff] %v22467_v36  ;;  %v493_v62 = vld [vmem:[%s20162_s20 + $0x4f0] sm:$0xff] }
 0x324   : > { %8953 = vmatpush1.bf16.msra.mxu1 %v18931_v26  ;;  %v18946_v26 = vld [vmem:[%s26097_s2 + $0x17d8] ss:$24 sps:$4 sm:$0xff]  }
 0x325   : > { %7569 = vmatpush1.bf16.msra.mxu0 %v18934_v27  ;;  %8954 = vmatprep.subr.bf16.mxu1 %v18939_v57  ;;  %v485_v57 = vld [vmem:[%s20162_s20 + $0x4b0] sm:$0xff] }
 0x326   : > { %7472 = vmatmul.mubr.bf16.gmra.mrb[28].mxu0 %v22465_v23  ;;  %7570 = vmatprep.subr.bf16.mxu0 %v18942_v13  ;;  %v18943_v27 = vld [vmem:[%s26097_s2 + $0x17d0] ss:$24 sps:$4 sm:$0xff]   ;;  %v18972_v13 = vld [vmem:[%s26097_s2 + $0x14] ss:$24 sps:$4 sm:$0xff]  }
 0x327   : > { %8856 = vmatmul.mubr.bf16.gmra.mrb[28].mxu1 %v22465_v23  ;;  %7481 = vmatprep.mubr.bf16.mxu0 %v22467_v36  ;;  %v22499_v23 = vcombine.low %v469_v61, %v477_v46  ;;  %v501_v61 = vld [vmem:[%s20162_s20 + $0x530] sm:$0xff] }
 0x328   : > { %8865 = vmatprep.mubr.bf16.mxu1 %v22467_v36  ;;  %8955 = vmatpush1.bf16.msra.mxu1 %v18937_v29  ;;  %v18951_v36 = vld [vmem:[%s26098_s3 + $0x4] ss:$24 sps:$4 sm:$0xff]   ;;  %v22501_v29 = vcombine.high %v485_v57, %v493_v62  ;;  %v509_v46 = vld [vmem:[%s20162_s20 + $0x570] sm:$0xff] }
 0x329   : > { %7571 = vmatpush1.bf16.msra.mxu0 %v18940_v21  ;;  %8956 = vmatprep.subr.bf16.mxu1 %v18948_v49  ;;  %26492 = vst [vmem:[#allocation136_spill] sm:$0xff] %v22499_v23  ;;  %v22512_v21 = vcombine.low %v485_v57, %v493_v62  ;;  %v22514_v49 = vcombine.high %v501_v61, %v509_v46  ;;  %v533_v57 = vld [vmem:[%s20162_s20 + $0x630] sm:$0xff] }
 0x32a   : > { %7572 = vmatprep.subr.bf16.mxu0 %v18945_v25  ;;  %26493 = vst [vmem:[#allocation137_spill] sm:$0xff] %v22501_v29  ;;  %v525_v25 = vld [vmem:[%s20162_s20 + $0x5f0] sm:$0xff] }
 0x32b   : > { %26494 = vst [vmem:[#allocation138_spill] sm:$0xff] %v22512_v21  ;;  %26495 = vst [vmem:[#allocation139_spill] sm:$0xff] %v22514_v49  ;;  %v541_v62 = vld [vmem:[%s20162_s20 + $0x670] sm:$0xff] }
 0x32c   : > { %8957 = vmatpush1.bf16.msra.mxu1 %v18946_v26  ;;  %v22522_v26 = vcombine.low %v501_v61, %v509_v46  ;;  %v549_v61 = vld [vmem:[%s20162_s20 + $0x6b0] sm:$0xff] }
 0x32d   : > { %7573 = vmatpush1.bf16.msra.mxu0 %v18943_v27  ;;  %12640 = vmatprep.subr.bf16.mxu1 %v18951_v36  ;;  %v517_v36 = vld [vmem:[%s20162_s20 + $0x5b0] sm:$0xff] }
 0x32e   : > { %7482 = vmatmul.mubr.bf16.gmra.mrb[32].mxu0 %v22499_v23  ;;  %9099 = vmatprep.subr.bf16.mxu0 %v18972_v13  ;;  %26496 = vst [vmem:[#allocation140_spill] sm:$0xff] %v22522_v26  ;;  %v22524_v27 = vcombine.high %v517_v36, %v525_v25  ;;  %v22532_v13 = vcombine.low %v517_v36, %v525_v25  ;;  %v557_v46 = vld [vmem:[%s20162_s20 + $0x6f0] sm:$0xff] }
 0x32f   : > { %8866 = vmatmul.mubr.bf16.gmra.mrb[32].mxu1 %v22499_v23  ;;  %7491 = vmatprep.mubr.bf16.mxu0 %v22501_v29  ;;  %v22548_v36 = vcombine.low %v533_v57, %v541_v62  ;;  %v22550_v25 = vcombine.high %v549_v61, %v557_v46 }
 0x330   : > { %8875 = vmatprep.mubr.bf16.mxu1 %v22501_v29  ;;  %26497 = vst [vmem:[#allocation141_spill] sm:$0xff] %v22524_v27  ;;  %26498 = vst [vmem:[#allocation142_spill] sm:$0xff] %v22532_v13 }
 0x331   : > { %26500 = vst [vmem:[#allocation144_spill] sm:$0xff] %v22548_v36  ;;  %26501 = vst [vmem:[#allocation145_spill] sm:$0xff] %v22550_v25 }
 0x336   : > { %7492 = vmatmul.mubr.bf16.gmra.mrb[36].mxu0 %v22512_v21 }
 0x337   : > { %8876 = vmatmul.mubr.bf16.gmra.mrb[36].mxu1 %v22512_v21  ;;  %7501 = vmatprep.mubr.bf16.mxu0 %v22514_v49  ;;  %v382_v21 = vld [vmem:[%s20162_s20 + $0x178] sm:$0xff] }
 0x338   : > { %8885 = vmatprep.mubr.bf16.mxu1 %v22514_v49  ;;  %v22534_v49 = vcombine.high %v533_v57, %v541_v62  ;;  %v358_v57 = vld [vmem:[%s20162_s20 + $0xb8] sm:$0xff] }
 0x339   : > { %v366_v62 = vld [vmem:[%s20162_s20 + $0xf8] sm:$0xff] }
 0x33a   : > { %26499 = vst [vmem:[#allocation143_spill] sm:$0xff] %v22534_v49  ;;  %v22599_v29 = vcombine.low %v358_v57, %v366_v62 }
 0x33c   : > { %26506 = vst [vmem:[#allocation150_spill] sm:$0xff] %v22599_v29 }
 0x33e   : > { %7502 = vmatmul.mubr.bf16.gmra.mrb[40].mxu0 %v22522_v26 }
 0x33f   : > { %8886 = vmatmul.mubr.bf16.gmra.mrb[40].mxu1 %v22522_v26  ;;  %7511 = vmatprep.mubr.bf16.mxu0 %v22524_v27 }
 0x340   : > { %8895 = vmatprep.mubr.bf16.mxu1 %v22524_v27  ;;  %v22558_v27 = vcombine.low %v549_v61, %v557_v46  ;;  %v18949_v61 = vld [vmem:[%s26098_s3] ss:$24 sps:$4 sm:$0xff]   ;;  %v22573_v46 = vcombine.high %v358_v57, %v366_v62  ;;  %v18960_v57 = vld [vmem:[%s26098_s3 + $0x94] ss:$24 sps:$4 sm:$0xff]   ;;  %v18979_v62 = vld [vmem:[%s26097_s2 + $0x70] ss:$24 sps:$4 sm:$0xff]  }
 0x342   : > { %26502 = vst [vmem:[#allocation146_spill] sm:$0xff] %v22558_v27  ;;  %26505 = vst [vmem:[#allocation149_spill] sm:$0xff] %v22573_v46 }
 0x346   : > { %7512 = vmatmul.mubr.bf16.gmra.mrb[44].mxu0 %v22532_v13 }
 0x347   : > { %8896 = vmatmul.mubr.bf16.gmra.mrb[44].mxu1 %v22532_v13  ;;  %7521 = vmatprep.mubr.bf16.mxu0 %v22534_v49  ;;  %v350_v13 = vld [vmem:[%s20162_s20 + $0x78] sm:$0xff] }
 0x348   : > { %8905 = vmatprep.mubr.bf16.mxu1 %v22534_v49  ;;  %v342_v49 = vld [vmem:[%s20162_s20 + $0x38] sm:$0xff] }
 0x349   : > { %v22560_v26 = vcombine.high %v342_v49, %v350_v13 }
 0x34b   : > { %26503 = vst [vmem:[#allocation147_spill] sm:$0xff] %v22560_v26 }
 0x34e   : > { %7522 = vmatmul.mubr.bf16.gmra.mrb[48].mxu0 %v22548_v36 }
 0x34f   : > { %8906 = vmatmul.mubr.bf16.gmra.mrb[48].mxu1 %v22548_v36  ;;  %7531 = vmatprep.mubr.bf16.mxu0 %v22550_v25  ;;  %v22568_v36 = vcombine.low %v342_v49, %v350_v13  ;;  %v18975_v49 = vld [vmem:[%s26097_s2 + $0x44] ss:$24 sps:$4 sm:$0xff]   ;;  %v18952_v13 = vld [vmem:[%s26098_s3 + $0x30] ss:$24 sps:$4 sm:$0xff]  }
 0x350   : > { %8915 = vmatprep.mubr.bf16.mxu1 %v22550_v25  ;;  %v374_v25 = vld [vmem:[%s20162_s20 + $0x138] sm:$0xff] }
 0x351   : > { %26504 = vst [vmem:[#allocation148_spill] sm:$0xff] %v22568_v36  ;;  %v22601_v23 = vcombine.high %v374_v25, %v382_v21 }
 0x353   : > { %26507 = vst [vmem:[#allocation151_spill] sm:$0xff] %v22601_v23 }
 0x356   : > { %7532 = vmatmul.mubr.bf16.gmra.mrb[52].mxu0 %v22558_v27 }
 0x357   : > { %8916 = vmatmul.mubr.bf16.gmra.mrb[52].mxu1 %v22558_v27  ;;  %7574 = vmatprep.mubr.bf16.mxu0 %v22560_v26  ;;  %v18954_v27 = vld [vmem:[%s26098_s3 + $0x34] ss:$24 sps:$4 sm:$0xff]  }
 0x358   : > { %8958 = vmatprep.mubr.bf16.mxu1 %v22560_v26  ;;  %v18970_v26 = vld [vmem:[%s26097_s2 + $0x10] ss:$24 sps:$4 sm:$0xff]  }
 0x35e   : > { %7575 = vmatmul.mubr.bf16.vlgmr.msra.gmra.mrb[0].mxu0 %v22568_v36 }
 0x35f   : > { %8959 = vmatmul.mubr.bf16.vlgmr.msra.gmra.mrb[0].mxu1 %v22568_v36  ;;  %7584 = vmatprep.mubr.bf16.mxu0 %v22573_v46  ;;  %v18957_v36 = vld [vmem:[%s26098_s3 + $0x64] ss:$24 sps:$4 sm:$0xff]  }
 0x360   : > { %12641 = vmatpush1.bf16.msra.mxu1 %v18949_v61  ;;  %8968 = vmatprep.mubr.bf16.mxu1 %v22573_v46  ;;  %v18973_v61 = vld [vmem:[%s26097_s2 + $0x40] ss:$24 sps:$4 sm:$0xff]  }
 0x361   : > { %12642 = vmatprep.subr.bf16.mxu1 %v18954_v27  ;;  %9100 = vmatpush1.bf16.msra.mxu0 %v18970_v26  ;;  %v18955_v27 = vld [vmem:[%s26098_s3 + $0x60] ss:$24 sps:$4 sm:$0xff]   ;;  %v18981_v26 = vld [vmem:[%s26097_s2 + $0x74] ss:$24 sps:$4 sm:$0xff]  }
 0x362   : > { %9101 = vmatprep.subr.bf16.mxu0 %v18975_v49  ;;  %v390_v49 = vld [vmem:[%s20162_s20 + $0x1b8] sm:$0xff] }
 0x363   : > { %v18982_v46 = vld [vmem:[%s26097_s2 + $0xa0] ss:$24 sps:$4 sm:$0xff]  }
 0x364   : > { %12643 = vmatpush1.bf16.msra.mxu1 %v18952_v13  ;;  %v398_v13 = vld [vmem:[%s20162_s20 + $0x1f8] sm:$0xff] }
 0x365   : > { %12644 = vmatprep.subr.bf16.mxu1 %v18957_v36  ;;  %9102 = vmatpush1.bf16.msra.mxu0 %v18973_v61  ;;  %v18984_v36 = vld [vmem:[%s26097_s2 + $0xa4] ss:$24 sps:$4 sm:$0xff]   ;;  %v18958_v61 = vld [vmem:[%s26098_s3 + $0x90] ss:$24 sps:$4 sm:$0xff]  }
 0x366   : > { %7585 = vmatmul.mubr.bf16.gmra.mrb[4].mxu0 %v22599_v29  ;;  %9103 = vmatprep.subr.bf16.mxu0 %v18981_v26  ;;  %v18961_v26 = vld [vmem:[%s26098_s3 + $0xc0] ss:$24 sps:$4 sm:$0xff]  }
 0x367   : > { %8969 = vmatmul.mubr.bf16.gmra.mrb[4].mxu1 %v22599_v29  ;;  %7594 = vmatprep.mubr.bf16.mxu0 %v22601_v23  ;;  %v18963_v29 = vld [vmem:[%s26098_s3 + $0xc4] ss:$24 sps:$4 sm:$0xff]  }
 0x368   : > { %8978 = vmatprep.mubr.bf16.mxu1 %v22601_v23  ;;  %12645 = vmatpush1.bf16.msra.mxu1 %v18955_v27  ;;  %v22633_v23 = vcombine.low %v374_v25, %v382_v21  ;;  %v22635_v27 = vcombine.high %v390_v49, %v398_v13  ;;  %v18988_v21 = vld [vmem:[%s26097_s2 + $0xd0] ss:$24 sps:$4 sm:$0xff]   ;;  %v18993_v25 = vld [vmem:[%s26097_s2 + $0x104] ss:$24 sps:$4 sm:$0xff]  }
 0x369   : > { %12646 = vmatprep.subr.bf16.mxu1 %v18960_v57  ;;  %9104 = vmatpush1.bf16.msra.mxu0 %v18979_v62  ;;  %v18990_v57 = vld [vmem:[%s26097_s2 + $0xd4] ss:$24 sps:$4 sm:$0xff]  }
 0x36a   : > { %26508 = vst [vmem:[#allocation152_spill] sm:$0xff] %v22633_v23  ;;  %9105 = vmatprep.subr.bf16.mxu0 %v18984_v36  ;;  %26509 = vst [vmem:[#allocation153_spill] sm:$0xff] %v22635_v27  ;;  %v18966_v62 = vld [vmem:[%s26098_s3 + $0xf4] ss:$24 sps:$4 sm:$0xff]   ;;  %v414_v36 = vld [vmem:[%s20162_s20 + $0x278] sm:$0xff] }
 0x36c   : > { %12647 = vmatpush1.bf16.msra.mxu1 %v18958_v61  ;;  %v18969_v61 = vld [vmem:[%s26098_s3 + $0x124] ss:$24 sps:$4 sm:$0xff]  }
 0x36d   : > { %12648 = vmatprep.subr.bf16.mxu1 %v18963_v29  ;;  %9106 = vmatpush1.bf16.msra.mxu0 %v18982_v46  ;;  %v406_v29 = vld [vmem:[%s20162_s20 + $0x238] sm:$0xff]  ;;  %v18964_v46 = vld [vmem:[%s26098_s3 + $0xf0] ss:$24 sps:$4 sm:$0xff]  }
 0x36e   : > { %7595 = vmatmul.mubr.bf16.gmra.mrb[8].mxu0 %v22633_v23  ;;  %9107 = vmatprep.subr.bf16.mxu0 %v18990_v57  ;;  %v18967_v57 = vld [vmem:[%s26098_s3 + $0x120] ss:$24 sps:$4 sm:$0xff]  }
 0x36f   : > { %8979 = vmatmul.mubr.bf16.gmra.mrb[8].mxu1 %v22633_v23  ;;  %7604 = vmatprep.mubr.bf16.mxu0 %v22635_v27  ;;  %v18991_v23 = vld [vmem:[%s26097_s2 + $0x100] ss:$24 sps:$4 sm:$0xff]  }
 0x370   : > { %8988 = vmatprep.mubr.bf16.mxu1 %v22635_v27  ;;  %12649 = vmatpush1.bf16.msra.mxu1 %v18961_v26  ;;  %v22667_v27 = vcombine.low %v390_v49, %v398_v13  ;;  %v22669_v26 = vcombine.high %v406_v29, %v414_v36  ;;  %v18997_v49 = vld [vmem:[%s26097_s2 + $0x130] ss:$24 sps:$4 sm:$0xff]   ;;  %v19005_v13 = vld [vmem:[%s26097_s2 + $0x164] ss:$24 sps:$4 sm:$0xff]  }
 0x371   : > { %12650 = vmatprep.subr.bf16.mxu1 %v18966_v62  ;;  %9108 = vmatpush1.bf16.msra.mxu0 %v18988_v21  ;;  %v18999_v62 = vld [vmem:[%s26097_s2 + $0x134] ss:$24 sps:$4 sm:$0xff]  }
 0x372   : > { %26510 = vst [vmem:[#allocation154_spill] sm:$0xff] %v22667_v27  ;;  %9109 = vmatprep.subr.bf16.mxu0 %v18993_v25  ;;  %26511 = vst [vmem:[#allocation155_spill] sm:$0xff] %v22669_v26  ;;  %v18978_v21 = vld [vmem:[%s26098_s3 + $0x154] ss:$24 sps:$4 sm:$0xff]   ;;  %v422_v25 = vld [vmem:[%s20162_s20 + $0x2b8] sm:$0xff] }
 0x374   : > { %12651 = vmatpush1.bf16.msra.mxu1 %v18964_v46  ;;  %v430_v46 = vld [vmem:[%s20162_s20 + $0x2f8] sm:$0xff] }
 0x375   : > { %12652 = vmatprep.subr.bf16.mxu1 %v18969_v61  ;;  %9110 = vmatpush1.bf16.msra.mxu0 %v18991_v23  ;;  %v18976_v23 = vld [vmem:[%s26098_s3 + $0x150] ss:$24 sps:$4 sm:$0xff]   ;;  %v18987_v61 = vld [vmem:[%s26098_s3 + $0x184] ss:$24 sps:$4 sm:$0xff]  }
 0x376   : > { %7605 = vmatmul.mubr.bf16.gmra.mrb[12].mxu0 %v22667_v27  ;;  %9111 = vmatprep.subr.bf16.mxu0 %v18999_v62  ;;  %v18985_v62 = vld [vmem:[%s26098_s3 + $0x180] ss:$24 sps:$4 sm:$0xff]  }
 0x377   : > { %8989 = vmatmul.mubr.bf16.gmra.mrb[12].mxu1 %v22667_v27  ;;  %7614 = vmatprep.mubr.bf16.mxu0 %v22669_v26  ;;  %v19003_v27 = vld [vmem:[%s26097_s2 + $0x160] ss:$24 sps:$4 sm:$0xff]  }
 0x378   : > { %8998 = vmatprep.mubr.bf16.mxu1 %v22669_v26  ;;  %12653 = vmatpush1.bf16.msra.mxu1 %v18967_v57  ;;  %v22701_v26 = vcombine.low %v406_v29, %v414_v36  ;;  %v22703_v57 = vcombine.high %v422_v25, %v430_v46  ;;  %v19006_v29 = vld [vmem:[%s26097_s2 + $0x190] ss:$24 sps:$4 sm:$0xff]   ;;  %v19014_v36 = vld [vmem:[%s26097_s2 + $0x1c4] ss:$24 sps:$4 sm:$0xff]  }
 0x379   : > { %12654 = vmatprep.subr.bf16.mxu1 %v18978_v21  ;;  %9112 = vmatpush1.bf16.msra.mxu0 %v18997_v49  ;;  %v19008_v21 = vld [vmem:[%s26097_s2 + $0x194] ss:$24 sps:$4 sm:$0xff]  }
 0x37a   : > { %26512 = vst [vmem:[#allocation156_spill] sm:$0xff] %v22701_v26  ;;  %9113 = vmatprep.subr.bf16.mxu0 %v19005_v13  ;;  %26513 = vst [vmem:[#allocation157_spill] sm:$0xff] %v22703_v57  ;;  %v18996_v49 = vld [vmem:[%s26098_s3 + $0x1b4] ss:$24 sps:$4 sm:$0xff]   ;;  %v438_v13 = vld [vmem:[%s20162_s20 + $0x338] sm:$0xff] }
 0x37c   : > { %12655 = vmatpush1.bf16.msra.mxu1 %v18976_v23  ;;  %v446_v23 = vld [vmem:[%s20162_s20 + $0x378] sm:$0xff] }
 0x37d   : > { %12656 = vmatprep.subr.bf16.mxu1 %v18987_v61  ;;  %9114 = vmatpush1.bf16.msra.mxu0 %v19003_v27  ;;  %v18994_v27 = vld [vmem:[%s26098_s3 + $0x1b0] ss:$24 sps:$4 sm:$0xff]   ;;  %v19002_v61 = vld [vmem:[%s26098_s3 + $0x1e4] ss:$24 sps:$4 sm:$0xff]  }
 0x37e   : > { %7615 = vmatmul.mubr.bf16.gmra.mrb[16].mxu0 %v22701_v26  ;;  %9115 = vmatprep.subr.bf16.mxu0 %v19008_v21  ;;  %v19000_v21 = vld [vmem:[%s26098_s3 + $0x1e0] ss:$24 sps:$4 sm:$0xff]  }
 0x37f   : > { %8999 = vmatmul.mubr.bf16.gmra.mrb[16].mxu1 %v22701_v26  ;;  %7624 = vmatprep.mubr.bf16.mxu0 %v22703_v57  ;;  %v19012_v26 = vld [vmem:[%s26097_s2 + $0x1c0] ss:$24 sps:$4 sm:$0xff]  }
 0x380   : > { %9008 = vmatprep.mubr.bf16.mxu1 %v22703_v57  ;;  %12657 = vmatpush1.bf16.msra.mxu1 %v18985_v62  ;;  %v22735_v57 = vcombine.low %v422_v25, %v430_v46  ;;  %v22737_v62 = vcombine.high %v438_v13, %v446_v23  ;;  %v19015_v25 = vld [vmem:[%s26097_s2 + $0x1f0] ss:$24 sps:$4 sm:$0xff]   ;;  %v19023_v46 = vld [vmem:[%s26097_s2 + $0x224] ss:$24 sps:$4 sm:$0xff]  }
 0x381   : > { %12658 = vmatprep.subr.bf16.mxu1 %v18996_v49  ;;  %9116 = vmatpush1.bf16.msra.mxu0 %v19006_v29  ;;  %v19017_v49 = vld [vmem:[%s26097_s2 + $0x1f4] ss:$24 sps:$4 sm:$0xff]  }
 0x382   : > { %26514 = vst [vmem:[#allocation158_spill] sm:$0xff] %v22735_v57  ;;  %9117 = vmatprep.subr.bf16.mxu0 %v19014_v36  ;;  %26515 = vst [vmem:[#allocation159_spill] sm:$0xff] %v22737_v62  ;;  %v19011_v29 = vld [vmem:[%s26098_s3 + $0x214] ss:$24 sps:$4 sm:$0xff]   ;;  %v454_v36 = vld [vmem:[%s20162_s20 + $0x3b8] sm:$0xff] }
 0x384   : > { %12659 = vmatpush1.bf16.msra.mxu1 %v18994_v27  ;;  %v462_v27 = vld [vmem:[%s20162_s20 + $0x3f8] sm:$0xff] }
 0x385   : > { %12660 = vmatprep.subr.bf16.mxu1 %v19002_v61  ;;  %9118 = vmatpush1.bf16.msra.mxu0 %v19012_v26  ;;  %v19009_v26 = vld [vmem:[%s26098_s3 + $0x210] ss:$24 sps:$4 sm:$0xff]   ;;  %v19020_v61 = vld [vmem:[%s26098_s3 + $0x244] ss:$24 sps:$4 sm:$0xff]  }
 0x386   : > { %7625 = vmatmul.mubr.bf16.gmra.mrb[20].mxu0 %v22735_v57  ;;  %9119 = vmatprep.subr.bf16.mxu0 %v19017_v49  ;;  %v19018_v49 = vld [vmem:[%s26098_s3 + $0x240] ss:$24 sps:$4 sm:$0xff]  }
 0x387   : > { %9009 = vmatmul.mubr.bf16.gmra.mrb[20].mxu1 %v22735_v57  ;;  %7634 = vmatprep.mubr.bf16.mxu0 %v22737_v62  ;;  %v19021_v57 = vld [vmem:[%s26097_s2 + $0x220] ss:$24 sps:$4 sm:$0xff]  }
 0x388   : > { %9018 = vmatprep.mubr.bf16.mxu1 %v22737_v62  ;;  %12661 = vmatpush1.bf16.msra.mxu1 %v19000_v21  ;;  %v22769_v62 = vcombine.low %v438_v13, %v446_v23  ;;  %v22771_v21 = vcombine.high %v454_v36, %v462_v27  ;;  %v19024_v13 = vld [vmem:[%s26097_s2 + $0x250] ss:$24 sps:$4 sm:$0xff]   ;;  %v19029_v23 = vld [vmem:[%s26098_s3 + $0x274] ss:$24 sps:$4 sm:$0xff]  }
 0x389   : > { %12662 = vmatprep.subr.bf16.mxu1 %v19011_v29  ;;  %9120 = vmatpush1.bf16.msra.mxu0 %v19015_v25  ;;  %v19026_v29 = vld [vmem:[%s26097_s2 + $0x254] ss:$24 sps:$4 sm:$0xff]   ;;  %v19032_v25 = vld [vmem:[%s26097_s2 + $0x284] ss:$24 sps:$4 sm:$0xff]  }
 0x38a   : > { %26516 = vst [vmem:[#allocation160_spill] sm:$0xff] %v22769_v62  ;;  %9121 = vmatprep.subr.bf16.mxu0 %v19023_v46  ;;  %26517 = vst [vmem:[#allocation161_spill] sm:$0xff] %v22771_v21  ;;  %v478_v46 = vld [vmem:[%s20162_s20 + $0x478] sm:$0xff] }
 0x38c   : > { %12663 = vmatpush1.bf16.msra.mxu1 %v19009_v26  ;;  %v19027_v26 = vld [vmem:[%s26098_s3 + $0x270] ss:$24 sps:$4 sm:$0xff]  }
 0x38d   : > { %12664 = vmatprep.subr.bf16.mxu1 %v19020_v61  ;;  %9122 = vmatpush1.bf16.msra.mxu0 %v19021_v57  ;;  %v470_v57 = vld [vmem:[%s20162_s20 + $0x438] sm:$0xff] }
 0x38e   : > { %7635 = vmatmul.mubr.bf16.gmra.mrb[24].mxu0 %v22769_v62  ;;  %9123 = vmatprep.subr.bf16.mxu0 %v19026_v29  ;;  %v19030_v61 = vld [vmem:[%s26097_s2 + $0x280] ss:$24 sps:$4 sm:$0xff]  }
 0x38f   : > { %9019 = vmatmul.mubr.bf16.gmra.mrb[24].mxu1 %v22769_v62  ;;  %7644 = vmatprep.mubr.bf16.mxu0 %v22771_v21  ;;  %v19035_v62 = vld [vmem:[%s26098_s3 + $0x2a4] ss:$24 sps:$4 sm:$0xff]   ;;  %v19033_v29 = vld [vmem:[%s26098_s3 + $0x2a0] ss:$24 sps:$4 sm:$0xff]  }
 0x390   : > { %9028 = vmatprep.mubr.bf16.mxu1 %v22771_v21  ;;  %12665 = vmatpush1.bf16.msra.mxu1 %v19018_v49  ;;  %v22803_v21 = vcombine.low %v454_v36, %v462_v27  ;;  %v22805_v49 = vcombine.high %v470_v57, %v478_v46  ;;  %v19036_v36 = vld [vmem:[%s26097_s2 + $0x2b0] ss:$24 sps:$4 sm:$0xff]   ;;  %v19041_v27 = vld [vmem:[%s26098_s3 + $0x2d4] ss:$24 sps:$4 sm:$0xff]  }
 0x391   : > { %12666 = vmatprep.subr.bf16.mxu1 %v19029_v23  ;;  %9124 = vmatpush1.bf16.msra.mxu0 %v19024_v13  ;;  %v19038_v13 = vld [vmem:[%s26097_s2 + $0x2b4] ss:$24 sps:$4 sm:$0xff]   ;;  %v19044_v23 = vld [vmem:[%s26097_s2 + $0x2e4] ss:$24 sps:$4 sm:$0xff]  }
 0x392   : > { %26518 = vst [vmem:[#allocation162_spill] sm:$0xff] %v22803_v21  ;;  %9125 = vmatprep.subr.bf16.mxu0 %v19032_v25  ;;  %26519 = vst [vmem:[#allocation163_spill] sm:$0xff] %v22805_v49  ;;  %v494_v25 = vld [vmem:[%s20162_s20 + $0x4f8] sm:$0xff] }
 0x394   : > { %12667 = vmatpush1.bf16.msra.mxu1 %v19027_v26  ;;  %v19039_v26 = vld [vmem:[%s26098_s3 + $0x2d0] ss:$24 sps:$4 sm:$0xff]  }
 0x395   : > { %9126 = vmatpush1.bf16.msra.mxu0 %v19030_v61  ;;  %12668 = vmatprep.subr.bf16.mxu1 %v19035_v62  ;;  %v486_v62 = vld [vmem:[%s20162_s20 + $0x4b8] sm:$0xff] }
 0x396   : > { %7645 = vmatmul.mubr.bf16.gmra.mrb[28].mxu0 %v22803_v21  ;;  %9127 = vmatprep.subr.bf16.mxu0 %v19038_v13  ;;  %v19042_v61 = vld [vmem:[%s26097_s2 + $0x2e0] ss:$24 sps:$4 sm:$0xff]   ;;  %v19089_v13 = vld [vmem:[%s26097_s2 + $0x314] ss:$24 sps:$4 sm:$0xff]  }
 0x397   : > { %9029 = vmatmul.mubr.bf16.gmra.mrb[28].mxu1 %v22803_v21  ;;  %7654 = vmatprep.mubr.bf16.mxu0 %v22805_v49  ;;  %v22837_v21 = vcombine.low %v470_v57, %v478_v46  ;;  %v502_v57 = vld [vmem:[%s20162_s20 + $0x538] sm:$0xff] }
 0x398   : > { %9038 = vmatprep.mubr.bf16.mxu1 %v22805_v49  ;;  %12669 = vmatpush1.bf16.msra.mxu1 %v19033_v29  ;;  %v19050_v49 = vld [vmem:[%s26098_s3 + $0x304] ss:$24 sps:$4 sm:$0xff]   ;;  %v22839_v29 = vcombine.high %v486_v62, %v494_v25 }
 0x399   : > { %9128 = vmatpush1.bf16.msra.mxu0 %v19036_v36  ;;  %12670 = vmatprep.subr.bf16.mxu1 %v19041_v27  ;;  %26520 = vst [vmem:[#allocation164_spill] sm:$0xff] %v22837_v21  ;;  %v510_v46 = vld [vmem:[%s20162_s20 + $0x578] sm:$0xff]  ;;  %v22850_v36 = vcombine.low %v486_v62, %v494_v25 }
 0x39a   : > { %9129 = vmatprep.subr.bf16.mxu0 %v19044_v23  ;;  %26521 = vst [vmem:[#allocation165_spill] sm:$0xff] %v22839_v29  ;;  %v22852_v27 = vcombine.high %v502_v57, %v510_v46  ;;  %v526_v23 = vld [vmem:[%s20162_s20 + $0x5f8] sm:$0xff] }
 0x39b   : > { %26522 = vst [vmem:[#allocation166_spill] sm:$0xff] %v22850_v36  ;;  %v534_v62 = vld [vmem:[%s20162_s20 + $0x638] sm:$0xff] }
 0x39c   : > { %12671 = vmatpush1.bf16.msra.mxu1 %v19039_v26  ;;  %26523 = vst [vmem:[#allocation167_spill] sm:$0xff] %v22852_v27  ;;  %v22860_v26 = vcombine.low %v502_v57, %v510_v46  ;;  %v542_v25 = vld [vmem:[%s20162_s20 + $0x678] sm:$0xff] }
 0x39d   : > { %9130 = vmatpush1.bf16.msra.mxu0 %v19042_v61  ;;  %12693 = vmatprep.subr.bf16.mxu1 %v19050_v49  ;;  %v518_v49 = vld [vmem:[%s20162_s20 + $0x5b8] sm:$0xff] }
 0x39e   : > { %7655 = vmatmul.mubr.bf16.gmra.mrb[32].mxu0 %v22837_v21  ;;  %9272 = vmatprep.subr.bf16.mxu0 %v19089_v13  ;;  %26524 = vst [vmem:[#allocation168_spill] sm:$0xff] %v22860_v26  ;;  %v22862_v61 = vcombine.high %v518_v49, %v526_v23  ;;  %v22870_v13 = vcombine.low %v518_v49, %v526_v23  ;;  %v550_v57 = vld [vmem:[%s20162_s20 + $0x6b8] sm:$0xff] }
 0x39f   : > { %9039 = vmatmul.mubr.bf16.gmra.mrb[32].mxu1 %v22837_v21  ;;  %7664 = vmatprep.mubr.bf16.mxu0 %v22839_v29  ;;  %v558_v46 = vld [vmem:[%s20162_s20 + $0x6f8] sm:$0xff] }
 0x3a0   : > { %9048 = vmatprep.mubr.bf16.mxu1 %v22839_v29  ;;  %26525 = vst [vmem:[#allocation169_spill] sm:$0xff] %v22862_v61  ;;  %26526 = vst [vmem:[#allocation170_spill] sm:$0xff] %v22870_v13  ;;  %v22888_v49 = vcombine.low %v550_v57, %v558_v46  ;;  %v22891_v23 = vld [vmem:[%s22546_s9 + $0x4] ss:$24 sps:$4 sm:$0xff]  }
 0x3a2   : > { %26530 = vst [vmem:[#allocation174_spill] sm:$0xff] %v22888_v49 }
 0x3a6   : > { %7665 = vmatmul.mubr.bf16.gmra.mrb[36].mxu0 %v22850_v36 }
 0x3a7   : > { %9049 = vmatmul.mubr.bf16.gmra.mrb[36].mxu1 %v22850_v36  ;;  %7674 = vmatprep.mubr.bf16.mxu0 %v22852_v27 }
 0x3a8   : > { %9058 = vmatprep.mubr.bf16.mxu1 %v22852_v27  ;;  %v22872_v27 = vcombine.high %v534_v62, %v542_v25 }
 0x3aa   : > { %26527 = vst [vmem:[#allocation171_spill] sm:$0xff] %v22872_v27 }
 0x3ae   : > { %7675 = vmatmul.mubr.bf16.gmra.mrb[40].mxu0 %v22860_v26 }
 0x3af   : > { %9059 = vmatmul.mubr.bf16.gmra.mrb[40].mxu1 %v22860_v26  ;;  %7684 = vmatprep.mubr.bf16.mxu0 %v22862_v61  ;;  %v22880_v26 = vcombine.low %v534_v62, %v542_v25  ;;  %v19045_v62 = vld [vmem:[%s22546_s9] ss:$24 sps:$4 sm:$0xff]  }
 0x3b0   : > { %9068 = vmatprep.mubr.bf16.mxu1 %v22862_v61  ;;  %v22882_v61 = vcombine.high %v550_v57, %v558_v46  ;;  %v19048_v25 = vld [vmem:[%s26098_s3 + $0x300] ss:$24 sps:$4 sm:$0xff]   ;;  %v19053_v57 = vld [vmem:[%s26098_s3 + $0x334] ss:$24 sps:$4 sm:$0xff]   ;;  %v19087_v46 = vld [vmem:[%s26097_s2 + $0x310] ss:$24 sps:$4 sm:$0xff]  }
 0x3b1   : > { %26528 = vst [vmem:[#allocation172_spill] sm:$0xff] %v22880_v26 }
 0x3b2   : > { %26529 = vst [vmem:[#allocation173_spill] sm:$0xff] %v22882_v61 }
 0x3b6   : > { %7685 = vmatmul.mubr.bf16.gmra.mrb[44].mxu0 %v22870_v13 }
 0x3b7   : > { %9069 = vmatmul.mubr.bf16.gmra.mrb[44].mxu1 %v22870_v13  ;;  %7694 = vmatprep.mubr.bf16.mxu0 %v22872_v27 }
 0x3b8   : > { %9078 = vmatprep.mubr.bf16.mxu1 %v22872_v27  ;;  %v19093_v27 = vld [vmem:[%s26097_s2 + $0x340] ss:$24 sps:$4 sm:$0xff]  }
 0x3be   : > { %7695 = vmatmul.mubr.bf16.gmra.mrb[48].mxu0 %v22880_v26 }
 0x3bf   : > { %9079 = vmatmul.mubr.bf16.gmra.mrb[48].mxu1 %v22880_v26  ;;  %7704 = vmatprep.mubr.bf16.mxu0 %v22882_v61  ;;  %v19056_v26 = vld [vmem:[%s26098_s3 + $0x364] ss:$24 sps:$4 sm:$0xff]  }
 0x3c0   : > { %9088 = vmatprep.mubr.bf16.mxu1 %v22882_v61  ;;  %v19051_v61 = vld [vmem:[%s26098_s3 + $0x330] ss:$24 sps:$4 sm:$0xff]  }
 0x3c6   : > { %7705 = vmatmul.mubr.bf16.gmra.mrb[52].mxu0 %v22888_v49 }
 0x3c7   : > { %9089 = vmatmul.mubr.bf16.gmra.mrb[52].mxu1 %v22888_v49  ;;  %9131 = vmatprep.mubr.bf16.mxu0 %v20181_v51  ;;  %v19095_v51 = vld [vmem:[%s26097_s2 + $0x344] ss:$24 sps:$4 sm:$0xff]   ;;  %v19096_v49 = vld [vmem:[%s22546_s9 + $0x34] ss:$24 sps:$4 sm:$0xff]  }
 0x3c8   : > { %12672 = vmatprep.mubr.bf16.mxu1 %v22891_v23 }
 0x3ce   : > { %9132 = vmatmul.mubr.bf16.vlgmr.msra.gmra.mrb[56].mxu0 %v20238_v7  ;;  %v19103_v7 = vld [vmem:[%s26097_s2 + $0x374] ss:$24 sps:$4 sm:$0xff]  }
 0x3cf   : > { %12673 = vmatmul.mubr.bf16.vlgmr.msra.gmra.mrb[56].mxu1 %v19045_v62  ;;  %9141 = vmatprep.mubr.bf16.mxu0 %v20243_v9  ;;  %v19104_v62 = vld [vmem:[%s22546_s9 + $0x30] ss:$24 sps:$4 sm:$0xff]   ;;  %v19054_v9 = vld [vmem:[%s26098_s3 + $0x360] ss:$24 sps:$4 sm:$0xff]  }
 0x3d0   : > { %12694 = vmatpush1.bf16.msra.mxu1 %v19048_v25  ;;  %9273 = vmatpush1.bf16.msra.mxu0 %v19087_v46  ;;  %v19059_v25 = vld [vmem:[%s26098_s3 + $0x394] ss:$24 sps:$4 sm:$0xff]   ;;  %v19108_v46 = vld [vmem:[%s26097_s2 + $0x3a0] ss:$24 sps:$4 sm:$0xff]  }
 0x3d1   : > { %12695 = vmatprep.subr.bf16.mxu1 %v19053_v57  ;;  %9274 = vmatprep.subr.bf16.mxu0 %v19095_v51  ;;  %v19110_v57 = vld [vmem:[%s26097_s2 + $0x3a4] ss:$24 sps:$4 sm:$0xff]   ;;  %v19065_v51 = vld [vmem:[%s26098_s3 + $0x3f4] ss:$24 sps:$4 sm:$0xff]  }
 0x3d2   : > { %12682 = vmatprep.mubr.bf16.mxu1 %v19096_v49  ;;  %v19101_v49 = vld [vmem:[%s26097_s2 + $0x370] ss:$24 sps:$4 sm:$0xff]  }
 0x3d4   : > { %12696 = vmatpush1.bf16.msra.mxu1 %v19051_v61  ;;  %9275 = vmatpush1.bf16.msra.mxu0 %v19093_v27  ;;  %v19113_v61 = vld [vmem:[%s22546_s9 + $0xc] ss:$24 sps:$4 sm:$0xff]  }
 0x3d5   : > { %12697 = vmatprep.subr.bf16.mxu1 %v19056_v26  ;;  %9276 = vmatprep.subr.bf16.mxu0 %v19103_v7  ;;  %v19057_v26 = vld [vmem:[%s26098_s3 + $0x390] ss:$24 sps:$4 sm:$0xff]   ;;  %v19062_v27 = vld [vmem:[%s26098_s3 + $0x3c4] ss:$24 sps:$4 sm:$0xff]  }
 0x3d6   : > { %9142 = vmatmul.mubr.bf16.gmra.mrb[60].mxu0 %v20269_v18  ;;  %v19119_v18 = vld [vmem:[%s26097_s2 + $0x3d4] ss:$24 sps:$4 sm:$0xff]   ;;  %v19117_v7 = vld [vmem:[%s26097_s2 + $0x3d0] ss:$24 sps:$4 sm:$0xff]  }
 0x3d7   : > { %12683 = vmatmul.mubr.bf16.gmra.mrb[60].mxu1 %v19104_v62  ;;  %9151 = vmatprep.mubr.bf16.mxu0 %v20271_v19  ;;  %v19060_v19 = vld [vmem:[%s26098_s3 + $0x3c0] ss:$24 sps:$4 sm:$0xff]   ;;  %v19125_v62 = vld [vmem:[%s26097_s2 + $0x404] ss:$24 sps:$4 sm:$0xff]  }
 0x3d8   : > { %12698 = vmatpush1.bf16.msra.mxu1 %v19054_v9  ;;  %9277 = vmatpush1.bf16.msra.mxu0 %v19101_v49  ;;  %v19063_v9 = vld [vmem:[%s26098_s3 + $0x3f0] ss:$24 sps:$4 sm:$0xff]   ;;  %v19123_v49 = vld [vmem:[%s26097_s2 + $0x400] ss:$24 sps:$4 sm:$0xff]  }
 0x3d9   : > { %12699 = vmatprep.subr.bf16.mxu1 %v19059_v25  ;;  %9278 = vmatprep.subr.bf16.mxu0 %v19110_v57  ;;  %v19068_v25 = vld [vmem:[%s26098_s3 + $0x424] ss:$24 sps:$4 sm:$0xff]   ;;  %v19071_v57 = vld [vmem:[%s26098_s3 + $0x454] ss:$24 sps:$4 sm:$0xff]  }
 0x3da   : > { %12725 = vmatprep.mubr.bf16.mxu1 %v19113_v61  ;;  %v19129_v61 = vld [vmem:[%s26097_s2 + $0x430] ss:$24 sps:$4 sm:$0xff]  }
 0x3dc   : > { %12700 = vmatpush1.bf16.msra.mxu1 %v19057_v26  ;;  %9279 = vmatpush1.bf16.msra.mxu0 %v19108_v46  ;;  %v19137_v26 = vld [vmem:[%s26097_s2 + $0x464] ss:$24 sps:$4 sm:$0xff]  }
 0x3dd   : > { %12701 = vmatprep.subr.bf16.mxu1 %v19062_v27  ;;  %9280 = vmatprep.subr.bf16.mxu0 %v19119_v18  ;;  %v19069_v27 = vld [vmem:[%s26098_s3 + $0x450] ss:$24 sps:$4 sm:$0xff]   ;;  %v19074_v46 = vld [vmem:[%s26098_s3 + $0x484] ss:$24 sps:$4 sm:$0xff]   ;;  %v19135_v18 = vld [vmem:[%s26097_s2 + $0x460] ss:$24 sps:$4 sm:$0xff]  }
 0x3de   : > { %9152 = vmatmul.mubr.bf16.gmra.mrb[64].mxu0 %v20303_v30  ;;  %v19131_v30 = vld [vmem:[%s26097_s2 + $0x434] ss:$24 sps:$4 sm:$0xff]  }
 0x3df   : > { %9161 = vmatprep.mubr.bf16.mxu0 %v20305_v31  ;;  %v19066_v31 = vld [vmem:[%s26098_s3 + $0x420] ss:$24 sps:$4 sm:$0xff]  }
 0x3e0   : > { %12702 = vmatpush1.bf16.msra.mxu1 %v19060_v19  ;;  %9281 = vmatpush1.bf16.msra.mxu0 %v19117_v7  ;;  %v19077_v19 = vld [vmem:[%s26098_s3 + $0x4b4] ss:$24 sps:$4 sm:$0xff]   ;;  %v19149_v7 = vld [vmem:[%s26097_s2 + $0x4c4] ss:$24 sps:$4 sm:$0xff]  }
 0x3e1   : > { %12703 = vmatprep.subr.bf16.mxu1 %v19065_v51  ;;  %9282 = vmatprep.subr.bf16.mxu0 %v19125_v62  ;;  %v19141_v51 = vld [vmem:[%s26097_s2 + $0x490] ss:$24 sps:$4 sm:$0xff]  }
 0x3e2   : > { %v19075_v62 = vld [vmem:[%s26098_s3 + $0x4b0] ss:$24 sps:$4 sm:$0xff]  }
 0x3e4   : > { %12704 = vmatpush1.bf16.msra.mxu1 %v19063_v9  ;;  %9283 = vmatpush1.bf16.msra.mxu0 %v19123_v49  ;;  %v19080_v9 = vld [vmem:[%s26098_s3 + $0x4e4] ss:$24 sps:$4 sm:$0xff]   ;;  %v19083_v49 = vld [vmem:[%s26098_s3 + $0x514] ss:$24 sps:$4 sm:$0xff]  }
 0x3e5   : > { %12705 = vmatprep.subr.bf16.mxu1 %v19068_v25  ;;  %9284 = vmatprep.subr.bf16.mxu0 %v19131_v30  ;;  %v19147_v25 = vld [vmem:[%s26097_s2 + $0x4c0] ss:$24 sps:$4 sm:$0xff]   ;;  %v19153_v30 = vld [vmem:[%s26097_s2 + $0x4f0] ss:$24 sps:$4 sm:$0xff]  }
 0x3e6   : > { %9162 = vmatmul.mubr.bf16.gmra.mrb[68].mxu0 %v20337_v42  ;;  %v19143_v42 = vld [vmem:[%s26097_s2 + $0x494] ss:$24 sps:$4 sm:$0xff]  }
 0x3e7   : > { %9171 = vmatprep.mubr.bf16.mxu0 %v20339_v43  ;;  %v19072_v43 = vld [vmem:[%s26098_s3 + $0x480] ss:$24 sps:$4 sm:$0xff]  }
 0x3e8   : > { %12706 = vmatpush1.bf16.msra.mxu1 %v19066_v31  ;;  %9285 = vmatpush1.bf16.msra.mxu0 %v19129_v61  ;;  %v19161_v31 = vld [vmem:[%s26097_s2 + $0x524] ss:$24 sps:$4 sm:$0xff]  }
 0x3e9   : > { %12707 = vmatprep.subr.bf16.mxu1 %v19071_v57  ;;  %9286 = vmatprep.subr.bf16.mxu0 %v19137_v26  ;;  %v19081_v57 = vld [vmem:[%s26098_s3 + $0x510] ss:$24 sps:$4 sm:$0xff]   ;;  %v19086_v61 = vld [vmem:[%s26098_s3 + $0x544] ss:$24 sps:$4 sm:$0xff]   ;;  %v19159_v26 = vld [vmem:[%s26097_s2 + $0x520] ss:$24 sps:$4 sm:$0xff]  }
 0x3ec   : > { %12708 = vmatpush1.bf16.msra.mxu1 %v19069_v27  ;;  %9287 = vmatpush1.bf16.msra.mxu0 %v19135_v18  ;;  %v19092_v27 = vld [vmem:[%s26098_s3 + $0x574] ss:$24 sps:$4 sm:$0xff]   ;;  %v19173_v18 = vld [vmem:[%s26097_s2 + $0x584] ss:$24 sps:$4 sm:$0xff]  }
 0x3ed   : > { %12709 = vmatprep.subr.bf16.mxu1 %v19074_v46  ;;  %9288 = vmatprep.subr.bf16.mxu0 %v19143_v42  ;;  %v19165_v46 = vld [vmem:[%s26097_s2 + $0x550] ss:$24 sps:$4 sm:$0xff]  }
 0x3ee   : > { %9172 = vmatmul.mubr.bf16.gmra.mrb[72].mxu0 %v20371_v55  ;;  %v19155_v55 = vld [vmem:[%s26097_s2 + $0x4f4] ss:$24 sps:$4 sm:$0xff]   ;;  %v19090_v42 = vld [vmem:[%s26098_s3 + $0x570] ss:$24 sps:$4 sm:$0xff]  }
 0x3ef   : > { %9181 = vmatprep.mubr.bf16.mxu0 %v20373_v56  ;;  %v19078_v56 = vld [vmem:[%s26098_s3 + $0x4e0] ss:$24 sps:$4 sm:$0xff]  }
 0x3f0   : > { %12710 = vmatpush1.bf16.msra.mxu1 %v19072_v43  ;;  %9289 = vmatpush1.bf16.msra.mxu0 %v19141_v51  ;;  %v19100_v43 = vld [vmem:[%s26098_s3 + $0x5a4] ss:$24 sps:$4 sm:$0xff]   ;;  %v19107_v51 = vld [vmem:[%s26098_s3 + $0x5d4] ss:$24 sps:$4 sm:$0xff]  }
 0x3f1   : > { %12711 = vmatprep.subr.bf16.mxu1 %v19077_v19  ;;  %9290 = vmatprep.subr.bf16.mxu0 %v19149_v7  ;;  %v19171_v19 = vld [vmem:[%s26097_s2 + $0x580] ss:$24 sps:$4 sm:$0xff]   ;;  %v19177_v7 = vld [vmem:[%s26097_s2 + $0x5b0] ss:$24 sps:$4 sm:$0xff]  }
 0x3f4   : > { %12712 = vmatpush1.bf16.msra.mxu1 %v19075_v62  ;;  %9291 = vmatpush1.bf16.msra.mxu0 %v19147_v25  ;;  %v19185_v62 = vld [vmem:[%s26097_s2 + $0x5e4] ss:$24 sps:$4 sm:$0xff]  }
 0x3f5   : > { %12713 = vmatprep.subr.bf16.mxu1 %v19080_v9  ;;  %9292 = vmatprep.subr.bf16.mxu0 %v19155_v55  ;;  %v19105_v9 = vld [vmem:[%s26098_s3 + $0x5d0] ss:$24 sps:$4 sm:$0xff]   ;;  %v19116_v25 = vld [vmem:[%s26098_s3 + $0x604] ss:$24 sps:$4 sm:$0xff]   ;;  %v19183_v55 = vld [vmem:[%s26097_s2 + $0x5e0] ss:$24 sps:$4 sm:$0xff]  }
 0x3f6   : > { %9182 = vmatmul.mubr.bf16.gmra.mrb[76].mxu0 %v20405_v3  ;;  %v19167_v3 = vld [vmem:[%s26097_s2 + $0x554] ss:$24 sps:$4 sm:$0xff]  }
 0x3f7   : > { %9191 = vmatprep.mubr.bf16.mxu0 %v20407_v4  ;;  %v19084_v4 = vld [vmem:[%s26098_s3 + $0x540] ss:$24 sps:$4 sm:$0xff]  }
 0x3f8   : > { %12714 = vmatpush1.bf16.msra.mxu1 %v19078_v56  ;;  %9293 = vmatpush1.bf16.msra.mxu0 %v19153_v30  ;;  %v19111_v56 = vld [vmem:[%s22546_s9 + $0x8] ss:$24 sps:$4 sm:$0xff]   ;;  %v19192_v30 = vld [vmem:[%s22546_s9 + $0x3c] ss:$24 sps:$4 sm:$0xff]  }
 0x3f9   : > { %12715 = vmatprep.subr.bf16.mxu1 %v19083_v49  ;;  %9294 = vmatprep.subr.bf16.mxu0 %v19161_v31  ;;  %v19122_v49 = vld [vmem:[%s26098_s3 + $0x634] ss:$24 sps:$4 sm:$0xff]   ;;  %v19120_v31 = vld [vmem:[%s26098_s3 + $0x630] ss:$24 sps:$4 sm:$0xff]  }
 0x3fc   : > { %12716 = vmatpush1.bf16.msra.mxu1 %v19081_v57  ;;  %9295 = vmatpush1.bf16.msra.mxu0 %v19159_v26  ;;  %v19128_v57 = vld [vmem:[%s26098_s3 + $0x664] ss:$24 sps:$4 sm:$0xff]   ;;  %v19134_v26 = vld [vmem:[%s26098_s3 + $0x694] ss:$24 sps:$4 sm:$0xff]  }
 0x3fd   : > { %12717 = vmatprep.subr.bf16.mxu1 %v19086_v61  ;;  %9296 = vmatprep.subr.bf16.mxu0 %v19167_v3  ;;  %v19194_v61 = vld [vmem:[%s22546_s9 + $0x38] ss:$24 sps:$4 sm:$0xff]   ;;  %v19203_v3 = vld [vmem:[%s22546_s9 + $0x14] ss:$24 sps:$4 sm:$0xff]  }
 0x3fe   : > { %9192 = vmatmul.mubr.bf16.gmra.mrb[80].mxu0 %v20439_v17  ;;  %v19179_v17 = vld [vmem:[%s26097_s2 + $0x5b4] ss:$24 sps:$4 sm:$0xff]  }
 0x3ff   : > { %9201 = vmatprep.mubr.bf16.mxu0 %v20441_v20  ;;  %v19098_v20 = vld [vmem:[%s26098_s3 + $0x5a0] ss:$24 sps:$4 sm:$0xff]  }
 0x400   : > { %12718 = vmatpush1.bf16.msra.mxu1 %v19084_v4  ;;  %9297 = vmatpush1.bf16.msra.mxu0 %v19165_v46  ;;  %v19140_v4 = vld [vmem:[%s26098_s3 + $0x6c4] ss:$24 sps:$4 sm:$0xff]  }
 0x401   : > { %12719 = vmatprep.subr.bf16.mxu1 %v19092_v27  ;;  %9298 = vmatprep.subr.bf16.mxu0 %v19173_v18  ;;  %v19138_v27 = vld [vmem:[%s26098_s3 + $0x6c0] ss:$24 sps:$4 sm:$0xff]   ;;  %v19152_v46 = vld [vmem:[%s26098_s3 + $0x724] ss:$24 sps:$4 sm:$0xff]  }
 0x402   : > { %v19150_v18 = vld [vmem:[%s26098_s3 + $0x720] ss:$24 sps:$4 sm:$0xff]  }
 0x404   : > { %12720 = vmatpush1.bf16.msra.mxu1 %v19090_v42  ;;  %9299 = vmatpush1.bf16.msra.mxu0 %v19171_v19  ;;  %v26273_v42 = vlaneseq }
 0x405   : > { %12721 = vmatprep.subr.bf16.mxu1 %v19100_v43  ;;  %9300 = vmatprep.subr.bf16.mxu0 %v19179_v17  ;;  %v19164_v43 = vld [vmem:[%s26098_s3 + $0x784] ss:$24 sps:$4 sm:$0xff]  }
 0x406   : > { %9202 = vmatmul.mubr.bf16.gmra.mrb[84].mxu0 %v20473_v33  ;;  %v19236_v33 = vld [vmem:[%s26097_s2 + $0x614] ss:$24 sps:$4 sm:$0xff]   ;;  %v23170_v19 = vshrl.u32 %v26273_v42, 7 }
 0x407   : > { %9211 = vmatprep.mubr.bf16.mxu0 %v20475_v34  ;;  %v19114_v34 = vld [vmem:[%s26098_s3 + $0x600] ss:$24 sps:$4 sm:$0xff]  }
 0x408   : > { %12722 = vmatpush1.bf16.msra.mxu1 %v19098_v20  ;;  %9301 = vmatpush1.bf16.msra.mxu0 %v19177_v7  ;;  %v23176_v17 = vsub.s32 0, %v23170_v19  ;;  %v26275_v20 = vsub.s32 2, %v23170_v19  ;;  %v26276_v7 = vsub.s32 1, %v23170_v19 }
 0x409   : > { %12723 = vmatprep.subr.bf16.mxu1 %v19107_v51  ;;  %9302 = vmatprep.subr.bf16.mxu0 %v19185_v62  ;;  %v1339_v51 = vld [vmem:[%s26099_s4] ss:$2 sm:$0x3f]  ;;  %v26274_v62 = vsub.s32 3, %v23170_v19 }
 0x40a   : > { %26531 = vst [vmem:[#allocation175_spill] sm:$0xff] %v23176_v17 }
 0x40c   : > { %12724 = vmatpush1.bf16.msra.mxu1 %v19105_v9  ;;  %9303 = vmatpush1.bf16.msra.mxu0 %v19183_v55  ;;  %v19168_v9 = vld [vmem:[%s26098_s3 + $0x7b0] ss:$24 sps:$4 sm:$0xff]   ;;  %v23197_v55 = vrot.slane %v1339_v51, %v26275_v20 }
 0x40d   : > { %12746 = vmatprep.subr.bf16.mxu1 %v19116_v25  ;;  %9445 = vmatprep.subr.bf16.mxu0 %v19236_v33  ;;  %v23193_v25 = vrot.slane %v1339_v51, %v23176_v17  ;;  %v19176_v33 = vld [vmem:[%s26098_s3 + $0x7e4] ss:$24 sps:$4 sm:$0xff]  }
 0x40e   : > { %9212 = vmatmul.mubr.bf16.gmra.mrb[88].mxu0 %v20507_v47  ;;  %v19126_v47 = vld [vmem:[%s26098_s3 + $0x660] ss:$24 sps:$4 sm:$0xff]  }
 0x40f   : > { %12726 = vmatmul.mubr.bf16.vlgmr.msra.gmra.mrb[56].mxu1 %v19111_v56  ;;  %9221 = vmatprep.mubr.bf16.mxu0 %v20509_v48  ;;  %v19132_v48 = vld [vmem:[%s26098_s3 + $0x690] ss:$24 sps:$4 sm:$0xff]  }
 0x410   : > { %12747 = vmatpush1.bf16.msra.mxu1 %v19114_v34  ;;  %12735 = vmatprep.mubr.bf16.mxu1 %v19192_v30  ;;  %v23204_v34 = vrot.slane %v1339_v51, %v26276_v7 }
 0x411   : > { %12748 = vmatprep.subr.bf16.mxu1 %v19122_v49 }
 0x414   : > { %12749 = vmatpush1.bf16.msra.mxu1 %v19120_v31 }
 0x415   : > { %12750 = vmatprep.subr.bf16.mxu1 %v19128_v57 }
 0x416   : > { %9222 = vmatmul.mubr.bf16.gmra.mrb[92].mxu0 %v20520_v53  ;;  %v19146_v53 = vld [vmem:[%s26098_s3 + $0x6f4] ss:$24 sps:$4 sm:$0xff]  }
 0x417   : > { %12736 = vmatmul.mubr.bf16.gmra.mrb[60].mxu1 %v19194_v61  ;;  %9231 = vmatprep.mubr.bf16.mxu0 %v20522_v54  ;;  %v19144_v54 = vld [vmem:[%s26098_s3 + $0x6f0] ss:$24 sps:$4 sm:$0xff]   ;;  %v19174_v61 = vld [vmem:[%s26098_s3 + $0x7e0] ss:$24 sps:$4 sm:$0xff]  }
 0x418   : > { %12751 = vmatpush1.bf16.msra.mxu1 %v19126_v47  ;;  %12778 = vmatprep.mubr.bf16.mxu1 %v19203_v3 }
 0x419   : > { %12752 = vmatprep.subr.bf16.mxu1 %v19134_v26 }
 0x41c   : > { %12753 = vmatpush1.bf16.msra.mxu1 %v19132_v48 }
 0x41d   : > { %12754 = vmatprep.subr.bf16.mxu1 %v19140_v4 }
 0x41e   : > { %9232 = vmatmul.mubr.bf16.gmra.mrb[96].mxu0 %v20530_v59  ;;  %v19158_v59 = vld [vmem:[%s26098_s3 + $0x754] ss:$24 sps:$4 sm:$0xff]  }
 0x41f   : > { %9241 = vmatprep.mubr.bf16.mxu0 %v20532_v60  ;;  %v19156_v60 = vld [vmem:[%s26098_s3 + $0x750] ss:$24 sps:$4 sm:$0xff]  }
 0x420   : > { %12755 = vmatpush1.bf16.msra.mxu1 %v19138_v27 }
 0x421   : > { %12756 = vmatprep.subr.bf16.mxu1 %v19146_v53  ;;  %v19182_v53 = vld [vmem:[%s26098_s3 + $0x814] ss:$24 sps:$4 sm:$0xff]  }
 0x424   : > { %12757 = vmatpush1.bf16.msra.mxu1 %v19144_v54 }
 0x425   : > { %12758 = vmatprep.subr.bf16.mxu1 %v19152_v46 }
 0x426   : > { %9242 = vmatmul.mubr.bf16.gmra.mrb[100].mxu0 %v20540_v63  ;;  %v19162_v63 = vld [vmem:[%s26098_s3 + $0x780] ss:$24 sps:$4 sm:$0xff]  }
 0x427   : > { %9251 = vmatprep.mubr.bf16.mxu0 %v20542_v0  ;;  %v19170_v0 = vld [vmem:[%s26098_s3 + $0x7b4] ss:$24 sps:$4 sm:$0xff]  }
 0x428   : > { %12759 = vmatpush1.bf16.msra.mxu1 %v19150_v18 }
 0x429   : > { %12760 = vmatprep.subr.bf16.mxu1 %v19158_v59 }
 0x42c   : > { %12761 = vmatpush1.bf16.msra.mxu1 %v19156_v60 }
 0x42d   : > { %12762 = vmatprep.subr.bf16.mxu1 %v19164_v43 }
 0x42e   : > { %9252 = vmatmul.mubr.bf16.gmra.mrb[104].mxu0 %v20550_v5 }
 0x42f   : > { %9261 = vmatprep.mubr.bf16.mxu0 %v20552_v6  ;;  %v23208_v6 = vrot.slane %v1339_v51, %v26274_v62  ;;  %v19180_v51 = vld [vmem:[%s26098_s3 + $0x810] ss:$24 sps:$4 sm:$0xff]  }
 0x430   : > { %12763 = vmatpush1.bf16.msra.mxu1 %v19162_v63 }
 0x431   : > { %12764 = vmatprep.subr.bf16.mxu1 %v19170_v0  ;;  %v7576_v5 = vpop.f32.mrb[0].mxu0 }
 0x432   : > { %v8960_v56 = vpop.f32.mrb[0].mxu1  ;;  %v7578_v49 = vpop.f32.mrb[1].mxu0  ;;  %v23214_v47 = vadd.f32 %v7576_v5, %v23193_v25 }
 0x433   : > { %v8962_v30 = vpop.f32.mrb[1].mxu1  ;;  %v7580_v31 = vpop.f32.mrb[2].mxu0  ;;  %v23217_v26 = vadd.f32 %v8960_v56, %v23197_v55  ;;  %v23229_v54 = vadd.f32 %v7578_v49, %v23204_v34 }
 0x434   : > { %12765 = vmatpush1.bf16.msra.mxu1 %v19168_v9  ;;  %v8964_v57 = vpop.f32.mrb[2].mxu1  ;;  %v23220_v3 = vadd.f32 %v7580_v31, %v23193_v25  ;;  %v7582_v4 = vpop.f32.mrb[3].mxu0  ;;  %v23232_v46 = vadd.f32 %v8962_v30, %v23208_v6  ;;  %v19188_v9 = vld [vmem:[%s26098_s3 + $0x844] ss:$24 sps:$4 sm:$0xff]   ;;  %v19186_v31 = vld [vmem:[%s26098_s3 + $0x840] ss:$24 sps:$4 sm:$0xff]  }
 0x435   : > { %26532 = vst [vmem:[#allocation176_spill] sm:$0xff] %v23217_v26  ;;  %v23223_v48 = vadd.f32 %v8964_v57, %v23197_v55  ;;  %v8966_v27 = vpop.f32.mrb[3].mxu1  ;;  %12766 = vmatprep.subr.bf16.mxu1 %v19176_v33  ;;  %v23235_v18 = vadd.f32 %v7582_v4, %v23204_v34 }
 0x436   : > { %26534 = vst [vmem:[#allocation178_spill] sm:$0xff] %v23232_v46  ;;  %v23238_v59 = vadd.f32 %v8966_v27, %v23208_v6  ;;  %9262 = vmatmul.mubr.bf16.gmra.mrb[108].mxu0 %v20560_v11 }
 0x437   : > { %26533 = vst [vmem:[#allocation177_spill] sm:$0xff] %v23223_v48  ;;  %9304 = vmatprep.mubr.bf16.mxu0 %v20562_v12 }
 0x438   : > { %26535 = vst [vmem:[#allocation179_spill] sm:$0xff] %v23238_v59  ;;  %12767 = vmatpush1.bf16.msra.mxu1 %v19174_v61 }
 0x439   : > { %12768 = vmatprep.subr.bf16.mxu1 %v19182_v53  ;;  %v7586_v33 = vpop.f32.mrb[4].mxu0 }
 0x43a   : > { %v8970_v11 = vpop.f32.mrb[4].mxu1  ;;  %v7588_v5 = vpop.f32.mrb[5].mxu0  ;;  %v23260_v57 = vadd.f32 %v7586_v33, %v23193_v25  ;;  %v19234_v33 = vld [vmem:[%s26097_s2 + $0x610] ss:$24 sps:$4 sm:$0xff]  }
 0x43b   : > { %v8972_v56 = vpop.f32.mrb[5].mxu1  ;;  %v7590_v49 = vpop.f32.mrb[6].mxu0  ;;  %v23263_v12 = vadd.f32 %v8970_v11, %v23197_v55  ;;  %v23278_v11 = vadd.f32 %v7588_v5, %v23204_v34  ;;  %v19197_v5 = vld [vmem:[%s26098_s3 + $0x8a4] ss:$24 sps:$4 sm:$0xff]  }
 0x43c   : > { %12769 = vmatpush1.bf16.msra.mxu1 %v19180_v51  ;;  %v8974_v30 = vpop.f32.mrb[6].mxu1  ;;  %v23266_v61 = vadd.f32 %v7590_v49, %v23193_v25  ;;  %v7592_v27 = vpop.f32.mrb[7].mxu0  ;;  %v19191_v51 = vld [vmem:[%s26098_s3 + $0x874] ss:$24 sps:$4 sm:$0xff]   ;;  %v23281_v49 = vadd.f32 %v8972_v56, %v23208_v6 }
 0x43d   : > { %26536 = vst [vmem:[#allocation180_spill] sm:$0xff] %v23263_v12  ;;  %v23269_v4 = vadd.f32 %v8974_v30, %v23197_v55  ;;  %v8976_v53 = vpop.f32.mrb[7].mxu1  ;;  %12770 = vmatprep.subr.bf16.mxu1 %v19188_v9  ;;  %v23284_v30 = vadd.f32 %v7592_v27, %v23204_v34  ;;  %v19242_v9 = vld [vmem:[%s26097_s2 + $0x644] ss:$24 sps:$4 sm:$0xff]  }
 0x43e   : > { %26538 = vst [vmem:[#allocation182_spill] sm:$0xff] %v23281_v49  ;;  %v23287_v42 = vadd.f32 %v8976_v53, %v23208_v6  ;;  %9305 = vmatmul.mubr.bf16.vlgmr.msra.gmra.mrb[56].mxu0 %v20573_v16  ;;  %v19189_v53 = vld [vmem:[%s26098_s3 + $0x870] ss:$24 sps:$4 sm:$0xff]   ;;  %v19240_v16 = vld [vmem:[%s26097_s2 + $0x640] ss:$24 sps:$4 sm:$0xff]  }
 0x43f   : > { %26537 = vst [vmem:[#allocation181_spill] sm:$0xff] %v23269_v4  ;;  %9314 = vmatprep.mubr.bf16.mxu0 %v20578_v22  ;;  %9446 = vmatpush1.bf16.msra.mxu0 %v19234_v33  ;;  %v19195_v33 = vld [vmem:[%s26098_s3 + $0x8a0] ss:$24 sps:$4 sm:$0xff]  }
 0x440   : > { %26539 = vst [vmem:[#allocation183_spill] sm:$0xff] %v23287_v42  ;;  %12771 = vmatpush1.bf16.msra.mxu1 %v19186_v31  ;;  %9447 = vmatprep.subr.bf16.mxu0 %v19242_v9  ;;  %v19248_v31 = vld [vmem:[%s26097_s2 + $0x674] ss:$24 sps:$4 sm:$0xff]  }
 0x441   : > { %12772 = vmatprep.subr.bf16.mxu1 %v19191_v51  ;;  %v7596_v0 = vpop.f32.mrb[8].mxu0 }
 0x442   : > { %v8980_v62 = vpop.f32.mrb[8].mxu1  ;;  %v7598_v27 = vpop.f32.mrb[9].mxu0  ;;  %v23315_v22 = vadd.f32 %v7596_v0, %v23193_v25  ;;  %v19200_v0 = vld [vmem:[%s26098_s3 + $0x8d4] ss:$24 sps:$4 sm:$0xff]  }
 0x443   : > { %v8982_v43 = vpop.f32.mrb[9].mxu1  ;;  %v7600_v51 = vpop.f32.mrb[10].mxu0  ;;  %v23321_v56 = vadd.f32 %v8980_v62, %v23197_v55  ;;  %9448 = vmatpush1.bf16.msra.mxu0 %v19240_v16  ;;  %v23336_v62 = vadd.f32 %v7598_v27, %v23204_v34  ;;  %v19254_v16 = vld [vmem:[%s26097_s2 + $0x6a4] ss:$24 sps:$4 sm:$0xff]  }
 0x444   : > { %12773 = vmatpush1.bf16.msra.mxu1 %v19189_v53  ;;  %v8984_v20 = vpop.f32.mrb[10].mxu1  ;;  %v23324_v9 = vadd.f32 %v7600_v51, %v23193_v25  ;;  %v7602_v63 = vpop.f32.mrb[11].mxu0  ;;  %v19246_v53 = vld [vmem:[%s26097_s2 + $0x670] ss:$24 sps:$4 sm:$0xff]   ;;  %v23339_v51 = vadd.f32 %v8982_v43, %v23208_v6  ;;  %9449 = vmatprep.subr.bf16.mxu0 %v19248_v31  ;;  %v19206_v31 = vld [vmem:[%s26098_s3 + $0xc] ss:$24 sps:$4 sm:$0xff]  }
 0x445   : > { %26540 = vst [vmem:[#allocation184_spill] sm:$0xff] %v23321_v56  ;;  %v23327_v60 = vadd.f32 %v8984_v20, %v23197_v55  ;;  %v8986_v7 = vpop.f32.mrb[11].mxu1  ;;  %12774 = vmatprep.subr.bf16.mxu1 %v19197_v5  ;;  %v23342_v20 = vadd.f32 %v7602_v63, %v23204_v34  ;;  %v19198_v63 = vld [vmem:[%s26098_s3 + $0x8d0] ss:$24 sps:$4 sm:$0xff]  }
 0x446   : > { %26542 = vst [vmem:[#allocation186_spill] sm:$0xff] %v23339_v51  ;;  %v23345_v5 = vadd.f32 %v8986_v7, %v23208_v6  ;;  %9315 = vmatmul.mubr.bf16.gmra.mrb[60].mxu0 %v20601_v32  ;;  %v19252_v7 = vld [vmem:[%s26097_s2 + $0x6a0] ss:$24 sps:$4 sm:$0xff]   ;;  %v19201_v43 = vld [vmem:[%s22546_s9 + $0x10] ss:$24 sps:$4 sm:$0xff]  }
 0x447   : > { %26541 = vst [vmem:[#allocation185_spill] sm:$0xff] %v23327_v60  ;;  %9324 = vmatprep.mubr.bf16.mxu0 %v20609_v37  ;;  %9450 = vmatpush1.bf16.msra.mxu0 %v19246_v53  ;;  %v19204_v37 = vld [vmem:[%s26098_s3 + $0x8] ss:$24 sps:$4 sm:$0xff]  }
 0x448   : > { %26543 = vst [vmem:[#allocation187_spill] sm:$0xff] %v23345_v5  ;;  %12775 = vmatpush1.bf16.msra.mxu1 %v19195_v33  ;;  %9451 = vmatprep.subr.bf16.mxu0 %v19254_v16 }
 0x449   : > { %12776 = vmatprep.subr.bf16.mxu1 %v19200_v0  ;;  %v7606_v32 = vpop.f32.mrb[12].mxu0  ;;  %v19210_v0 = vld [vmem:[%s22546_s9 + $0x44] ss:$24 sps:$4 sm:$0xff]  }
 0x44a   : > { %v8990_v27 = vpop.f32.mrb[12].mxu1  ;;  %v7608_v33 = vpop.f32.mrb[13].mxu0  ;;  %v23375_v53 = vadd.f32 %v7606_v32, %v23193_v25 }
 0x44b   : > { %v8992_v12 = vpop.f32.mrb[13].mxu1  ;;  %v7610_v56 = vpop.f32.mrb[14].mxu0  ;;  %v23378_v51 = vadd.f32 %v8990_v27, %v23197_v55  ;;  %v23386_v42 = vadd.f32 %v7608_v33, %v23204_v34  ;;  %9452 = vmatpush1.bf16.msra.mxu0 %v19252_v7  ;;  %v19207_v7 = vld [vmem:[%s26098_s3 + $0x38] ss:$24 sps:$4 sm:$0xff]  }
 0x44c   : > { %12777 = vmatpush1.bf16.msra.mxu1 %v19198_v63  ;;  %v8994_v60 = vpop.f32.mrb[14].mxu1  ;;  %v16766_v5 = vadd.f32 %v7610_v56, %v23193_v25  ;;  %v7612_v4 = vpop.f32.mrb[15].mxu0  ;;  %v19209_v63 = vld [vmem:[%s26098_s3 + $0x3c] ss:$24 sps:$4 sm:$0xff]   ;;  %v23389_v32 = vadd.f32 %v8992_v12, %v23208_v6  ;;  %v19258_v12 = vld [vmem:[%s26097_s2 + $0x6d0] ss:$24 sps:$4 sm:$0xff]  }
 0x44d   : > { %26544 = vst [vmem:[#allocation188_spill] sm:$0xff] %v23378_v51  ;;  %v16822_v16 = vadd.f32 %v8994_v60, %v23197_v55  ;;  %v8996_v49 = vpop.f32.mrb[15].mxu1  ;;  %12799 = vmatprep.subr.bf16.mxu1 %v19206_v31  ;;  %v16767_v27 = vadd.f32 %v7612_v4, %v23204_v34  ;;  %v19260_v60 = vld [vmem:[%s26097_s2 + $0x6d4] ss:$24 sps:$4 sm:$0xff]  }
 0x44e   : > { %26545 = vst [vmem:[#allocation189_spill] sm:$0xff] %v23389_v32  ;;  %v16823_v26 = vadd.f32 %v8996_v49, %v23208_v6  ;;  %v10501_v56 = vpack.c.bf16 %v16766_v5, %v23375_v53  ;;  %9325 = vmatmul.mubr.bf16.gmra.mrb[64].mxu0 %v20635_v50  ;;  %v19266_v5 = vld [vmem:[%s26097_s2 + $0x704] ss:$24 sps:$4 sm:$0xff]   ;;  %9453 = vmatprep.subr.bf16.mxu0 %v19260_v60 }
 0x44f   : > { %v10503_v31 = vpack.c.bf16 %v16822_v16, %v23378_v51  ;;  %12779 = vmatmul.mubr.bf16.vlgmr.msra.gmra.mrb[56].mxu1 %v19201_v43  ;;  %v10502_v4 = vpack.c.bf16 %v16767_v27, %v23386_v42  ;;  %9334 = vmatprep.mubr.bf16.mxu0 %v20643_v58  ;;  %v19215_v50 = vld [vmem:[%s26098_s3 + $0x6c] ss:$24 sps:$4 sm:$0xff]   ;;  %v19212_v16 = vld [vmem:[%s22546_s9 + $0x40] ss:$24 sps:$4 sm:$0xff]  }
 0x450   : > { %v10504_v49 = vpack.c.bf16 %v16823_v26, %v23389_v32  ;;  %12800 = vmatpush1.bf16.msra.mxu1 %v19204_v37  ;;  %12788 = vmatprep.mubr.bf16.mxu1 %v19210_v0 }
 0x451   : > { %12801 = vmatprep.subr.bf16.mxu1 %v19209_v63  ;;  %v7616_v43 = vpop.f32.mrb[16].mxu0  ;;  %9454 = vmatpush1.bf16.msra.mxu0 %v19258_v12  ;;  %v19213_v63 = vld [vmem:[%s26098_s3 + $0x68] ss:$24 sps:$4 sm:$0xff]   ;;  %v19218_v12 = vld [vmem:[%s26098_s3 + $0x9c] ss:$24 sps:$4 sm:$0xff]  }
 0x452   : > { %v9000_v33 = vpop.f32.mrb[16].mxu1  ;;  %v7618_v26 = vpop.f32.mrb[17].mxu0  ;;  %9455 = vmatprep.subr.bf16.mxu0 %v19266_v5  ;;  %v16768_v58 = vadd.f32 %v7616_v43, %v23193_v25 }
 0x453   : > { %v9002_v37 = vpop.f32.mrb[17].mxu1  ;;  %v7620_v0 = vpop.f32.mrb[18].mxu0  ;;  %v16824_v51 = vadd.f32 %v9000_v33, %v23197_v55  ;;  %v16769_v5 = vadd.f32 %v7618_v26, %v23204_v34 }
 0x454   : > { %12802 = vmatpush1.bf16.msra.mxu1 %v19207_v7  ;;  %v9004_v27 = vpop.f32.mrb[18].mxu1  ;;  %v16770_v32 = vadd.f32 %v7620_v0, %v23193_v25  ;;  %v7622_v48 = vpop.f32.mrb[19].mxu0  ;;  %v19264_v7 = vld [vmem:[%s26097_s2 + $0x700] ss:$24 sps:$4 sm:$0xff]   ;;  %v16825_v43 = vadd.f32 %v9002_v37, %v23208_v6  ;;  %v10695_v37 = vunpack.c.h.b16 %v10503_v31 }
 0x455   : > { %v16826_v60 = vadd.f32 %v9004_v27, %v23197_v55  ;;  %v9006_v46 = vpop.f32.mrb[19].mxu1  ;;  %12803 = vmatprep.subr.bf16.mxu1 %v19215_v50  ;;  %v16771_v33 = vadd.f32 %v7622_v48, %v23204_v34  ;;  %v19272_v50 = vld [vmem:[%s26097_s2 + $0x734] ss:$24 sps:$4 sm:$0xff]   ;;  %v19216_v48 = vld [vmem:[%s26098_s3 + $0x98] ss:$24 sps:$4 sm:$0xff]   ;;  %9456 = vmatpush1.bf16.msra.mxu0 %v19264_v7 }
 0x456   : > { %v16827_v0 = vadd.f32 %v9006_v46, %v23208_v6  ;;  %v23435_v27 = vpack.c.bf16 %v16770_v32, %v16768_v58  ;;  %9335 = vmatmul.mubr.bf16.gmra.mrb[68].mxu0 %v20669_v15  ;;  %v10693_v46 = vunpack.c.h.b16 %v10501_v56  ;;  %v19221_v15 = vld [vmem:[%s26098_s3 + $0xcc] ss:$24 sps:$4 sm:$0xff]   ;;  %v10696_v58 = vunpack.c.h.b16 %v10504_v49  ;;  %9457 = vmatprep.subr.bf16.mxu0 %v19272_v50  ;;  %v19219_v50 = vld [vmem:[%s26098_s3 + $0xc8] ss:$24 sps:$4 sm:$0xff]  }
 0x457   : > { %v23437_v59 = vpack.c.bf16 %v16826_v60, %v16824_v51  ;;  %12789 = vmatmul.mubr.bf16.gmra.mrb[60].mxu1 %v19212_v16  ;;  %v23440_v13 = vpack.c.bf16 %v16771_v33, %v16769_v5  ;;  %9344 = vmatprep.mubr.bf16.mxu0 %v20677_v24  ;;  %v19270_v16 = vld [vmem:[%s26097_s2 + $0x730] ss:$24 sps:$4 sm:$0xff]  }
 0x458   : > { %v23442_v26 = vpack.c.bf16 %v16827_v0, %v16825_v43  ;;  %12804 = vmatpush1.bf16.msra.mxu1 %v19213_v63  ;;  %v10699_v32 = vunpack.c.l.b16 %v23435_v27  ;;  %v10694_v63 = vunpack.c.h.b16 %v10502_v4  ;;  %12831 = vmatprep.mubr.bf16.mxu1 %v22891_v23 }
 0x459   : > { %v10701_v51 = vunpack.c.l.b16 %v23437_v59  ;;  %12805 = vmatprep.subr.bf16.mxu1 %v19218_v12  ;;  %v10700_v24 = vunpack.c.l.b16 %v23440_v13  ;;  %v7626_v31 = vpop.f32.mrb[20].mxu0  ;;  %v19278_v12 = vld [vmem:[%s26097_s2 + $0x764] ss:$24 sps:$4 sm:$0xff]   ;;  %9458 = vmatpush1.bf16.msra.mxu0 %v19270_v16 }
 0x45a   : > { %v10702_v56 = vunpack.c.l.b16 %v23442_v26  ;;  %v9010_v60 = vpop.f32.mrb[20].mxu1  ;;  %v23462_v7 = vpack.c.b16 %v10699_v32, %v10693_v46  ;;  %v7628_v43 = vpop.f32.mrb[21].mxu0  ;;  %v16772_v49 = vadd.f32 %v7626_v31, %v23193_v25  ;;  %9459 = vmatprep.subr.bf16.mxu0 %v19278_v12  ;;  %v10705_v12 = vunpack.c.h.b16 %v23435_v27 }
 0x45b   : > { %v23464_v5 = vpack.c.b16 %v10701_v51, %v10695_v37  ;;  %v9012_v4 = vpop.f32.mrb[21].mxu1  ;;  %v7630_v33 = vpop.f32.mrb[22].mxu0  ;;  %v23470_v36 = vpack.c.b16 %v10700_v24, %v10694_v63  ;;  %v16828_v23 = vadd.f32 %v9010_v60, %v23197_v55  ;;  %v19276_v63 = vld [vmem:[%s26097_s2 + $0x760] ss:$24 sps:$4 sm:$0xff]   ;;  %v10708_v27 = vunpack.c.h.b16 %v23442_v26 }
 0x45c   : > { %12806 = vmatpush1.bf16.msra.mxu1 %v19216_v48  ;;  %v9014_v0 = vpop.f32.mrb[22].mxu1  ;;  %v23472_v29 = vpack.c.b16 %v10702_v56, %v10696_v58  ;;  %v16774_v46 = vadd.f32 %v7630_v33, %v23193_v25  ;;  %v7632_v32 = vpop.f32.mrb[23].mxu0  ;;  %v19224_v48 = vld [vmem:[%s26098_s3 + $0xfc] ss:$24 sps:$4 sm:$0xff]   ;;  %v16773_v58 = vadd.f32 %v7628_v43, %v23204_v34  ;;  %v16829_v24 = vadd.f32 %v9012_v4, %v23208_v6  ;;  %v19222_v4 = vld [vmem:[%s26098_s3 + $0xf8] ss:$24 sps:$4 sm:$0xff]  }
 0x45d   : > { %26546 = vst [vmem:[#allocation190_spill] sm:$0xff] %v23464_v5  ;;  %v16830_v37 = vadd.f32 %v9014_v0, %v23197_v55  ;;  %v9016_v51 = vpop.f32.mrb[23].mxu1  ;;  %12807 = vmatprep.subr.bf16.mxu1 %v19221_v15  ;;  %v16775_v56 = vadd.f32 %v7632_v32, %v23204_v34  ;;  %v19284_v15 = vld [vmem:[%s26097_s2 + $0x794] ss:$24 sps:$4 sm:$0xff]   ;;  %9460 = vmatpush1.bf16.msra.mxu0 %v19276_v63 }
 0x45e   : > { %26547 = vst [vmem:[#allocation191_spill] sm:$0xff] %v23472_v29  ;;  %v16831_v31 = vadd.f32 %v9016_v51, %v23208_v6  ;;  %v23490_v60 = vpack.c.bf16 %v16774_v46, %v16772_v49  ;;  %9345 = vmatmul.mubr.bf16.gmra.mrb[72].mxu0 %v20703_v39  ;;  %v10707_v49 = vunpack.c.h.b16 %v23437_v59  ;;  %v19227_v39 = vld [vmem:[%s26098_s3 + $0x12c] ss:$24 sps:$4 sm:$0xff]   ;;  %9461 = vmatprep.subr.bf16.mxu0 %v19284_v15 }
 0x45f   : > { %v23492_v16 = vpack.c.bf16 %v16830_v37, %v16828_v23  ;;  %v23495_v33 = vpack.c.bf16 %v16775_v56, %v16773_v58  ;;  %9354 = vmatprep.mubr.bf16.mxu0 %v20708_v41  ;;  %v10706_v41 = vunpack.c.h.b16 %v23440_v13  ;;  %v19290_v51 = vld [vmem:[%s26097_s2 + $0x7c4] ss:$24 sps:$4 sm:$0xff]  }
 0x460   : > { %v23497_v43 = vpack.c.bf16 %v16831_v31, %v16829_v24  ;;  %12808 = vmatpush1.bf16.msra.mxu1 %v19219_v50  ;;  %v10711_v0 = vunpack.c.l.b16 %v23490_v60  ;;  %v19282_v50 = vld [vmem:[%s26097_s2 + $0x790] ss:$24 sps:$4 sm:$0xff]  }
 0x461   : > { %v10713_v23 = vunpack.c.l.b16 %v23492_v16  ;;  %12809 = vmatprep.subr.bf16.mxu1 %v19224_v48  ;;  %v10712_v59 = vunpack.c.l.b16 %v23495_v33  ;;  %v7636_v37 = vpop.f32.mrb[24].mxu0  ;;  %v19225_v31 = vld [vmem:[%s26098_s3 + $0x128] ss:$24 sps:$4 sm:$0xff]   ;;  %9462 = vmatpush1.bf16.msra.mxu0 %v19282_v50  ;;  %v19296_v50 = vld [vmem:[%s26097_s2 + $0x7f4] ss:$24 sps:$4 sm:$0xff]  }
 0x462   : > { %v10714_v46 = vunpack.c.l.b16 %v23497_v43  ;;  %v9020_v32 = vpop.f32.mrb[24].mxu1  ;;  %v7638_v63 = vpop.f32.mrb[25].mxu0  ;;  %v23522_v24 = vpack.c.b16 %v10711_v0, %v10705_v12  ;;  %v16776_v13 = vadd.f32 %v7636_v37, %v23193_v25  ;;  %v19230_v37 = vld [vmem:[%s26098_s3 + $0x15c] ss:$24 sps:$4 sm:$0xff]   ;;  %9463 = vmatprep.subr.bf16.mxu0 %v19290_v51  ;;  %v10717_v51 = vunpack.c.h.b16 %v23490_v60  ;;  %v19294_v60 = vld [vmem:[%s26097_s2 + $0x7f0] ss:$24 sps:$4 sm:$0xff]  }
 0x463   : > { %v23520_v48 = vpack.c.b16 %v10713_v23, %v10707_v49  ;;  %v9022_v58 = vpop.f32.mrb[25].mxu1  ;;  %v7640_v26 = vpop.f32.mrb[26].mxu0  ;;  %v23528_v15 = vpack.c.b16 %v10712_v59, %v10706_v41  ;;  %v16832_v49 = vadd.f32 %v9020_v32, %v23197_v55  ;;  %v16777_v41 = vadd.f32 %v7638_v63, %v23204_v34  ;;  %v19288_v32 = vld [vmem:[%s26097_s2 + $0x7c0] ss:$24 sps:$4 sm:$0xff]  }
 0x464   : > { %12810 = vmatpush1.bf16.msra.mxu1 %v19222_v4  ;;  %v9024_v56 = vpop.f32.mrb[26].mxu1  ;;  %v23530_v5 = vpack.c.b16 %v10714_v46, %v10708_v27  ;;  %v23534_v23 = vadd.f32 %v7640_v26, %v23193_v25  ;;  %v7642_v0 = vpop.f32.mrb[27].mxu0  ;;  %v16833_v27 = vadd.f32 %v9022_v58, %v23208_v6 }
 0x465   : > { %26548 = vst [vmem:[#allocation192_spill] sm:$0xff] %v23520_v48  ;;  %v23537_v12 = vadd.f32 %v9024_v56, %v23197_v55  ;;  %v9026_v4 = vpop.f32.mrb[27].mxu1  ;;  %12811 = vmatprep.subr.bf16.mxu1 %v19227_v39  ;;  %v23545_v59 = vadd.f32 %v7642_v0, %v23204_v34  ;;  %v19228_v56 = vld [vmem:[%s26098_s3 + $0x158] ss:$24 sps:$4 sm:$0xff]   ;;  %9464 = vmatpush1.bf16.msra.mxu0 %v19288_v32  ;;  %v19231_v32 = vld [vmem:[%s26098_s3 + $0x188] ss:$24 sps:$4 sm:$0xff]  }
 0x466   : > { %26549 = vst [vmem:[#allocation193_spill] sm:$0xff] %v23530_v5  ;;  %v23548_v46 = vadd.f32 %v9026_v4, %v23208_v6  ;;  %v10519_v39 = vpack.c.bf16 %v23534_v23, %v16776_v13  ;;  %9355 = vmatmul.mubr.bf16.gmra.mrb[76].mxu0 %v20737_v2  ;;  %v10719_v13 = vunpack.c.h.b16 %v23492_v16  ;;  %v19233_v2 = vld [vmem:[%s26098_s3 + $0x18c] ss:$24 sps:$4 sm:$0xff]   ;;  %v10718_v4 = vunpack.c.h.b16 %v23495_v33  ;;  %9465 = vmatprep.subr.bf16.mxu0 %v19296_v50 }
 0x467   : > { %26550 = vst [vmem:[#allocation194_spill] sm:$0xff] %v23537_v12  ;;  %v10521_v26 = vpack.c.bf16 %v23537_v12, %v16832_v49  ;;  %v10520_v63 = vpack.c.bf16 %v23545_v59, %v16777_v41  ;;  %9364 = vmatprep.mubr.bf16.mxu0 %v20742_v10  ;;  %v19302_v33 = vld [vmem:[%s26097_s2 + $0x824] ss:$24 sps:$4 sm:$0xff]  }
 0x468   : > { %26551 = vst [vmem:[#allocation195_spill] sm:$0xff] %v23548_v46  ;;  %v10522_v58 = vpack.c.bf16 %v23548_v46, %v16833_v27  ;;  %12812 = vmatpush1.bf16.msra.mxu1 %v19225_v31  ;;  %v10723_v49 = vunpack.c.l.b16 %v10519_v39  ;;  %v10720_v31 = vunpack.c.h.b16 %v23497_v43 }
 0x469   : > { %v10725_v0 = vunpack.c.l.b16 %v10521_v26  ;;  %12813 = vmatprep.subr.bf16.mxu1 %v19230_v37  ;;  %v10724_v41 = vunpack.c.l.b16 %v10520_v63  ;;  %v7646_v12 = vpop.f32.mrb[28].mxu0  ;;  %9466 = vmatpush1.bf16.msra.mxu0 %v19294_v60 }
 0x46a   : > { %v10726_v27 = vunpack.c.l.b16 %v10522_v58  ;;  %v9030_v46 = vpop.f32.mrb[28].mxu1  ;;  %v7648_v10 = vpop.f32.mrb[29].mxu0  ;;  %v23580_v39 = vpack.c.b16 %v10723_v49, %v10717_v51  ;;  %9467 = vmatprep.subr.bf16.mxu0 %v19302_v33 }
 0x46b   : > { %v23575_v16 = vpack.c.b16 %v10725_v0, %v10719_v13  ;;  %v9032_v37 = vpop.f32.mrb[29].mxu1  ;;  %v7650_v43 = vpop.f32.mrb[30].mxu0  ;;  %v23585_v63 = vpack.c.b16 %v10724_v41, %v10718_v4  ;;  %v23590_v13 = vadd.f32 %v7646_v12, %v23193_v25  ;;  %v23593_v50 = vadd.f32 %v9030_v46, %v23197_v55  ;;  %v19239_v4 = vld [vmem:[%s26098_s3 + $0x1bc] ss:$24 sps:$4 sm:$0xff]  }
 0x46c   : > { %12814 = vmatpush1.bf16.msra.mxu1 %v19228_v56  ;;  %v9034_v26 = vpop.f32.mrb[30].mxu1  ;;  %v23587_v58 = vpack.c.b16 %v10726_v27, %v10720_v31  ;;  %v23596_v51 = vadd.f32 %v7650_v43, %v23193_v25  ;;  %v7652_v49 = vpop.f32.mrb[31].mxu0  ;;  %v23605_v31 = vadd.f32 %v7648_v10, %v23204_v34  ;;  %v23608_v12 = vadd.f32 %v9032_v37, %v23208_v6  ;;  %v19308_v37 = vld [vmem:[%s26097_s2 + $0x854] ss:$24 sps:$4 sm:$0xff]   ;;  %v19314_v43 = vld [vmem:[%s26097_s2 + $0x884] ss:$24 sps:$4 sm:$0xff]  }
 0x46d   : > { %26552 = vst [vmem:[#allocation196_spill] sm:$0xff] %v23575_v16  ;;  %26554 = vst [vmem:[#allocation198_spill] sm:$0xff] %v23590_v13  ;;  %v23599_v56 = vadd.f32 %v9034_v26, %v23197_v55  ;;  %v9036_v0 = vpop.f32.mrb[31].mxu1  ;;  %12815 = vmatprep.subr.bf16.mxu1 %v19233_v2  ;;  %v23611_v46 = vadd.f32 %v7652_v49, %v23204_v34  ;;  %v19300_v2 = vld [vmem:[%s26097_s2 + $0x820] ss:$24 sps:$4 sm:$0xff]  }
 0x46e   : > { %26553 = vst [vmem:[#allocation197_spill] sm:$0xff] %v23587_v58  ;;  %26555 = vst [vmem:[#allocation199_spill] sm:$0xff] %v23593_v50  ;;  %v23614_v41 = vadd.f32 %v9036_v0, %v23208_v6  ;;  %9365 = vmatmul.mubr.bf16.gmra.mrb[80].mxu0 %v20771_v35  ;;  %v19237_v26 = vld [vmem:[%s26098_s3 + $0x1b8] ss:$24 sps:$4 sm:$0xff]   ;;  %v19245_v35 = vld [vmem:[%s26098_s3 + $0x1ec] ss:$24 sps:$4 sm:$0xff]  }
 0x46f   : > { %26556 = vst [vmem:[#allocation200_spill] sm:$0xff] %v23599_v56  ;;  %26557 = vst [vmem:[#allocation201_spill] sm:$0xff] %v23608_v12  ;;  %9374 = vmatprep.mubr.bf16.mxu0 %v20779_v40  ;;  %9468 = vmatpush1.bf16.msra.mxu0 %v19300_v2  ;;  %v19306_v0 = vld [vmem:[%s26097_s2 + $0x850] ss:$24 sps:$4 sm:$0xff]   ;;  %v19251_v12 = vld [vmem:[%s26098_s3 + $0x21c] ss:$24 sps:$4 sm:$0xff]  }
 0x470   : > { %26558 = vst [vmem:[#allocation202_spill] sm:$0xff] %v23614_v41  ;;  %12816 = vmatpush1.bf16.msra.mxu1 %v19231_v32  ;;  %9469 = vmatprep.subr.bf16.mxu0 %v19308_v37  ;;  %v19243_v27 = vld [vmem:[%s26098_s3 + $0x1e8] ss:$24 sps:$4 sm:$0xff]   ;;  %v19263_v16 = vld [vmem:[%s26098_s3 + $0x27c] ss:$24 sps:$4 sm:$0xff]  }
 0x471   : > { %12817 = vmatprep.subr.bf16.mxu1 %v19239_v4  ;;  %v7656_v33 = vpop.f32.mrb[32].mxu0 }
 0x472   : > { %v9040_v49 = vpop.f32.mrb[32].mxu1  ;;  %v7658_v10 = vpop.f32.mrb[33].mxu0  ;;  %v23648_v2 = vadd.f32 %v7656_v33, %v23193_v25 }
 0x473   : > { %v9042_v32 = vpop.f32.mrb[33].mxu1  ;;  %v7660_v40 = vpop.f32.mrb[34].mxu0  ;;  %v23651_v60 = vadd.f32 %v9040_v49, %v23197_v55  ;;  %v23663_v41 = vadd.f32 %v7658_v10, %v23204_v34  ;;  %9470 = vmatpush1.bf16.msra.mxu0 %v19306_v0  ;;  %v19326_v0 = vld [vmem:[%s26097_s2 + $0x8e4] ss:$24 sps:$4 sm:$0xff]  }
 0x474   : > { %12818 = vmatpush1.bf16.msra.mxu1 %v19237_v26  ;;  %v9044_v4 = vpop.f32.mrb[34].mxu1  ;;  %26559 = vst [vmem:[#allocation203_spill] sm:$0xff] %v23648_v2  ;;  %v23654_v50 = vadd.f32 %v7660_v40, %v23193_v25  ;;  %v7662_v56 = vpop.f32.mrb[35].mxu0  ;;  %v23666_v33 = vadd.f32 %v9042_v32, %v23208_v6  ;;  %9471 = vmatprep.subr.bf16.mxu0 %v19314_v43 }
 0x475   : > { %26560 = vst [vmem:[#allocation204_spill] sm:$0xff] %v23651_v60  ;;  %v23657_v37 = vadd.f32 %v9044_v4, %v23197_v55  ;;  %v9046_v26 = vpop.f32.mrb[35].mxu1  ;;  %12819 = vmatprep.subr.bf16.mxu1 %v19245_v35  ;;  %26563 = vst [vmem:[#allocation207_spill] sm:$0xff] %v23663_v41  ;;  %v23669_v49 = vadd.f32 %v7662_v56, %v23204_v34  ;;  %v19312_v35 = vld [vmem:[%s26097_s2 + $0x880] ss:$24 sps:$4 sm:$0xff]  }
 0x476   : > { %26561 = vst [vmem:[#allocation205_spill] sm:$0xff] %v23654_v50  ;;  %26564 = vst [vmem:[#allocation208_spill] sm:$0xff] %v23666_v33  ;;  %v23672_v40 = vadd.f32 %v9046_v26, %v23208_v6  ;;  %9375 = vmatmul.mubr.bf16.gmra.mrb[84].mxu0 %v20805_v1  ;;  %v19320_v56 = vld [vmem:[%s26097_s2 + $0x8b4] ss:$24 sps:$4 sm:$0xff]   ;;  %v19249_v26 = vld [vmem:[%s26098_s3 + $0x218] ss:$24 sps:$4 sm:$0xff]  }
 0x477   : > { %26562 = vst [vmem:[#allocation206_spill] sm:$0xff] %v23657_v37  ;;  %26565 = vst [vmem:[#allocation209_spill] sm:$0xff] %v23669_v49  ;;  %9384 = vmatprep.mubr.bf16.mxu0 %v20813_v14  ;;  %v19257_v1 = vld [vmem:[%s26098_s3 + $0x24c] ss:$24 sps:$4 sm:$0xff]   ;;  %9472 = vmatpush1.bf16.msra.mxu0 %v19312_v35  ;;  %v19318_v4 = vld [vmem:[%s26097_s2 + $0x8b0] ss:$24 sps:$4 sm:$0xff]  }
 0x478   : > { %26566 = vst [vmem:[#allocation210_spill] sm:$0xff] %v23672_v40  ;;  %12820 = vmatpush1.bf16.msra.mxu1 %v19243_v27  ;;  %9473 = vmatprep.subr.bf16.mxu0 %v19320_v56  ;;  %v19255_v60 = vld [vmem:[%s26098_s3 + $0x248] ss:$24 sps:$4 sm:$0xff]  }
 0x479   : > { %12821 = vmatprep.subr.bf16.mxu1 %v19251_v12  ;;  %v7666_v43 = vpop.f32.mrb[36].mxu0 }
 0x47a   : > { %v9050_v10 = vpop.f32.mrb[36].mxu1  ;;  %v7668_v32 = vpop.f32.mrb[37].mxu0  ;;  %v23706_v35 = vadd.f32 %v7666_v43, %v23193_v25 }
 0x47b   : > { %v9052_v27 = vpop.f32.mrb[37].mxu1  ;;  %v7670_v14 = vpop.f32.mrb[38].mxu0  ;;  %v23709_v37 = vadd.f32 %v9050_v10, %v23197_v55  ;;  %v23721_v58 = vadd.f32 %v7668_v32, %v23204_v34  ;;  %9474 = vmatpush1.bf16.msra.mxu0 %v19318_v4 }
 0x47c   : > { %12822 = vmatpush1.bf16.msra.mxu1 %v19249_v26  ;;  %v9054_v12 = vpop.f32.mrb[38].mxu1  ;;  %26567 = vst [vmem:[#allocation211_spill] sm:$0xff] %v23706_v35  ;;  %v23712_v33 = vadd.f32 %v7670_v14, %v23193_v25  ;;  %v7672_v40 = vpop.f32.mrb[39].mxu0  ;;  %v23724_v43 = vadd.f32 %v9052_v27, %v23208_v6  ;;  %9475 = vmatprep.subr.bf16.mxu0 %v19326_v0 }
 0x47d   : > { %26568 = vst [vmem:[#allocation212_spill] sm:$0xff] %v23709_v37  ;;  %v23715_v56 = vadd.f32 %v9054_v12, %v23197_v55  ;;  %v9056_v26 = vpop.f32.mrb[39].mxu1  ;;  %12823 = vmatprep.subr.bf16.mxu1 %v19257_v1  ;;  %26571 = vst [vmem:[#allocation215_spill] sm:$0xff] %v23721_v58  ;;  %v23727_v10 = vadd.f32 %v7672_v40, %v23204_v34  ;;  %v19324_v1 = vld [vmem:[%s26097_s2 + $0x8e0] ss:$24 sps:$4 sm:$0xff]  }
 0x47e   : > { %26569 = vst [vmem:[#allocation213_spill] sm:$0xff] %v23712_v33  ;;  %26572 = vst [vmem:[#allocation216_spill] sm:$0xff] %v23724_v43  ;;  %v23730_v14 = vadd.f32 %v9056_v26, %v23208_v6  ;;  %9385 = vmatmul.mubr.bf16.gmra.mrb[88].mxu0 %v20839_v38  ;;  %v19368_v40 = vld [vmem:[%s26097_s2 + $0x914] ss:$24 sps:$4 sm:$0xff]   ;;  %v19261_v26 = vld [vmem:[%s26098_s3 + $0x278] ss:$24 sps:$4 sm:$0xff]  }
 0x47f   : > { %26570 = vst [vmem:[#allocation214_spill] sm:$0xff] %v23715_v56  ;;  %26573 = vst [vmem:[#allocation217_spill] sm:$0xff] %v23727_v10  ;;  %9394 = vmatprep.mubr.bf16.mxu0 %v20841_v44  ;;  %v19269_v38 = vld [vmem:[%s26098_s3 + $0x2ac] ss:$24 sps:$4 sm:$0xff]   ;;  %9476 = vmatpush1.bf16.msra.mxu0 %v19324_v1  ;;  %v19267_v37 = vld [vmem:[%s26098_s3 + $0x2a8] ss:$24 sps:$4 sm:$0xff]  }
 0x480   : > { %26574 = vst [vmem:[#allocation218_spill] sm:$0xff] %v23730_v14  ;;  %12824 = vmatpush1.bf16.msra.mxu1 %v19255_v60  ;;  %9618 = vmatprep.subr.bf16.mxu0 %v19368_v40  ;;  %v19275_v40 = vld [vmem:[%s26098_s3 + $0x2dc] ss:$24 sps:$4 sm:$0xff]  }
 0x481   : > { %12825 = vmatprep.subr.bf16.mxu1 %v19263_v16  ;;  %v7676_v0 = vpop.f32.mrb[40].mxu0 }
 0x482   : > { %v9060_v32 = vpop.f32.mrb[40].mxu1  ;;  %v7678_v12 = vpop.f32.mrb[41].mxu0  ;;  %v23758_v44 = vadd.f32 %v7676_v0, %v23193_v25 }
 0x483   : > { %v9062_v4 = vpop.f32.mrb[41].mxu1  ;;  %v7680_v27 = vpop.f32.mrb[42].mxu0  ;;  %v23761_v16 = vadd.f32 %v9060_v32, %v23197_v55 }
 0x484   : > { %12826 = vmatpush1.bf16.msra.mxu1 %v19261_v26  ;;  %v9064_v60 = vpop.f32.mrb[42].mxu1  ;;  %26575 = vst [vmem:[#allocation219_spill] sm:$0xff] %v23758_v44  ;;  %v16794_v56 = vadd.f32 %v7680_v27, %v23193_v25  ;;  %v7682_v43 = vpop.f32.mrb[43].mxu0  ;;  %v23769_v26 = vadd.f32 %v7678_v12, %v23204_v34  ;;  %v23772_v0 = vadd.f32 %v9062_v4, %v23208_v6  ;;  %v19273_v12 = vld [vmem:[%s26098_s3 + $0x2d8] ss:$24 sps:$4 sm:$0xff]   ;;  %v26579_v4 = vld [vmem:[#allocation2_spill] sm:$0xff] }
 0x485   : > { %26576 = vst [vmem:[#allocation220_spill] sm:$0xff] %v23761_v16  ;;  %v16850_v1 = vadd.f32 %v9064_v60, %v23197_v55  ;;  %v9066_v14 = vpop.f32.mrb[43].mxu1  ;;  %12827 = vmatprep.subr.bf16.mxu1 %v19269_v38  ;;  %v16795_v32 = vadd.f32 %v7682_v43, %v23204_v34 }
 0x486   : > { %26577 = vst [vmem:[#allocation221_spill] sm:$0xff] %v23769_v26  ;;  %26578 = vst [vmem:[#allocation222_spill] sm:$0xff] %v23772_v0  ;;  %v16851_v48 = vadd.f32 %v9066_v14, %v23208_v6  ;;  %v10543_v27 = vpack.c.bf16 %v16794_v56, %v23758_v44  ;;  %9395 = vmatmul.mubr.bf16.gmra.mrb[92].mxu0 %v20852_v52  ;;  %v19281_v56 = vld [vmem:[%s26098_s3 + $0x30c] ss:$24 sps:$4 sm:$0xff]  }
 0x487   : > { %v10545_v60 = vpack.c.bf16 %v16850_v1, %v23761_v16  ;;  %v10544_v38 = vpack.c.bf16 %v16795_v32, %v23769_v26  ;;  %9404 = vmatprep.mubr.bf16.mxu0 %v26579_v4 }
 0x488   : > { %v10546_v5 = vpack.c.bf16 %v16851_v48, %v23772_v0  ;;  %12828 = vmatpush1.bf16.msra.mxu1 %v19267_v37  ;;  %v19279_v48 = vld [vmem:[%s26098_s3 + $0x308] ss:$24 sps:$4 sm:$0xff]  }
 0x489   : > { %12829 = vmatprep.subr.bf16.mxu1 %v19275_v40  ;;  %v7686_v43 = vpop.f32.mrb[44].mxu0 }
 0x48a   : > { %v9070_v14 = vpop.f32.mrb[44].mxu1  ;;  %v7688_v1 = vpop.f32.mrb[45].mxu0  ;;  %v16796_v37 = vadd.f32 %v7686_v43, %v23193_v25 }
 0x48b   : > { %v9072_v52 = vpop.f32.mrb[45].mxu1  ;;  %v7690_v32 = vpop.f32.mrb[46].mxu0  ;;  %v16852_v40 = vadd.f32 %v9070_v14, %v23197_v55  ;;  %v16797_v44 = vadd.f32 %v7688_v1, %v23204_v34 }
 0x48c   : > { %12830 = vmatpush1.bf16.msra.mxu1 %v19273_v12  ;;  %v9074_v16 = vpop.f32.mrb[46].mxu1  ;;  %v16798_v4 = vadd.f32 %v7690_v32, %v23193_v25  ;;  %v7692_v29 = vpop.f32.mrb[47].mxu0  ;;  %v19287_v12 = vld [vmem:[%s26098_s3 + $0x33c] ss:$24 sps:$4 sm:$0xff]   ;;  %v16853_v35 = vadd.f32 %v9072_v52, %v23208_v6  ;;  %v10777_v52 = vunpack.c.h.b16 %v10543_v27 }
 0x48d   : > { %v16854_v0 = vadd.f32 %v9074_v16, %v23197_v55  ;;  %v9076_v21 = vpop.f32.mrb[47].mxu1  ;;  %12852 = vmatprep.subr.bf16.mxu1 %v19281_v56  ;;  %v16799_v33 = vadd.f32 %v7692_v29, %v23204_v34  ;;  %v26580_v16 = vld [vmem:[#allocation3_spill] sm:$0xff]  ;;  %v23808_v56 = vld [vmem:[%s22546_s9] ss:$24 sps:$4 sm:$0xff]   ;;  %v26581_v29 = vld [vmem:[#allocation4_spill] sm:$0xff] }
 0x48e   : > { %v16855_v43 = vadd.f32 %v9076_v21, %v23208_v6  ;;  %v23802_v14 = vpack.c.bf16 %v16798_v4, %v16796_v37  ;;  %9405 = vmatmul.mubr.bf16.gmra.mrb[96].mxu0 %v26580_v16  ;;  %v19285_v21 = vld [vmem:[%s26098_s3 + $0x338] ss:$24 sps:$4 sm:$0xff]  }
 0x48f   : > { %v23804_v32 = vpack.c.bf16 %v16854_v0, %v16852_v40  ;;  %12832 = vmatmul.mubr.bf16.vlgmr.msra.gmra.mrb[64].mxu1 %v23808_v56  ;;  %v23811_v26 = vpack.c.bf16 %v16799_v33, %v16797_v44  ;;  %9414 = vmatprep.mubr.bf16.mxu0 %v26581_v29  ;;  %v10779_v0 = vunpack.c.h.b16 %v10545_v60  ;;  %v19293_v33 = vld [vmem:[%s26098_s3 + $0x36c] ss:$24 sps:$4 sm:$0xff]   ;;  %v10778_v44 = vunpack.c.h.b16 %v10544_v38  ;;  %v19291_v38 = vld [vmem:[%s26098_s3 + $0x368] ss:$24 sps:$4 sm:$0xff]  }
 0x490   : > { %v23813_v1 = vpack.c.bf16 %v16855_v43, %v16853_v35  ;;  %12853 = vmatpush1.bf16.msra.mxu1 %v19279_v48  ;;  %v10783_v37 = vunpack.c.l.b16 %v23802_v14  ;;  %v23825_v35 = vld [vmem:[%s22546_s9 + $0x34] ss:$24 sps:$4 sm:$0xff]   ;;  %v10780_v48 = vunpack.c.h.b16 %v10546_v5 }
 0x491   : > { %v10785_v40 = vunpack.c.l.b16 %v23804_v32  ;;  %12854 = vmatprep.subr.bf16.mxu1 %v19287_v12  ;;  %12841 = vmatprep.mubr.bf16.mxu1 %v23825_v35  ;;  %v10784_v4 = vunpack.c.l.b16 %v23811_v26  ;;  %v7696_v60 = vpop.f32.mrb[48].mxu0 }
 0x492   : > { %v10786_v27 = vunpack.c.l.b16 %v23813_v1  ;;  %v9080_v43 = vpop.f32.mrb[48].mxu1  ;;  %v23830_v16 = vpack.c.b16 %v10783_v37, %v10777_v52  ;;  %v7698_v12 = vpop.f32.mrb[49].mxu0  ;;  %v16800_v41 = vadd.f32 %v7696_v60, %v23193_v25 }
 0x493   : > { %v23832_v29 = vpack.c.b16 %v10785_v40, %v10779_v0  ;;  %v9082_v58 = vpop.f32.mrb[49].mxu1  ;;  %v7700_v10 = vpop.f32.mrb[50].mxu0  ;;  %v23837_v5 = vpack.c.b16 %v10784_v4, %v10778_v44  ;;  %v16856_v52 = vadd.f32 %v9080_v43, %v23197_v55  ;;  %v16801_v44 = vadd.f32 %v7698_v12, %v23204_v34 }
 0x494   : > { %26582 = vst [vmem:[#allocation2_spill] sm:$0xff] %v23830_v16  ;;  %12855 = vmatpush1.bf16.msra.mxu1 %v19285_v21  ;;  %v9084_v2 = vpop.f32.mrb[50].mxu1  ;;  %v23839_v50 = vpack.c.b16 %v10786_v27, %v10780_v48  ;;  %v16802_v0 = vadd.f32 %v7700_v10, %v23193_v25  ;;  %v7702_v21 = vpop.f32.mrb[51].mxu0  ;;  %v16857_v48 = vadd.f32 %v9082_v58, %v23208_v6  ;;  %v19297_v58 = vld [vmem:[%s26098_s3 + $0x398] ss:$24 sps:$4 sm:$0xff]  }
 0x495   : > { %26583 = vst [vmem:[#allocation3_spill] sm:$0xff] %v23832_v29  ;;  %26584 = vst [vmem:[#allocation4_spill] sm:$0xff] %v23837_v5  ;;  %v16858_v37 = vadd.f32 %v9084_v2, %v23197_v55  ;;  %v9086_v40 = vpop.f32.mrb[51].mxu1  ;;  %12856 = vmatprep.subr.bf16.mxu1 %v19293_v33  ;;  %v19299_v29 = vld [vmem:[%s26098_s3 + $0x39c] ss:$24 sps:$4 sm:$0xff]   ;;  %v16803_v4 = vadd.f32 %v7702_v21, %v23204_v34 }
 0x496   : > { %26585 = vst [vmem:[#allocation223_spill] sm:$0xff] %v23839_v50  ;;  %v16859_v27 = vadd.f32 %v9086_v40, %v23208_v6  ;;  %v23852_v60 = vpack.c.bf16 %v16802_v0, %v16800_v41  ;;  %v26586_v2 = vld [vmem:[#allocation5_spill] sm:$0xff]  ;;  %v23858_v33 = vld [vmem:[%s22546_s9 + $0x30] ss:$24 sps:$4 sm:$0xff]   ;;  %v26587_v41 = vld [vmem:[#allocation6_spill] sm:$0xff]  ;;  %v10791_v0 = vunpack.c.h.b16 %v23804_v32 }
 0x497   : > { %v23854_v10 = vpack.c.bf16 %v16858_v37, %v16856_v52  ;;  %9415 = vmatmul.mubr.bf16.gmra.mrb[100].mxu0 %v26586_v2  ;;  %12842 = vmatmul.mubr.bf16.gmra.mrb[68].mxu1 %v23858_v33  ;;  %v23861_v43 = vpack.c.bf16 %v16803_v4, %v16801_v44  ;;  %v10789_v52 = vunpack.c.h.b16 %v23802_v14  ;;  %v19305_v40 = vld [vmem:[%s26098_s3 + $0x3cc] ss:$24 sps:$4 sm:$0xff]   ;;  %v10790_v44 = vunpack.c.h.b16 %v23811_v26  ;;  %v19303_v26 = vld [vmem:[%s26098_s3 + $0x3c8] ss:$24 sps:$4 sm:$0xff]  }
 0x498   : > { %v23863_v12 = vpack.c.bf16 %v16859_v27, %v16857_v48  ;;  %12857 = vmatpush1.bf16.msra.mxu1 %v19291_v38  ;;  %9424 = vmatprep.mubr.bf16.mxu0 %v26587_v41  ;;  %v10795_v37 = vunpack.c.l.b16 %v23852_v60  ;;  %v23877_v38 = vld [vmem:[%s22546_s9 + $0xc] ss:$24 sps:$4 sm:$0xff]   ;;  %v10792_v48 = vunpack.c.h.b16 %v23813_v1 }
 0x499   : > { %v10797_v21 = vunpack.c.l.b16 %v23854_v10  ;;  %12858 = vmatprep.subr.bf16.mxu1 %v19299_v29  ;;  %12884 = vmatprep.mubr.bf16.mxu1 %v23877_v38  ;;  %v10796_v14 = vunpack.c.l.b16 %v23861_v43  ;;  %v7706_v4 = vpop.f32.mrb[52].mxu0 }
 0x49a   : > { %v10798_v32 = vunpack.c.l.b16 %v23863_v12  ;;  %v9090_v27 = vpop.f32.mrb[52].mxu1  ;;  %v7708_v29 = vpop.f32.mrb[53].mxu0  ;;  %v23886_v50 = vpack.c.b16 %v10795_v37, %v10789_v52  ;;  %v16804_v13 = vadd.f32 %v7706_v4, %v23193_v25 }
 0x49b   : > { %v23884_v2 = vpack.c.b16 %v10797_v21, %v10791_v0  ;;  %v9092_v41 = vpop.f32.mrb[53].mxu1  ;;  %v7710_v16 = vpop.f32.mrb[54].mxu0  ;;  %v23891_v1 = vpack.c.b16 %v10796_v14, %v10790_v44  ;;  %v16860_v0 = vadd.f32 %v9090_v27, %v23197_v55  ;;  %v19311_v44 = vld [vmem:[%s26098_s3 + $0x3fc] ss:$24 sps:$4 sm:$0xff]   ;;  %v19309_v27 = vld [vmem:[%s26098_s3 + $0x3f8] ss:$24 sps:$4 sm:$0xff]  }
 0x49c   : > { %12859 = vmatpush1.bf16.msra.mxu1 %v19297_v58  ;;  %v9094_v5 = vpop.f32.mrb[54].mxu1  ;;  %v23893_v49 = vpack.c.b16 %v10798_v32, %v10792_v48  ;;  %v23898_v21 = vadd.f32 %v7710_v16, %v23193_v25  ;;  %v7712_v58 = vpop.f32.mrb[55].mxu0  ;;  %v16805_v48 = vadd.f32 %v7708_v29, %v23204_v34  ;;  %v16861_v14 = vadd.f32 %v9092_v41, %v23208_v6 }
 0x49d   : > { %26588 = vst [vmem:[#allocation5_spill] sm:$0xff] %v23884_v2  ;;  %v23901_v52 = vadd.f32 %v9094_v5, %v23197_v55  ;;  %v9096_v37 = vpop.f32.mrb[55].mxu1  ;;  %12860 = vmatprep.subr.bf16.mxu1 %v19305_v40  ;;  %v23909_v32 = vadd.f32 %v7712_v58, %v23204_v34  ;;  %v26593_v5 = vld [vmem:[#allocation7_spill] sm:$0xff]  ;;  %v10801_v34 = vunpack.c.h.b16 %v23852_v60  ;;  %v10802_v58 = vunpack.c.h.b16 %v23861_v43  ;;  %v19323_v43 = vld [vmem:[%s26098_s3 + $0x45c] ss:$24 sps:$4 sm:$0xff]  }
 0x49e   : > { %26589 = vst [vmem:[#allocation6_spill] sm:$0xff] %v23893_v49  ;;  %26590 = vst [vmem:[#allocation224_spill] sm:$0xff] %v23898_v21  ;;  %v23912_v25 = vadd.f32 %v9096_v37, %v23208_v6  ;;  %v10561_v55 = vpack.c.bf16 %v23898_v21, %v16804_v13  ;;  %v10803_v6 = vunpack.c.h.b16 %v23854_v10  ;;  %v26594_v13 = vld [vmem:[#allocation8_spill] sm:$0xff]  ;;  %v19315_v10 = vld [vmem:[%s26098_s3 + $0x428] ss:$24 sps:$4 sm:$0xff]  }
 0x49f   : > { %26591 = vst [vmem:[#allocation225_spill] sm:$0xff] %v23901_v52  ;;  %v10563_v16 = vpack.c.bf16 %v23901_v52, %v16860_v0  ;;  %9425 = vmatmul.mubr.bf16.gmra.mrb[104].mxu0 %v26593_v5  ;;  %v10562_v40 = vpack.c.bf16 %v23909_v32, %v16805_v48  ;;  %v19317_v0 = vld [vmem:[%s26098_s3 + $0x42c] ss:$24 sps:$4 sm:$0xff]   ;;  %v26629_v52 = vld [vmem:[#allocation41_spill] sm:$0xff] }
 0x4a0   : > { %26592 = vst [vmem:[#allocation226_spill] sm:$0xff] %v23912_v25  ;;  %v10564_v4 = vpack.c.bf16 %v23912_v25, %v16861_v14  ;;  %12861 = vmatpush1.bf16.msra.mxu1 %v19303_v26  ;;  %v10807_v29 = vunpack.c.l.b16 %v10561_v55  ;;  %9434 = vmatprep.mubr.bf16.mxu0 %v26594_v13  ;;  %v10804_v26 = vunpack.c.h.b16 %v23863_v12  ;;  %v26597_v12 = vld [vmem:[#allocation9_spill] sm:$0xff]  ;;  %v26598_v5 = vld [vmem:[#allocation10_spill] sm:$0xff]  ;;  %v26600_v13 = vld [vmem:[#allocation12_spill] sm:$0xff] }
 0x4a1   : > { %v10809_v41 = vunpack.c.l.b16 %v10563_v16  ;;  %12862 = vmatprep.subr.bf16.mxu1 %v19311_v44  ;;  %v10808_v37 = vunpack.c.l.b16 %v10562_v40  ;;  %v19321_v16 = vld [vmem:[%s26098_s3 + $0x458] ss:$24 sps:$4 sm:$0xff]   ;;  %v19329_v40 = vld [vmem:[%s26098_s3 + $0x48c] ss:$24 sps:$4 sm:$0xff]  }
 0x4a2   : > { %v10810_v48 = vunpack.c.l.b16 %v10564_v4  ;;  %v23932_v60 = vpack.c.b16 %v10807_v29, %v10801_v34  ;;  %v19327_v4 = vld [vmem:[%s26098_s3 + $0x488] ss:$24 sps:$4 sm:$0xff]   ;;  %v19476_v49 = vld [vmem:[%s26098_s3 + $0x1c4] ss:$24 sps:$4 sm:$0xff]  }
 0x4a3   : > { %v23930_v14 = vpack.c.b16 %v10809_v41, %v10803_v6  ;;  %v23937_v44 = vpack.c.b16 %v10808_v37, %v10802_v58  ;;  %v19366_v34 = vld [vmem:[%s26097_s2 + $0x910] ss:$24 sps:$4 sm:$0xff]   ;;  %v19374_v6 = vld [vmem:[%s26097_s2 + $0x944] ss:$24 sps:$4 sm:$0xff]   ;;  %v19372_v58 = vld [vmem:[%s26097_s2 + $0x940] ss:$24 sps:$4 sm:$0xff]  }
 0x4a4   : > { %12863 = vmatpush1.bf16.msra.mxu1 %v19309_v27  ;;  %v23939_v55 = vpack.c.b16 %v10810_v48, %v10804_v26  ;;  %v19332_v27 = vld [vmem:[%s26098_s3 + $0x4bc] ss:$24 sps:$4 sm:$0xff]   ;;  %v26599_v29 = vld [vmem:[#allocation11_spill] sm:$0xff]  ;;  %v19330_v41 = vld [vmem:[%s26098_s3 + $0x4b8] ss:$24 sps:$4 sm:$0xff]  }
 0x4a5   : > { %26595 = vst [vmem:[#allocation7_spill] sm:$0xff] %v23930_v14  ;;  %12864 = vmatprep.subr.bf16.mxu1 %v19317_v0  ;;  %v19335_v0 = vld [vmem:[%s26098_s3 + $0x4ec] ss:$24 sps:$4 sm:$0xff]   ;;  %v19333_v37 = vld [vmem:[%s26098_s3 + $0x4e8] ss:$24 sps:$4 sm:$0xff]  }
 0x4a6   : > { %26596 = vst [vmem:[#allocation8_spill] sm:$0xff] %v23939_v55  ;;  %v19380_v26 = vld [vmem:[%s26097_s2 + $0x974] ss:$24 sps:$4 sm:$0xff]   ;;  %v26630_v14 = vld [vmem:[#allocation42_spill] sm:$0xff] }
 0x4a7   : > { %9435 = vmatmul.mubr.bf16.gmra.mrb[108].mxu0 %v26597_v12  ;;  %v19338_v48 = vld [vmem:[%s26098_s3 + $0x51c] ss:$24 sps:$4 sm:$0xff]   ;;  %v26631_v21 = vld [vmem:[#allocation43_spill] sm:$0xff] }
 0x4a8   : > { %12865 = vmatpush1.bf16.msra.mxu1 %v19315_v10  ;;  %9477 = vmatprep.mubr.bf16.mxu0 %v26598_v5  ;;  %v19378_v10 = vld [vmem:[%s26097_s2 + $0x970] ss:$24 sps:$4 sm:$0xff]   ;;  %v26601_v12 = vld [vmem:[#allocation13_spill] sm:$0xff]  ;;  %v26602_v5 = vld [vmem:[#allocation14_spill] sm:$0xff] }
 0x4a9   : > { %12866 = vmatprep.subr.bf16.mxu1 %v19323_v43  ;;  %v19386_v43 = vld [vmem:[%s26097_s2 + $0x9a4] ss:$24 sps:$4 sm:$0xff]  }
 0x4ac   : > { %12867 = vmatpush1.bf16.msra.mxu1 %v19321_v16  ;;  %v19336_v16 = vld [vmem:[%s26098_s3 + $0x518] ss:$24 sps:$4 sm:$0xff]  }
 0x4ad   : > { %12868 = vmatprep.subr.bf16.mxu1 %v19329_v40  ;;  %v19341_v40 = vld [vmem:[%s26098_s3 + $0x54c] ss:$24 sps:$4 sm:$0xff]  }
 0x4af   : > { %9478 = vmatmul.mubr.bf16.vlgmr.msra.gmra.mrb[56].mxu0 %v26599_v29  ;;  %v19390_v29 = vld [vmem:[%s26097_s2 + $0x9d0] ss:$24 sps:$4 sm:$0xff]  }
 0x4b0   : > { %12869 = vmatpush1.bf16.msra.mxu1 %v19327_v4  ;;  %9487 = vmatprep.mubr.bf16.mxu0 %v26600_v13  ;;  %v19384_v4 = vld [vmem:[%s26097_s2 + $0x9a0] ss:$24 sps:$4 sm:$0xff]   ;;  %v26603_v13 = vld [vmem:[#allocation15_spill] sm:$0xff] }
 0x4b1   : > { %12870 = vmatprep.subr.bf16.mxu1 %v19332_v27  ;;  %9619 = vmatpush1.bf16.msra.mxu0 %v19366_v34  ;;  %v19392_v27 = vld [vmem:[%s26097_s2 + $0x9d4] ss:$24 sps:$4 sm:$0xff]   ;;  %v19339_v34 = vld [vmem:[%s26098_s3 + $0x548] ss:$24 sps:$4 sm:$0xff]  }
 0x4b2   : > { %9620 = vmatprep.subr.bf16.mxu0 %v19374_v6  ;;  %v19344_v6 = vld [vmem:[%s26098_s3 + $0x57c] ss:$24 sps:$4 sm:$0xff]  }
 0x4b4   : > { %12871 = vmatpush1.bf16.msra.mxu1 %v19330_v41  ;;  %v19398_v41 = vld [vmem:[%s26097_s2 + $0xa04] ss:$24 sps:$4 sm:$0xff]  }
 0x4b5   : > { %12872 = vmatprep.subr.bf16.mxu1 %v19335_v0  ;;  %9621 = vmatpush1.bf16.msra.mxu0 %v19372_v58  ;;  %v19342_v0 = vld [vmem:[%s26098_s3 + $0x578] ss:$24 sps:$4 sm:$0xff]  }
 0x4b6   : > { %9622 = vmatprep.subr.bf16.mxu0 %v19380_v26  ;;  %v26604_v58 = vld [vmem:[#allocation16_spill] sm:$0xff]  ;;  %v19347_v26 = vld [vmem:[%s26098_s3 + $0x5ac] ss:$24 sps:$4 sm:$0xff]  }
 0x4b7   : > { %9488 = vmatmul.mubr.bf16.gmra.mrb[60].mxu0 %v26601_v12  ;;  %v19402_v12 = vld [vmem:[%s26097_s2 + $0xa30] ss:$24 sps:$4 sm:$0xff]  }
 0x4b8   : > { %12873 = vmatpush1.bf16.msra.mxu1 %v19333_v37  ;;  %9497 = vmatprep.mubr.bf16.mxu0 %v26602_v5  ;;  %v19396_v37 = vld [vmem:[%s26097_s2 + $0xa00] ss:$24 sps:$4 sm:$0xff]  }
 0x4b9   : > { %12874 = vmatprep.subr.bf16.mxu1 %v19338_v48  ;;  %9623 = vmatpush1.bf16.msra.mxu0 %v19378_v10  ;;  %v19404_v48 = vld [vmem:[%s26097_s2 + $0xa34] ss:$24 sps:$4 sm:$0xff]   ;;  %v19345_v10 = vld [vmem:[%s26098_s3 + $0x5a8] ss:$24 sps:$4 sm:$0xff]   ;;  %v26605_v5 = vld [vmem:[#allocation17_spill] sm:$0xff] }
 0x4ba   : > { %9624 = vmatprep.subr.bf16.mxu0 %v19386_v43  ;;  %v19350_v43 = vld [vmem:[%s26098_s3 + $0x5dc] ss:$24 sps:$4 sm:$0xff]  }
 0x4bc   : > { %12875 = vmatpush1.bf16.msra.mxu1 %v19336_v16  ;;  %v19410_v16 = vld [vmem:[%s26097_s2 + $0xa64] ss:$24 sps:$4 sm:$0xff]  }
 0x4bd   : > { %12876 = vmatprep.subr.bf16.mxu1 %v19341_v40  ;;  %9625 = vmatpush1.bf16.msra.mxu0 %v19384_v4  ;;  %v19348_v40 = vld [vmem:[%s26098_s3 + $0x5d8] ss:$24 sps:$4 sm:$0xff]   ;;  %v26606_v4 = vld [vmem:[#allocation18_spill] sm:$0xff] }
 0x4be   : > { %9626 = vmatprep.subr.bf16.mxu0 %v19392_v27  ;;  %v19353_v27 = vld [vmem:[%s26098_s3 + $0x60c] ss:$24 sps:$4 sm:$0xff]  }
 0x4bf   : > { %9498 = vmatmul.mubr.bf16.gmra.mrb[64].mxu0 %v26603_v13  ;;  %v19414_v13 = vld [vmem:[%s26097_s2 + $0xa90] ss:$24 sps:$4 sm:$0xff]  }
 0x4c0   : > { %12877 = vmatpush1.bf16.msra.mxu1 %v19339_v34  ;;  %9507 = vmatprep.mubr.bf16.mxu0 %v26604_v58  ;;  %v19408_v34 = vld [vmem:[%s26097_s2 + $0xa60] ss:$24 sps:$4 sm:$0xff]   ;;  %v26607_v58 = vld [vmem:[#allocation19_spill] sm:$0xff] }
 0x4c1   : > { %12878 = vmatprep.subr.bf16.mxu1 %v19344_v6  ;;  %9627 = vmatpush1.bf16.msra.mxu0 %v19390_v29  ;;  %v19416_v6 = vld [vmem:[%s26097_s2 + $0xa94] ss:$24 sps:$4 sm:$0xff]   ;;  %v19351_v29 = vld [vmem:[%s26098_s3 + $0x608] ss:$24 sps:$4 sm:$0xff]  }
 0x4c2   : > { %9628 = vmatprep.subr.bf16.mxu0 %v19398_v41  ;;  %v19356_v41 = vld [vmem:[%s26098_s3 + $0x63c] ss:$24 sps:$4 sm:$0xff]  }
 0x4c4   : > { %12879 = vmatpush1.bf16.msra.mxu1 %v19342_v0  ;;  %v19422_v0 = vld [vmem:[%s26097_s2 + $0xac4] ss:$24 sps:$4 sm:$0xff]  }
 0x4c5   : > { %12880 = vmatprep.subr.bf16.mxu1 %v19347_v26  ;;  %9629 = vmatpush1.bf16.msra.mxu0 %v19396_v37  ;;  %v24070_v26 = vld [vmem:[%s22546_s9 + $0x8] ss:$24 sps:$4 sm:$0xff]   ;;  %v19354_v37 = vld [vmem:[%s26098_s3 + $0x638] ss:$24 sps:$4 sm:$0xff]  }
 0x4c6   : > { %9630 = vmatprep.subr.bf16.mxu0 %v19404_v48  ;;  %v26608_v48 = vld [vmem:[#allocation20_spill] sm:$0xff] }
 0x4c7   : > { %9508 = vmatmul.mubr.bf16.gmra.mrb[68].mxu0 %v26605_v5  ;;  %v19357_v5 = vld [vmem:[%s26098_s3 + $0x668] ss:$24 sps:$4 sm:$0xff]  }
 0x4c8   : > { %12881 = vmatpush1.bf16.msra.mxu1 %v19345_v10  ;;  %9517 = vmatprep.mubr.bf16.mxu0 %v26606_v4  ;;  %v19359_v10 = vld [vmem:[%s26098_s3 + $0x66c] ss:$24 sps:$4 sm:$0xff]   ;;  %v19426_v4 = vld [vmem:[%s26097_s2 + $0xaf0] ss:$24 sps:$4 sm:$0xff]  }
 0x4c9   : > { %12882 = vmatprep.subr.bf16.mxu1 %v19350_v43  ;;  %9631 = vmatpush1.bf16.msra.mxu0 %v19402_v12  ;;  %v19420_v43 = vld [vmem:[%s26097_s2 + $0xac0] ss:$24 sps:$4 sm:$0xff]   ;;  %v24084_v12 = vld [vmem:[%s22546_s9 + $0x3c] ss:$24 sps:$4 sm:$0xff]  }
 0x4ca   : > { %9632 = vmatprep.subr.bf16.mxu0 %v19410_v16  ;;  %v19428_v16 = vld [vmem:[%s26097_s2 + $0xaf4] ss:$24 sps:$4 sm:$0xff]  }
 0x4cc   : > { %12883 = vmatpush1.bf16.msra.mxu1 %v19348_v40  ;;  %v19362_v40 = vld [vmem:[%s26098_s3 + $0x69c] ss:$24 sps:$4 sm:$0xff]  }
 0x4cd   : > { %12905 = vmatprep.subr.bf16.mxu1 %v19353_v27  ;;  %9633 = vmatpush1.bf16.msra.mxu0 %v19408_v34  ;;  %v19434_v27 = vld [vmem:[%s26097_s2 + $0xb24] ss:$24 sps:$4 sm:$0xff]  }
 0x4ce   : > { %9634 = vmatprep.subr.bf16.mxu0 %v19416_v6  ;;  %v26609_v34 = vld [vmem:[#allocation21_spill] sm:$0xff] }
 0x4cf   : > { %9518 = vmatmul.mubr.bf16.gmra.mrb[72].mxu0 %v26607_v58  ;;  %12885 = vmatmul.mubr.bf16.vlgmr.msra.gmra.mrb[64].mxu1 %v24070_v26  ;;  %v24104_v6 = vld [vmem:[%s22546_s9 + $0x38] ss:$24 sps:$4 sm:$0xff]   ;;  %v24118_v58 = vld [vmem:[%s22546_s9 + $0x14] ss:$24 sps:$4 sm:$0xff]  }
 0x4d0   : > { %12906 = vmatpush1.bf16.msra.mxu1 %v19351_v29  ;;  %9527 = vmatprep.mubr.bf16.mxu0 %v26608_v48  ;;  %v19360_v29 = vld [vmem:[%s26098_s3 + $0x698] ss:$24 sps:$4 sm:$0xff]   ;;  %v19363_v48 = vld [vmem:[%s26098_s3 + $0x6c8] ss:$24 sps:$4 sm:$0xff]  }
 0x4d1   : > { %12907 = vmatprep.subr.bf16.mxu1 %v19356_v41  ;;  %9635 = vmatpush1.bf16.msra.mxu0 %v19414_v13  ;;  %v26610_v41 = vld [vmem:[#allocation22_spill] sm:$0xff] }
 0x4d2   : > { %9636 = vmatprep.subr.bf16.mxu0 %v19422_v0  ;;  %12894 = vmatprep.mubr.bf16.mxu1 %v24084_v12  ;;  %v19365_v13 = vld [vmem:[%s26098_s3 + $0x6cc] ss:$24 sps:$4 sm:$0xff]   ;;  %v19432_v0 = vld [vmem:[%s26097_s2 + $0xb20] ss:$24 sps:$4 sm:$0xff]  }
 0x4d4   : > { %12908 = vmatpush1.bf16.msra.mxu1 %v19354_v37  ;;  %v19440_v37 = vld [vmem:[%s26097_s2 + $0xb54] ss:$24 sps:$4 sm:$0xff]  }
 0x4d5   : > { %12909 = vmatprep.subr.bf16.mxu1 %v19359_v10  ;;  %9637 = vmatpush1.bf16.msra.mxu0 %v19420_v43  ;;  %v19371_v10 = vld [vmem:[%s26098_s3 + $0x6fc] ss:$24 sps:$4 sm:$0xff]   ;;  %v19438_v43 = vld [vmem:[%s26097_s2 + $0xb50] ss:$24 sps:$4 sm:$0xff]  }
 0x4d6   : > { %9638 = vmatprep.subr.bf16.mxu0 %v19428_v16  ;;  %v19446_v16 = vld [vmem:[%s26097_s2 + $0xb84] ss:$24 sps:$4 sm:$0xff]  }
 0x4d7   : > { %9528 = vmatmul.mubr.bf16.gmra.mrb[76].mxu0 %v26609_v34  ;;  %12895 = vmatmul.mubr.bf16.gmra.mrb[68].mxu1 %v24104_v6  ;;  %v19444_v34 = vld [vmem:[%s26097_s2 + $0xb80] ss:$24 sps:$4 sm:$0xff]  }
 0x4d8   : > { %12910 = vmatpush1.bf16.msra.mxu1 %v19357_v5  ;;  %9537 = vmatprep.mubr.bf16.mxu0 %v26610_v41  ;;  %v26611_v5 = vld [vmem:[#allocation23_spill] sm:$0xff] }
 0x4d9   : > { %12911 = vmatprep.subr.bf16.mxu1 %v19362_v40  ;;  %9639 = vmatpush1.bf16.msra.mxu0 %v19426_v4  ;;  %v19369_v40 = vld [vmem:[%s26098_s3 + $0x6f8] ss:$24 sps:$4 sm:$0xff]   ;;  %v19375_v41 = vld [vmem:[%s26098_s3 + $0x728] ss:$24 sps:$4 sm:$0xff]  }
 0x4da   : > { %9640 = vmatprep.subr.bf16.mxu0 %v19434_v27  ;;  %12937 = vmatprep.mubr.bf16.mxu1 %v24118_v58  ;;  %v26612_v4 = vld [vmem:[#allocation24_spill] sm:$0xff]  ;;  %v19377_v27 = vld [vmem:[%s26098_s3 + $0x72c] ss:$24 sps:$4 sm:$0xff]  }
 0x4dc   : > { %12912 = vmatpush1.bf16.msra.mxu1 %v19360_v29  ;;  %v19452_v29 = vld [vmem:[%s26097_s2 + $0xbb4] ss:$24 sps:$4 sm:$0xff]  }
 0x4dd   : > { %12913 = vmatprep.subr.bf16.mxu1 %v19365_v13  ;;  %9641 = vmatpush1.bf16.msra.mxu0 %v19432_v0  ;;  %v19383_v13 = vld [vmem:[%s26098_s3 + $0x75c] ss:$24 sps:$4 sm:$0xff]   ;;  %v19450_v0 = vld [vmem:[%s26097_s2 + $0xbb0] ss:$24 sps:$4 sm:$0xff]  }
 0x4de   : > { %9642 = vmatprep.subr.bf16.mxu0 %v19440_v37  ;;  %v19458_v37 = vld [vmem:[%s26097_s2 + $0xbe4] ss:$24 sps:$4 sm:$0xff]  }
 0x4df   : > { %9538 = vmatmul.mubr.bf16.gmra.mrb[80].mxu0 %v26611_v5  ;;  %v19456_v5 = vld [vmem:[%s26097_s2 + $0xbe0] ss:$24 sps:$4 sm:$0xff]  }
 0x4e0   : > { %12914 = vmatpush1.bf16.msra.mxu1 %v19363_v48  ;;  %9547 = vmatprep.mubr.bf16.mxu0 %v26612_v4  ;;  %v26613_v48 = vld [vmem:[#allocation25_spill] sm:$0xff]  ;;  %v19387_v4 = vld [vmem:[%s26098_s3 + $0x788] ss:$24 sps:$4 sm:$0xff]  }
 0x4e1   : > { %12915 = vmatprep.subr.bf16.mxu1 %v19371_v10  ;;  %9643 = vmatpush1.bf16.msra.mxu0 %v19438_v43  ;;  %v19381_v10 = vld [vmem:[%s26098_s3 + $0x758] ss:$24 sps:$4 sm:$0xff]   ;;  %v26614_v43 = vld [vmem:[#allocation26_spill] sm:$0xff] }
 0x4e2   : > { %9644 = vmatprep.subr.bf16.mxu0 %v19446_v16  ;;  %v19389_v16 = vld [vmem:[%s26098_s3 + $0x78c] ss:$24 sps:$4 sm:$0xff]  }
 0x4e4   : > { %12916 = vmatpush1.bf16.msra.mxu1 %v19369_v40  ;;  %v19500_v40 = vld [vmem:[%s26097_s2 + $0xc14] ss:$24 sps:$4 sm:$0xff]  }
 0x4e5   : > { %12917 = vmatprep.subr.bf16.mxu1 %v19377_v27  ;;  %9645 = vmatpush1.bf16.msra.mxu0 %v19444_v34  ;;  %v19395_v27 = vld [vmem:[%s26098_s3 + $0x7bc] ss:$24 sps:$4 sm:$0xff]   ;;  %v26615_v34 = vld [vmem:[#allocation27_spill] sm:$0xff] }
 0x4e6   : > { %9646 = vmatprep.subr.bf16.mxu0 %v19452_v29  ;;  %v19393_v29 = vld [vmem:[%s26098_s3 + $0x7b8] ss:$24 sps:$4 sm:$0xff]  }
 0x4e7   : > { %9548 = vmatmul.mubr.bf16.gmra.mrb[84].mxu0 %v26613_v48  ;;  %v26617_v48 = vld [vmem:[#allocation29_spill] sm:$0xff] }
 0x4e8   : > { %12918 = vmatpush1.bf16.msra.mxu1 %v19375_v41  ;;  %9557 = vmatprep.mubr.bf16.mxu0 %v26614_v43  ;;  %v26616_v41 = vld [vmem:[#allocation28_spill] sm:$0xff]  ;;  %v26618_v43 = vld [vmem:[#allocation30_spill] sm:$0xff] }
 0x4e9   : > { %12919 = vmatprep.subr.bf16.mxu1 %v19383_v13  ;;  %9647 = vmatpush1.bf16.msra.mxu0 %v19450_v0  ;;  %v19401_v13 = vld [vmem:[%s26098_s3 + $0x7ec] ss:$24 sps:$4 sm:$0xff]   ;;  %v19399_v0 = vld [vmem:[%s26098_s3 + $0x7e8] ss:$24 sps:$4 sm:$0xff]  }
 0x4ea   : > { %9648 = vmatprep.subr.bf16.mxu0 %v19458_v37  ;;  %v19407_v37 = vld [vmem:[%s26098_s3 + $0x81c] ss:$24 sps:$4 sm:$0xff]  }
 0x4ec   : > { %12920 = vmatpush1.bf16.msra.mxu1 %v19381_v10  ;;  %v19405_v10 = vld [vmem:[%s26098_s3 + $0x818] ss:$24 sps:$4 sm:$0xff]  }
 0x4ed   : > { %12921 = vmatprep.subr.bf16.mxu1 %v19389_v16  ;;  %9649 = vmatpush1.bf16.msra.mxu0 %v19456_v5  ;;  %v19413_v16 = vld [vmem:[%s26098_s3 + $0x84c] ss:$24 sps:$4 sm:$0xff]   ;;  %v19411_v5 = vld [vmem:[%s26098_s3 + $0x848] ss:$24 sps:$4 sm:$0xff]  }
 0x4ee   : > { %9791 = vmatprep.subr.bf16.mxu0 %v19500_v40  ;;  %v19419_v40 = vld [vmem:[%s26098_s3 + $0x87c] ss:$24 sps:$4 sm:$0xff]  }
 0x4ef   : > { %9558 = vmatmul.mubr.bf16.gmra.mrb[88].mxu0 %v26615_v34  ;;  %v26620_v34 = vld [vmem:[#allocation32_spill] sm:$0xff] }
 0x4f0   : > { %12922 = vmatpush1.bf16.msra.mxu1 %v19387_v4  ;;  %9567 = vmatprep.mubr.bf16.mxu0 %v26616_v41  ;;  %v26619_v4 = vld [vmem:[#allocation31_spill] sm:$0xff] }
 0x4f1   : > { %12923 = vmatprep.subr.bf16.mxu1 %v19395_v27  ;;  %v19417_v27 = vld [vmem:[%s26098_s3 + $0x878] ss:$24 sps:$4 sm:$0xff]   ;;  %v19423_v41 = vld [vmem:[%s26098_s3 + $0x8a8] ss:$24 sps:$4 sm:$0xff]  }
 0x4f4   : > { %12924 = vmatpush1.bf16.msra.mxu1 %v19393_v29  ;;  %v19425_v29 = vld [vmem:[%s26098_s3 + $0x8ac] ss:$24 sps:$4 sm:$0xff]  }
 0x4f5   : > { %12925 = vmatprep.subr.bf16.mxu1 %v19401_v13  ;;  %v19431_v13 = vld [vmem:[%s26098_s3 + $0x8dc] ss:$24 sps:$4 sm:$0xff]  }
 0x4f7   : > { %9568 = vmatmul.mubr.bf16.gmra.mrb[92].mxu0 %v26617_v48  ;;  %v26622_v48 = vld [vmem:[#allocation34_spill] sm:$0xff] }
 0x4f8   : > { %12926 = vmatpush1.bf16.msra.mxu1 %v19399_v0  ;;  %9577 = vmatprep.mubr.bf16.mxu0 %v26618_v43  ;;  %v26621_v0 = vld [vmem:[#allocation33_spill] sm:$0xff]  ;;  %v19435_v43 = vld [vmem:[%s26098_s3 + $0x10] ss:$24 sps:$4 sm:$0xff]  }
 0x4f9   : > { %12927 = vmatprep.subr.bf16.mxu1 %v19407_v37  ;;  %v19429_v37 = vld [vmem:[%s26098_s3 + $0x8d8] ss:$24 sps:$4 sm:$0xff]  }
 0x4fc   : > { %12928 = vmatpush1.bf16.msra.mxu1 %v19405_v10  ;;  %v19437_v10 = vld [vmem:[%s26098_s3 + $0x14] ss:$24 sps:$4 sm:$0xff]  }
 0x4fd   : > { %12929 = vmatprep.subr.bf16.mxu1 %v19413_v16  ;;  %v19443_v16 = vld [vmem:[%s26098_s3 + $0x44] ss:$24 sps:$4 sm:$0xff]  }
 0x4ff   : > { %9578 = vmatmul.mubr.bf16.gmra.mrb[96].mxu0 %v26619_v4  ;;  %v19441_v4 = vld [vmem:[%s26098_s3 + $0x40] ss:$24 sps:$4 sm:$0xff]  }
 0x500   : > { %12930 = vmatpush1.bf16.msra.mxu1 %v19411_v5  ;;  %9587 = vmatprep.mubr.bf16.mxu0 %v26620_v34  ;;  %v24239_v5 = vld [vmem:[%s22546_s9 + $0x10] ss:$24 sps:$4 sm:$0xff]  }
 0x501   : > { %12931 = vmatprep.subr.bf16.mxu1 %v19419_v40  ;;  %v26623_v40 = vld [vmem:[#allocation35_spill] sm:$0xff]  ;;  %v26624_v34 = vld [vmem:[#allocation36_spill] sm:$0xff] }
 0x504   : > { %12932 = vmatpush1.bf16.msra.mxu1 %v19417_v27  ;;  %v24247_v27 = vld [vmem:[%s22546_s9 + $0x44] ss:$24 sps:$4 sm:$0xff]  }
 0x505   : > { %12933 = vmatprep.subr.bf16.mxu1 %v19425_v29  ;;  %v19449_v29 = vld [vmem:[%s26098_s3 + $0x74] ss:$24 sps:$4 sm:$0xff]  }
 0x507   : > { %9588 = vmatmul.mubr.bf16.gmra.mrb[100].mxu0 %v26621_v0  ;;  %v24261_v0 = vld [vmem:[%s22546_s9 + $0x40] ss:$24 sps:$4 sm:$0xff]  }
 0x508   : > { %12934 = vmatpush1.bf16.msra.mxu1 %v19423_v41  ;;  %9597 = vmatprep.mubr.bf16.mxu0 %v26622_v48  ;;  %v19447_v41 = vld [vmem:[%s26098_s3 + $0x70] ss:$24 sps:$4 sm:$0xff]   ;;  %v19453_v48 = vld [vmem:[%s26098_s3 + $0xa0] ss:$24 sps:$4 sm:$0xff]  }
 0x509   : > { %12935 = vmatprep.subr.bf16.mxu1 %v19431_v13  ;;  %v19455_v13 = vld [vmem:[%s26098_s3 + $0xa4] ss:$24 sps:$4 sm:$0xff]  }
 0x50c   : > { %12936 = vmatpush1.bf16.msra.mxu1 %v19429_v37  ;;  %v26625_v37 = vld [vmem:[#allocation37_spill] sm:$0xff] }
 0x50d   : > { %12958 = vmatprep.subr.bf16.mxu1 %v19437_v10  ;;  %v26626_v10 = vld [vmem:[#allocation38_spill] sm:$0xff] }
 0x50f   : > { %12938 = vmatmul.mubr.bf16.vlgmr.msra.gmra.mrb[64].mxu1 %v24239_v5  ;;  %9598 = vmatmul.mubr.bf16.gmra.mrb[104].mxu0 %v26623_v40  ;;  %v19459_v40 = vld [vmem:[%s26098_s3 + $0xd0] ss:$24 sps:$4 sm:$0xff]  }
 0x510   : > { %12959 = vmatpush1.bf16.msra.mxu1 %v19435_v43  ;;  %12947 = vmatprep.mubr.bf16.mxu1 %v24247_v27  ;;  %v19461_v43 = vld [vmem:[%s26098_s3 + $0xd4] ss:$24 sps:$4 sm:$0xff]  }
 0x511   : > { %12960 = vmatprep.subr.bf16.mxu1 %v19443_v16  ;;  %9607 = vmatprep.mubr.bf16.mxu0 %v26624_v34  ;;  %v19954_v16 = vld [vmem:[%s22546_s9 + $0x4] ss:$24 sps:$4 sm:$0xff]   ;;  %v19498_v34 = vld [vmem:[%s26097_s2 + $0xc10] ss:$24 sps:$4 sm:$0xff]  }
 0x514   : > { %12961 = vmatpush1.bf16.msra.mxu1 %v19441_v4  ;;  %v19464_v4 = vld [vmem:[%s26098_s3 + $0x104] ss:$24 sps:$4 sm:$0xff]  }
 0x515   : > { %12962 = vmatprep.subr.bf16.mxu1 %v19449_v29  ;;  %v19506_v29 = vld [vmem:[%s26097_s2 + $0xc44] ss:$24 sps:$4 sm:$0xff]  }
 0x517   : > { %12948 = vmatmul.mubr.bf16.gmra.mrb[68].mxu1 %v24261_v0  ;;  %9608 = vmatmul.mubr.bf16.gmra.mrb[108].mxu0 %v26625_v37  ;;  %v26628_v37 = vld [vmem:[#allocation40_spill] sm:$0xff] }
 0x518   : > { %12963 = vmatpush1.bf16.msra.mxu1 %v19447_v41  ;;  %9650 = vmatprep.mubr.bf16.mxu0 %v26626_v10  ;;  %v26627_v41 = vld [vmem:[#allocation39_spill] sm:$0xff]  ;;  %v19504_v10 = vld [vmem:[%s26097_s2 + $0xc40] ss:$24 sps:$4 sm:$0xff]  }
 0x519   : > { %12964 = vmatprep.subr.bf16.mxu1 %v19455_v13  ;;  %12990 = vmatprep.mubr.bf16.mxu1 %v19954_v16  ;;  %v19462_v13 = vld [vmem:[%s26098_s3 + $0x100] ss:$24 sps:$4 sm:$0xff]   ;;  %v19512_v16 = vld [vmem:[%s26097_s2 + $0xc74] ss:$24 sps:$4 sm:$0xff]  }
 0x51c   : > { %12965 = vmatpush1.bf16.msra.mxu1 %v19453_v48  ;;  %v19467_v48 = vld [vmem:[%s26098_s3 + $0x134] ss:$24 sps:$4 sm:$0xff]  }
 0x51d   : > { %12966 = vmatprep.subr.bf16.mxu1 %v19461_v43 }
 0x51f   : > { %9651 = vmatmul.mubr.bf16.vlgmr.msra.gmra.mrb[56].mxu0 %v26627_v41 }
 0x520   : > { %12967 = vmatpush1.bf16.msra.mxu1 %v19459_v40  ;;  %9660 = vmatprep.mubr.bf16.mxu0 %v26628_v37  ;;  %v19510_v37 = vld [vmem:[%s26097_s2 + $0xc70] ss:$24 sps:$4 sm:$0xff]  }
 0x521   : > { %12968 = vmatprep.subr.bf16.mxu1 %v19464_v4  ;;  %9792 = vmatpush1.bf16.msra.mxu0 %v19498_v34  ;;  %v19465_v4 = vld [vmem:[%s26098_s3 + $0x130] ss:$24 sps:$4 sm:$0xff]  }
 0x522   : > { %v24296_v43 = vpop.f32.mrb[56].mxu1  ;;  %9793 = vmatprep.subr.bf16.mxu0 %v19506_v29  ;;  %v19470_v29 = vld [vmem:[%s26098_s3 + $0x164] ss:$24 sps:$4 sm:$0xff]  }
 0x523   : > { %v24301_v40 = vpop.f32.mrb[57].mxu1 }
 0x524   : > { %v24303_v41 = vpop.f32.mrb[58].mxu1  ;;  %12969 = vmatpush1.bf16.msra.mxu1 %v19462_v13  ;;  %v19518_v13 = vld [vmem:[%s26097_s2 + $0xca4] ss:$24 sps:$4 sm:$0xff]  }
 0x525   : > { %v24308_v34 = vpop.f32.mrb[59].mxu1  ;;  %12970 = vmatprep.subr.bf16.mxu1 %v19467_v48  ;;  %9794 = vmatpush1.bf16.msra.mxu0 %v19504_v10  ;;  %v24323_v48 = vld [vmem:[%s26099_s4 + $0x1] ss:$2 sm:$0x3f] }
 0x526   : > { %9795 = vmatprep.subr.bf16.mxu0 %v19512_v16  ;;  %v19468_v10 = vld [vmem:[%s26098_s3 + $0x160] ss:$24 sps:$4 sm:$0xff]   ;;  %v19473_v16 = vld [vmem:[%s26098_s3 + $0x194] ss:$24 sps:$4 sm:$0xff]  }
 0x527   : > { %9661 = vmatmul.mubr.bf16.gmra.mrb[60].mxu0 %v26629_v52  ;;  %v19516_v52 = vld [vmem:[%s26097_s2 + $0xca0] ss:$24 sps:$4 sm:$0xff]  }
 0x528   : > { %12971 = vmatpush1.bf16.msra.mxu1 %v19465_v4  ;;  %9670 = vmatprep.mubr.bf16.mxu0 %v26630_v14  ;;  %v19524_v4 = vld [vmem:[%s26097_s2 + $0xcd4] ss:$24 sps:$4 sm:$0xff]   ;;  %v24342_v14 = vrot.slane %v24323_v48, %v23176_v17  ;;  %v19522_v17 = vld [vmem:[%s26097_s2 + $0xcd0] ss:$24 sps:$4 sm:$0xff]  }
 0x529   : > { %12972 = vmatprep.subr.bf16.mxu1 %v19470_v29  ;;  %9796 = vmatpush1.bf16.msra.mxu0 %v19510_v37  ;;  %v19471_v37 = vld [vmem:[%s26098_s3 + $0x190] ss:$24 sps:$4 sm:$0xff]  }
 0x52a   : > { %v24335_v25 = vpop.f32.mrb[60].mxu1  ;;  %9797 = vmatprep.subr.bf16.mxu0 %v19518_v13 }
 0x52b   : > { %v24344_v29 = vpop.f32.mrb[61].mxu1 }
 0x52c   : > { %v12794_v55 = vpop.f32.mrb[62].mxu1  ;;  %12973 = vmatpush1.bf16.msra.mxu1 %v19468_v10  ;;  %v19530_v10 = vld [vmem:[%s26097_s2 + $0xd04] ss:$24 sps:$4 sm:$0xff]  }
 0x52d   : > { %v24350_v2 = vadd.f32 %v12794_v55, %v24342_v14  ;;  %v24352_v13 = vpop.f32.mrb[63].mxu1  ;;  %12974 = vmatprep.subr.bf16.mxu1 %v19473_v16  ;;  %9798 = vmatpush1.bf16.msra.mxu0 %v19516_v52  ;;  %v19474_v55 = vld [vmem:[%s26098_s3 + $0x1c0] ss:$24 sps:$4 sm:$0xff]   ;;  %v26632_v16 = vld [vmem:[#allocation44_spill] sm:$0xff] }
 0x52e   : > { %9799 = vmatprep.subr.bf16.mxu0 %v19524_v4  ;;  %v19479_v52 = vld [vmem:[%s26098_s3 + $0x1f4] ss:$24 sps:$4 sm:$0xff]   ;;  %v19528_v4 = vld [vmem:[%s26097_s2 + $0xd00] ss:$24 sps:$4 sm:$0xff]  }
 0x52f   : > { %9671 = vmatmul.mubr.bf16.gmra.mrb[64].mxu0 %v26631_v21  ;;  %v19536_v21 = vld [vmem:[%s26097_s2 + $0xd34] ss:$24 sps:$4 sm:$0xff]  }
 0x530   : > { %12975 = vmatpush1.bf16.msra.mxu1 %v19471_v37  ;;  %9680 = vmatprep.mubr.bf16.mxu0 %v26632_v16  ;;  %v19477_v37 = vld [vmem:[%s26098_s3 + $0x1f0] ss:$24 sps:$4 sm:$0xff]   ;;  %v19480_v16 = vld [vmem:[%s26098_s3 + $0x220] ss:$24 sps:$4 sm:$0xff]  }
 0x531   : > { %12976 = vmatprep.subr.bf16.mxu1 %v19476_v49  ;;  %9800 = vmatpush1.bf16.msra.mxu0 %v19522_v17  ;;  %v19482_v49 = vld [vmem:[%s26098_s3 + $0x224] ss:$24 sps:$4 sm:$0xff]   ;;  %v19534_v17 = vld [vmem:[%s26097_s2 + $0xd30] ss:$24 sps:$4 sm:$0xff]  }
 0x532   : > { %9801 = vmatprep.subr.bf16.mxu0 %v19530_v10  ;;  %v19542_v10 = vld [vmem:[%s26097_s2 + $0xd64] ss:$24 sps:$4 sm:$0xff]  }
 0x534   : > { %12977 = vmatpush1.bf16.msra.mxu1 %v19474_v55  ;;  %v26633_v55 = vld [vmem:[#allocation45_spill] sm:$0xff] }
 0x535   : > { %12978 = vmatprep.subr.bf16.mxu1 %v19479_v52  ;;  %9802 = vmatpush1.bf16.msra.mxu0 %v19528_v4  ;;  %v26634_v52 = vld [vmem:[#allocation46_spill] sm:$0xff]  ;;  %v19485_v4 = vld [vmem:[%s26098_s3 + $0x254] ss:$24 sps:$4 sm:$0xff]  }
 0x536   : > { %9803 = vmatprep.subr.bf16.mxu0 %v19536_v21  ;;  %v19540_v21 = vld [vmem:[%s26097_s2 + $0xd60] ss:$24 sps:$4 sm:$0xff]  }
 0x537   : > { %9681 = vmatmul.mubr.bf16.gmra.mrb[68].mxu0 %v26633_v55  ;;  %v19483_v55 = vld [vmem:[%s26098_s3 + $0x250] ss:$24 sps:$4 sm:$0xff]  }
 0x538   : > { %12979 = vmatpush1.bf16.msra.mxu1 %v19477_v37  ;;  %9690 = vmatprep.mubr.bf16.mxu0 %v26634_v52  ;;  %v19548_v37 = vld [vmem:[%s26097_s2 + $0xd94] ss:$24 sps:$4 sm:$0xff]   ;;  %v19486_v52 = vld [vmem:[%s26098_s3 + $0x280] ss:$24 sps:$4 sm:$0xff]  }
 0x539   : > { %12980 = vmatprep.subr.bf16.mxu1 %v19482_v49  ;;  %9804 = vmatpush1.bf16.msra.mxu0 %v19534_v17  ;;  %v19488_v49 = vld [vmem:[%s26098_s3 + $0x284] ss:$24 sps:$4 sm:$0xff]   ;;  %v19546_v17 = vld [vmem:[%s26097_s2 + $0xd90] ss:$24 sps:$4 sm:$0xff]  }
 0x53a   : > { %9805 = vmatprep.subr.bf16.mxu0 %v19542_v10  ;;  %v19554_v10 = vld [vmem:[%s26097_s2 + $0xdc4] ss:$24 sps:$4 sm:$0xff]  }
 0x53c   : > { %12981 = vmatpush1.bf16.msra.mxu1 %v19480_v16  ;;  %v26635_v16 = vld [vmem:[#allocation47_spill] sm:$0xff] }
 0x53d   : > { %12982 = vmatprep.subr.bf16.mxu1 %v19485_v4  ;;  %9806 = vmatpush1.bf16.msra.mxu0 %v19540_v21  ;;  %v26636_v4 = vld [vmem:[#allocation48_spill] sm:$0xff] }
 0x53e   : > { %9807 = vmatprep.subr.bf16.mxu0 %v19548_v37  ;;  %v19491_v21 = vld [vmem:[%s26098_s3 + $0x2b4] ss:$24 sps:$4 sm:$0xff]   ;;  %v19552_v37 = vld [vmem:[%s26097_s2 + $0xdc0] ss:$24 sps:$4 sm:$0xff]  }
 0x53f   : > { %9691 = vmatmul.mubr.bf16.gmra.mrb[72].mxu0 %v26635_v16  ;;  %v19489_v16 = vld [vmem:[%s26098_s3 + $0x2b0] ss:$24 sps:$4 sm:$0xff]  }
 0x540   : > { %12983 = vmatpush1.bf16.msra.mxu1 %v19483_v55  ;;  %9700 = vmatprep.mubr.bf16.mxu0 %v26636_v4  ;;  %v19560_v55 = vld [vmem:[%s26097_s2 + $0xdf4] ss:$24 sps:$4 sm:$0xff]   ;;  %v19492_v4 = vld [vmem:[%s26098_s3 + $0x2e0] ss:$24 sps:$4 sm:$0xff]  }
 0x541   : > { %12984 = vmatprep.subr.bf16.mxu1 %v19488_v49  ;;  %9808 = vmatpush1.bf16.msra.mxu0 %v19546_v17  ;;  %v19494_v49 = vld [vmem:[%s26098_s3 + $0x2e4] ss:$24 sps:$4 sm:$0xff]   ;;  %v19558_v17 = vld [vmem:[%s26097_s2 + $0xdf0] ss:$24 sps:$4 sm:$0xff]  }
 0x542   : > { %9809 = vmatprep.subr.bf16.mxu0 %v19554_v10  ;;  %v19566_v10 = vld [vmem:[%s26097_s2 + $0xe24] ss:$24 sps:$4 sm:$0xff]  }
 0x544   : > { %12985 = vmatpush1.bf16.msra.mxu1 %v19486_v52  ;;  %v26637_v52 = vld [vmem:[#allocation49_spill] sm:$0xff] }
 0x545   : > { %12986 = vmatprep.subr.bf16.mxu1 %v19491_v21  ;;  %9810 = vmatpush1.bf16.msra.mxu0 %v19552_v37  ;;  %v26638_v21 = vld [vmem:[#allocation50_spill] sm:$0xff]  ;;  %v19497_v37 = vld [vmem:[%s26098_s3 + $0x314] ss:$24 sps:$4 sm:$0xff]  }
 0x546   : > { %9811 = vmatprep.subr.bf16.mxu0 %v19560_v55  ;;  %v19564_v55 = vld [vmem:[%s26097_s2 + $0xe20] ss:$24 sps:$4 sm:$0xff]  }
 0x547   : > { %9701 = vmatmul.mubr.bf16.gmra.mrb[76].mxu0 %v26637_v52  ;;  %v19495_v52 = vld [vmem:[%s26098_s3 + $0x310] ss:$24 sps:$4 sm:$0xff]  }
 0x548   : > { %12987 = vmatpush1.bf16.msra.mxu1 %v19489_v16  ;;  %9710 = vmatprep.mubr.bf16.mxu0 %v26638_v21  ;;  %v19572_v16 = vld [vmem:[%s26097_s2 + $0xe54] ss:$24 sps:$4 sm:$0xff]   ;;  %v19501_v21 = vld [vmem:[%s26098_s3 + $0x340] ss:$24 sps:$4 sm:$0xff]  }
 0x549   : > { %12988 = vmatprep.subr.bf16.mxu1 %v19494_v49  ;;  %9812 = vmatpush1.bf16.msra.mxu0 %v19558_v17  ;;  %v19503_v49 = vld [vmem:[%s26098_s3 + $0x344] ss:$24 sps:$4 sm:$0xff]   ;;  %v19570_v17 = vld [vmem:[%s26097_s2 + $0xe50] ss:$24 sps:$4 sm:$0xff]  }
 0x54a   : > { %9813 = vmatprep.subr.bf16.mxu0 %v19566_v10  ;;  %v19578_v10 = vld [vmem:[%s26097_s2 + $0xe84] ss:$24 sps:$4 sm:$0xff]  }
 0x54c   : > { %12989 = vmatpush1.bf16.msra.mxu1 %v19492_v4  ;;  %v26639_v4 = vld [vmem:[#allocation51_spill] sm:$0xff] }
 0x54d   : > { %13011 = vmatprep.subr.bf16.mxu1 %v19497_v37  ;;  %9814 = vmatpush1.bf16.msra.mxu0 %v19564_v55  ;;  %v26640_v37 = vld [vmem:[#allocation52_spill] sm:$0xff] }
 0x54e   : > { %9815 = vmatprep.subr.bf16.mxu0 %v19572_v16  ;;  %v19509_v55 = vld [vmem:[%s26098_s3 + $0x374] ss:$24 sps:$4 sm:$0xff]   ;;  %v19576_v16 = vld [vmem:[%s26097_s2 + $0xe80] ss:$24 sps:$4 sm:$0xff]  }
 0x54f   : > { %9711 = vmatmul.mubr.bf16.gmra.mrb[80].mxu0 %v26639_v4  ;;  %12991 = vmatmul.mubr.bf16.vlgmr.msra.gmra.mrb[72].mxu1 %v23808_v56  ;;  %v19584_v56 = vld [vmem:[%s26097_s2 + $0xeb4] ss:$24 sps:$4 sm:$0xff]   ;;  %v19513_v4 = vld [vmem:[%s26098_s3 + $0x3a0] ss:$24 sps:$4 sm:$0xff]  }
 0x550   : > { %13012 = vmatpush1.bf16.msra.mxu1 %v19495_v52  ;;  %9720 = vmatprep.mubr.bf16.mxu0 %v26640_v37  ;;  %v19507_v52 = vld [vmem:[%s26098_s3 + $0x370] ss:$24 sps:$4 sm:$0xff]   ;;  %v19521_v37 = vld [vmem:[%s26098_s3 + $0x3d4] ss:$24 sps:$4 sm:$0xff]  }
 0x551   : > { %13013 = vmatprep.subr.bf16.mxu1 %v19503_v49  ;;  %9816 = vmatpush1.bf16.msra.mxu0 %v19570_v17  ;;  %v19515_v49 = vld [vmem:[%s26098_s3 + $0x3a4] ss:$24 sps:$4 sm:$0xff]   ;;  %v19582_v17 = vld [vmem:[%s26097_s2 + $0xeb0] ss:$24 sps:$4 sm:$0xff]  }
 0x552   : > { %9817 = vmatprep.subr.bf16.mxu0 %v19578_v10  ;;  %13000 = vmatprep.mubr.bf16.mxu1 %v23825_v35  ;;  %v19590_v35 = vld [vmem:[%s26097_s2 + $0xee4] ss:$24 sps:$4 sm:$0xff]  }
 0x553   : > { %v26641_v10 = vld [vmem:[#allocation53_spill] sm:$0xff] }
 0x554   : > { %13014 = vmatpush1.bf16.msra.mxu1 %v19501_v21  ;;  %v26642_v21 = vld [vmem:[#allocation54_spill] sm:$0xff] }
 0x555   : > { %13015 = vmatprep.subr.bf16.mxu1 %v19509_v55  ;;  %9818 = vmatpush1.bf16.msra.mxu0 %v19576_v16  ;;  %v19588_v55 = vld [vmem:[%s26097_s2 + $0xee0] ss:$24 sps:$4 sm:$0xff]   ;;  %v19519_v16 = vld [vmem:[%s26098_s3 + $0x3d0] ss:$24 sps:$4 sm:$0xff]  }
 0x556   : > { %9819 = vmatprep.subr.bf16.mxu0 %v19584_v56  ;;  %v19527_v56 = vld [vmem:[%s26098_s3 + $0x404] ss:$24 sps:$4 sm:$0xff]  }
 0x557   : > { %9721 = vmatmul.mubr.bf16.gmra.mrb[84].mxu0 %v26641_v10  ;;  %13001 = vmatmul.mubr.bf16.gmra.mrb[76].mxu1 %v23858_v33  ;;  %v19632_v33 = vld [vmem:[%s26097_s2 + $0xf14] ss:$24 sps:$4 sm:$0xff]   ;;  %v19539_v10 = vld [vmem:[%s26098_s3 + $0x464] ss:$24 sps:$4 sm:$0xff]  }
 0x558   : > { %13016 = vmatpush1.bf16.msra.mxu1 %v19507_v52  ;;  %9730 = vmatprep.mubr.bf16.mxu0 %v26642_v21  ;;  %v26643_v52 = vld [vmem:[#allocation55_spill] sm:$0xff]  ;;  %v19537_v21 = vld [vmem:[%s26098_s3 + $0x460] ss:$24 sps:$4 sm:$0xff]  }
 0x559   : > { %13017 = vmatprep.subr.bf16.mxu1 %v19515_v49  ;;  %9820 = vmatpush1.bf16.msra.mxu0 %v19582_v17  ;;  %v26644_v49 = vld [vmem:[#allocation56_spill] sm:$0xff] }
 0x55a   : > { %9821 = vmatprep.subr.bf16.mxu0 %v19590_v35  ;;  %13043 = vmatprep.mubr.bf16.mxu1 %v23877_v38  ;;  %v19525_v38 = vld [vmem:[%s26098_s3 + $0x400] ss:$24 sps:$4 sm:$0xff]   ;;  %v19533_v17 = vld [vmem:[%s26098_s3 + $0x434] ss:$24 sps:$4 sm:$0xff]   ;;  %v19531_v35 = vld [vmem:[%s26098_s3 + $0x430] ss:$24 sps:$4 sm:$0xff]  }
 0x55c   : > { %13018 = vmatpush1.bf16.msra.mxu1 %v19513_v4  ;;  %v26645_v4 = vld [vmem:[#allocation57_spill] sm:$0xff] }
 0x55d   : > { %13019 = vmatprep.subr.bf16.mxu1 %v19521_v37  ;;  %9822 = vmatpush1.bf16.msra.mxu0 %v19588_v55  ;;  %v26646_v37 = vld [vmem:[#allocation58_spill] sm:$0xff]  ;;  %v19545_v55 = vld [vmem:[%s26098_s3 + $0x494] ss:$24 sps:$4 sm:$0xff]  }
 0x55e   : > { %9964 = vmatprep.subr.bf16.mxu0 %v19632_v33  ;;  %v19543_v33 = vld [vmem:[%s26098_s3 + $0x490] ss:$24 sps:$4 sm:$0xff]  }
 0x55f   : > { %9731 = vmatmul.mubr.bf16.gmra.mrb[88].mxu0 %v26643_v52  ;;  %v19549_v52 = vld [vmem:[%s26098_s3 + $0x4c0] ss:$24 sps:$4 sm:$0xff]  }
 0x560   : > { %13020 = vmatpush1.bf16.msra.mxu1 %v19519_v16  ;;  %9740 = vmatprep.mubr.bf16.mxu0 %v26644_v49  ;;  %v19551_v16 = vld [vmem:[%s26098_s3 + $0x4c4] ss:$24 sps:$4 sm:$0xff]   ;;  %v19557_v49 = vld [vmem:[%s26098_s3 + $0x4f4] ss:$24 sps:$4 sm:$0xff]  }
 0x561   : > { %13021 = vmatprep.subr.bf16.mxu1 %v19527_v56  ;;  %v26647_v56 = vld [vmem:[#allocation59_spill] sm:$0xff] }
 0x564   : > { %13022 = vmatpush1.bf16.msra.mxu1 %v19525_v38  ;;  %v26648_v38 = vld [vmem:[#allocation60_spill] sm:$0xff] }
 0x565   : > { %13023 = vmatprep.subr.bf16.mxu1 %v19533_v17  ;;  %v19555_v17 = vld [vmem:[%s26098_s3 + $0x4f0] ss:$24 sps:$4 sm:$0xff]  }
 0x567   : > { %9741 = vmatmul.mubr.bf16.gmra.mrb[92].mxu0 %v26645_v4  ;;  %v19561_v4 = vld [vmem:[%s26098_s3 + $0x520] ss:$24 sps:$4 sm:$0xff]  }
 0x568   : > { %13024 = vmatpush1.bf16.msra.mxu1 %v19531_v35  ;;  %9750 = vmatprep.mubr.bf16.mxu0 %v26646_v37  ;;  %v19563_v35 = vld [vmem:[%s26098_s3 + $0x524] ss:$24 sps:$4 sm:$0xff]   ;;  %v19569_v37 = vld [vmem:[%s26098_s3 + $0x554] ss:$24 sps:$4 sm:$0xff]  }
 0x569   : > { %13025 = vmatprep.subr.bf16.mxu1 %v19539_v10  ;;  %v26649_v10 = vld [vmem:[#allocation61_spill] sm:$0xff] }
 0x56c   : > { %13026 = vmatpush1.bf16.msra.mxu1 %v19537_v21  ;;  %v26650_v21 = vld [vmem:[#allocation62_spill] sm:$0xff] }
 0x56d   : > { %13027 = vmatprep.subr.bf16.mxu1 %v19545_v55  ;;  %v19567_v55 = vld [vmem:[%s26098_s3 + $0x550] ss:$24 sps:$4 sm:$0xff]  }
 0x56f   : > { %9751 = vmatmul.mubr.bf16.gmra.mrb[96].mxu0 %v26647_v56  ;;  %v19573_v56 = vld [vmem:[%s26098_s3 + $0x580] ss:$24 sps:$4 sm:$0xff]  }
 0x570   : > { %13028 = vmatpush1.bf16.msra.mxu1 %v19543_v33  ;;  %9760 = vmatprep.mubr.bf16.mxu0 %v26648_v38  ;;  %v19575_v33 = vld [vmem:[%s26098_s3 + $0x584] ss:$24 sps:$4 sm:$0xff]   ;;  %v19581_v38 = vld [vmem:[%s26098_s3 + $0x5b4] ss:$24 sps:$4 sm:$0xff]  }
 0x571   : > { %13029 = vmatprep.subr.bf16.mxu1 %v19551_v16  ;;  %v26651_v16 = vld [vmem:[#allocation63_spill] sm:$0xff] }
 0x574   : > { %13030 = vmatpush1.bf16.msra.mxu1 %v19549_v52  ;;  %v26652_v52 = vld [vmem:[#allocation64_spill] sm:$0xff] }
 0x575   : > { %13031 = vmatprep.subr.bf16.mxu1 %v19557_v49  ;;  %v19579_v49 = vld [vmem:[%s26098_s3 + $0x5b0] ss:$24 sps:$4 sm:$0xff]  }
 0x577   : > { %9761 = vmatmul.mubr.bf16.gmra.mrb[100].mxu0 %v26649_v10  ;;  %v19585_v10 = vld [vmem:[%s26098_s3 + $0x5e0] ss:$24 sps:$4 sm:$0xff]  }
 0x578   : > { %13032 = vmatpush1.bf16.msra.mxu1 %v19555_v17  ;;  %9770 = vmatprep.mubr.bf16.mxu0 %v26650_v21  ;;  %v19587_v17 = vld [vmem:[%s26098_s3 + $0x5e4] ss:$24 sps:$4 sm:$0xff]   ;;  %v19593_v21 = vld [vmem:[%s26098_s3 + $0x614] ss:$24 sps:$4 sm:$0xff]  }
 0x579   : > { %13033 = vmatprep.subr.bf16.mxu1 %v19563_v35  ;;  %v26653_v35 = vld [vmem:[#allocation65_spill] sm:$0xff] }
 0x57c   : > { %13034 = vmatpush1.bf16.msra.mxu1 %v19561_v4  ;;  %v26654_v4 = vld [vmem:[#allocation66_spill] sm:$0xff] }
 0x57d   : > { %13035 = vmatprep.subr.bf16.mxu1 %v19569_v37  ;;  %v19591_v37 = vld [vmem:[%s26098_s3 + $0x610] ss:$24 sps:$4 sm:$0xff]  }
 0x57f   : > { %9771 = vmatmul.mubr.bf16.gmra.mrb[104].mxu0 %v26651_v16  ;;  %v19638_v16 = vld [vmem:[%s26097_s2 + $0xf44] ss:$24 sps:$4 sm:$0xff]  }
 0x580   : > { %13036 = vmatpush1.bf16.msra.mxu1 %v19567_v55  ;;  %9780 = vmatprep.mubr.bf16.mxu0 %v26652_v52  ;;  %v19596_v55 = vld [vmem:[%s26098_s3 + $0x644] ss:$24 sps:$4 sm:$0xff]   ;;  %v19594_v52 = vld [vmem:[%s26098_s3 + $0x640] ss:$24 sps:$4 sm:$0xff]  }
 0x581   : > { %13037 = vmatprep.subr.bf16.mxu1 %v19575_v33  ;;  %v19630_v33 = vld [vmem:[%s26097_s2 + $0xf10] ss:$24 sps:$4 sm:$0xff]  }
 0x584   : > { %13038 = vmatpush1.bf16.msra.mxu1 %v19573_v56  ;;  %v26655_v56 = vld [vmem:[#allocation67_spill] sm:$0xff] }
 0x585   : > { %13039 = vmatprep.subr.bf16.mxu1 %v19581_v38  ;;  %v26656_v38 = vld [vmem:[#allocation68_spill] sm:$0xff] }
 0x587   : > { %9781 = vmatmul.mubr.bf16.gmra.mrb[108].mxu0 %v26653_v35  ;;  %v19597_v35 = vld [vmem:[%s26098_s3 + $0x670] ss:$24 sps:$4 sm:$0xff]  }
 0x588   : > { %13040 = vmatpush1.bf16.msra.mxu1 %v19579_v49  ;;  %9823 = vmatprep.mubr.bf16.mxu0 %v26654_v4  ;;  %v19599_v49 = vld [vmem:[%s26098_s3 + $0x674] ss:$24 sps:$4 sm:$0xff]   ;;  %v19642_v4 = vld [vmem:[%s26097_s2 + $0xf70] ss:$24 sps:$4 sm:$0xff]  }
 0x589   : > { %13041 = vmatprep.subr.bf16.mxu1 %v19587_v17  ;;  %v19636_v17 = vld [vmem:[%s26097_s2 + $0xf40] ss:$24 sps:$4 sm:$0xff]  }
 0x58c   : > { %13042 = vmatpush1.bf16.msra.mxu1 %v19585_v10  ;;  %v19602_v10 = vld [vmem:[%s26098_s3 + $0x6a4] ss:$24 sps:$4 sm:$0xff]  }
 0x58d   : > { %13064 = vmatprep.subr.bf16.mxu1 %v19593_v21  ;;  %v26657_v21 = vld [vmem:[#allocation69_spill] sm:$0xff] }
 0x58f   : > { %9824 = vmatmul.mubr.bf16.vlgmr.msra.gmra.mrb[56].mxu0 %v26655_v56  ;;  %13044 = vmatmul.mubr.bf16.vlgmr.msra.gmra.mrb[72].mxu1 %v24070_v26  ;;  %v19644_v26 = vld [vmem:[%s26097_s2 + $0xf74] ss:$24 sps:$4 sm:$0xff]   ;;  %v19603_v56 = vld [vmem:[%s26098_s3 + $0x6d0] ss:$24 sps:$4 sm:$0xff]  }
 0x590   : > { %13065 = vmatpush1.bf16.msra.mxu1 %v19591_v37  ;;  %9833 = vmatprep.mubr.bf16.mxu0 %v26656_v38  ;;  %v19600_v37 = vld [vmem:[%s26098_s3 + $0x6a0] ss:$24 sps:$4 sm:$0xff]   ;;  %v19651_v38 = vld [vmem:[%s26097_s2 + $0xfd0] ss:$24 sps:$4 sm:$0xff]  }
 0x591   : > { %13066 = vmatprep.subr.bf16.mxu1 %v19596_v55  ;;  %9965 = vmatpush1.bf16.msra.mxu0 %v19630_v33  ;;  %v26658_v55 = vld [vmem:[#allocation70_spill] sm:$0xff]  ;;  %v19605_v33 = vld [vmem:[%s26098_s3 + $0x6d4] ss:$24 sps:$4 sm:$0xff]  }
 0x592   : > { %9966 = vmatprep.subr.bf16.mxu0 %v19638_v16  ;;  %13053 = vmatprep.mubr.bf16.mxu1 %v24084_v12  ;;  %v19650_v12 = vld [vmem:[%s26097_s2 + $0xfa4] ss:$24 sps:$4 sm:$0xff]   ;;  %v19648_v16 = vld [vmem:[%s26097_s2 + $0xfa0] ss:$24 sps:$4 sm:$0xff]  }
 0x594   : > { %13067 = vmatpush1.bf16.msra.mxu1 %v19594_v52  ;;  %v19608_v52 = vld [vmem:[%s26098_s3 + $0x704] ss:$24 sps:$4 sm:$0xff]  }
 0x595   : > { %13068 = vmatprep.subr.bf16.mxu1 %v19599_v49  ;;  %9967 = vmatpush1.bf16.msra.mxu0 %v19636_v17  ;;  %v26659_v49 = vld [vmem:[#allocation71_spill] sm:$0xff]  ;;  %v19606_v17 = vld [vmem:[%s26098_s3 + $0x700] ss:$24 sps:$4 sm:$0xff]  }
 0x596   : > { %9968 = vmatprep.subr.bf16.mxu0 %v19644_v26  ;;  %v26660_v26 = vld [vmem:[#allocation72_spill] sm:$0xff] }
 0x597   : > { %9834 = vmatmul.mubr.bf16.gmra.mrb[60].mxu0 %v26657_v21  ;;  %13054 = vmatmul.mubr.bf16.gmra.mrb[76].mxu1 %v24104_v6  ;;  %v19653_v6 = vld [vmem:[%s26097_s2 + $0xfd4] ss:$24 sps:$4 sm:$0xff]   ;;  %v19614_v21 = vld [vmem:[%s26098_s3 + $0x764] ss:$24 sps:$4 sm:$0xff]  }
 0x598   : > { %13069 = vmatpush1.bf16.msra.mxu1 %v19597_v35  ;;  %9843 = vmatprep.mubr.bf16.mxu0 %v26658_v55  ;;  %v19611_v35 = vld [vmem:[%s26098_s3 + $0x734] ss:$24 sps:$4 sm:$0xff]   ;;  %v19662_v55 = vld [vmem:[%s26097_s2 + $0x1064] ss:$24 sps:$4 sm:$0xff]  }
 0x599   : > { %13070 = vmatprep.subr.bf16.mxu1 %v19602_v10  ;;  %9969 = vmatpush1.bf16.msra.mxu0 %v19642_v4  ;;  %v19654_v10 = vld [vmem:[%s26097_s2 + $0x1000] ss:$24 sps:$4 sm:$0xff]   ;;  %v19659_v4 = vld [vmem:[%s26097_s2 + $0x1034] ss:$24 sps:$4 sm:$0xff]  }
 0x59a   : > { %9970 = vmatprep.subr.bf16.mxu0 %v19650_v12  ;;  %13096 = vmatprep.mubr.bf16.mxu1 %v24118_v58  ;;  %v19656_v58 = vld [vmem:[%s26097_s2 + $0x1004] ss:$24 sps:$4 sm:$0xff]   ;;  %v19609_v12 = vld [vmem:[%s26098_s3 + $0x730] ss:$24 sps:$4 sm:$0xff]  }
 0x59c   : > { %13071 = vmatpush1.bf16.msra.mxu1 %v19600_v37  ;;  %v19657_v37 = vld [vmem:[%s26097_s2 + $0x1030] ss:$24 sps:$4 sm:$0xff]  }
 0x59d   : > { %13072 = vmatprep.subr.bf16.mxu1 %v19605_v33  ;;  %9971 = vmatpush1.bf16.msra.mxu0 %v19648_v16  ;;  %v26661_v33 = vld [vmem:[#allocation73_spill] sm:$0xff] }
 0x59e   : > { %9972 = vmatprep.subr.bf16.mxu0 %v19653_v6  ;;  %v19612_v16 = vld [vmem:[%s26098_s3 + $0x760] ss:$24 sps:$4 sm:$0xff]  }
 0x59f   : > { %9844 = vmatmul.mubr.bf16.gmra.mrb[64].mxu0 %v26659_v49  ;;  %v26662_v6 = vld [vmem:[#allocation74_spill] sm:$0xff] }
 0x5a0   : > { %13073 = vmatpush1.bf16.msra.mxu1 %v19603_v56  ;;  %9853 = vmatprep.mubr.bf16.mxu0 %v26660_v26  ;;  %v19617_v56 = vld [vmem:[%s26098_s3 + $0x794] ss:$24 sps:$4 sm:$0xff]   ;;  %v19620_v49 = vld [vmem:[%s26098_s3 + $0x7c4] ss:$24 sps:$4 sm:$0xff]  }
 0x5a1   : > { %13074 = vmatprep.subr.bf16.mxu1 %v19608_v52  ;;  %9973 = vmatpush1.bf16.msra.mxu0 %v19651_v38  ;;  %v19660_v52 = vld [vmem:[%s26097_s2 + $0x1060] ss:$24 sps:$4 sm:$0xff]   ;;  %v19665_v38 = vld [vmem:[%s26097_s2 + $0x1094] ss:$24 sps:$4 sm:$0xff]   ;;  %v19668_v26 = vld [vmem:[%s26097_s2 + $0x10c4] ss:$24 sps:$4 sm:$0xff]  }
 0x5a2   : > { %9974 = vmatprep.subr.bf16.mxu0 %v19656_v58  ;;  %v19615_v58 = vld [vmem:[%s26098_s3 + $0x790] ss:$24 sps:$4 sm:$0xff]  }
 0x5a4   : > { %13075 = vmatpush1.bf16.msra.mxu1 %v19606_v17  ;;  %v19663_v17 = vld [vmem:[%s26097_s2 + $0x1090] ss:$24 sps:$4 sm:$0xff]  }
 0x5a5   : > { %13076 = vmatprep.subr.bf16.mxu1 %v19611_v35  ;;  %9975 = vmatpush1.bf16.msra.mxu0 %v19654_v10  ;;  %v26663_v35 = vld [vmem:[#allocation75_spill] sm:$0xff]  ;;  %v19618_v10 = vld [vmem:[%s26098_s3 + $0x7c0] ss:$24 sps:$4 sm:$0xff]  }
 0x5a6   : > { %9976 = vmatprep.subr.bf16.mxu0 %v19659_v4  ;;  %v26664_v4 = vld [vmem:[#allocation76_spill] sm:$0xff] }
 0x5a7   : > { %9854 = vmatmul.mubr.bf16.gmra.mrb[68].mxu0 %v26661_v33  ;;  %v19626_v33 = vld [vmem:[%s26098_s3 + $0x824] ss:$24 sps:$4 sm:$0xff]  }
 0x5a8   : > { %13077 = vmatpush1.bf16.msra.mxu1 %v19609_v12  ;;  %9863 = vmatprep.mubr.bf16.mxu0 %v26662_v6  ;;  %v19623_v12 = vld [vmem:[%s26098_s3 + $0x7f4] ss:$24 sps:$4 sm:$0xff]   ;;  %v19674_v6 = vld [vmem:[%s26097_s2 + $0x1124] ss:$24 sps:$4 sm:$0xff]  }
 0x5a9   : > { %13078 = vmatprep.subr.bf16.mxu1 %v19614_v21  ;;  %9977 = vmatpush1.bf16.msra.mxu0 %v19657_v37  ;;  %v19666_v21 = vld [vmem:[%s26097_s2 + $0x10c0] ss:$24 sps:$4 sm:$0xff]   ;;  %v19671_v37 = vld [vmem:[%s26097_s2 + $0x10f4] ss:$24 sps:$4 sm:$0xff]  }
 0x5aa   : > { %9978 = vmatprep.subr.bf16.mxu0 %v19662_v55  ;;  %v19621_v55 = vld [vmem:[%s26098_s3 + $0x7f0] ss:$24 sps:$4 sm:$0xff]  }
 0x5ac   : > { %13079 = vmatpush1.bf16.msra.mxu1 %v19612_v16  ;;  %v19669_v16 = vld [vmem:[%s26097_s2 + $0x10f0] ss:$24 sps:$4 sm:$0xff]  }
 0x5ad   : > { %13080 = vmatprep.subr.bf16.mxu1 %v19617_v56  ;;  %9979 = vmatpush1.bf16.msra.mxu0 %v19660_v52  ;;  %v26665_v56 = vld [vmem:[#allocation77_spill] sm:$0xff] }
 0x5ae   : > { %9980 = vmatprep.subr.bf16.mxu0 %v19665_v38  ;;  %v19624_v52 = vld [vmem:[%s26098_s3 + $0x820] ss:$24 sps:$4 sm:$0xff]  }
 0x5af   : > { %9864 = vmatmul.mubr.bf16.gmra.mrb[72].mxu0 %v26663_v35  ;;  %v26666_v38 = vld [vmem:[#allocation78_spill] sm:$0xff] }
 0x5b0   : > { %13081 = vmatpush1.bf16.msra.mxu1 %v19615_v58  ;;  %9873 = vmatprep.mubr.bf16.mxu0 %v26664_v4  ;;  %v19629_v58 = vld [vmem:[%s26098_s3 + $0x854] ss:$24 sps:$4 sm:$0xff]   ;;  %v19635_v35 = vld [vmem:[%s26098_s3 + $0x884] ss:$24 sps:$4 sm:$0xff]  }
 0x5b1   : > { %13082 = vmatprep.subr.bf16.mxu1 %v19620_v49  ;;  %9981 = vmatpush1.bf16.msra.mxu0 %v19663_v17  ;;  %v19672_v49 = vld [vmem:[%s26097_s2 + $0x1120] ss:$24 sps:$4 sm:$0xff]   ;;  %v19677_v17 = vld [vmem:[%s26097_s2 + $0x1154] ss:$24 sps:$4 sm:$0xff]   ;;  %v19680_v4 = vld [vmem:[%s26097_s2 + $0x1184] ss:$24 sps:$4 sm:$0xff]  }
 0x5b2   : > { %9982 = vmatprep.subr.bf16.mxu0 %v19668_v26  ;;  %v19627_v26 = vld [vmem:[%s26098_s3 + $0x850] ss:$24 sps:$4 sm:$0xff]  }
 0x5b4   : > { %13083 = vmatpush1.bf16.msra.mxu1 %v19618_v10  ;;  %v19675_v10 = vld [vmem:[%s26097_s2 + $0x1150] ss:$24 sps:$4 sm:$0xff]  }
 0x5b5   : > { %13084 = vmatprep.subr.bf16.mxu1 %v19623_v12  ;;  %9983 = vmatpush1.bf16.msra.mxu0 %v19666_v21  ;;  %v19633_v12 = vld [vmem:[%s26098_s3 + $0x880] ss:$24 sps:$4 sm:$0xff]   ;;  %v19641_v21 = vld [vmem:[%s26098_s3 + $0x8b4] ss:$24 sps:$4 sm:$0xff]  }
 0x5b6   : > { %9984 = vmatprep.subr.bf16.mxu0 %v19671_v37  ;;  %v19678_v37 = vld [vmem:[%s26097_s2 + $0x1180] ss:$24 sps:$4 sm:$0xff]  }
 0x5b7   : > { %9874 = vmatmul.mubr.bf16.gmra.mrb[76].mxu0 %v26665_v56  ;;  %v19686_v56 = vld [vmem:[%s26097_s2 + $0x11e4] ss:$24 sps:$4 sm:$0xff]  }
 0x5b8   : > { %13085 = vmatpush1.bf16.msra.mxu1 %v19621_v55  ;;  %9883 = vmatprep.mubr.bf16.mxu0 %v26666_v38  ;;  %v26667_v55 = vsub.s32 1, %v23170_v19  ;;  %v19645_v38 = vld [vmem:[%s26098_s3 + $0x8e0] ss:$24 sps:$4 sm:$0xff]  }
 0x5b9   : > { %13086 = vmatprep.subr.bf16.mxu1 %v19626_v33  ;;  %9985 = vmatpush1.bf16.msra.mxu0 %v19669_v16  ;;  %v19647_v16 = vld [vmem:[%s26098_s3 + $0x8e4] ss:$24 sps:$4 sm:$0xff]  }
 0x5ba   : > { %9986 = vmatprep.subr.bf16.mxu0 %v19674_v6  ;;  %v24784_v33 = vrot.slane %v24323_v48, %v26667_v55  ;;  %v19681_v6 = vld [vmem:[%s26097_s2 + $0x11b0] ss:$24 sps:$4 sm:$0xff]   ;;  %v26674_v55 = vpack.c.bf16 %v23220_v3, %v23214_v47 }
 0x5bc   : > { %13087 = vmatpush1.bf16.msra.mxu1 %v19624_v52  ;;  %v16921_v52 = vadd.f32 %v24301_v40, %v24784_v33  ;;  %v19689_v40 = vld [vmem:[%s26097_s2 + $0x1214] ss:$24 sps:$4 sm:$0xff]  }
 0x5bd   : > { %13088 = vmatprep.subr.bf16.mxu1 %v19629_v58  ;;  %9987 = vmatpush1.bf16.msra.mxu0 %v19672_v49  ;;  %v26668_v58 = vld [vmem:[#allocation79_spill] sm:$0xff]  ;;  %v19684_v49 = vld [vmem:[%s26097_s2 + $0x11e0] ss:$24 sps:$4 sm:$0xff]  }
 0x5be   : > { %9988 = vmatprep.subr.bf16.mxu0 %v19677_v17  ;;  %v16663_v17 = vpack.c.bf16 %v16921_v52, %v16921_v52  ;;  %v26682_v52 = vld [vmem:[#allocation87_spill] sm:$0xff] }
 0x5bf   : > { %9884 = vmatmul.mubr.bf16.gmra.mrb[80].mxu0 %v21767_v28  ;;  %v19683_v28 = vld [vmem:[%s26097_s2 + $0x11b4] ss:$24 sps:$4 sm:$0xff]  }
 0x5c0   : > { %13089 = vmatpush1.bf16.msra.mxu1 %v19627_v26  ;;  %9893 = vmatprep.mubr.bf16.mxu0 %v21775_v45  ;;  %v19639_v45 = vld [vmem:[%s26098_s3 + $0x8b0] ss:$24 sps:$4 sm:$0xff]  }
 0x5c1   : > { %13090 = vmatprep.subr.bf16.mxu1 %v19635_v35  ;;  %9989 = vmatpush1.bf16.msra.mxu0 %v19675_v10  ;;  %v26669_v26 = vld [vmem:[#allocation80_spill] sm:$0xff]  ;;  %v16923_v35 = vadd.f32 %v24308_v34, %v24784_v33  ;;  %v26670_v10 = vld [vmem:[#allocation81_spill] sm:$0xff]  ;;  %v16922_v34 = vadd.f32 %v24303_v41, %v24342_v14 }
 0x5c2   : > { %9990 = vmatprep.subr.bf16.mxu0 %v19680_v4 }
 0x5c4   : > { %13091 = vmatpush1.bf16.msra.mxu1 %v19633_v12  ;;  %v16667_v12 = vpack.c.bf16 %v16923_v35, %v16923_v35  ;;  %v26685_v35 = vld [vmem:[#allocation88_spill] sm:$0xff] }
 0x5c5   : > { %13092 = vmatprep.subr.bf16.mxu1 %v19641_v21  ;;  %9991 = vmatpush1.bf16.msra.mxu0 %v19678_v37  ;;  %v26671_v21 = vld [vmem:[#allocation82_spill] sm:$0xff]  ;;  %v16666_v37 = vpack.c.bf16 %v16922_v34, %v16922_v34  ;;  %v26692_v34 = vld [vmem:[#allocation95_spill] sm:$0xff] }
 0x5c6   : > { %9992 = vmatprep.subr.bf16.mxu0 %v19683_v28 }
 0x5c7   : > { %9894 = vmatmul.mubr.bf16.gmra.mrb[84].mxu0 %v21801_v8  ;;  %v16920_v8 = vadd.f32 %v24296_v43, %v24342_v14  ;;  %v26673_v43 = vld [vmem:[#allocation83_spill] sm:$0xff] }
 0x5c8   : > { %13093 = vmatpush1.bf16.msra.mxu1 %v19639_v45  ;;  %9903 = vmatprep.mubr.bf16.mxu0 %v26668_v58 }
 0x5c9   : > { %13094 = vmatprep.subr.bf16.mxu1 %v19647_v16  ;;  %9993 = vmatpush1.bf16.msra.mxu0 %v19681_v6  ;;  %v16662_v4 = vpack.c.bf16 %v16920_v8, %v16920_v8 }
 0x5ca   : > { %9994 = vmatprep.subr.bf16.mxu0 %v19686_v56  ;;  %v26681_v56 = vpack.c.bf16 %v23342_v20, %v23336_v62  ;;  %v16661_v20 = vpack.c.bf16 %v23386_v42, %v23386_v42  ;;  %v26688_v42 = vld [vmem:[#allocation91_spill] sm:$0xff] }
 0x5cc   : > { %13095 = vmatpush1.bf16.msra.mxu1 %v19645_v38  ;;  %v26683_v38 = vsub.s32 3, %v23170_v19 }
 0x5cd   : > { %13207 = vmatprep.subr.bf16.mxu1 %v16663_v17  ;;  %9995 = vmatpush1.bf16.msra.mxu0 %v19684_v49 }
 0x5ce   : > { %10137 = vmatprep.subr.bf16.mxu0 %v19689_v40  ;;  %v24862_v58 = vrot.slane %v24323_v48, %v26683_v38  ;;  %v26698_v38 = vld [vmem:[#allocation198_spill] sm:$0xff] }
 0x5cf   : > { %13097 = vmatmul.mubr.bf16.vlgmr.msra.gmra.mrb[72].mxu1 %v24239_v5  ;;  %9904 = vmatmul.mubr.bf16.gmra.mrb[88].mxu0 %v26669_v26  ;;  %v26672_v5 = vpack.c.bf16 %v23235_v18, %v23229_v54  ;;  %v26676_v54 = vpack.c.bf16 %v23284_v30, %v23278_v11  ;;  %v26677_v18 = vld [vmem:[#allocation85_spill] sm:$0xff]  ;;  %v26679_v11 = vpack.c.bf16 %v23266_v61, %v23260_v57  ;;  %v26680_v30 = vld [vmem:[#allocation86_spill] sm:$0xff] }
 0x5d0   : > { %13106 = vmatprep.mubr.bf16.mxu1 %v24247_v27  ;;  %9913 = vmatprep.mubr.bf16.mxu0 %v26670_v10  ;;  %v16925_v27 = vadd.f32 %v24344_v29, %v24784_v33  ;;  %v26678_v29 = vsub.s32 2, %v23170_v19  ;;  %v26686_v10 = vld [vmem:[#allocation89_spill] sm:$0xff] }
 0x5d2   : > { %v16671_v28 = vpack.c.bf16 %v16925_v27, %v16925_v27  ;;  %v24842_v45 = vrot.slane %v24323_v48, %v26678_v29  ;;  %v26684_v48 = vpack.c.bf16 %v23324_v9, %v23315_v22  ;;  %v16927_v22 = vadd.f32 %v24352_v13, %v24784_v33  ;;  %v19693_v13 = vld [vmem:[%s26097_s2 + $0x1270] ss:$24 sps:$4 sm:$0xff]   ;;  %v19698_v33 = vld [vmem:[%s26097_s2 + $0x12a4] ss:$24 sps:$4 sm:$0xff]   ;;  %v19696_v27 = vld [vmem:[%s26097_s2 + $0x12a0] ss:$24 sps:$4 sm:$0xff]  }
 0x5d3   : > { %v26695_v29 = vld [vmem:[#allocation98_spill] sm:$0xff] }
 0x5d5   : > { %13208 = vmatpush1.bf16.xpose.msra.mxu1 %v16662_v4  ;;  %v16660_v4 = vpack.c.bf16 %v23375_v53, %v23375_v53  ;;  %v26689_v53 = vld [vmem:[#allocation92_spill] sm:$0xff] }
 0x5d6   : > { %13291 = vmatprep.subr.bf16.mxu1 %v16667_v12  ;;  %v26687_v12 = vld [vmem:[#allocation90_spill] sm:$0xff] }
 0x5d7   : > { %13107 = vmatmul.mubr.bf16.gmra.mrb[76].mxu1 %v24261_v0  ;;  %9914 = vmatmul.mubr.bf16.gmra.mrb[92].mxu0 %v26671_v21  ;;  %v26675_v0 = vld [vmem:[#allocation84_spill] sm:$0xff]  ;;  %v16924_v21 = vadd.f32 %v24335_v25, %v24342_v14  ;;  %v26690_v25 = vld [vmem:[#allocation93_spill] sm:$0xff] }
 0x5d8   : > { %13239 = vmatprep.mubr.bf16.mxu1 %v26672_v5  ;;  %9923 = vmatprep.mubr.bf16.mxu0 %v26673_v43  ;;  %v19687_v5 = vld [vmem:[%s26097_s2 + $0x1210] ss:$24 sps:$4 sm:$0xff]   ;;  %v16675_v43 = vpack.c.bf16 %v16927_v22, %v16927_v22  ;;  %v19690_v14 = vld [vmem:[%s26097_s2 + $0x1240] ss:$24 sps:$4 sm:$0xff]  }
 0x5d9   : > { %v16670_v9 = vpack.c.bf16 %v16924_v21, %v16924_v21  ;;  %v26709_v21 = vld [vmem:[#allocation217_spill] sm:$0xff]  ;;  %v26710_v22 = vld [vmem:[#allocation215_spill] sm:$0xff] }
 0x5df   : > { %13240 = vmatmul.mubr.bf16.vlgmr.msra.gmra.mrb[80].mxu1 %v26674_v55  ;;  %9924 = vmatmul.mubr.bf16.gmra.mrb[96].mxu0 %v26675_v0  ;;  %v19704_v55 = vld [vmem:[%s26097_s2 + $0x1304] ss:$24 sps:$4 sm:$0xff]  }
 0x5e0   : > { %13292 = vmatpush1.bf16.xpose.msra.mxu1 %v16666_v37  ;;  %13247 = vmatprep.mubr.bf16.mxu1 %v26676_v54  ;;  %v16665_v37 = vpack.c.bf16 %v23545_v59, %v23545_v59  ;;  %v26694_v0 = vld [vmem:[#allocation97_spill] sm:$0xff]  ;;  %v16664_v54 = vpack.c.bf16 %v23534_v23, %v23534_v23  ;;  %v26697_v23 = vld [vmem:[#allocation99_spill] sm:$0xff] }
 0x5e1   : > { %13375 = vmatprep.subr.bf16.mxu1 %v16671_v28  ;;  %9933 = vmatprep.mubr.bf16.mxu0 %v26677_v18  ;;  %v26693_v28 = vld [vmem:[#allocation96_spill] sm:$0xff]  ;;  %v19702_v59 = vld [vmem:[%s26097_s2 + $0x1300] ss:$24 sps:$4 sm:$0xff]  }
 0x5e2   : > { %v24837_v41 = vpop.f32.mrb[64].mxu1  ;;  %v19705_v18 = vld [vmem:[%s26097_s2 + $0x1330] ss:$24 sps:$4 sm:$0xff]  }
 0x5e3   : > { %v24844_v16 = vpop.f32.mrb[65].mxu1 }
 0x5e4   : > { %v12943_v47 = vpop.f32.mrb[66].mxu1 }
 0x5e5   : > { %v24847_v3 = vadd.f32 %v12943_v47, %v24842_v45  ;;  %v24849_v6 = vpop.f32.mrb[67].mxu1  ;;  %v19710_v47 = vld [vmem:[%s26097_s2 + $0x1364] ss:$24 sps:$4 sm:$0xff]  }
 0x5e7   : > { %13248 = vmatmul.mubr.bf16.gmra.mrb[84].mxu1 %v26679_v11  ;;  %9934 = vmatmul.mubr.bf16.gmra.mrb[100].mxu0 %v26680_v30  ;;  %v26696_v11 = vpack.c.bf16 %v23611_v46, %v23605_v31  ;;  %v19708_v30 = vld [vmem:[%s26097_s2 + $0x1360] ss:$24 sps:$4 sm:$0xff]   ;;  %v19713_v31 = vld [vmem:[%s26097_s2 + $0x1394] ss:$24 sps:$4 sm:$0xff]  }
 0x5e8   : > { %13255 = vmatprep.mubr.bf16.mxu1 %v26681_v56  ;;  %9943 = vmatprep.mubr.bf16.mxu0 %v26682_v52  ;;  %v16929_v56 = vadd.f32 %v24844_v16, %v24862_v58  ;;  %v16674_v52 = vpack.c.bf16 %v24350_v2, %v24350_v2  ;;  %v19711_v16 = vld [vmem:[%s26097_s2 + $0x1390] ss:$24 sps:$4 sm:$0xff]  }
 0x5e9   : > { %v26702_v2 = vld [vmem:[#allocation207_spill] sm:$0xff] }
 0x5ea   : > { %v12949_v49 = vpop.f32.mrb[68].mxu1  ;;  %v16677_v46 = vpack.c.bf16 %v16929_v56, %v16929_v56  ;;  %v26723_v56 = vld [vmem:[#allocation2_spill] sm:$0xff] }
 0x5eb   : > { %v24865_v40 = vadd.f32 %v12949_v49, %v24842_v45  ;;  %v12951_v17 = vpop.f32.mrb[69].mxu1  ;;  %v26699_v49 = vpack.c.bf16 %v23596_v51, %v26698_v38  ;;  %v26704_v51 = vld [vmem:[#allocation101_spill] sm:$0xff]  ;;  %v16673_v38 = vpack.c.bf16 %v23909_v32, %v23909_v32  ;;  %v26735_v32 = vld [vmem:[#allocation118_spill] sm:$0xff] }
 0x5ec   : > { %v24868_v57 = vadd.f32 %v12951_v17, %v24862_v58  ;;  %v12953_v61 = vpop.f32.mrb[70].mxu1  ;;  %v26700_v17 = vld [vmem:[#allocation100_spill] sm:$0xff] }
 0x5ed   : > { %v24871_v8 = vadd.f32 %v12953_v61, %v24842_v45  ;;  %v12955_v62 = vpop.f32.mrb[71].mxu1  ;;  %v26701_v61 = vld [vmem:[#allocation209_spill] sm:$0xff] }
 0x5ee   : > { %v24876_v26 = vadd.f32 %v12955_v62, %v24862_v58  ;;  %v26703_v62 = vpack.c.bf16 %v26701_v61, %v26702_v2  ;;  %v26732_v61 = vld [vmem:[#allocation115_spill] sm:$0xff]  ;;  %v26734_v2 = vld [vmem:[#allocation117_spill] sm:$0xff] }
 0x5ef   : > { %13256 = vmatmul.mubr.bf16.gmra.mrb[88].mxu1 %v26684_v48  ;;  %9944 = vmatmul.mubr.bf16.gmra.mrb[104].mxu0 %v26685_v35  ;;  %v19714_v48 = vld [vmem:[%s26097_s2 + $0x13c0] ss:$24 sps:$4 sm:$0xff]   ;;  %v19719_v35 = vld [vmem:[%s26097_s2 + $0x13f4] ss:$24 sps:$4 sm:$0xff]  }
 0x5f0   : > { %13263 = vmatprep.mubr.bf16.mxu1 %v16661_v20  ;;  %9953 = vmatprep.mubr.bf16.mxu0 %v26686_v10  ;;  %v19716_v20 = vld [vmem:[%s26097_s2 + $0x13c4] ss:$24 sps:$4 sm:$0xff]  }
 0x5f1   : > { %v26705_v10 = vld [vmem:[#allocation205_spill] sm:$0xff] }
 0x5f7   : > { %13264 = vmatmul.mubr.bf16.gmra.mrb[92].mxu1 %v16660_v4  ;;  %9954 = vmatmul.mubr.bf16.gmra.mrb[108].mxu0 %v26687_v12  ;;  %v26706_v4 = vld [vmem:[#allocation203_spill] sm:$0xff] }
 0x5f8   : > { %13323 = vmatprep.mubr.bf16.mxu1 %v23470_v36  ;;  %9996 = vmatprep.mubr.bf16.mxu0 %v26688_v42  ;;  %v19692_v36 = vld [vmem:[%s26097_s2 + $0x1244] ss:$24 sps:$4 sm:$0xff]   ;;  %v26707_v12 = vpack.c.bf16 %v26705_v10, %v26706_v4  ;;  %v19743_v10 = vld [vmem:[%s26097_s2 + $0x1574] ss:$24 sps:$4 sm:$0xff]   ;;  %v19741_v4 = vld [vmem:[%s26097_s2 + $0x1570] ss:$24 sps:$4 sm:$0xff]  }
 0x5f9   : > { %v26708_v42 = vld [vmem:[#allocation102_spill] sm:$0xff] }
 0x5ff   : > { %13324 = vmatmul.mubr.bf16.vlgmr.msra.gmra.mrb[96].mxu1 %v23462_v7  ;;  %9997 = vmatmul.mubr.bf16.vlgmr.msra.gmra.mrb[56].mxu0 %v26689_v53  ;;  %v19695_v7 = vld [vmem:[%s26097_s2 + $0x1274] ss:$24 sps:$4 sm:$0xff]   ;;  %v19722_v53 = vld [vmem:[%s26097_s2 + $0x1424] ss:$24 sps:$4 sm:$0xff]  }
 0x600   : > { %13376 = vmatpush1.bf16.xpose.msra.mxu1 %v16670_v9  ;;  %13331 = vmatprep.mubr.bf16.mxu1 %v23528_v15  ;;  %v26691_v15 = vld [vmem:[#allocation94_spill] sm:$0xff]  ;;  %v26711_v9 = vpack.c.bf16 %v26709_v21, %v26710_v22  ;;  %v26740_v21 = vld [vmem:[#allocation123_spill] sm:$0xff] }
 0x601   : > { %13459 = vmatprep.subr.bf16.mxu1 %v16675_v43  ;;  %10006 = vmatprep.mubr.bf16.mxu0 %v26690_v25  ;;  %v19717_v43 = vld [vmem:[%s26097_s2 + $0x13f0] ss:$24 sps:$4 sm:$0xff]   ;;  %v26713_v25 = vld [vmem:[#allocation221_spill] sm:$0xff] }
 0x602   : > { %10138 = vmatpush1.bf16.msra.mxu0 %v19687_v5  ;;  %v26712_v5 = vld [vmem:[#allocation103_spill] sm:$0xff]  ;;  %v19744_v22 = vld [vmem:[%s26097_s2 + $0x15a0] ss:$24 sps:$4 sm:$0xff]  }
 0x603   : > { %10139 = vmatprep.subr.bf16.mxu0 %v19692_v36  ;;  %v19720_v36 = vld [vmem:[%s26097_s2 + $0x1420] ss:$24 sps:$4 sm:$0xff]  }
 0x606   : > { %10140 = vmatpush1.bf16.msra.mxu0 %v19690_v14  ;;  %v16669_v14 = vpack.c.bf16 %v26713_v25, %v26713_v25  ;;  %v19750_v25 = vld [vmem:[%s26097_s2 + $0x1600] ss:$24 sps:$4 sm:$0xff]  }
 0x607   : > { %13332 = vmatmul.mubr.bf16.gmra.mrb[100].mxu1 %v23522_v24  ;;  %10007 = vmatmul.mubr.bf16.gmra.mrb[60].mxu0 %v26691_v15  ;;  %v19701_v24 = vld [vmem:[%s26097_s2 + $0x12d4] ss:$24 sps:$4 sm:$0xff]  }
 0x608   : > { %13339 = vmatprep.mubr.bf16.mxu1 %v23585_v63  ;;  %10016 = vmatprep.mubr.bf16.mxu0 %v26692_v34  ;;  %v19699_v63 = vld [vmem:[%s26097_s2 + $0x12d0] ss:$24 sps:$4 sm:$0xff]  }
 0x609   : > { %10141 = vmatprep.subr.bf16.mxu0 %v19695_v7  ;;  %v19725_v7 = vld [vmem:[%s26097_s2 + $0x1454] ss:$24 sps:$4 sm:$0xff]  }
 0x60a   : > { %10142 = vmatpush1.bf16.msra.mxu0 %v19693_v13  ;;  %v26714_v13 = vld [vmem:[#allocation213_spill] sm:$0xff]  ;;  %v26715_v15 = vld [vmem:[#allocation211_spill] sm:$0xff]  ;;  %v26717_v34 = vld [vmem:[#allocation104_spill] sm:$0xff] }
 0x60b   : > { %10143 = vmatprep.subr.bf16.mxu0 %v19698_v33  ;;  %v26716_v33 = vpack.c.bf16 %v26714_v13, %v26715_v15  ;;  %v19758_v13 = vld [vmem:[%s26097_s2 + $0x1664] ss:$24 sps:$4 sm:$0xff]  }
 0x60c   : > { %v26743_v15 = vld [vmem:[#allocation126_spill] sm:$0xff] }
 0x60e   : > { %10144 = vmatpush1.bf16.msra.mxu0 %v19696_v27  ;;  %v26718_v27 = vld [vmem:[#allocation105_spill] sm:$0xff] }
 0x60f   : > { %13340 = vmatmul.mubr.bf16.gmra.mrb[104].mxu1 %v23580_v39  ;;  %10017 = vmatmul.mubr.bf16.gmra.mrb[64].mxu0 %v26693_v28  ;;  %v19707_v39 = vld [vmem:[%s26097_s2 + $0x1334] ss:$24 sps:$4 sm:$0xff]  }
 0x610   : > { %13347 = vmatprep.mubr.bf16.mxu1 %v16665_v37  ;;  %10026 = vmatprep.mubr.bf16.mxu0 %v26694_v0  ;;  %v19728_v37 = vld [vmem:[%s26097_s2 + $0x1484] ss:$24 sps:$4 sm:$0xff]   ;;  %v19731_v0 = vld [vmem:[%s26097_s2 + $0x14b4] ss:$24 sps:$4 sm:$0xff]  }
 0x611   : > { %10145 = vmatprep.subr.bf16.mxu0 %v19701_v24  ;;  %v19723_v24 = vld [vmem:[%s26097_s2 + $0x1450] ss:$24 sps:$4 sm:$0xff]  }
 0x612   : > { %10146 = vmatpush1.bf16.msra.mxu0 %v19699_v63  ;;  %v26719_v63 = vld [vmem:[#allocation219_spill] sm:$0xff] }
 0x613   : > { %10147 = vmatprep.subr.bf16.mxu0 %v19704_v55  ;;  %v16668_v28 = vpack.c.bf16 %v26719_v63, %v26719_v63  ;;  %v19726_v55 = vld [vmem:[%s26097_s2 + $0x1480] ss:$24 sps:$4 sm:$0xff]   ;;  %v26745_v63 = vld [vmem:[#allocation128_spill] sm:$0xff] }
 0x616   : > { %10148 = vmatpush1.bf16.msra.mxu0 %v19702_v59  ;;  %v16928_v59 = vadd.f32 %v24837_v41, %v24842_v45  ;;  %v16931_v41 = vadd.f32 %v24849_v6, %v24862_v58  ;;  %v19732_v45 = vld [vmem:[%s26097_s2 + $0x14e0] ss:$24 sps:$4 sm:$0xff]  }
 0x617   : > { %13348 = vmatmul.mubr.bf16.gmra.mrb[108].mxu1 %v16664_v54  ;;  %10027 = vmatmul.mubr.bf16.gmra.mrb[68].mxu0 %v26695_v29  ;;  %v26720_v54 = vld [vmem:[#allocation106_spill] sm:$0xff]  ;;  %v19729_v29 = vld [vmem:[%s26097_s2 + $0x14b0] ss:$24 sps:$4 sm:$0xff]   ;;  %v26725_v6 = vld [vmem:[#allocation109_spill] sm:$0xff] }
 0x618   : > { %13407 = vmatprep.mubr.bf16.mxu1 %v26696_v11  ;;  %10036 = vmatprep.mubr.bf16.mxu0 %v26697_v23  ;;  %v16676_v11 = vpack.c.bf16 %v16928_v59, %v16928_v59  ;;  %v26726_v58 = vld [vmem:[#allocation110_spill] sm:$0xff]  ;;  %v19765_v59 = vld [vmem:[%s26097_s2 + $0x16f0] ss:$24 sps:$4 sm:$0xff]  }
 0x619   : > { %10149 = vmatprep.subr.bf16.mxu0 %v19707_v39  ;;  %v26721_v39 = vld [vmem:[#allocation4_spill] sm:$0xff] }
 0x61a   : > { %10150 = vmatpush1.bf16.msra.mxu0 %v19705_v18  ;;  %v26722_v18 = vld [vmem:[#allocation107_spill] sm:$0xff]  ;;  %v13947_v23 = vsel %vm13945_vm0, %v16676_v11, 0 }
 0x61b   : > { %10151 = vmatprep.subr.bf16.mxu0 %v19710_v47  ;;  %v19734_v47 = vld [vmem:[%s26097_s2 + $0x14e4] ss:$24 sps:$4 sm:$0xff]   ;;  %v19771_v11 = vld [vmem:[%s26097_s2 + $0x1750] ss:$24 sps:$4 sm:$0xff]  }
 0x61e   : > { %10152 = vmatpush1.bf16.msra.mxu0 %v19708_v30  ;;  %v16679_v30 = vpack.c.bf16 %v16931_v41, %v16931_v41  ;;  %v19776_v41 = vld [vmem:[%s26097_s2 + $0x1784] ss:$24 sps:$4 sm:$0xff]  }
 0x61f   : > { %13408 = vmatmul.mubr.bf16.vlgmr.msra.gmra.mrb[112].mxu1 %v26699_v49  ;;  %10037 = vmatmul.mubr.bf16.gmra.mrb[72].mxu0 %v26700_v17  ;;  %v26729_v49 = vld [vmem:[#allocation113_spill] sm:$0xff]  ;;  %v26730_v17 = vld [vmem:[#allocation224_spill] sm:$0xff] }
 0x620   : > { %13460 = vmatpush1.bf16.xpose.msra.mxu1 %v16674_v52  ;;  %13415 = vmatprep.mubr.bf16.mxu1 %v26703_v62  ;;  %v26724_v52 = vld [vmem:[#allocation108_spill] sm:$0xff] }
 0x621   : > { %16574 = vmatprep.subr.msk.bf16.mxu1 %vm13945_vm0, %v16677_v46  ;;  %10046 = vmatprep.mubr.bf16.mxu0 %v26704_v51  ;;  %v26727_v46 = vld [vmem:[#allocation111_spill] sm:$0xff]  ;;  %v26737_v51 = vld [vmem:[#allocation120_spill] sm:$0xff] }
 0x622   : > { %10153 = vmatprep.subr.bf16.mxu0 %v19713_v31  ;;  %v19737_v31 = vld [vmem:[%s26097_s2 + $0x1514] ss:$24 sps:$4 sm:$0xff]   ;;  %v19735_v62 = vld [vmem:[%s26097_s2 + $0x1510] ss:$24 sps:$4 sm:$0xff]  }
 0x623   : > { %10154 = vmatpush1.bf16.msra.mxu0 %v19711_v16  ;;  %v16672_v16 = vpack.c.bf16 %v26730_v17, %v26730_v17  ;;  %v26751_v17 = vld [vmem:[#allocation134_spill] sm:$0xff] }
 0x624   : > { %10155 = vmatprep.subr.bf16.mxu0 %v19716_v20  ;;  %v19740_v20 = vld [vmem:[%s26097_s2 + $0x1544] ss:$24 sps:$4 sm:$0xff]  }
 0x627   : > { %13416 = vmatmul.mubr.bf16.gmra.mrb[116].mxu1 %v26707_v12  ;;  %10047 = vmatmul.mubr.bf16.gmra.mrb[76].mxu0 %v26708_v42  ;;  %v19746_v12 = vld [vmem:[%s26097_s2 + $0x15a4] ss:$24 sps:$4 sm:$0xff]  }
 0x628   : > { %13423 = vmatprep.mubr.bf16.mxu1 %v26711_v9  ;;  %10056 = vmatprep.mubr.bf16.mxu0 %v26712_v5  ;;  %v26739_v42 = vld [vmem:[#allocation122_spill] sm:$0xff]  ;;  %v19749_v9 = vld [vmem:[%s26097_s2 + $0x15d4] ss:$24 sps:$4 sm:$0xff]   ;;  %v19747_v5 = vld [vmem:[%s26097_s2 + $0x15d0] ss:$24 sps:$4 sm:$0xff]  }
 0x629   : > { %10156 = vmatpush1.bf16.msra.mxu0 %v19714_v48  ;;  %v26738_v48 = vld [vmem:[#allocation121_spill] sm:$0xff] }
 0x62a   : > { %10157 = vmatprep.subr.bf16.mxu0 %v19719_v35  ;;  %v19738_v35 = vld [vmem:[%s26097_s2 + $0x1540] ss:$24 sps:$4 sm:$0xff]  }
 0x62d   : > { %10158 = vmatpush1.bf16.msra.mxu0 %v19717_v43  ;;  %v19752_v43 = vld [vmem:[%s26097_s2 + $0x1604] ss:$24 sps:$4 sm:$0xff]  }
 0x62e   : > { %10159 = vmatprep.subr.bf16.mxu0 %v19722_v53  ;;  %v26741_v53 = vld [vmem:[#allocation124_spill] sm:$0xff] }
 0x62f   : > { %13424 = vmatmul.mubr.bf16.gmra.mrb[120].mxu1 %v26716_v33  ;;  %10057 = vmatmul.mubr.bf16.gmra.mrb[80].mxu0 %v26717_v34  ;;  %v26744_v33 = vld [vmem:[#allocation127_spill] sm:$0xff]  ;;  %v19756_v34 = vld [vmem:[%s26097_s2 + $0x1660] ss:$24 sps:$4 sm:$0xff]  }
 0x630   : > { %13431 = vmatprep.mubr.bf16.mxu1 %v16669_v14  ;;  %10066 = vmatprep.mubr.bf16.mxu0 %v26718_v27  ;;  %v19755_v14 = vld [vmem:[%s26097_s2 + $0x1634] ss:$24 sps:$4 sm:$0xff]  }
 0x631   : > { %10160 = vmatpush1.bf16.msra.mxu0 %v19720_v36  ;;  %v26742_v36 = vld [vmem:[#allocation125_spill] sm:$0xff]  ;;  %v19761_v27 = vld [vmem:[%s26097_s2 + $0x1694] ss:$24 sps:$4 sm:$0xff]  }
 0x632   : > { %10161 = vmatprep.subr.bf16.mxu0 %v19725_v7  ;;  %v19753_v7 = vld [vmem:[%s26097_s2 + $0x1630] ss:$24 sps:$4 sm:$0xff]  }
 0x635   : > { %10162 = vmatpush1.bf16.msra.mxu0 %v19723_v24  ;;  %v19759_v24 = vld [vmem:[%s26097_s2 + $0x1690] ss:$24 sps:$4 sm:$0xff]  }
 0x636   : > { %10163 = vmatprep.subr.bf16.mxu0 %v19728_v37  ;;  %v19764_v37 = vld [vmem:[%s26097_s2 + $0x16c4] ss:$24 sps:$4 sm:$0xff]  }
 0x637   : > { %13432 = vmatmul.mubr.bf16.gmra.mrb[124].mxu1 %v16668_v28  ;;  %10067 = vmatmul.mubr.bf16.gmra.mrb[84].mxu0 %v26720_v54  ;;  %v26746_v28 = vld [vmem:[#allocation129_spill] sm:$0xff] }
 0x638   : > { %13491 = vmatprep.mubr.bf16.mxu1 %v26721_v39  ;;  %10076 = vmatprep.mubr.bf16.mxu0 %v26722_v18  ;;  %v19770_v54 = vld [vmem:[%s26097_s2 + $0x1724] ss:$24 sps:$4 sm:$0xff]   ;;  %v26748_v18 = vld [vmem:[#allocation131_spill] sm:$0xff] }
 0x639   : > { %10164 = vmatpush1.bf16.msra.mxu0 %v19726_v55  ;;  %v19762_v55 = vld [vmem:[%s26097_s2 + $0x16c0] ss:$24 sps:$4 sm:$0xff]  }
 0x63a   : > { %10165 = vmatprep.subr.bf16.mxu0 %v19731_v0  ;;  %v19767_v0 = vld [vmem:[%s26097_s2 + $0x16f4] ss:$24 sps:$4 sm:$0xff]   ;;  %v26747_v39 = vld [vmem:[#allocation130_spill] sm:$0xff] }
 0x63d   : > { %10166 = vmatpush1.bf16.msra.mxu0 %v19729_v29  ;;  %v19768_v29 = vld [vmem:[%s26097_s2 + $0x1720] ss:$24 sps:$4 sm:$0xff]  }
 0x63e   : > { %10167 = vmatprep.subr.bf16.mxu0 %v19734_v47  ;;  %v19773_v47 = vld [vmem:[%s26097_s2 + $0x1754] ss:$24 sps:$4 sm:$0xff]  }
 0x63f   : > { %13492 = vmatmul.mubr.bf16.vlgmr.msra.gmra.mrb[128].mxu1 %v26723_v56  ;;  %10077 = vmatmul.mubr.bf16.gmra.mrb[88].mxu0 %v26724_v52  ;;  %v19779_v56 = vld [vmem:[%s26097_s2 + $0x17b4] ss:$24 sps:$4 sm:$0xff]  }
 0x640   : > { %13953 = vmatpush1.bf16.msra.mxu1 %v13947_v23  ;;  %13499 = vmatprep.mubr.bf16.mxu1 %v23891_v1  ;;  %v26728_v1 = vld [vmem:[#allocation112_spill] sm:$0xff]  ;;  %v26750_v23 = vld [vmem:[#allocation133_spill] sm:$0xff] }
 0x641   : > { %16578 = vmatprep.subr.msk.bf16.mxu1 %vm13945_vm0, %v16679_v30  ;;  %10086 = vmatprep.mubr.bf16.mxu0 %v26725_v6  ;;  %v19774_v30 = vld [vmem:[%s26097_s2 + $0x1780] ss:$24 sps:$4 sm:$0xff]  }
 0x642   : > { %10168 = vmatpush1.bf16.msra.mxu0 %v19732_v45  ;;  %v26749_v45 = vld [vmem:[#allocation132_spill] sm:$0xff] }
 0x643   : > { %10310 = vmatprep.subr.bf16.mxu0 %v19737_v31 }
 0x647   : > { %13500 = vmatmul.mubr.bf16.gmra.mrb[132].mxu1 %v23886_v50  ;;  %10087 = vmatmul.mubr.bf16.gmra.mrb[92].mxu0 %v26726_v58  ;;  %v26731_v50 = vld [vmem:[#allocation114_spill] sm:$0xff]  ;;  %v19777_v58 = vld [vmem:[%s26097_s2 + $0x17b0] ss:$24 sps:$4 sm:$0xff]  }
 0x648   : > { %13507 = vmatprep.mubr.bf16.mxu1 %v23937_v44  ;;  %10096 = vmatprep.mubr.bf16.mxu0 %v26727_v46  ;;  %v26733_v44 = vld [vmem:[#allocation116_spill] sm:$0xff]  ;;  %v1359_v46 = vsub.s32 4, %v23170_v19 }
 0x64f   : > { %13508 = vmatmul.mubr.bf16.gmra.mrb[136].mxu1 %v23932_v60  ;;  %10097 = vmatmul.mubr.bf16.gmra.mrb[96].mxu0 %v26728_v1  ;;  %v26736_v60 = vld [vmem:[#allocation119_spill] sm:$0xff]  ;;  %v19782_v1 = vld [vmem:[%s26097_s2 + $0x17e4] ss:$24 sps:$4 sm:$0xff]  }
 0x650   : > { %13515 = vmatprep.mubr.bf16.mxu1 %v16673_v38  ;;  %10106 = vmatprep.mubr.bf16.mxu0 %v26729_v49  ;;  %v1363_v49 = vsub.s32 5, %v23170_v19 }
 0x657   : > { %13516 = vmatmul.mubr.bf16.gmra.mrb[140].mxu1 %v16672_v16  ;;  %10107 = vmatmul.mubr.bf16.gmra.mrb[100].mxu0 %v26731_v50  ;;  %v26752_v16 = vld [vmem:[#allocation135_spill] sm:$0xff]  ;;  %v19780_v50 = vld [vmem:[%s26097_s2 + $0x17e0] ss:$24 sps:$4 sm:$0xff]  }
 0x658   : > { %10116 = vmatprep.mubr.bf16.mxu0 %v26732_v61  ;;  %v19955_v61 = vld [vmem:[%s26099_s4 + $0x1] ss:$2 sm:$0x3f] }
 0x65f   : > { %10117 = vmatmul.mubr.bf16.gmra.mrb[104].mxu0 %v26733_v44  ;;  %v25192_v44 = vrot.slane %v19955_v61, %v1359_v46 }
 0x660   : > { %10126 = vmatprep.mubr.bf16.mxu0 %v26734_v2  ;;  %v25196_v2 = vrot.slane %v19955_v61, %v1363_v49 }
 0x667   : > { %10127 = vmatmul.mubr.bf16.gmra.mrb[108].mxu0 %v26735_v32 }
 0x668   : > { %10169 = vmatprep.mubr.bf16.mxu0 %v26736_v60 }
 0x66f   : > { %10170 = vmatmul.mubr.bf16.vlgmr.msra.gmra.mrb[56].mxu0 %v26737_v51 }
 0x670   : > { %10179 = vmatprep.mubr.bf16.mxu0 %v26738_v48  ;;  %10311 = vmatpush1.bf16.msra.mxu0 %v19735_v62 }
 0x671   : > { %10312 = vmatprep.subr.bf16.mxu0 %v19740_v20 }
 0x674   : > { %10313 = vmatpush1.bf16.msra.mxu0 %v19738_v35 }
 0x675   : > { %10314 = vmatprep.subr.bf16.mxu0 %v19743_v10 }
 0x677   : > { %10180 = vmatmul.mubr.bf16.gmra.mrb[60].mxu0 %v26739_v42 }
 0x678   : > { %10189 = vmatprep.mubr.bf16.mxu0 %v26740_v21  ;;  %10315 = vmatpush1.bf16.msra.mxu0 %v19741_v4  ;;  %v26757_v4 = vld [vmem:[#allocation136_spill] sm:$0xff] }
 0x679   : > { %10316 = vmatprep.subr.bf16.mxu0 %v19746_v12  ;;  %v26758_v12 = vld [vmem:[#allocation137_spill] sm:$0xff] }
 0x67c   : > { %10317 = vmatpush1.bf16.msra.mxu0 %v19744_v22 }
 0x67d   : > { %10318 = vmatprep.subr.bf16.mxu0 %v19749_v9 }
 0x67f   : > { %10190 = vmatmul.mubr.bf16.gmra.mrb[64].mxu0 %v26741_v53 }
 0x680   : > { %10199 = vmatprep.mubr.bf16.mxu0 %v26742_v36  ;;  %10319 = vmatpush1.bf16.msra.mxu0 %v19747_v5  ;;  %v26760_v36 = vld [vmem:[#allocation139_spill] sm:$0xff] }
 0x681   : > { %10320 = vmatprep.subr.bf16.mxu0 %v19752_v43  ;;  %v26759_v43 = vld [vmem:[#allocation138_spill] sm:$0xff] }
 0x684   : > { %10321 = vmatpush1.bf16.msra.mxu0 %v19750_v25 }
 0x685   : > { %10322 = vmatprep.subr.bf16.mxu0 %v19755_v14 }
 0x687   : > { %10200 = vmatmul.mubr.bf16.gmra.mrb[68].mxu0 %v26743_v15 }
 0x688   : > { %10209 = vmatprep.mubr.bf16.mxu0 %v26744_v33  ;;  %10323 = vmatpush1.bf16.msra.mxu0 %v19753_v7  ;;  %v26761_v33 = vld [vmem:[#allocation140_spill] sm:$0xff] }
 0x689   : > { %10324 = vmatprep.subr.bf16.mxu0 %v19758_v13 }
 0x68c   : > { %10325 = vmatpush1.bf16.msra.mxu0 %v19756_v34 }
 0x68d   : > { %10326 = vmatprep.subr.bf16.mxu0 %v19761_v27  ;;  %v26762_v27 = vld [vmem:[#allocation141_spill] sm:$0xff] }
 0x68f   : > { %10210 = vmatmul.mubr.bf16.gmra.mrb[72].mxu0 %v26745_v63 }
 0x690   : > { %10219 = vmatprep.mubr.bf16.mxu0 %v26746_v28  ;;  %10327 = vmatpush1.bf16.msra.mxu0 %v19759_v24 }
 0x691   : > { %10328 = vmatprep.subr.bf16.mxu0 %v19764_v37 }
 0x694   : > { %10329 = vmatpush1.bf16.msra.mxu0 %v19762_v55 }
 0x695   : > { %10330 = vmatprep.subr.bf16.mxu0 %v19767_v0 }
 0x697   : > { %10220 = vmatmul.mubr.bf16.gmra.mrb[76].mxu0 %v26747_v39 }
 0x698   : > { %10229 = vmatprep.mubr.bf16.mxu0 %v26748_v18  ;;  %10331 = vmatpush1.bf16.msra.mxu0 %v19765_v59  ;;  %v26763_v59 = vld [vmem:[#allocation142_spill] sm:$0xff] }
 0x699   : > { %10332 = vmatprep.subr.bf16.mxu0 %v19770_v54  ;;  %v26764_v54 = vld [vmem:[#allocation143_spill] sm:$0xff] }
 0x69c   : > { %10333 = vmatpush1.bf16.msra.mxu0 %v19768_v29 }
 0x69d   : > { %10334 = vmatprep.subr.bf16.mxu0 %v19773_v47 }
 0x69f   : > { %10230 = vmatmul.mubr.bf16.gmra.mrb[80].mxu0 %v26749_v45  ;;  %v26766_v45 = vld [vmem:[#allocation145_spill] sm:$0xff] }
 0x6a0   : > { %10239 = vmatprep.mubr.bf16.mxu0 %v26750_v23  ;;  %10335 = vmatpush1.bf16.msra.mxu0 %v19771_v11 }
 0x6a1   : > { %10336 = vmatprep.subr.bf16.mxu0 %v19776_v41  ;;  %v26765_v41 = vld [vmem:[#allocation144_spill] sm:$0xff] }
 0x6a2   : > { %v25166_v52 = vpop.f32.mrb[72].mxu1 }
 0x6a3   : > { %v25168_v31 = vpop.f32.mrb[73].mxu1 }
 0x6a4   : > { %v25170_v6 = vpop.f32.mrb[74].mxu1  ;;  %10337 = vmatpush1.bf16.msra.mxu0 %v19774_v30 }
 0x6a5   : > { %v25176_v38 = vpop.f32.mrb[75].mxu1  ;;  %10338 = vmatprep.subr.bf16.mxu0 %v19779_v56 }
 0x6a7   : > { %10240 = vmatmul.mubr.bf16.gmra.mrb[84].mxu0 %v26751_v17 }
 0x6a8   : > { %10249 = vmatprep.mubr.bf16.mxu0 %v26752_v16  ;;  %10339 = vmatpush1.bf16.msra.mxu0 %v19777_v58  ;;  %v26767_v16 = vld [vmem:[#allocation146_spill] sm:$0xff] }
 0x6a9   : > { %10340 = vmatprep.subr.bf16.mxu0 %v19782_v1 }
 0x6aa   : > { %v13108_v32 = vpop.f32.mrb[76].mxu1 }
 0x6ab   : > { %v25199_v60 = vadd.f32 %v13108_v32, %v25192_v44  ;;  %v13110_v62 = vpop.f32.mrb[77].mxu1 }
 0x6ac   : > { %v25202_v20 = vadd.f32 %v13110_v62, %v25196_v2  ;;  %v13112_v51 = vpop.f32.mrb[78].mxu1  ;;  %10341 = vmatpush1.bf16.msra.mxu0 %v19780_v50  ;;  %v26768_v50 = vld [vmem:[#allocation147_spill] sm:$0xff] }
 0x6ad   : > { %26753 = vst [vmem:[#allocation9_spill] sm:$0xff] %v25199_v60  ;;  %v25205_v48 = vadd.f32 %v13112_v51, %v25192_v44  ;;  %v13114_v35 = vpop.f32.mrb[79].mxu1 }
 0x6ae   : > { %26754 = vst [vmem:[#allocation10_spill] sm:$0xff] %v25202_v20  ;;  %v25208_v10 = vadd.f32 %v13114_v35, %v25196_v2 }
 0x6af   : > { %26755 = vst [vmem:[#allocation11_spill] sm:$0xff] %v25205_v48  ;;  %10250 = vmatmul.mubr.bf16.gmra.mrb[88].mxu0 %v26757_v4 }
 0x6b0   : > { %26756 = vst [vmem:[#allocation12_spill] sm:$0xff] %v25208_v10  ;;  %10259 = vmatprep.mubr.bf16.mxu0 %v26758_v12  ;;  %v26769_v12 = vld [vmem:[#allocation148_spill] sm:$0xff] }
 0x6b2   : > { %v25212_v42 = vpop.f32.mrb[80].mxu1 }
 0x6b3   : > { %v13243_v21 = vpop.f32.mrb[81].mxu1  ;;  %v13524_v22 = vsel %vm13523_vm1, %v25212_v42, -inf }
 0x6b4   : > { %13525 = vmax.xlane.f32.xlu0 %v13524_v22  ;;  %v25216_v9 = vpop.f32.mrb[82].mxu1  ;;  %v26770_v21 = vld [vmem:[#allocation149_spill] sm:$0xff] }
 0x6b5   : > { %v13246_v5 = vpop.f32.mrb[83].mxu1  ;;  %v13527_v53 = vsel %vm13523_vm1, %v25216_v9, -inf }
 0x6b7   : > { %10260 = vmatmul.mubr.bf16.gmra.mrb[92].mxu0 %v26759_v43 }
 0x6b8   : > { %13528 = vmax.xlane.f32.xlu0 %v13527_v53  ;;  %10269 = vmatprep.mubr.bf16.mxu0 %v26760_v36 }
 0x6ba   : > { %v25222_v25 = vpop.f32.mrb[84].mxu1 }
 0x6bb   : > { %v13251_v14 = vpop.f32.mrb[85].mxu1  ;;  %v13530_v7 = vsel %vm13523_vm1, %v25222_v25, -inf }
 0x6bc   : > { %13531 = vmax.xlane.f32.xlu1 %v13530_v7  ;;  %v25226_v13 = vpop.f32.mrb[86].mxu1  ;;  %v26771_v7 = vld [vmem:[#allocation150_spill] sm:$0xff] }
 0x6bd   : > { %v13254_v15 = vpop.f32.mrb[87].mxu1  ;;  %v13533_v34 = vsel %vm13523_vm1, %v25226_v13, -inf }
 0x6be   : > { %v26772_v15 = vld [vmem:[#allocation151_spill] sm:$0xff] }
 0x6bf   : > { %10270 = vmatmul.mubr.bf16.gmra.mrb[96].mxu0 %v26761_v33 }
 0x6c0   : > { %13534 = vmax.xlane.f32.xlu1 %v13533_v34  ;;  %10279 = vmatprep.mubr.bf16.mxu0 %v26762_v27 }
 0x6c2   : > { %v25232_v24 = vpop.f32.mrb[88].mxu1 }
 0x6c3   : > { %v13259_v37 = vpop.f32.mrb[89].mxu1  ;;  %v13536_v63 = vsel %vm13523_vm1, %v25232_v24, -inf }
 0x6c4   : > { %13537 = vmax.xlane.f32.xlu0 %v13536_v63  ;;  %v25236_v28 = vpop.f32.mrb[90].mxu1 }
 0x6c5   : > { %v13262_v55 = vpop.f32.mrb[91].mxu1  ;;  %v13539_v0 = vsel %vm13523_vm1, %v25236_v28, -inf }
 0x6c6   : > { %13540 = vmax.xlane.f32.xlu1 %v13539_v0  ;;  %v26773_v55 = vld [vmem:[#allocation152_spill] sm:$0xff]  ;;  %v26774_v0 = vld [vmem:[#allocation153_spill] sm:$0xff] }
 0x6c7   : > { %10280 = vmatmul.mubr.bf16.gmra.mrb[100].mxu0 %v26763_v59 }
 0x6c8   : > { %10289 = vmatprep.mubr.bf16.mxu0 %v26764_v54 }
 0x6ca   : > { %v25242_v39 = vpop.f32.mrb[92].mxu1 }
 0x6cb   : > { %v13267_v18 = vpop.f32.mrb[93].mxu1  ;;  %v13542_v29 = vsel %vm13523_vm1, %v25242_v39, -inf }
 0x6cc   : > { %13543 = vmax.xlane.f32.xlu0 %v13542_v29  ;;  %v13268_v47 = vpop.f32.mrb[94].mxu1 }
 0x6cd   : > { %v13269_v11 = vpop.f32.mrb[95].mxu1 }
 0x6cf   : > { %10290 = vmatmul.mubr.bf16.gmra.mrb[104].mxu0 %v26765_v41  ;;  %v26775_v41 = vld [vmem:[#allocation154_spill] sm:$0xff] }
 0x6d0   : > { %10299 = vmatprep.mubr.bf16.mxu0 %v26766_v45  ;;  %v26776_v45 = vld [vmem:[#allocation155_spill] sm:$0xff] }
 0x6d2   : > { %v25248_v23 = vpop.f32.mrb[96].mxu1 }
 0x6d3   : > { %v13327_v30 = vpop.f32.mrb[97].mxu1  ;;  %v13545_v56 = vsel %vm13523_vm1, %v25248_v23, -inf }
 0x6d4   : > { %13546 = vmax.xlane.f32.xlu0 %v13545_v56  ;;  %v25252_v58 = vpop.f32.mrb[98].mxu1 }
 0x6d5   : > { %v13330_v1 = vpop.f32.mrb[99].mxu1  ;;  %v13548_v17 = vsel %vm13523_vm1, %v25252_v58, -inf }
 0x6d6   : > { %13549 = vmax.xlane.f32.xlu1 %v13548_v17 }
 0x6d7   : > { %10300 = vmatmul.mubr.bf16.gmra.mrb[108].mxu0 %v26767_v16 }
 0x6d8   : > { %10342 = vmatprep.mubr.bf16.mxu0 %v26768_v50 }
 0x6da   : > { %v25258_v61 = vpop.f32.mrb[100].mxu1 }
 0x6db   : > { %v13335_v32 = vpop.f32.mrb[101].mxu1  ;;  %v13551_v62 = vsel %vm13523_vm1, %v25258_v61, -inf }
 0x6dc   : > { %13552 = vmax.xlane.f32.xlu1 %v13551_v62  ;;  %v25262_v51 = vpop.f32.mrb[102].mxu1  ;;  %v26777_v32 = vld [vmem:[#allocation156_spill] sm:$0xff]  ;;  %v26778_v62 = vld [vmem:[#allocation157_spill] sm:$0xff] }
 0x6dd   : > { %v13338_v35 = vpop.f32.mrb[103].mxu1  ;;  %v13554_v4 = vsel %vm13523_vm1, %v25262_v51, -inf }
 0x6de   : > { %13555 = vmax.xlane.f32.xlu0 %v13554_v4 }
 0x6df   : > { %10343 = vmatmul.mubr.bf16.vlgmr.msra.gmra.mrb[56].mxu0 %v26769_v12 }
 0x6e0   : > { %10352 = vmatprep.mubr.bf16.mxu0 %v26770_v21 }
 0x6e2   : > { %v25268_v22 = vpop.f32.mrb[104].mxu1 }
 0x6e3   : > { %v13343_v5 = vpop.f32.mrb[105].mxu1  ;;  %v13557_v43 = vsel %vm13523_vm1, %v25268_v22, -inf }
 0x6e4   : > { %13558 = vmax.xlane.f32.xlu1 %v13557_v43  ;;  %v25272_v53 = vpop.f32.mrb[106].mxu1 }
 0x6e5   : > { %v13346_v36 = vpop.f32.mrb[107].mxu1  ;;  %v13560_v14 = vsel %vm13523_vm1, %v25272_v53, -inf }
 0x6e6   : > { %13561 = vmax.xlane.f32.xlu0 %v13560_v14  ;;  %v26779_v36 = vld [vmem:[#allocation158_spill] sm:$0xff]  ;;  %v26780_v14 = vld [vmem:[#allocation159_spill] sm:$0xff] }
 0x6e7   : > { %10353 = vmatmul.mubr.bf16.gmra.mrb[60].mxu0 %v26771_v7 }
 0x6e8   : > { %10362 = vmatprep.mubr.bf16.mxu0 %v26772_v15 }
 0x6ea   : > { %v25278_v33 = vpop.f32.mrb[108].mxu1 }
 0x6eb   : > { %v13351_v34 = vpop.f32.mrb[109].mxu1  ;;  %v13563_v27 = vsel %vm13523_vm1, %v25278_v33, -inf }
 0x6ec   : > { %13564 = vmax.xlane.f32.xlu1 %v13563_v27  ;;  %v13352_v37 = vpop.f32.mrb[110].mxu1 }
 0x6ed   : > { %v13353_v63 = vpop.f32.mrb[111].mxu1 }
 0x6ee   : > { %v26781_v63 = vld [vmem:[#allocation160_spill] sm:$0xff] }
 0x6ef   : > { %10363 = vmatmul.mubr.bf16.gmra.mrb[64].mxu0 %v26773_v55  ;;  %v26782_v55 = vld [vmem:[#allocation161_spill] sm:$0xff] }
 0x6f0   : > { %10372 = vmatprep.mubr.bf16.mxu0 %v26774_v0 }
 0x6f2   : > { %v25284_v59 = vpop.f32.mrb[112].mxu1 }
 0x6f3   : > { %v13411_v54 = vpop.f32.mrb[113].mxu1  ;;  %v13566_v18 = vsel %vm13523_vm1, %v25284_v59, -inf }
 0x6f4   : > { %13567 = vmax.xlane.f32.xlu1 %v13566_v18  ;;  %v25288_v29 = vpop.f32.mrb[114].mxu1 }
 0x6f5   : > { %v13414_v47 = vpop.f32.mrb[115].mxu1  ;;  %v13569_v11 = vsel %vm13523_vm1, %v25288_v29, -inf }
 0x6f6   : > { %13570 = vmax.xlane.f32.xlu0 %v13569_v11 }
 0x6f7   : > { %10373 = vmatmul.mubr.bf16.gmra.mrb[68].mxu0 %v26775_v41 }
 0x6f8   : > { %10382 = vmatprep.mubr.bf16.mxu0 %v26776_v45  ;;  %v26783_v45 = vld [vmem:[#allocation162_spill] sm:$0xff] }
 0x6fa   : > { %v25294_v30 = vpop.f32.mrb[116].mxu1 }
 0x6fb   : > { %v13419_v56 = vpop.f32.mrb[117].mxu1  ;;  %v13572_v1 = vsel %vm13523_vm1, %v25294_v30, -inf }
 0x6fc   : > { %13573 = vmax.xlane.f32.xlu0 %v13572_v1  ;;  %v25298_v17 = vpop.f32.mrb[118].mxu1  ;;  %v26784_v56 = vld [vmem:[#allocation163_spill] sm:$0xff] }
 0x6fd   : > { %v13422_v16 = vpop.f32.mrb[119].mxu1  ;;  %v13575_v50 = vsel %vm13523_vm1, %v25298_v17, -inf }
 0x6fe   : > { %13576 = vmax.xlane.f32.xlu1 %v13575_v50 }
 0x6ff   : > { %10383 = vmatmul.mubr.bf16.gmra.mrb[72].mxu0 %v26777_v32 }
 0x700   : > { %10392 = vmatprep.mubr.bf16.mxu0 %v26778_v62 }
 0x702   : > { %v25304_v35 = vpop.f32.mrb[120].mxu1 }
 0x703   : > { %v13427_v4 = vpop.f32.mrb[121].mxu1  ;;  %v13578_v12 = vsel %vm13523_vm1, %v25304_v35, -inf }
 0x704   : > { %13579 = vmax.xlane.f32.xlu0 %v13578_v12  ;;  %v25308_v21 = vpop.f32.mrb[122].mxu1  ;;  %v26785_v12 = vld [vmem:[#allocation164_spill] sm:$0xff] }
 0x705   : > { %v13430_v5 = vpop.f32.mrb[123].mxu1  ;;  %v13581_v43 = vsel %vm13523_vm1, %v25308_v21, -inf }
 0x706   : > { %13582 = vmax.xlane.f32.xlu1 %v13581_v43  ;;  %v26786_v5 = vld [vmem:[#allocation165_spill] sm:$0xff] }
 0x707   : > { %10393 = vmatmul.mubr.bf16.gmra.mrb[76].mxu0 %v26779_v36 }
 0x708   : > { %10402 = vmatprep.mubr.bf16.mxu0 %v26780_v14 }
 0x70a   : > { %v25314_v7 = vpop.f32.mrb[124].mxu1 }
 0x70b   : > { %v13435_v15 = vpop.f32.mrb[125].mxu1  ;;  %v13584_v34 = vsel %vm13523_vm1, %v25314_v7, -inf }
 0x70c   : > { %13585 = vmax.xlane.f32.xlu0 %v13584_v34  ;;  %v13436_v27 = vpop.f32.mrb[126].mxu1 }
 0x70d   : > { %v13437_v37 = vpop.f32.mrb[127].mxu1 }
 0x70e   : > { %v26787_v37 = vld [vmem:[#allocation166_spill] sm:$0xff] }
 0x70f   : > { %10403 = vmatmul.mubr.bf16.gmra.mrb[80].mxu0 %v26781_v63  ;;  %v26788_v63 = vld [vmem:[#allocation167_spill] sm:$0xff] }
 0x710   : > { %10412 = vmatprep.mubr.bf16.mxu0 %v26782_v55 }
 0x712   : > { %v25320_v0 = vpop.f32.mrb[128].mxu1 }
 0x713   : > { %v13495_v54 = vpop.f32.mrb[129].mxu1  ;;  %v13587_v18 = vsel %vm13523_vm1, %v25320_v0, -inf }
 0x714   : > { %13588 = vmax.xlane.f32.xlu0 %v13587_v18  ;;  %v25324_v47 = vpop.f32.mrb[130].mxu1 }
 0x715   : > { %v13498_v11 = vpop.f32.mrb[131].mxu1  ;;  %v13590_v41 = vsel %vm13523_vm1, %v25324_v47, -inf }
 0x716   : > { %13591 = vmax.xlane.f32.xlu1 %v13590_v41 }
 0x717   : > { %10413 = vmatmul.mubr.bf16.gmra.mrb[84].mxu0 %v26783_v45  ;;  %v26789_v45 = vld [vmem:[#allocation168_spill] sm:$0xff] }
 0x718   : > { %10422 = vmatprep.mubr.bf16.mxu0 %v26784_v56  ;;  %v26790_v56 = vld [vmem:[#allocation169_spill] sm:$0xff] }
 0x71a   : > { %v25330_v1 = vpop.f32.mrb[132].mxu1 }
 0x71b   : > { %v13503_v16 = vpop.f32.mrb[133].mxu1  ;;  %v13593_v50 = vsel %vm13523_vm1, %v25330_v1, -inf }
 0x71c   : > { %13594 = vmax.xlane.f32.xlu1 %v13593_v50  ;;  %v25334_v32 = vpop.f32.mrb[134].mxu1  ;;  %v26791_v16 = vld [vmem:[#allocation170_spill] sm:$0xff]  ;;  %v26792_v50 = vld [vmem:[#allocation171_spill] sm:$0xff] }
 0x71d   : > { %v13506_v62 = vpop.f32.mrb[135].mxu1  ;;  %v13596_v4 = vsel %vm13523_vm1, %v25334_v32, -inf }
 0x71e   : > { %13597 = vmax.xlane.f32.xlu0 %v13596_v4  ;;  %v26793_v62 = vld [vmem:[#allocation172_spill] sm:$0xff]  ;;  %v26794_v4 = vld [vmem:[#allocation173_spill] sm:$0xff] }
 0x71f   : > { %10423 = vmatmul.mubr.bf16.gmra.mrb[88].mxu0 %v26785_v12 }
 0x720   : > { %10432 = vmatprep.mubr.bf16.mxu0 %v26786_v5 }
 0x722   : > { %v25340_v43 = vpop.f32.mrb[136].mxu1 }
 0x723   : > { %v13511_v36 = vpop.f32.mrb[137].mxu1  ;;  %v13599_v14 = vsel %vm13523_vm1, %v25340_v43, -inf }
 0x724   : > { %13600 = vmax.xlane.f32.xlu1 %v13599_v14  ;;  %v25344_v15 = vpop.f32.mrb[138].mxu1 }
 0x725   : > { %v13514_v34 = vpop.f32.mrb[139].mxu1  ;;  %v13602_v27 = vsel %vm13523_vm1, %v25344_v15, -inf }
 0x726   : > { %13603 = vmax.xlane.f32.xlu0 %v13602_v27  ;;  %v26795_v27 = vld [vmem:[#allocation174_spill] sm:$0xff] }
 0x727   : > { %10433 = vmatmul.mubr.bf16.gmra.mrb[92].mxu0 %v26787_v37 }
 0x728   : > { %10442 = vmatprep.mubr.bf16.mxu0 %v26788_v63 }
 0x72a   : > { %v25350_v55 = vpop.f32.mrb[140].mxu1 }
 0x72b   : > { %v13519_v54 = vpop.f32.mrb[141].mxu1  ;;  %v13605_v18 = vsel %vm13523_vm1, %v25350_v55, -inf }
 0x72c   : > { %13606 = vmax.xlane.f32.xlu1 %v13605_v18  ;;  %v13520_v11 = vpop.f32.mrb[142].mxu1 }
 0x72d   : > { %v13521_v41 = vpop.f32.mrb[143].mxu1 }
 0x72f   : > { %10443 = vmatmul.mubr.bf16.gmra.mrb[96].mxu0 %v26789_v45 }
 0x730   : > { %10452 = vmatprep.mubr.bf16.mxu0 %v26790_v56 }
 0x737   : > { %10453 = vmatmul.mubr.bf16.gmra.mrb[100].mxu0 %v26791_v16 }
 0x738   : > { %10462 = vmatprep.mubr.bf16.mxu0 %v26792_v50 }
 0x73f   : > { %10463 = vmatmul.mubr.bf16.gmra.mrb[104].mxu0 %v26793_v62 }
 0x740   : > { %10472 = vmatprep.mubr.bf16.mxu0 %v26794_v4 }
 0x741   : > { %v13526_v12 = vpop.xlane.xlu0 %13525 }
 0x742   : > { %v13608_v5 = vsub.f32 %v25212_v42, %v13526_v12 }
 0x744   : > { %v13636_v36 = vmul.f32 1.442695, %v13608_v5 }
 0x745   : > { %v13529_v14 = vpop.xlane.xlu0 %13528 }
 0x746   : > { %19815 = vpow2.f32 %v13636_v36  ;;  %v13609_v34 = vsub.f32 %v25216_v9, %v13529_v14 }
 0x747   : > { %10473 = vmatmul.mubr.bf16.gmra.mrb[108].mxu0 %v26795_v27 }
 0x748   : > { %v13638_v37 = vmul.f32 1.442695, %v13609_v34 }
 0x749   : > { %v13532_v63 = vpop.xlane.xlu1 %13531 }
 0x74a   : > { %19817 = vpow2.f32 %v13638_v37  ;;  %v13610_v54 = vsub.f32 %v25222_v25, %v13532_v63 }
 0x74c   : > { %v13640_v18 = vmul.f32 1.442695, %v13610_v54 }
 0x74d   : > { %v13535_v11 = vpop.xlane.xlu1 %13534 }
 0x74e   : > { %19819 = vpow2.f32 %v13640_v18  ;;  %v13611_v41 = vsub.f32 %v25226_v13, %v13535_v11 }
 0x750   : > { %v25365_v45 = vpop.eup %19815  ;;  %v13642_v42 = vmul.f32 1.442695, %v13611_v41 }
 0x751   : > { %v13538_v56 = vpop.xlane.xlu0 %13537  ;;  %v13692_v16 = vsel %vm13523_vm1, %v25365_v45, 0.0 }
 0x752   : > { %19821 = vpow2.f32 %v13642_v42  ;;  %v13612_v9 = vsub.f32 %v25232_v24, %v13538_v56  ;;  %13693 = vadd.xlane.f32.xlu0 %v13692_v16 }
 0x753   : > { %v13541_v50 = vpop.xlane.xlu1 %13540 }
 0x754   : > { %v25370_v62 = vpop.eup %19817  ;;  %v13644_v25 = vmul.f32 1.442695, %v13612_v9  ;;  %v13613_v4 = vsub.f32 %v25236_v28, %v13541_v50 }
 0x755   : > { %v13695_v13 = vsel %vm13523_vm1, %v25370_v62, 0.0 }
 0x756   : > { %19823 = vpow2.f32 %v13644_v25  ;;  %v13646_v12 = vmul.f32 1.442695, %v13613_v4  ;;  %13696 = vadd.xlane.f32.xlu1 %v13695_v13 }
 0x758   : > { %v25375_v5 = vpop.eup %19819  ;;  %19825 = vpow2.f32 %v13646_v12 }
 0x759   : > { %v13544_v36 = vpop.xlane.xlu0 %13543  ;;  %v13698_v24 = vsel %vm13523_vm1, %v25375_v5, 0.0 }
 0x75a   : > { %v13614_v14 = vsub.f32 %v25242_v39, %v13544_v36  ;;  %13699 = vadd.xlane.f32.xlu0 %v13698_v24 }
 0x75c   : > { %v25380_v34 = vpop.eup %19821  ;;  %v13648_v27 = vmul.f32 1.442695, %v13614_v14 }
 0x75d   : > { %v13701_v28 = vsel %vm13523_vm1, %v25380_v34, 0.0 }
 0x75e   : > { %19827 = vpow2.f32 %v13648_v27  ;;  %13702 = vadd.xlane.f32.xlu1 %v13701_v28 }
 0x760   : > { %v25384_v37 = vpop.eup %19823 }
 0x761   : > { %v13547_v63 = vpop.xlane.xlu0 %13546  ;;  %v13704_v54 = vsel %vm13523_vm1, %v25384_v37, 0.0 }
 0x762   : > { %v25388_v18 = vpop.eup %19825  ;;  %v13615_v11 = vsub.f32 %v25248_v23, %v13547_v63  ;;  %13705 = vadd.xlane.f32.xlu0 %v13704_v54 }
 0x763   : > { %v13550_v39 = vpop.xlane.xlu1 %13549  ;;  %v13707_v41 = vsel %vm13523_vm1, %v25388_v18, 0.0 }
 0x764   : > { %v13650_v42 = vmul.f32 1.442695, %v13615_v11  ;;  %v13616_v56 = vsub.f32 %v25252_v58, %v13550_v39  ;;  %13708 = vadd.xlane.f32.xlu1 %v13707_v41 }
 0x766   : > { %19829 = vpow2.f32 %v13650_v42  ;;  %v13652_v16 = vmul.f32 1.442695, %v13616_v56 }
 0x768   : > { %v25394_v9 = vpop.eup %19827  ;;  %19831 = vpow2.f32 %v13652_v16 }
 0x769   : > { %v13553_v50 = vpop.xlane.xlu1 %13552  ;;  %v13710_v25 = vsel %vm13523_vm1, %v25394_v9, 0.0 }
 0x76a   : > { %v13617_v23 = vsub.f32 %v25258_v61, %v13553_v50  ;;  %13711 = vadd.xlane.f32.xlu0 %v13710_v25 }
 0x76b   : > { %v13556_v4 = vpop.xlane.xlu0 %13555 }
 0x76c   : > { %v13654_v13 = vmul.f32 1.442695, %v13617_v23  ;;  %v13618_v12 = vsub.f32 %v25262_v51, %v13556_v4 }
 0x76e   : > { %19833 = vpow2.f32 %v13654_v13  ;;  %v13656_v36 = vmul.f32 1.442695, %v13618_v12 }
 0x770   : > { %v25400_v58 = vpop.eup %19829  ;;  %19835 = vpow2.f32 %v13656_v36 }
 0x771   : > { %v13559_v24 = vpop.xlane.xlu1 %13558  ;;  %v13713_v14 = vsel %vm13523_vm1, %v25400_v58, 0.0 }
 0x772   : > { %v25404_v27 = vpop.eup %19831  ;;  %v13619_v28 = vsub.f32 %v25268_v22, %v13559_v24  ;;  %13714 = vadd.xlane.f32.xlu0 %v13713_v14 }
 0x773   : > { %v13562_v61 = vpop.xlane.xlu0 %13561  ;;  %v13716_v63 = vsel %vm13523_vm1, %v25404_v27, 0.0 }
 0x774   : > { %v13658_v54 = vmul.f32 1.442695, %v13619_v28  ;;  %v13620_v51 = vsub.f32 %v25272_v53, %v13562_v61  ;;  %13717 = vadd.xlane.f32.xlu1 %v13716_v63 }
 0x776   : > { %19837 = vpow2.f32 %v13658_v54  ;;  %v13660_v11 = vmul.f32 1.442695, %v13620_v51 }
 0x778   : > { %v25410_v39 = vpop.eup %19833  ;;  %19839 = vpow2.f32 %v13660_v11 }
 0x779   : > { %v13565_v41 = vpop.xlane.xlu1 %13564  ;;  %v13719_v42 = vsel %vm13523_vm1, %v25410_v39, 0.0 }
 0x77a   : > { %v25414_v56 = vpop.eup %19835  ;;  %v13621_v22 = vsub.f32 %v25278_v33, %v13565_v41  ;;  %13720 = vadd.xlane.f32.xlu1 %v13719_v42 }
 0x77b   : > { %v13722_v16 = vsel %vm13523_vm1, %v25414_v56, 0.0 }
 0x77c   : > { %v13662_v50 = vmul.f32 1.442695, %v13621_v22  ;;  %13723 = vadd.xlane.f32.xlu0 %v13722_v16 }
 0x77e   : > { %19841 = vpow2.f32 %v13662_v50 }
 0x780   : > { %v25419_v53 = vpop.eup %19837 }
 0x781   : > { %v13568_v25 = vpop.xlane.xlu1 %13567  ;;  %v13725_v23 = vsel %vm13523_vm1, %v25419_v53, 0.0 }
 0x782   : > { %v25423_v4 = vpop.eup %19839  ;;  %v13622_v13 = vsub.f32 %v25284_v59, %v13568_v25  ;;  %13726 = vadd.xlane.f32.xlu1 %v13725_v23 }
 0x783   : > { %v13571_v12 = vpop.xlane.xlu0 %13570  ;;  %v13728_v33 = vsel %vm13523_vm1, %v25423_v4, 0.0 }
 0x784   : > { %v13664_v36 = vmul.f32 1.442695, %v13622_v13  ;;  %v13623_v24 = vsub.f32 %v25288_v29, %v13571_v12  ;;  %13729 = vadd.xlane.f32.xlu0 %v13728_v33  ;;  %v26327_v33 = vmov 0  }
 0x785   : > { %13984 = vmatprep.mubr.bf16.mxu1 %v26327_v33 }
 0x786   : > { %19843 = vpow2.f32 %v13664_v36  ;;  %v13666_v14 = vmul.f32 1.442695, %v13623_v24 }
 0x788   : > { %v25429_v28 = vpop.eup %19841  ;;  %19845 = vpow2.f32 %v13666_v14 }
 0x789   : > { %v13574_v61 = vpop.xlane.xlu0 %13573  ;;  %v13731_v63 = vsel %vm13523_vm1, %v25429_v28, 0.0 }
 0x78a   : > { %v13624_v59 = vsub.f32 %v25294_v30, %v13574_v61  ;;  %13732 = vadd.xlane.f32.xlu1 %v13731_v63 }
 0x78b   : > { %v13577_v54 = vpop.xlane.xlu1 %13576 }
 0x78c   : > { %v13668_v51 = vmul.f32 1.442695, %v13624_v59  ;;  %v13625_v11 = vsub.f32 %v25298_v17, %v13577_v54 }
 0x78e   : > { %19847 = vpow2.f32 %v13668_v51  ;;  %v13670_v41 = vmul.f32 1.442695, %v13625_v11 }
 0x790   : > { %v25435_v29 = vpop.eup %19843  ;;  %19849 = vpow2.f32 %v13670_v41 }
 0x791   : > { %v13580_v42 = vpop.xlane.xlu0 %13579  ;;  %v13734_v22 = vsel %vm13523_vm1, %v25435_v29, 0.0 }
 0x792   : > { %v25439_v16 = vpop.eup %19845  ;;  %v13626_v50 = vsub.f32 %v25304_v35, %v13580_v42  ;;  %13735 = vadd.xlane.f32.xlu1 %v13734_v22 }
 0x793   : > { %v13583_v30 = vpop.xlane.xlu1 %13582  ;;  %v13737_v25 = vsel %vm13523_vm1, %v25439_v16, 0.0 }
 0x794   : > { %v13672_v23 = vmul.f32 1.442695, %v13626_v50  ;;  %v13627_v17 = vsub.f32 %v25308_v21, %v13583_v30  ;;  %13738 = vadd.xlane.f32.xlu0 %v13737_v25 }
 0x796   : > { %19851 = vpow2.f32 %v13672_v23  ;;  %v13674_v13 = vmul.f32 1.442695, %v13627_v17 }
 0x798   : > { %v25445_v12 = vpop.eup %19847  ;;  %19853 = vpow2.f32 %v13674_v13 }
 0x799   : > { %v13586_v36 = vpop.xlane.xlu0 %13585  ;;  %v13740_v35 = vsel %vm13523_vm1, %v25445_v12, 0.0 }
 0x79a   : > { %v25450_v24 = vpop.eup %19849  ;;  %v13628_v14 = vsub.f32 %v25314_v7, %v13586_v36  ;;  %13741 = vadd.xlane.f32.xlu0 %v13740_v35 }
 0x79b   : > { %v13743_v21 = vsel %vm13523_vm1, %v25450_v24, 0.0 }
 0x79c   : > { %v13676_v61 = vmul.f32 1.442695, %v13628_v14  ;;  %13744 = vadd.xlane.f32.xlu1 %v13743_v21  ;;  %v19956_v14 = vld [vmem:[%s26099_s4] ss:$2 sm:$0x3f] }
 0x79d   : > { %v25478_v21 = vrot.slane %v19956_v14, %v1359_v46 }
 0x79e   : > { %19855 = vpow2.f32 %v13676_v61 }
 0x7a0   : > { %v25455_v63 = vpop.eup %19851 }
 0x7a1   : > { %v13589_v59 = vpop.xlane.xlu0 %13588  ;;  %v13746_v54 = vsel %vm13523_vm1, %v25455_v63, 0.0 }
 0x7a2   : > { %v25459_v51 = vpop.eup %19853  ;;  %v13629_v11 = vsub.f32 %v25320_v0, %v13589_v59  ;;  %13747 = vadd.xlane.f32.xlu0 %v13746_v54 }
 0x7a3   : > { %v13592_v41 = vpop.xlane.xlu1 %13591  ;;  %v13749_v7 = vsel %vm13523_vm1, %v25459_v51, 0.0 }
 0x7a4   : > { %v13678_v42 = vmul.f32 1.442695, %v13629_v11  ;;  %v13630_v22 = vsub.f32 %v25324_v47, %v13592_v41  ;;  %13750 = vadd.xlane.f32.xlu1 %v13749_v7 }
 0x7a6   : > { %19857 = vpow2.f32 %v13678_v42  ;;  %v13680_v50 = vmul.f32 1.442695, %v13630_v22 }
 0x7a8   : > { %v25465_v30 = vpop.eup %19855  ;;  %19859 = vpow2.f32 %v13680_v50 }
 0x7a9   : > { %v13595_v25 = vpop.xlane.xlu1 %13594  ;;  %v13752_v23 = vsel %vm13523_vm1, %v25465_v30, 0.0 }
 0x7aa   : > { %v13631_v0 = vsub.f32 %v25330_v1, %v13595_v25  ;;  %13753 = vadd.xlane.f32.xlu0 %v13752_v23 }
 0x7ab   : > { %v13598_v17 = vpop.xlane.xlu0 %13597 }
 0x7ac   : > { %v13682_v13 = vmul.f32 1.442695, %v13631_v0  ;;  %v13632_v36 = vsub.f32 %v25334_v32, %v13598_v17  ;;  %v25486_v32 = vrot.slane %v19956_v14, %v1363_v49 }
 0x7ae   : > { %19861 = vpow2.f32 %v13682_v13  ;;  %v13684_v35 = vmul.f32 1.442695, %v13632_v36 }
 0x7b0   : > { %v25471_v47 = vpop.eup %19857  ;;  %19863 = vpow2.f32 %v13684_v35 }
 0x7b1   : > { %v13601_v61 = vpop.xlane.xlu1 %13600  ;;  %v13755_v1 = vsel %vm13523_vm1, %v25471_v47, 0.0 }
 0x7b2   : > { %v25482_v59 = vpop.eup %19859  ;;  %v13633_v54 = vsub.f32 %v25340_v43, %v13601_v61  ;;  %13756 = vadd.xlane.f32.xlu0 %v13755_v1  ;;  %v10344_v11 = vpop.f32.mrb[56].mxu0 }
 0x7b3   : > { %v13604_v41 = vpop.xlane.xlu0 %13603  ;;  %v10346_v7 = vpop.f32.mrb[57].mxu0  ;;  %v13758_v46 = vsel %vm13523_vm1, %v25482_v59, 0.0  ;;  %v25493_v25 = vadd.f32 %v10344_v11, %v25478_v21 }
 0x7b4   : > { %v13686_v42 = vmul.f32 1.442695, %v13633_v54  ;;  %v13634_v22 = vsub.f32 %v25344_v15, %v13604_v41  ;;  %13759 = vadd.xlane.f32.xlu1 %v13758_v46  ;;  %v10348_v50 = vpop.f32.mrb[58].mxu0  ;;  %v25499_v0 = vadd.f32 %v10346_v7, %v25486_v32 }
 0x7b5   : > { %26796 = vst [vmem:[#allocation13_spill] sm:$0xff] %v25493_v25  ;;  %v25496_v49 = vadd.f32 %v10348_v50, %v25478_v21  ;;  %v10350_v23 = vpop.f32.mrb[59].mxu0 }
 0x7b6   : > { %19865 = vpow2.f32 %v13686_v42  ;;  %v13688_v43 = vmul.f32 1.442695, %v13634_v22  ;;  %26798 = vst [vmem:[#allocation15_spill] sm:$0xff] %v25499_v0  ;;  %v25502_v17 = vadd.f32 %v10350_v23, %v25486_v32 }
 0x7b7   : > { %26797 = vst [vmem:[#allocation14_spill] sm:$0xff] %v25496_v49 }
 0x7b8   : > { %26799 = vst [vmem:[#allocation16_spill] sm:$0xff] %v25502_v17  ;;  %v25506_v13 = vpop.eup %19861  ;;  %19867 = vpow2.f32 %v13688_v43 }
 0x7b9   : > { %v13607_v35 = vpop.xlane.xlu1 %13606  ;;  %v13761_v14 = vsel %vm13523_vm1, %v25506_v13, 0.0 }
 0x7ba   : > { %v25512_v61 = vpop.eup %19863  ;;  %v13635_v1 = vsub.f32 %v25350_v55, %v13607_v35  ;;  %13762 = vadd.xlane.f32.xlu1 %v13761_v14  ;;  %v10354_v54 = vpop.f32.mrb[60].mxu0 }
 0x7bb   : > { %v10356_v11 = vpop.f32.mrb[61].mxu0  ;;  %v13764_v41 = vsel %vm13523_vm1, %v25512_v61, 0.0  ;;  %v25518_v42 = vadd.f32 %v10354_v54, %v25478_v21 }
 0x7bc   : > { %v13690_v7 = vmul.f32 1.442695, %v13635_v1  ;;  %13765 = vadd.xlane.f32.xlu0 %v13764_v41  ;;  %v10358_v46 = vpop.f32.mrb[62].mxu0  ;;  %v25524_v23 = vadd.f32 %v10356_v11, %v25486_v32 }
 0x7bd   : > { %26800 = vst [vmem:[#allocation17_spill] sm:$0xff] %v25518_v42  ;;  %v25521_v22 = vadd.f32 %v10358_v46, %v25478_v21  ;;  %v10360_v50 = vpop.f32.mrb[63].mxu0 }
 0x7be   : > { %19869 = vpow2.f32 %v13690_v7  ;;  %26802 = vst [vmem:[#allocation19_spill] sm:$0xff] %v25524_v23  ;;  %v25527_v55 = vadd.f32 %v10360_v50, %v25486_v32 }
 0x7bf   : > { %26801 = vst [vmem:[#allocation18_spill] sm:$0xff] %v25521_v22 }
 0x7c0   : > { %26803 = vst [vmem:[#allocation20_spill] sm:$0xff] %v25527_v55  ;;  %v25531_v35 = vpop.eup %19865 }
 0x7c1   : > { %v13767_v1 = vsel %vm13523_vm1, %v25531_v35, 0.0 }
 0x7c2   : > { %v25537_v54 = vpop.eup %19867  ;;  %13768 = vadd.xlane.f32.xlu1 %v13767_v1  ;;  %v10364_v41 = vpop.f32.mrb[64].mxu0 }
 0x7c3   : > { %v10366_v11 = vpop.f32.mrb[65].mxu0  ;;  %v13770_v7 = vsel %vm13523_vm1, %v25537_v54, 0.0  ;;  %v25542_v50 = vadd.f32 %v10364_v41, %v25478_v21 }
 0x7c4   : > { %13771 = vadd.xlane.f32.xlu0 %v13770_v7  ;;  %v10368_v46 = vpop.f32.mrb[66].mxu0  ;;  %v25548_v15 = vadd.f32 %v10366_v11, %v25486_v32 }
 0x7c5   : > { %26804 = vst [vmem:[#allocation21_spill] sm:$0xff] %v25542_v50  ;;  %v25545_v43 = vadd.f32 %v10368_v46, %v25478_v21  ;;  %v10370_v14 = vpop.f32.mrb[67].mxu0 }
 0x7c6   : > { %26806 = vst [vmem:[#allocation23_spill] sm:$0xff] %v25548_v15  ;;  %v25551_v36 = vadd.f32 %v10370_v14, %v25486_v32 }
 0x7c7   : > { %26805 = vst [vmem:[#allocation22_spill] sm:$0xff] %v25545_v43 }
 0x7c8   : > { %26807 = vst [vmem:[#allocation24_spill] sm:$0xff] %v25551_v36  ;;  %v25555_v33 = vpop.eup %19869 }
 0x7c9   : > { %v13773_v41 = vsel %vm13523_vm1, %v25555_v33, 0.0 }
 0x7ca   : > { %13774 = vadd.xlane.f32.xlu1 %v13773_v41  ;;  %v10374_v46 = vpop.f32.mrb[68].mxu0 }
 0x7cb   : > { %v10376_v42 = vpop.f32.mrb[69].mxu0  ;;  %v25562_v11 = vadd.f32 %v10374_v46, %v25478_v21 }
 0x7cc   : > { %v10378_v22 = vpop.f32.mrb[70].mxu0  ;;  %v25566_v1 = vadd.f32 %v10376_v42, %v25486_v32 }
 0x7cd   : > { %26808 = vst [vmem:[#allocation25_spill] sm:$0xff] %v25562_v11  ;;  %v16878_v14 = vadd.f32 %v10378_v22, %v25478_v21  ;;  %v10380_v23 = vpop.f32.mrb[71].mxu0 }
 0x7ce   : > { %26809 = vst [vmem:[#allocation26_spill] sm:$0xff] %v25566_v1  ;;  %v16879_v50 = vadd.f32 %v10380_v23, %v25486_v32 }
 0x7cf   : > { %v10505_v7 = vpack.c.bf16 %v16878_v14, %v25562_v11 }
 0x7d0   : > { %v10506_v43 = vpack.c.bf16 %v16879_v50, %v25566_v1 }
 0x7d1   : > { %v10697_v0 = vunpack.c.h.b16 %v10505_v7 }
 0x7d2   : > { %v10384_v15 = vpop.f32.mrb[72].mxu0  ;;  %v10698_v17 = vunpack.c.h.b16 %v10506_v43 }
 0x7d3   : > { %v10386_v41 = vpop.f32.mrb[73].mxu0  ;;  %v16880_v55 = vadd.f32 %v10384_v15, %v25478_v21 }
 0x7d4   : > { %v10388_v36 = vpop.f32.mrb[74].mxu0  ;;  %v16881_v22 = vadd.f32 %v10386_v41, %v25486_v32 }
 0x7d5   : > { %v16882_v46 = vadd.f32 %v10388_v36, %v25478_v21  ;;  %v10390_v25 = vpop.f32.mrb[75].mxu0 }
 0x7d6   : > { %v16883_v49 = vadd.f32 %v10390_v25, %v25486_v32 }
 0x7d7   : > { %v10511_v42 = vpack.c.bf16 %v16882_v46, %v16880_v55 }
 0x7d8   : > { %v10512_v48 = vpack.c.bf16 %v16883_v49, %v16881_v22 }
 0x7d9   : > { %v10703_v23 = vunpack.c.l.b16 %v10511_v42  ;;  %v10709_v43 = vunpack.c.h.b16 %v10511_v42 }
 0x7da   : > { %v10704_v14 = vunpack.c.l.b16 %v10512_v48  ;;  %v10394_v11 = vpop.f32.mrb[76].mxu0  ;;  %v10710_v22 = vunpack.c.h.b16 %v10512_v48 }
 0x7db   : > { %v25575_v50 = vpack.c.b16 %v10703_v23, %v10697_v0  ;;  %v10396_v1 = vpop.f32.mrb[77].mxu0  ;;  %v16884_v15 = vadd.f32 %v10394_v11, %v25478_v21 }
 0x7dc   : > { %v10398_v10 = vpop.f32.mrb[78].mxu0  ;;  %v25577_v60 = vpack.c.b16 %v10704_v14, %v10698_v17  ;;  %v16885_v25 = vadd.f32 %v10396_v1, %v25486_v32 }
 0x7dd   : > { %26810 = vst [vmem:[#allocation27_spill] sm:$0xff] %v25575_v50  ;;  %v16886_v36 = vadd.f32 %v10398_v10, %v25478_v21  ;;  %v10400_v41 = vpop.f32.mrb[79].mxu0 }
 0x7de   : > { %v16887_v49 = vadd.f32 %v10400_v41, %v25486_v32 }
 0x7df   : > { %v10517_v55 = vpack.c.bf16 %v16886_v36, %v16884_v15  ;;  %v13694_v23 = vpop.xlane.xlu0 %13693 }
 0x7e0   : > { %v10518_v7 = vpack.c.bf16 %v16887_v49, %v16885_v25 }
 0x7e1   : > { %v10715_v46 = vunpack.c.l.b16 %v10517_v55 }
 0x7e2   : > { %v10716_v0 = vunpack.c.l.b16 %v10518_v7  ;;  %v10404_v50 = vpop.f32.mrb[80].mxu0 }
 0x7e3   : > { %v25583_v20 = vpack.c.b16 %v10715_v46, %v10709_v43  ;;  %v13697_v17 = vpop.xlane.xlu1 %13696  ;;  %v10406_v14 = vpop.f32.mrb[81].mxu0  ;;  %v16888_v1 = vadd.f32 %v10404_v50, %v25478_v21  ;;  %v10721_v43 = vunpack.c.h.b16 %v10517_v55 }
 0x7e4   : > { %19871 = vrcp.f32 %v13697_v17  ;;  %v10408_v11 = vpop.f32.mrb[82].mxu0  ;;  %v25585_v10 = vpack.c.b16 %v10716_v0, %v10710_v22  ;;  %v16889_v48 = vadd.f32 %v10406_v14, %v25486_v32  ;;  %v10722_v22 = vunpack.c.h.b16 %v10518_v7 }
 0x7e5   : > { %26811 = vst [vmem:[#allocation28_spill] sm:$0xff] %v25583_v20  ;;  %v25589_v41 = vadd.f32 %v10408_v11, %v25478_v21  ;;  %v10410_v15 = vpop.f32.mrb[83].mxu0  ;;  %19873 = vrcp.f32 %v13694_v23 }
 0x7e6   : > { %v25593_v42 = vadd.f32 %v10410_v15, %v25486_v32 }
 0x7e7   : > { %v10523_v36 = vpack.c.bf16 %v25589_v41, %v16888_v1  ;;  %v13700_v25 = vpop.xlane.xlu0 %13699 }
 0x7e8   : > { %26812 = vst [vmem:[#allocation29_spill] sm:$0xff] %v25593_v42  ;;  %v10524_v49 = vpack.c.bf16 %v25593_v42, %v16889_v48  ;;  %19875 = vrcp.f32 %v13700_v25 }
 0x7e9   : > { %v10727_v46 = vunpack.c.l.b16 %v10523_v36 }
 0x7ea   : > { %v10728_v50 = vunpack.c.l.b16 %v10524_v49  ;;  %v10414_v0 = vpop.f32.mrb[84].mxu0 }
 0x7eb   : > { %v25597_v17 = vpack.c.b16 %v10727_v46, %v10721_v43  ;;  %v13703_v11 = vpop.xlane.xlu1 %13702  ;;  %v10416_v23 = vpop.f32.mrb[85].mxu0  ;;  %v25602_v15 = vadd.f32 %v10414_v0, %v25478_v21 }
 0x7ec   : > { %19877 = vrcp.f32 %v13703_v11  ;;  %v10418_v14 = vpop.f32.mrb[86].mxu0  ;;  %v25599_v20 = vpack.c.b16 %v10728_v50, %v10722_v22  ;;  %v25608_v7 = vadd.f32 %v10416_v23, %v25486_v32 }
 0x7ed   : > { %26813 = vst [vmem:[#allocation30_spill] sm:$0xff] %v25597_v17  ;;  %26814 = vst [vmem:[#allocation31_spill] sm:$0xff] %v25602_v15  ;;  %v25605_v1 = vadd.f32 %v10418_v14, %v25478_v21  ;;  %v10420_v48 = vpop.f32.mrb[87].mxu0 }
 0x7ee   : > { %v19872_v55 = vpop.eup %19871  ;;  %26816 = vst [vmem:[#allocation33_spill] sm:$0xff] %v25608_v7  ;;  %v25611_v36 = vadd.f32 %v10420_v48, %v25486_v32 }
 0x7ef   : > { %26815 = vst [vmem:[#allocation32_spill] sm:$0xff] %v25605_v1  ;;  %v13706_v49 = vpop.xlane.xlu0 %13705  ;;  %v19874_v43 = vpop.eup %19873  ;;  %v13805_v22 = vmul.f32 %v19872_v55, %v25370_v62 }
 0x7f0   : > { %26817 = vst [vmem:[#allocation34_spill] sm:$0xff] %v25611_v36  ;;  %19879 = vrcp.f32 %v13706_v49  ;;  %v13804_v23 = vmul.f32 %v19874_v43, %v25365_v45 }
 0x7f1   : > { %v13709_v50 = vpop.xlane.xlu1 %13708  ;;  %v13833_v42 = vmul.f32 0.020408163, %v13805_v22 }
 0x7f2   : > { %v19876_v0 = vpop.eup %19875  ;;  %19881 = vrcp.f32 %v13709_v50  ;;  %v10424_v11 = vpop.f32.mrb[88].mxu0  ;;  %v13832_v45 = vmul.f32 0.020408163, %v13804_v23 }
 0x7f3   : > { %v13806_v14 = vmul.f32 %v19876_v0, %v25375_v5  ;;  %v10426_v48 = vpop.f32.mrb[89].mxu0  ;;  %v25621_v25 = vadd.f32 %v10424_v11, %v25478_v21  ;;  %v13861_v0 = vsel %vm13523_vm1, %v13833_v42, 0.0 }
 0x7f4   : > { %v10428_v17 = vpop.f32.mrb[90].mxu0  ;;  %v25627_v62 = vadd.f32 %v10426_v48, %v25486_v32 }
 0x7f5   : > { %26818 = vst [vmem:[#allocation35_spill] sm:$0xff] %v25621_v25  ;;  %v25624_v15 = vadd.f32 %v10428_v17, %v25478_v21  ;;  %v10430_v49 = vpop.f32.mrb[91].mxu0  ;;  %v13834_v43 = vmul.f32 0.020408163, %v13806_v14 }
 0x7f6   : > { %v19878_v46 = vpop.eup %19877  ;;  %26820 = vst [vmem:[#allocation37_spill] sm:$0xff] %v25627_v62  ;;  %v25630_v55 = vadd.f32 %v10430_v49, %v25486_v32  ;;  %v13860_v49 = vsel %vm13523_vm1, %v13832_v45, 0.0 }
 0x7f7   : > { %26819 = vst [vmem:[#allocation36_spill] sm:$0xff] %v25624_v15  ;;  %v13807_v5 = vmul.f32 %v19878_v46, %v25380_v34  ;;  %v13712_v50 = vpop.xlane.xlu0 %13711  ;;  %v13863_v23 = vsel %vm13523_vm1, %v13834_v43, 0.0  ;;  %v13172_v34 = vadd.s32 48, %v23170_v19  ;;  %v13862_v25 = vadd.f32 %v13861_v0, %v13860_v49 }
 0x7f8   : > { %26821 = vst [vmem:[#allocation38_spill] sm:$0xff] %v25630_v55  ;;  %19883 = vrcp.f32 %v13712_v50 }
 0x7f9   : > { %v13835_v11 = vmul.f32 0.020408163, %v13807_v5  ;;  %v13864_v62 = vadd.f32 %v13863_v23, %v13862_v25  ;;  %vm13179_vm2 = vcmp.lt.s32.totalorder %v13172_v34, 49  ;;  %v19966_v23 = vmov 0.0  }
 0x7fa   : > { %v19880_v48 = vpop.eup %19879  ;;  %v10434_v1 = vpop.f32.mrb[92].mxu0 }
 0x7fb   : > { %v13808_v14 = vmul.f32 %v19880_v48, %v25384_v37  ;;  %v10436_v46 = vpop.f32.mrb[93].mxu0  ;;  %v13865_v15 = vsel %vm13523_vm1, %v13835_v11, 0.0  ;;  %v25645_v5 = vadd.f32 %v10434_v1, %v25478_v21 }
 0x7fc   : > { %v19882_v22 = vpop.eup %19881  ;;  %v10438_v17 = vpop.f32.mrb[94].mxu0  ;;  %v25651_v37 = vadd.f32 %v10436_v46, %v25486_v32  ;;  %v13866_v1 = vadd.f32 %v13865_v15, %v13864_v62 }
 0x7fd   : > { %v13836_v50 = vmul.f32 0.020408163, %v13808_v14  ;;  %v13809_v42 = vmul.f32 %v19882_v22, %v25388_v18  ;;  %26822 = vst [vmem:[#allocation39_spill] sm:$0xff] %v25645_v5  ;;  %v25648_v45 = vadd.f32 %v10438_v17, %v25478_v21  ;;  %v10440_v43 = vpop.f32.mrb[95].mxu0  ;;  %v25661_v14 = vsel %vm13179_vm2, 0.020408163, %v19966_v23 }
 0x7fe   : > { %26824 = vst [vmem:[#allocation41_spill] sm:$0xff] %v25651_v37  ;;  %v25654_v19 = vadd.f32 %v10440_v43, %v25486_v32 }
 0x7ff   : > { %26823 = vst [vmem:[#allocation40_spill] sm:$0xff] %v25648_v45  ;;  %v13867_v0 = vsel %vm13523_vm1, %v13836_v50, 0.0  ;;  %v13837_v11 = vmul.f32 0.020408163, %v13809_v42  ;;  %v13715_v17 = vpop.xlane.xlu0 %13714 }
 0x800   : > { %26825 = vst [vmem:[#allocation42_spill] sm:$0xff] %v25654_v19  ;;  %v13868_v49 = vadd.f32 %v13867_v0, %v13866_v1 }
 0x801   : > { %v13718_v48 = vpop.xlane.xlu1 %13717  ;;  %v13869_v50 = vsel %vm13523_vm1, %v13837_v11, 0.0 }
 0x802   : > { %v19884_v25 = vpop.eup %19883  ;;  %19885 = vrcp.f32 %v13718_v48  ;;  %v10444_v46 = vpop.f32.mrb[96].mxu0  ;;  %v13870_v1 = vadd.f32 %v13869_v50, %v13868_v49 }
 0x803   : > { %v13810_v34 = vmul.f32 %v19884_v25, %v25394_v9  ;;  %19887 = vrcp.f32 %v13715_v17  ;;  %v10446_v42 = vpop.f32.mrb[97].mxu0  ;;  %v25667_v62 = vadd.f32 %v10444_v46, %v25478_v21 }
 0x804   : > { %v10448_v43 = vpop.f32.mrb[98].mxu0  ;;  %v25671_v23 = vadd.f32 %v10446_v42, %v25486_v32 }
 0x805   : > { %v13838_v15 = vmul.f32 %v13810_v34, %v25661_v14  ;;  %26826 = vst [vmem:[#allocation43_spill] sm:$0xff] %v25667_v62  ;;  %v16906_v18 = vadd.f32 %v10448_v43, %v25478_v21  ;;  %v10450_v0 = vpop.f32.mrb[99].mxu0 }
 0x806   : > { %26827 = vst [vmem:[#allocation44_spill] sm:$0xff] %v25671_v23  ;;  %v16907_v48 = vadd.f32 %v10450_v0, %v25486_v32 }
 0x807   : > { %v13871_v11 = vsel %vm13523_vm1, %v13838_v15, 0.0  ;;  %v10547_v9 = vpack.c.bf16 %v16906_v18, %v25667_v62  ;;  %v13721_v17 = vpop.xlane.xlu1 %13720 }
 0x808   : > { %v13872_v25 = vadd.f32 %v13871_v11, %v13870_v1  ;;  %v10548_v34 = vpack.c.bf16 %v16907_v48, %v25671_v23  ;;  %19889 = vrcp.f32 %v13721_v17 }
 0x809   : > { %v13724_v46 = vpop.xlane.xlu0 %13723 }
 0x80a   : > { %v13873_v22 = vrot.slane %v13872_v25, 4  ;;  %19891 = vrcp.f32 %v13724_v46  ;;  %v10454_v43 = vpop.f32.mrb[100].mxu0  ;;  %v10782_v7 = vunpack.c.h.b16 %v10548_v34 }
 0x80b   : > { %v10456_v5 = vpop.f32.mrb[101].mxu0  ;;  %v16908_v0 = vadd.f32 %v10454_v43, %v25478_v21 }
 0x80c   : > { %v19886_v49 = vpop.eup %19885  ;;  %v13874_v50 = vadd.f32 %v13873_v22, %v13872_v25  ;;  %v10458_v42 = vpop.f32.mrb[102].mxu0  ;;  %v16909_v1 = vadd.f32 %v10456_v5, %v25486_v32  ;;  %v10781_v25 = vunpack.c.h.b16 %v10547_v9 }
 0x80d   : > { %v19888_v45 = vpop.eup %19887  ;;  %v16910_v15 = vadd.f32 %v10458_v42, %v25478_v21  ;;  %v10460_v37 = vpop.f32.mrb[103].mxu0  ;;  %v13812_v11 = vmul.f32 %v19886_v49, %v25404_v27  ;;  %v16678_v42 = vpack.c.bf16 %v24847_v3, %v24847_v3 }
 0x80e   : > { %v13875_v18 = vrot.slane %v13874_v50, 2  ;;  %v16911_v48 = vadd.f32 %v10460_v37, %v25486_v32  ;;  %v13811_v23 = vmul.f32 %v19888_v45, %v25400_v58 }
 0x80f   : > { %v10553_v17 = vpack.c.bf16 %v16910_v15, %v16908_v0  ;;  %v13727_v46 = vpop.xlane.xlu1 %13726  ;;  %v13840_v36 = vmul.f32 0.020408163, %v13812_v11 }
 0x810   : > { %v10554_v62 = vpack.c.bf16 %v16911_v48, %v16909_v1  ;;  %19893 = vrcp.f32 %v13727_v46  ;;  %v13876_v22 = vadd.f32 %v13875_v18, %v13874_v50  ;;  %v13839_v50 = vmul.f32 0.020408163, %v13811_v23 }
 0x811   : > { %v10787_v19 = vunpack.c.l.b16 %v10553_v17  ;;  %v13730_v43 = vpop.xlane.xlu0 %13729  ;;  %v13880_v23 = vsel %vm13523_vm1, %v13840_v36, 0.0 }
 0x812   : > { %v19890_v55 = vpop.eup %19889  ;;  %v10788_v5 = vunpack.c.l.b16 %v10554_v62  ;;  %19895 = vrcp.f32 %v13730_v43  ;;  %v10464_v37 = vpop.f32.mrb[104].mxu0  ;;  %v13877_v45 = vrot.slane %v13876_v22, 1  ;;  %v10794_v36 = vunpack.c.h.b16 %v10554_v62 }
 0x813   : > { %v13813_v27 = vmul.f32 %v19890_v55, %v25410_v39  ;;  %v25686_v49 = vpack.c.b16 %v10787_v19, %v10781_v25  ;;  %v10466_v58 = vpop.f32.mrb[105].mxu0  ;;  %v16912_v9 = vadd.f32 %v10464_v37, %v25478_v21  ;;  %v13999_v19 = vsel %vm13945_vm0, %v16678_v42, 0 }
 0x814   : > { %v19892_v0 = vpop.eup %19891  ;;  %v10468_v15 = vpop.f32.mrb[106].mxu0  ;;  %v25689_v18 = vpack.c.b16 %v10788_v5, %v10782_v7  ;;  %v13878_v11 = vadd.f32 %v13877_v45, %v13876_v22  ;;  %v16913_v39 = vadd.f32 %v10466_v58, %v25486_v32  ;;  %v16681_v7 = vpack.c.bf16 %v24868_v57, %v24868_v57 }
 0x815   : > { %v13841_v1 = vmul.f32 0.020408163, %v13813_v27  ;;  %v13814_v3 = vmul.f32 %v19892_v0, %v25414_v56  ;;  %v16914_v34 = vadd.f32 %v10468_v15, %v25478_v21  ;;  %v10470_v48 = vpop.f32.mrb[107].mxu0  ;;  %v13879_v37 = vsel %vm13523_vm1, %v13839_v50, 0.0 }
 0x816   : > { %v16915_v55 = vadd.f32 %v10470_v48, %v25486_v32  ;;  %v13936_v43 = vpack.c.bf16 %v13878_v11, %v13878_v11  ;;  %v10793_v27 = vunpack.c.h.b16 %v10553_v17  ;;  %v13881_v45 = vadd.f32 %v13880_v23, %v13879_v37 }
 0x817   : > { %v10559_v46 = vpack.c.bf16 %v16914_v34, %v16912_v9  ;;  %v13733_v25 = vpop.xlane.xlu1 %13732  ;;  %v13842_v5 = vmul.f32 0.020408163, %v13814_v3  ;;  %v13882_v22 = vsel %vm13523_vm1, %v13841_v1, 0.0  ;;  %v26828_v15 = vmov 0  }
 0x818   : > { %v10560_v56 = vpack.c.bf16 %v16915_v55, %v16913_v39  ;;  %19897 = vrcp.f32 %v13733_v25  ;;  %16575 = vmatmul.mubr.msk.bf16.vlgmr.msra.gmra.mrb[144].mxu1 %vm13523_vm1, %v13936_v43  ;;  %v13883_v17 = vadd.f32 %v13882_v22, %v13881_v45 }
 0x819   : > { %v10799_v58 = vunpack.c.l.b16 %v10559_v46  ;;  %14005 = vmatpush1.bf16.msra.mxu1 %v13999_v19  ;;  %14036 = vmatprep.mubr.bf16.mxu1 %v26828_v15  ;;  %v13884_v34 = vsel %vm13523_vm1, %v13842_v5, 0.0 }
 0x81a   : > { %v19894_v42 = vpop.eup %19893  ;;  %v10800_v0 = vunpack.c.l.b16 %v10560_v56  ;;  %v10474_v9 = vpop.f32.mrb[108].mxu0  ;;  %16582 = vmatprep.subr.msk.bf16.mxu1 %vm13945_vm0, %v16681_v7  ;;  %v13885_v37 = vadd.f32 %v13884_v34, %v13883_v17 }
 0x81b   : > { %v13815_v57 = vmul.f32 %v19894_v42, %v25419_v53  ;;  %v25704_v3 = vpack.c.b16 %v10799_v58, %v10793_v27  ;;  %v10476_v50 = vpop.f32.mrb[109].mxu0  ;;  %v16916_v55 = vadd.f32 %v10474_v9, %v25478_v21 }
 0x81c   : > { %v19896_v1 = vpop.eup %19895  ;;  %v10478_v48 = vpop.f32.mrb[110].mxu0  ;;  %v25708_v11 = vpack.c.b16 %v10800_v0, %v10794_v36  ;;  %v16917_v23 = vadd.f32 %v10476_v50, %v25486_v32  ;;  %v10806_v36 = vunpack.c.h.b16 %v10560_v56 }
 0x81d   : > { %v13843_v62 = vmul.f32 0.020408163, %v13815_v57  ;;  %v13816_v39 = vmul.f32 %v19896_v1, %v25423_v4  ;;  %v25713_v19 = vadd.f32 %v10478_v48, %v25478_v21  ;;  %v10480_v53 = vpop.f32.mrb[111].mxu0  ;;  %v10805_v4 = vunpack.c.h.b16 %v10559_v46 }
 0x81e   : > { %v25717_v25 = vadd.f32 %v10480_v53, %v25486_v32 }
 0x81f   : > { %v13886_v43 = vsel %vm13523_vm1, %v13843_v62, 0.0  ;;  %v13844_v7 = vmul.f32 0.020408163, %v13816_v39  ;;  %v10565_v5 = vpack.c.bf16 %v25713_v19, %v16916_v55  ;;  %v13736_v58 = vpop.xlane.xlu1 %13735 }
 0x820   : > { %v10566_v22 = vpack.c.bf16 %v25717_v25, %v16917_v23  ;;  %v13887_v45 = vadd.f32 %v13886_v43, %v13885_v37 }
 0x821   : > { %v10811_v27 = vunpack.c.l.b16 %v10565_v5  ;;  %v13739_v42 = vpop.xlane.xlu0 %13738  ;;  %v13888_v32 = vsel %vm13523_vm1, %v13844_v7, 0.0 }
 0x822   : > { %v19898_v21 = vpop.eup %19897  ;;  %v10812_v0 = vunpack.c.l.b16 %v10566_v22  ;;  %19899 = vrcp.f32 %v13739_v42  ;;  %v13889_v46 = vadd.f32 %v13888_v32, %v13887_v45 }
 0x823   : > { %v13817_v9 = vmul.f32 %v19898_v21, %v25429_v28  ;;  %v25724_v57 = vpack.c.b16 %v10811_v27, %v10805_v4  ;;  %19901 = vrcp.f32 %v13736_v58  ;;  %v16680_v21 = vpack.c.bf16 %v24865_v40, %v24865_v40 }
 0x824   : > { %v25726_v50 = vpack.c.b16 %v10812_v0, %v10806_v36 }
 0x825   : > { %v13845_v1 = vmul.f32 %v13817_v9, %v25661_v14 }
 0x827   : > { %v13890_v17 = vsel %vm13523_vm1, %v13845_v1, 0.0  ;;  %v13742_v34 = vpop.xlane.xlu0 %13741  ;;  %v14051_v1 = vsel %vm13945_vm0, %v16680_v21, 0 }
 0x828   : > { %v13891_v48 = vadd.f32 %v13890_v17, %v13889_v46  ;;  %19903 = vrcp.f32 %v13742_v34  ;;  %v16683_v46 = vpack.c.bf16 %v24876_v26, %v24876_v26 }
 0x829   : > { %v13745_v56 = vpop.xlane.xlu1 %13744 }
 0x82a   : > { %19905 = vrcp.f32 %v13745_v56  ;;  %v13892_v62 = vrot.slane %v13891_v48, 4 }
 0x82c   : > { %v19900_v39 = vpop.eup %19899  ;;  %v13893_v55 = vadd.f32 %v13892_v62, %v13891_v48 }
 0x82d   : > { %v19902_v53 = vpop.eup %19901  ;;  %v13819_v23 = vmul.f32 %v19900_v39, %v25439_v16 }
 0x82e   : > { %v13894_v28 = vrot.slane %v13893_v55, 2  ;;  %v13818_v5 = vmul.f32 %v19902_v53, %v25435_v29 }
 0x82f   : > { %v13748_v43 = vpop.xlane.xlu0 %13747  ;;  %v13847_v27 = vmul.f32 0.020408163, %v13819_v23 }
 0x830   : > { %19907 = vrcp.f32 %v13748_v43  ;;  %v13895_v7 = vadd.f32 %v13894_v28, %v13893_v55  ;;  %v13846_v36 = vmul.f32 0.020408163, %v13818_v5 }
 0x831   : > { %v13751_v37 = vpop.xlane.xlu1 %13750  ;;  %v13899_v9 = vsel %vm13523_vm1, %v13847_v27, 0.0 }
 0x832   : > { %v19904_v22 = vpop.eup %19903  ;;  %19909 = vrcp.f32 %v13751_v37  ;;  %v13896_v4 = vrot.slane %v13895_v7, 1 }
 0x833   : > { %v13820_v58 = vmul.f32 %v19904_v22, %v25445_v12  ;;  %v13898_v12 = vsel %vm13523_vm1, %v13846_v36, 0.0 }
 0x834   : > { %v19906_v42 = vpop.eup %19905  ;;  %v13897_v45 = vadd.f32 %v13896_v4, %v13895_v7  ;;  %v13900_v34 = vadd.f32 %v13899_v9, %v13898_v12 }
 0x835   : > { %v13848_v0 = vmul.f32 0.020408163, %v13820_v58  ;;  %v13821_v16 = vmul.f32 %v19906_v42, %v25450_v24 }
 0x836   : > { %v13937_v32 = vpack.c.bf16 %v13897_v45, %v13897_v45 }
 0x837   : > { %v13754_v29 = vpop.xlane.xlu0 %13753  ;;  %v13901_v40 = vsel %vm13523_vm1, %v13848_v0, 0.0  ;;  %v13849_v17 = vmul.f32 0.020408163, %v13821_v16 }
 0x838   : > { %19911 = vrcp.f32 %v13754_v29  ;;  %16579 = vmatmul.mubr.msk.bf16.vlgmr.msra.gmra.mrb[148].mxu1 %vm13523_vm1, %v13937_v32  ;;  %v13902_v62 = vadd.f32 %v13901_v40, %v13900_v34 }
 0x839   : > { %14057 = vmatpush1.bf16.msra.mxu1 %v14051_v1  ;;  %14088 = vmatprep.mubr.bf16.mxu1 %v26828_v15  ;;  %v13903_v26 = vsel %vm13523_vm1, %v13849_v17, 0.0 }
 0x83a   : > { %v19908_v24 = vpop.eup %19907  ;;  %16586 = vmatprep.subr.msk.bf16.mxu1 %vm13945_vm0, %v16683_v46  ;;  %v13904_v23 = vadd.f32 %v13903_v26, %v13902_v62 }
 0x83b   : > { %v13822_v48 = vmul.f32 %v19908_v24, %v25455_v63 }
 0x83c   : > { %v19910_v56 = vpop.eup %19909 }
 0x83d   : > { %v13850_v39 = vmul.f32 0.020408163, %v13822_v48  ;;  %v13823_v55 = vmul.f32 %v19910_v56, %v25459_v51  ;;  %v16682_v48 = vpack.c.bf16 %v24871_v8, %v24871_v8 }
 0x83f   : > { %v13905_v53 = vsel %vm13523_vm1, %v13850_v39, 0.0  ;;  %v13851_v28 = vmul.f32 0.020408163, %v13823_v55  ;;  %v13757_v43 = vpop.xlane.xlu0 %13756 }
 0x840   : > { %v13906_v37 = vadd.f32 %v13905_v53, %v13904_v23  ;;  %v14103_v53 = vsel %vm13945_vm0, %v16682_v48, 0  ;;  %v26833_v48 = vld [vmem:[#allocation176_spill] sm:$0xff] }
 0x841   : > { %v13760_v7 = vpop.xlane.xlu1 %13759  ;;  %v13907_v22 = vsel %vm13523_vm1, %v13851_v28, 0.0 }
 0x842   : > { %v19912_v5 = vpop.eup %19911  ;;  %19913 = vrcp.f32 %v13760_v7  ;;  %v13908_v27 = vadd.f32 %v13907_v22, %v13906_v37  ;;  %v26830_v7 = vld [vmem:[#allocation178_spill] sm:$0xff] }
 0x843   : > { %v13824_v63 = vmul.f32 %v19912_v5, %v25465_v30  ;;  %19915 = vrcp.f32 %v13757_v43 }
 0x845   : > { %v13852_v4 = vmul.f32 %v13824_v63, %v25661_v14 }
 0x847   : > { %v13909_v58 = vsel %vm13523_vm1, %v13852_v4, 0.0  ;;  %v13763_v51 = vpop.xlane.xlu1 %13762 }
 0x848   : > { %v13910_v42 = vadd.f32 %v13909_v58, %v13908_v27  ;;  %19917 = vrcp.f32 %v13763_v51 }
 0x849   : > { %v13766_v21 = vpop.xlane.xlu0 %13765 }
 0x84a   : > { %19919 = vrcp.f32 %v13766_v21  ;;  %v13911_v45 = vrot.slane %v13910_v42, 4 }
 0x84c   : > { %v19914_v36 = vpop.eup %19913  ;;  %v13912_v0 = vadd.f32 %v13911_v45, %v13910_v42 }
 0x84d   : > { %v19916_v16 = vpop.eup %19915  ;;  %v13826_v9 = vmul.f32 %v19914_v36, %v25482_v59 }
 0x84e   : > { %v13913_v32 = vrot.slane %v13912_v0, 2  ;;  %v13825_v1 = vmul.f32 %v19916_v16, %v25471_v47 }
 0x84f   : > { %v13769_v29 = vpop.xlane.xlu1 %13768  ;;  %v13854_v17 = vmul.f32 0.020408163, %v13826_v9 }
 0x850   : > { %19921 = vrcp.f32 %v13769_v29  ;;  %v13914_v30 = vadd.f32 %v13913_v32, %v13912_v0  ;;  %v13853_v62 = vmul.f32 0.020408163, %v13825_v1 }
 0x851   : > { %v13772_v46 = vpop.xlane.xlu0 %13771  ;;  %v13918_v55 = vsel %vm13523_vm1, %v13854_v17, 0.0 }
 0x852   : > { %v19918_v12 = vpop.eup %19917  ;;  %19923 = vrcp.f32 %v13772_v46  ;;  %v13915_v40 = vrot.slane %v13914_v30, 1 }
 0x853   : > { %v13827_v24 = vmul.f32 %v19918_v12, %v25506_v13  ;;  %v13917_v13 = vsel %vm13523_vm1, %v13853_v62, 0.0  ;;  %v26836_v62 = vld [vmem:[#allocation182_spill] sm:$0xff] }
 0x854   : > { %v19920_v34 = vpop.eup %19919  ;;  %v13916_v56 = vadd.f32 %v13915_v40, %v13914_v30  ;;  %v13919_v43 = vadd.f32 %v13918_v55, %v13917_v13  ;;  %v16937_v40 = vadd.f32 %v25168_v31, %v25196_v2  ;;  %v26842_v31 = vld [vmem:[#allocation186_spill] sm:$0xff]  ;;  %v26844_v13 = vld [vmem:[#allocation189_spill] sm:$0xff] }
 0x855   : > { %v13855_v26 = vmul.f32 0.020408163, %v13827_v24  ;;  %v13828_v59 = vmul.f32 %v19920_v34, %v25512_v61  ;;  %v26829_v61 = vld [vmem:[#allocation179_spill] sm:$0xff] }
 0x856   : > { %v13938_v39 = vpack.c.bf16 %v13916_v56, %v13916_v56  ;;  %v26831_v5 = vpack.c.bf16 %v26829_v61, %v26830_v7  ;;  %v16685_v34 = vpack.c.bf16 %v16937_v40, %v16937_v40  ;;  %v26835_v56 = vld [vmem:[#allocation183_spill] sm:$0xff]  ;;  %v26848_v61 = vld [vmem:[#allocation188_spill] sm:$0xff] }
 0x857   : > { %v13775_v47 = vpop.xlane.xlu1 %13774  ;;  %v13920_v28 = vsel %vm13523_vm1, %v13855_v26, 0.0  ;;  %v13856_v23 = vmul.f32 0.020408163, %v13828_v59  ;;  %v26837_v26 = vpack.c.bf16 %v26835_v56, %v26836_v62  ;;  %v26838_v59 = vld [vmem:[#allocation181_spill] sm:$0xff]  ;;  %v16686_v7 = vpack.c.bf16 %v26848_v61, %v26848_v61  ;;  %v26874_v56 = vld [vmem:[#allocation214_spill] sm:$0xff]  ;;  %v26875_v62 = vld [vmem:[#allocation212_spill] sm:$0xff] }
 0x858   : > { %19925 = vrcp.f32 %v13775_v47  ;;  %16583 = vmatmul.mubr.msk.bf16.vlgmr.msra.gmra.mrb[152].mxu1 %vm13523_vm1, %v13938_v39  ;;  %v13921_v63 = vadd.f32 %v13920_v28, %v13919_v43  ;;  %v26839_v39 = vld [vmem:[#allocation180_spill] sm:$0xff]  ;;  %v26841_v47 = vld [vmem:[#allocation187_spill] sm:$0xff]  ;;  %v16687_v28 = vpack.c.bf16 %v26844_v13, %v26844_v13  ;;  %v26885_v61 = vld [vmem:[#allocation226_spill] sm:$0xff] }
 0x859   : > { %14109 = vmatpush1.bf16.msra.mxu1 %v14103_v53  ;;  %14140 = vmatprep.mubr.bf16.mxu1 %v26828_v15  ;;  %v13922_v4 = vsel %vm13523_vm1, %v13856_v23, 0.0  ;;  %v26840_v55 = vpack.c.bf16 %v26838_v59, %v26839_v39  ;;  %v26843_v53 = vpack.c.bf16 %v26841_v47, %v26842_v31  ;;  %v26845_v23 = vld [vmem:[#allocation185_spill] sm:$0xff]  ;;  %v26877_v59 = vld [vmem:[#allocation220_spill] sm:$0xff] }
 0x85a   : > { %v19922_v8 = vpop.eup %19921  ;;  %14175 = vmatprep.subr.bf16.mxu1 %v26831_v5  ;;  %v13923_v21 = vadd.f32 %v13922_v4, %v13921_v63  ;;  %v16936_v5 = vadd.f32 %v25166_v52, %v25192_v44  ;;  %v16694_v39 = vpack.c.bf16 %v26877_v59, %v26877_v59  ;;  %v26879_v47 = vld [vmem:[#allocation9_spill] sm:$0xff] }
 0x85b   : > { %v13829_v37 = vmul.f32 %v19922_v8, %v25531_v35  ;;  %v26846_v8 = vld [vmem:[#allocation184_spill] sm:$0xff]  ;;  %v16692_v31 = vpack.c.bf16 %v26879_v47, %v26879_v47 }
 0x85c   : > { %v19924_v22 = vpop.eup %19923  ;;  %v26847_v43 = vpack.c.bf16 %v26845_v23, %v26846_v8  ;;  %v16684_v63 = vpack.c.bf16 %v16936_v5, %v16936_v5  ;;  %v26882_v23 = vld [vmem:[#allocation6_spill] sm:$0xff]  ;;  %v26883_v8 = vld [vmem:[#allocation5_spill] sm:$0xff]  ;;  %v26886_v5 = vld [vmem:[#allocation7_spill] sm:$0xff] }
 0x85d   : > { %v13857_v27 = vmul.f32 0.020408163, %v13829_v37  ;;  %v13830_v58 = vmul.f32 %v19924_v22, %v25537_v54  ;;  %v26849_v37 = vld [vmem:[#allocation191_spill] sm:$0xff]  ;;  %v16939_v22 = vadd.f32 %v25176_v38, %v25196_v2  ;;  %v16938_v2 = vadd.f32 %v25170_v6, %v25192_v44  ;;  %v26868_v6 = vld [vmem:[#allocation204_spill] sm:$0xff] }
 0x85f   : > { %v13924_v51 = vsel %vm13523_vm1, %v13857_v27, 0.0  ;;  %v13858_v42 = vmul.f32 0.020408163, %v13830_v58  ;;  %v16689_v4 = vpack.c.bf16 %v16939_v22, %v16939_v22  ;;  %v26850_v27 = vld [vmem:[#allocation190_spill] sm:$0xff]  ;;  %v26851_v58 = vld [vmem:[#allocation193_spill] sm:$0xff] }
 0x860   : > { %v13925_v36 = vadd.f32 %v13924_v51, %v13923_v21  ;;  %v26852_v51 = vld [vmem:[#allocation192_spill] sm:$0xff]  ;;  %v26854_v21 = vld [vmem:[#allocation195_spill] sm:$0xff] }
 0x861   : > { %v13926_v0 = vsel %vm13523_vm1, %v13858_v42, 0.0  ;;  %v26853_v42 = vld [vmem:[#allocation197_spill] sm:$0xff]  ;;  %v16691_v52 = vpack.c.bf16 %v26854_v21, %v26854_v21 }
 0x862   : > { %v19926_v45 = vpop.eup %19925  ;;  %v13927_v35 = vadd.f32 %v13926_v0, %v13925_v36  ;;  %v26856_v36 = vld [vmem:[#allocation194_spill] sm:$0xff] }
 0x863   : > { %v13831_v16 = vmul.f32 %v19926_v45, %v25555_v33  ;;  %v26832_v33 = vld [vmem:[#allocation177_spill] sm:$0xff]  ;;  %v26855_v45 = vld [vmem:[#allocation196_spill] sm:$0xff]  ;;  %v16690_v38 = vpack.c.bf16 %v26856_v36, %v26856_v36  ;;  %v26857_v0 = vld [vmem:[#allocation202_spill] sm:$0xff] }
 0x864   : > { %v26892_v36 = vld [vmem:[#allocation14_spill] sm:$0xff] }
 0x865   : > { %v13859_v32 = vmul.f32 %v13831_v16, %v25661_v14  ;;  %v26834_v14 = vpack.c.bf16 %v26832_v33, %v26833_v48  ;;  %v26858_v16 = vld [vmem:[#allocation201_spill] sm:$0xff]  ;;  %v26873_v48 = vld [vmem:[#allocation222_spill] sm:$0xff] }
 0x867   : > { %v13928_v9 = vsel %vm13523_vm1, %v13859_v32, 0.0  ;;  %v26859_v32 = vpack.c.bf16 %v26857_v0, %v26858_v16  ;;  %v26895_v0 = vld [vmem:[#allocation20_spill] sm:$0xff]  ;;  %v26896_v16 = vld [vmem:[#allocation19_spill] sm:$0xff] }
 0x868   : > { %v13929_v29 = vadd.f32 %v13928_v9, %v13927_v35  ;;  %v16688_v35 = vpack.c.bf16 %v16938_v2, %v16938_v2  ;;  %v26860_v9 = vld [vmem:[#allocation10_spill] sm:$0xff] }
 0x86a   : > { %v13930_v30 = vrot.slane %v13929_v29, 4 }
 0x86c   : > { %v13931_v1 = vadd.f32 %v13930_v30, %v13929_v29  ;;  %v16693_v29 = vpack.c.bf16 %v26860_v9, %v26860_v9  ;;  %v26861_v30 = vld [vmem:[#allocation200_spill] sm:$0xff]  ;;  %v26899_v9 = vld [vmem:[#allocation17_spill] sm:$0xff] }
 0x86e   : > { %v13932_v46 = vrot.slane %v13931_v1, 2 }
 0x870   : > { %v13933_v54 = vadd.f32 %v13932_v46, %v13931_v1  ;;  %v26862_v1 = vld [vmem:[#allocation199_spill] sm:$0xff] }
 0x871   : > { %v26863_v46 = vpack.c.bf16 %v26861_v30, %v26862_v1  ;;  %v26901_v30 = vld [vmem:[#allocation24_spill] sm:$0xff]  ;;  %v26902_v1 = vld [vmem:[#allocation23_spill] sm:$0xff] }
 0x872   : > { %v13934_v12 = vrot.slane %v13933_v54, 1 }
 0x874   : > { %v13935_v17 = vadd.f32 %v13934_v12, %v13933_v54  ;;  %v26864_v54 = vld [vmem:[#allocation210_spill] sm:$0xff]  ;;  %v26865_v12 = vld [vmem:[#allocation208_spill] sm:$0xff] }
 0x875   : > { %v26866_v40 = vpack.c.bf16 %v26864_v54, %v26865_v12  ;;  %v26904_v54 = vld [vmem:[#allocation25_spill] sm:$0xff] }
 0x876   : > { %v13939_v24 = vpack.c.bf16 %v13935_v17, %v13935_v17  ;;  %v26867_v17 = vld [vmem:[#allocation206_spill] sm:$0xff]  ;;  %v16700_v12 = vpack.c.bf16 %v26904_v54, %v26904_v54 }
 0x877   : > { %v26869_v44 = vpack.c.bf16 %v26867_v17, %v26868_v6  ;;  %v26906_v6 = vld [vmem:[#allocation22_spill] sm:$0xff] }
 0x878   : > { %16587 = vmatmul.mubr.msk.bf16.vlgmr.msra.gmra.mrb[156].mxu1 %vm13523_vm1, %v13939_v24  ;;  %v26870_v24 = vld [vmem:[#allocation218_spill] sm:$0xff] }
 0x879   : > { %14176 = vmatpush1.bf16.xpose.msra.mxu1 %v26834_v14  ;;  %14207 = vmatprep.mubr.bf16.mxu1 %v16685_v34  ;;  %v26871_v34 = vld [vmem:[#allocation216_spill] sm:$0xff]  ;;  %v16695_v14 = vpack.c.bf16 %v26873_v48, %v26873_v48 }
 0x87a   : > { %14177 = vmatprep.subr.bf16.mxu1 %v26837_v26  ;;  %v26872_v33 = vpack.c.bf16 %v26870_v24, %v26871_v34  ;;  %v26876_v26 = vpack.c.bf16 %v26874_v56, %v26875_v62  ;;  %v14494_v34 = vsel %vm13945_vm0, %v16700_v12, 0 }
 0x881   : > { %14178 = vmatpush1.bf16.xpose.msra.mxu1 %v26840_v55  ;;  %v26878_v55 = vld [vmem:[#allocation223_spill] sm:$0xff] }
 0x882   : > { %14179 = vmatprep.subr.bf16.mxu1 %v26843_v53  ;;  %v26880_v53 = vld [vmem:[#allocation12_spill] sm:$0xff] }
 0x883   : > { %v16697_v13 = vpack.c.bf16 %v26880_v53, %v26880_v53 }
 0x889   : > { %14180 = vmatpush1.bf16.xpose.msra.mxu1 %v26847_v43  ;;  %v26884_v43 = vld [vmem:[#allocation8_spill] sm:$0xff] }
 0x88a   : > { %14181 = vmatprep.subr.bf16.mxu1 %v16687_v28  ;;  %v26881_v28 = vld [vmem:[#allocation3_spill] sm:$0xff] }
 0x891   : > { %14182 = vmatpush1.bf16.xpose.msra.mxu1 %v16686_v7  ;;  %v16699_v7 = vpack.c.bf16 %v26885_v61, %v26885_v61 }
 0x892   : > { %14235 = vmatprep.subr.bf16.mxu1 %v26849_v37 }
 0x898   : > { %14208 = vmatmul.mubr.bf16.vlgmr.msra.gmra.mrb[160].mxu1 %v16684_v63 }
 0x899   : > { %14236 = vmatpush1.bf16.xpose.msra.mxu1 %v26850_v27  ;;  %14267 = vmatprep.mubr.bf16.mxu1 %v16689_v4  ;;  %v26887_v4 = vld [vmem:[#allocation225_spill] sm:$0xff] }
 0x89a   : > { %14237 = vmatprep.subr.bf16.mxu1 %v26851_v58  ;;  %v16698_v27 = vpack.c.bf16 %v26887_v4, %v26887_v4 }
 0x8a1   : > { %14238 = vmatpush1.bf16.xpose.msra.mxu1 %v26852_v51  ;;  %v26888_v51 = vld [vmem:[#allocation16_spill] sm:$0xff] }
 0x8a2   : > { %14239 = vmatprep.subr.bf16.mxu1 %v26853_v42  ;;  %v26889_v42 = vld [vmem:[#allocation15_spill] sm:$0xff] }
 0x8a3   : > { %v26890_v21 = vpack.c.bf16 %v26888_v51, %v26889_v42 }
 0x8a9   : > { %14240 = vmatpush1.bf16.xpose.msra.mxu1 %v26855_v45 }
 0x8aa   : > { %14241 = vmatprep.subr.bf16.mxu1 %v16691_v52  ;;  %v26891_v52 = vld [vmem:[#allocation11_spill] sm:$0xff] }
 0x8ab   : > { %v16696_v45 = vpack.c.bf16 %v26891_v52, %v26891_v52 }
 0x8b1   : > { %14242 = vmatpush1.bf16.xpose.msra.mxu1 %v16690_v38  ;;  %v26893_v38 = vld [vmem:[#allocation13_spill] sm:$0xff] }
 0x8b2   : > { %14295 = vmatprep.subr.bf16.mxu1 %v26859_v32  ;;  %v26894_v2 = vpack.c.bf16 %v26892_v36, %v26893_v38  ;;  %v26897_v32 = vpack.c.bf16 %v26895_v0, %v26896_v16 }
 0x8b8   : > { %14268 = vmatmul.mubr.bf16.vlgmr.msra.gmra.mrb[164].mxu1 %v16688_v35  ;;  %v26898_v35 = vld [vmem:[#allocation18_spill] sm:$0xff] }
 0x8b9   : > { %14296 = vmatpush1.bf16.xpose.msra.mxu1 %v26863_v46  ;;  %14327 = vmatprep.mubr.bf16.mxu1 %v16693_v29  ;;  %v26900_v29 = vpack.c.bf16 %v26898_v35, %v26899_v9  ;;  %v26903_v46 = vpack.c.bf16 %v26901_v30, %v26902_v1 }
 0x8ba   : > { %14297 = vmatprep.subr.bf16.mxu1 %v26866_v40  ;;  %v26905_v40 = vld [vmem:[#allocation26_spill] sm:$0xff] }
 0x8bb   : > { %v16701_v17 = vpack.c.bf16 %v26905_v40, %v26905_v40 }
 0x8c1   : > { %14298 = vmatpush1.bf16.xpose.msra.mxu1 %v26869_v44  ;;  %v26907_v44 = vld [vmem:[#allocation21_spill] sm:$0xff] }
 0x8c2   : > { %14299 = vmatprep.subr.bf16.mxu1 %v26872_v33  ;;  %v26908_v24 = vpack.c.bf16 %v26906_v6, %v26907_v44 }
 0x8c9   : > { %14300 = vmatpush1.bf16.xpose.msra.mxu1 %v26876_v26 }
 0x8ca   : > { %14301 = vmatprep.subr.bf16.mxu1 %v16695_v14 }
 0x8d1   : > { %14302 = vmatpush1.bf16.xpose.msra.mxu1 %v16694_v39 }
 0x8d2   : > { %14355 = vmatprep.subr.bf16.mxu1 %v26878_v55 }
 0x8d8   : > { %14328 = vmatmul.mubr.bf16.vlgmr.msra.gmra.mrb[168].mxu1 %v16692_v31 }
 0x8d9   : > { %14356 = vmatpush1.bf16.xpose.msra.mxu1 %v26881_v28  ;;  %14387 = vmatprep.mubr.bf16.mxu1 %v16697_v13 }
 0x8da   : > { %14357 = vmatprep.subr.bf16.mxu1 %v26882_v23 }
 0x8e1   : > { %14358 = vmatpush1.bf16.xpose.msra.mxu1 %v26883_v8 }
 0x8e2   : > { %14359 = vmatprep.subr.bf16.mxu1 %v26884_v43 }
 0x8e9   : > { %14360 = vmatpush1.bf16.xpose.msra.mxu1 %v26886_v5 }
 0x8ea   : > { %14361 = vmatprep.subr.bf16.mxu1 %v16699_v7 }
 0x8eb   : > { %v13986_v37 = vpop.f32.mrb[144].mxu1 }
 0x8ec   : > { %v13988_v22 = vpop.f32.mrb[145].mxu1 }
 0x8ed   : > { %v13990_v63 = vpop.f32.mrb[146].mxu1 }
 0x8ee   : > { %v13991_v58 = vpop.f32.mrb[147].mxu1 }
 0x8ef   : > { %v19967_v58 = vmov -1e+30  }
 0x8f1   : > { %14362 = vmatpush1.bf16.xpose.msra.mxu1 %v16698_v27 }
 0x8f2   : > { %14499 = vmatprep.subr.bf16.mxu1 %v26890_v21 }
 0x8f8   : > { %14388 = vmatmul.mubr.bf16.vlgmr.msra.gmra.mrb[172].mxu1 %v16696_v45 }
 0x8f9   : > { %14500 = vmatpush1.bf16.msra.mxu1 %v26894_v2  ;;  %14531 = vmatprep.mubr.bf16.mxu1 %v26828_v15 }
 0x8fa   : > { %14501 = vmatprep.subr.bf16.mxu1 %v26897_v32 }
 0x8fd   : > { %14502 = vmatpush1.bf16.msra.mxu1 %v26900_v29 }
 0x8fe   : > { %14503 = vmatprep.subr.bf16.mxu1 %v26903_v46 }
 0x901   : > { %14504 = vmatpush1.bf16.msra.mxu1 %v26908_v24 }
 0x902   : > { %16606 = vmatprep.subr.msk.bf16.mxu1 %vm13945_vm0, %v16701_v17 }
 0x905   : > { %14506 = vmatpush1.bf16.msra.mxu1 %v14494_v34 }
 0x906   : > { %14563 = vmatprep.subr.bf16.mxu1 %v25577_v60 }
 0x90b   : > { %v14038_v33 = vpop.f32.mrb[148].mxu1 }
 0x90c   : > { %v14740_v48 = vrot.slane %v14038_v33, 7  ;;  %v14040_v14 = vpop.f32.mrb[149].mxu1 }
 0x90d   : > { %v14749_v56 = vrot.slane %v14040_v14, 7  ;;  %v14042_v62 = vpop.f32.mrb[150].mxu1 }
 0x90e   : > { %v14742_v26 = vsel %vm14741_vm3, %v14740_v48, %v13986_v37  ;;  %v14043_v59 = vpop.f32.mrb[151].mxu1 }
 0x90f   : > { %v14750_v39 = vsel %vm14741_vm3, %v14749_v56, %v13988_v22  ;;  %v26909_v22 = vlaneseq }
 0x911   : > { %v14150_v27 = vand.u32 127, %v26909_v22 }
 0x913   : > { %vm14151_vm6 = vcmp.lt.s32.totalorder %v14150_v27, 49 }
 0x914   : > { %v14152_v51 = vsel %vm14151_vm6, 0.0, %v19967_v58 }
 0x92b   : > { %v14090_v55 = vpop.f32.mrb[152].mxu1 }
 0x92c   : > { %v14743_v47 = vrot.slane %v14090_v55, 6  ;;  %v14092_v31 = vpop.f32.mrb[153].mxu1 }
 0x92d   : > { %v14751_v53 = vrot.slane %v14092_v31, 6  ;;  %v14094_v13 = vpop.f32.mrb[154].mxu1 }
 0x92e   : > { %v14745_v28 = vsel %vm14744_vm4, %v14743_v47, %v14742_v26  ;;  %v14095_v23 = vpop.f32.mrb[155].mxu1 }
 0x92f   : > { %v14752_v8 = vsel %vm14744_vm4, %v14751_v53, %v14750_v39 }
 0x94b   : > { %v14142_v43 = vpop.f32.mrb[156].mxu1 }
 0x94c   : > { %v14746_v60 = vrot.slane %v14142_v43, 5  ;;  %v14144_v61 = vpop.f32.mrb[157].mxu1 }
 0x94d   : > { %v14753_v7 = vrot.slane %v14144_v61, 5  ;;  %v14146_v5 = vpop.f32.mrb[158].mxu1 }
 0x94e   : > { %v25880_v63 = vsel %vm14747_vm5, %v14746_v60, %v14745_v28  ;;  %v14147_v37 = vpop.f32.mrb[159].mxu1  ;;  %v19783_v5 = vld [vmem:[%s26100_s5 + $0x40] sm:$0xff]  }
 0x94f   : > { %v25882_v4 = vsel %vm14747_vm5, %v14753_v7, %v14752_v8  ;;  %v19784_v37 = vld [vmem:[%s26100_s5] sm:$0xff]   ;;  %16708 = vmatprep.subr.bf16.mxu0 %v19783_v5  ;;  %v26930_v5 = vld [vmem:[#allocation44_spill] sm:$0xff] }
 0x950   : > { %16709 = vmatpush3.bf16.msra.mxu0 %v19784_v37  ;;  %v16705_v37 = vpack.c.bf16 %v26930_v5, %v26930_v5 }
 0x96b   : > { %v14209_v42 = vpop.f32.mrb[160].mxu1 }
 0x96c   : > { %v14210_v21 = vadd.f32 %v14209_v42, %v14152_v51  ;;  %v14211_v52 = vpop.f32.mrb[161].mxu1 }
 0x96d   : > { %v14212_v45 = vpop.f32.mrb[162].mxu1 }
 0x96e   : > { %v14213_v36 = vpop.f32.mrb[163].mxu1  ;;  %v14396_v38 = vsel %vm14395_vm7, %v14210_v21, -inf }
 0x96f   : > { %14397 = vmax.xlane.f32.xlu0 %v14396_v38 }
 0x98b   : > { %v14269_v2 = vpop.f32.mrb[164].mxu1 }
 0x98c   : > { %v14270_v0 = vadd.f32 %v14269_v2, %v14152_v51  ;;  %v14271_v16 = vpop.f32.mrb[165].mxu1 }
 0x98d   : > { %v14272_v32 = vpop.f32.mrb[166].mxu1  ;;  %v26910_v16 = vld [vmem:[#allocation27_spill] sm:$0xff] }
 0x98e   : > { %v14273_v35 = vpop.f32.mrb[167].mxu1  ;;  %v14399_v9 = vsel %vm14395_vm7, %v14270_v0, -inf }
 0x98f   : > { %14400 = vmax.xlane.f32.xlu1 %v14399_v9  ;;  %v26911_v35 = vld [vmem:[#allocation28_spill] sm:$0xff]  ;;  %v16702_v9 = vpack.c.bf16 %v25589_v41, %v25589_v41 }
 0x9ab   : > { %v14329_v29 = vpop.f32.mrb[168].mxu1 }
 0x9ac   : > { %v14330_v30 = vadd.f32 %v14329_v29, %v14152_v51  ;;  %v14331_v1 = vpop.f32.mrb[169].mxu1  ;;  %v26912_v29 = vld [vmem:[#allocation29_spill] sm:$0xff] }
 0x9ad   : > { %v14332_v46 = vpop.f32.mrb[170].mxu1  ;;  %v26913_v1 = vld [vmem:[#allocation30_spill] sm:$0xff] }
 0x9ae   : > { %v14333_v54 = vpop.f32.mrb[171].mxu1  ;;  %v14402_v12 = vsel %vm14395_vm7, %v14330_v30, -inf }
 0x9af   : > { %14403 = vmax.xlane.f32.xlu0 %v14402_v12  ;;  %v14558_v54 = vsel %vm13945_vm0, %v16702_v9, 0 }
 0x9cb   : > { %v14389_v40 = vpop.f32.mrb[172].mxu1 }
 0x9cc   : > { %v14390_v17 = vadd.f32 %v14389_v40, %v14152_v51  ;;  %v14391_v6 = vpop.f32.mrb[173].mxu1  ;;  %v26915_v40 = vld [vmem:[#allocation33_spill] sm:$0xff] }
 0x9cd   : > { %v14392_v44 = vpop.f32.mrb[174].mxu1 }
 0x9ce   : > { %v14393_v24 = vpop.f32.mrb[175].mxu1  ;;  %v14405_v34 = vsel %vm14395_vm7, %v14390_v17, -inf }
 0x9cf   : > { %14406 = vmax.xlane.f32.xlu1 %v14405_v34 }
 0x9fc   : > { %v14398_v33 = vpop.xlane.xlu0 %14397 }
 0x9fd   : > { %v14408_v48 = vsub.f32 %v14210_v21, %v14398_v33 }
 0x9ff   : > { %v14412_v14 = vmul.f32 1.442695, %v14408_v48 }
 0xa01   : > { %19927 = vpow2.f32 %v14412_v14 }
 0xa0b   : > { %v19928_v56 = vpop.eup %19927 }
 0xa0c   : > { %v14420_v62 = vsel %vm14395_vm7, %v19928_v56, 0.0 }
 0xa0d   : > { %14421 = vadd.xlane.f32.xlu0 %v14420_v62  ;;  %v26918_v62 = vld [vmem:[#allocation31_spill] sm:$0xff] }
 0xa1c   : > { %v14401_v26 = vpop.xlane.xlu1 %14400 }
 0xa1d   : > { %v14409_v59 = vsub.f32 %v14270_v0, %v14401_v26 }
 0xa1f   : > { %v14414_v39 = vmul.f32 1.442695, %v14409_v59 }
 0xa21   : > { %19929 = vpow2.f32 %v14414_v39  ;;  %v26920_v39 = vld [vmem:[#allocation38_spill] sm:$0xff] }
 0xa2b   : > { %v19930_v55 = vpop.eup %19929 }
 0xa2c   : > { %v14423_v47 = vsel %vm14395_vm7, %v19930_v55, 0.0 }
 0xa2d   : > { %14424 = vadd.xlane.f32.xlu1 %v14423_v47 }
 0xa3c   : > { %v14404_v31 = vpop.xlane.xlu0 %14403 }
 0xa3d   : > { %v14410_v53 = vsub.f32 %v14330_v30, %v14404_v31  ;;  %v16703_v30 = vpack.c.bf16 %v26912_v29, %v26912_v29  ;;  %v26923_v31 = vld [vmem:[#allocation36_spill] sm:$0xff] }
 0xa3f   : > { %v14416_v13 = vmul.f32 1.442695, %v14410_v53  ;;  %v26924_v53 = vld [vmem:[#allocation35_spill] sm:$0xff] }
 0xa41   : > { %19931 = vpow2.f32 %v14416_v13  ;;  %v26925_v13 = vpack.c.bf16 %v26923_v31, %v26924_v53  ;;  %v19806_v31 = vld [vmem:[%s26101_s6 + $0x18] sm:$0xff]  }
 0xa4b   : > { %v25891_v28 = vpop.eup %19931 }
 0xa4c   : > { %v14426_v23 = vsel %vm14395_vm7, %v25891_v28, 0.0 }
 0xa4d   : > { %14427 = vadd.xlane.f32.xlu0 %v14426_v23  ;;  %v26926_v23 = vld [vmem:[#allocation42_spill] sm:$0xff] }
 0xa5c   : > { %v14407_v8 = vpop.xlane.xlu1 %14406 }
 0xa5d   : > { %v14411_v43 = vsub.f32 %v14390_v17, %v14407_v8  ;;  %v26927_v8 = vld [vmem:[#allocation41_spill] sm:$0xff] }
 0xa5f   : > { %v14418_v60 = vmul.f32 1.442695, %v14411_v43  ;;  %v26928_v43 = vpack.c.bf16 %v26926_v23, %v26927_v8 }
 0xa61   : > { %19933 = vpow2.f32 %v14418_v60  ;;  %v26929_v60 = vld [vmem:[#allocation43_spill] sm:$0xff] }
 0xa6b   : > { %v25895_v61 = vpop.eup %19933 }
 0xa6c   : > { %v14429_v7 = vsel %vm14395_vm7, %v25895_v61, 0.0 }
 0xa6d   : > { %14430 = vadd.xlane.f32.xlu1 %v14429_v7  ;;  %v16704_v7 = vpack.c.bf16 %v26929_v60, %v26929_v60 }
 0xa9a   : > { %v14422_v22 = vpop.xlane.xlu0 %14421 }
 0xa9b   : > { %19935 = vrcp.f32 %v14422_v22  ;;  %v26931_v22 = vld [vmem:[#allocation40_spill] sm:$0xff] }
 0xaa5   : > { %v19936_v27 = vpop.eup %19935 }
 0xaa6   : > { %v14436_v58 = vmul.f32 %v19936_v27, %v19928_v56  ;;  %v26917_v56 = vld [vmem:[#allocation32_spill] sm:$0xff]  ;;  %v26932_v27 = vld [vmem:[#allocation39_spill] sm:$0xff] }
 0xaa7   : > { %v26919_v26 = vpack.c.bf16 %v26917_v56, %v26918_v62  ;;  %v19799_v56 = vld [vmem:[%s26101_s6 + $0x40] sm:$0xff]  }
 0xaa8   : > { %v14440_v51 = vmul.f32 0.125, %v14436_v58  ;;  %v26933_v58 = vpack.c.bf16 %v26931_v22, %v26932_v27  ;;  %v19800_v62 = vld [vmem:[%s26101_s6] sm:$0xff]  }
 0xaaa   : > { %v14444_v42 = vsel %vm14395_vm7, %v14440_v51, 0.0 }
 0xaab   : > { %v14445_v21 = vrot.slane %v14444_v42, 4 }
 0xaad   : > { %v14446_v52 = vadd.f32 %v14445_v21, %v14444_v42  ;;  %v14622_v42 = vsel %vm13945_vm0, %v16704_v7, 0 }
 0xaaf   : > { %v14447_v45 = vrot.slane %v14446_v52, 2 }
 0xab1   : > { %v14448_v36 = vadd.f32 %v14447_v45, %v14446_v52 }
 0xab3   : > { %v14449_v38 = vrot.slane %v14448_v36, 1 }
 0xab5   : > { %v14450_v2 = vadd.f32 %v14449_v38, %v14448_v36 }
 0xab7   : > { %v14472_v0 = vpack.c.bf16 %v14450_v2, %v14450_v2 }
 0xab9   : > { %16607 = vmatmul.mubr.msk.bf16.vlgmr.msra.gmra.mrb[176].mxu1 %vm14395_vm7, %v14472_v0 }
 0xaba   : > { %14564 = vmatpush1.bf16.msra.mxu1 %v26910_v16  ;;  %v14425_v32 = vpop.xlane.xlu1 %14424  ;;  %14595 = vmatprep.mubr.bf16.mxu1 %v26828_v15 }
 0xabb   : > { %19937 = vrcp.f32 %v14425_v32  ;;  %14565 = vmatprep.subr.bf16.mxu1 %v25585_v10  ;;  %v26914_v10 = vld [vmem:[#allocation34_spill] sm:$0xff] }
 0xabc   : > { %v26916_v17 = vpack.c.bf16 %v26914_v10, %v26915_v40 }
 0xabe   : > { %14566 = vmatpush1.bf16.msra.mxu1 %v26911_v35 }
 0xabf   : > { %14567 = vmatprep.subr.bf16.mxu1 %v25599_v20 }
 0xac2   : > { %14568 = vmatpush1.bf16.msra.mxu1 %v26913_v1 }
 0xac3   : > { %16610 = vmatprep.subr.msk.bf16.mxu1 %vm13945_vm0, %v16703_v30 }
 0xac5   : > { %v19938_v46 = vpop.eup %19937 }
 0xac6   : > { %v14437_v12 = vmul.f32 %v19938_v46, %v19930_v55  ;;  %14570 = vmatpush1.bf16.msra.mxu1 %v14558_v54  ;;  %v26921_v55 = vld [vmem:[#allocation37_spill] sm:$0xff]  ;;  %v19788_v54 = vld [vmem:[%s26100_s5 + $0x10] sm:$0xff]  }
 0xac7   : > { %14627 = vmatprep.subr.bf16.mxu1 %v26916_v17  ;;  %v26922_v47 = vpack.c.bf16 %v26920_v39, %v26921_v55  ;;  %v19789_v17 = vld [vmem:[%s26100_s5 + $0x58] sm:$0xff]   ;;  %v19803_v39 = vld [vmem:[%s26101_s6 + $0x50] sm:$0xff]  }
 0xac8   : > { %v14441_v20 = vmul.f32 0.125, %v14437_v12  ;;  %v19804_v55 = vld [vmem:[%s26101_s6 + $0x10] sm:$0xff]  }
 0xaca   : > { %v14451_v6 = vsel %vm14395_vm7, %v14441_v20, 0.0  ;;  %v19790_v20 = vld [vmem:[%s26100_s5 + $0x18] sm:$0xff]  }
 0xacb   : > { %v14452_v41 = vrot.slane %v14451_v6, 4 }
 0xacd   : > { %v14453_v44 = vadd.f32 %v14452_v41, %v14451_v6  ;;  %v19791_v6 = vld [vmem:[%s26100_s5 + $0x60] sm:$0xff]  }
 0xace   : > { %v19792_v41 = vld [vmem:[%s26100_s5 + $0x20] sm:$0xff]  }
 0xacf   : > { %v14454_v24 = vrot.slane %v14453_v44, 2 }
 0xad1   : > { %v14455_v34 = vadd.f32 %v14454_v24, %v14453_v44  ;;  %v19793_v44 = vld [vmem:[%s26100_s5 + $0x68] sm:$0xff]  }
 0xad2   : > { %v19794_v24 = vld [vmem:[%s26100_s5 + $0x28] sm:$0xff]  }
 0xad3   : > { %v14456_v33 = vrot.slane %v14455_v34, 1 }
 0xad5   : > { %v14457_v48 = vadd.f32 %v14456_v33, %v14455_v34  ;;  %v19795_v34 = vld [vmem:[%s26100_s5 + $0x70] sm:$0xff]  }
 0xad6   : > { %v19796_v33 = vld [vmem:[%s26100_s5 + $0x30] sm:$0xff]  }
 0xad7   : > { %v14473_v14 = vpack.c.bf16 %v14457_v48, %v14457_v48  ;;  %v19797_v48 = vld [vmem:[%s26100_s5 + $0x78] sm:$0xff]  }
 0xad9   : > { %16611 = vmatmul.mubr.msk.bf16.vlgmr.msra.gmra.mrb[180].mxu1 %vm14395_vm7, %v14473_v14  ;;  %v19798_v14 = vld [vmem:[%s26100_s5 + $0x38] sm:$0xff]  }
 0xada   : > { %14628 = vmatpush1.bf16.msra.mxu1 %v26919_v26  ;;  %v14428_v59 = vpop.xlane.xlu0 %14427  ;;  %14659 = vmatprep.mubr.bf16.mxu1 %v26828_v15  ;;  %v19801_v26 = vld [vmem:[%s26101_s6 + $0x48] sm:$0xff]  }
 0xadb   : > { %14629 = vmatprep.subr.bf16.mxu1 %v26922_v47  ;;  %19939 = vrcp.f32 %v14428_v59  ;;  %v19802_v59 = vld [vmem:[%s26101_s6 + $0x8] sm:$0xff]   ;;  %v19805_v47 = vld [vmem:[%s26101_s6 + $0x58] sm:$0xff]  }
 0xade   : > { %14630 = vmatpush1.bf16.msra.mxu1 %v26925_v13 }
 0xadf   : > { %14631 = vmatprep.subr.bf16.mxu1 %v26928_v43 }
 0xae2   : > { %14632 = vmatpush1.bf16.msra.mxu1 %v26933_v58 }
 0xae3   : > { %16614 = vmatprep.subr.msk.bf16.mxu1 %vm13945_vm0, %v16705_v37 }
 0xae5   : > { %v19940_v51 = vpop.eup %19939 }
 0xae6   : > { %v14438_v21 = vmul.f32 %v19940_v51, %v25891_v28  ;;  %14634 = vmatpush1.bf16.msra.mxu1 %v14622_v42  ;;  %v16707_v28 = vpack.c.bf16 %v25717_v25, %v25717_v25  ;;  %v19786_v25 = vld [vmem:[%s26100_s5 + $0x8] sm:$0xff]  }
 0xae7   : > { %14691 = vmatprep.subr.bf16.mxu1 %v25689_v18  ;;  %v16706_v18 = vpack.c.bf16 %v25713_v19, %v25713_v19  ;;  %v19785_v19 = vld [vmem:[%s26100_s5 + $0x48] sm:$0xff]  }
 0xae8   : > { %v14442_v52 = vmul.f32 0.125, %v14438_v21  ;;  %16710 = vmatprep.subr.bf16.mxu0 %v19785_v19  ;;  %v19808_v19 = vld [vmem:[%s26101_s6 + $0x20] sm:$0xff]  }
 0xae9   : > { %v14686_v29 = vsel %vm13945_vm0, %v16706_v18, 0  ;;  %16711 = vmatpush3.bf16.msra.mxu0 %v19786_v25  ;;  %v19811_v25 = vld [vmem:[%s26101_s6 + $0x70] sm:$0xff]  }
 0xaea   : > { %v14458_v45 = vsel %vm14395_vm7, %v14442_v52, 0.0 }
 0xaeb   : > { %v14459_v36 = vrot.slane %v14458_v45, 4 }
 0xaed   : > { %v14460_v38 = vadd.f32 %v14459_v36, %v14458_v45 }
 0xaef   : > { %v14461_v2 = vrot.slane %v14460_v38, 2 }
 0xaf1   : > { %v14462_v0 = vadd.f32 %v14461_v2, %v14460_v38 }
 0xaf3   : > { %v14463_v16 = vrot.slane %v14462_v0, 1 }
 0xaf5   : > { %v14464_v32 = vadd.f32 %v14463_v16, %v14462_v0 }
 0xaf7   : > { %v14474_v35 = vpack.c.bf16 %v14464_v32, %v14464_v32 }
 0xaf9   : > { %16615 = vmatmul.mubr.msk.bf16.vlgmr.msra.gmra.mrb[184].mxu1 %vm14395_vm7, %v14474_v35 }
 0xafa   : > { %14692 = vmatpush1.bf16.msra.mxu1 %v25686_v49  ;;  %v14431_v9 = vpop.xlane.xlu1 %14430  ;;  %14723 = vmatprep.mubr.bf16.mxu1 %v26828_v15 }
 0xafb   : > { %19941 = vrcp.f32 %v14431_v9  ;;  %14693 = vmatprep.subr.bf16.mxu1 %v25708_v11 }
 0xafe   : > { %14694 = vmatpush1.bf16.msra.mxu1 %v25704_v3 }
 0xaff   : > { %14695 = vmatprep.subr.bf16.mxu1 %v25726_v50 }
 0xb02   : > { %14696 = vmatpush1.bf16.msra.mxu1 %v25724_v57  ;;  %v19787_v57 = vld [vmem:[%s26100_s5 + $0x50] sm:$0xff]  }
 0xb03   : > { %16618 = vmatprep.subr.msk.bf16.mxu1 %vm13945_vm0, %v16707_v28  ;;  %16712 = vmatprep.subr.bf16.mxu0 %v19787_v57  ;;  %v19812_v57 = vld [vmem:[%s26101_s6 + $0x30] sm:$0xff]  }
 0xb04   : > { %16713 = vmatpush3.bf16.msra.mxu0 %v19788_v54  ;;  %v19814_v54 = vld [vmem:[%s26101_s6 + $0x38] sm:$0xff]  }
 0xb05   : > { %v19942_v49 = vpop.eup %19941  ;;  %16714 = vmatprep.subr.bf16.mxu0 %v19789_v17  ;;  %v16620_v17 = vld [vmem:[%s26102_s7] ss:$0 sm:$0xff] }
 0xb06   : > { %v14439_v30 = vmul.f32 %v19942_v49, %v25895_v61  ;;  %14698 = vmatpush1.bf16.msra.mxu1 %v14686_v29 }
 0xb07   : > { %16730 = vmatprep.subr.bf16.mxu1 %v19799_v56  ;;  %v16638_v56 = vld [vmem:[%s26102_s7 + $0x2] ss:$0 sm:$0xff] }
 0xb08   : > { %v14443_v11 = vmul.f32 0.125, %v14439_v30  ;;  %16715 = vmatpush3.bf16.msra.mxu0 %v19790_v20 }
 0xb09   : > { %16716 = vmatprep.subr.bf16.mxu0 %v19791_v6 }
 0xb0a   : > { %v14465_v3 = vsel %vm14395_vm7, %v14443_v11, 0.0 }
 0xb0b   : > { %v14466_v50 = vrot.slane %v14465_v3, 4 }
 0xb0c   : > { %16717 = vmatpush3.bf16.msra.mxu0 %v19792_v41 }
 0xb0d   : > { %v14467_v1 = vadd.f32 %v14466_v50, %v14465_v3  ;;  %16718 = vmatprep.subr.bf16.mxu0 %v19793_v44 }
 0xb0f   : > { %v14468_v46 = vrot.slane %v14467_v1, 2 }
 0xb10   : > { %16719 = vmatpush3.bf16.msra.mxu0 %v19794_v24  ;;  %v16637_v24 = vld [vmem:[%s26102_s7 + $0x1] ss:$0 sm:$0xff] }
 0xb11   : > { %v14469_v61 = vadd.f32 %v14468_v46, %v14467_v1  ;;  %16720 = vmatprep.subr.bf16.mxu0 %v19795_v34  ;;  %v19807_v46 = vld [vmem:[%s26101_s6 + $0x60] sm:$0xff]  }
 0xb12   : > { %v16639_v34 = vld [vmem:[%s26102_s7 + $0x3] ss:$0 sm:$0xff] }
 0xb13   : > { %v14470_v12 = vrot.slane %v14469_v61, 1 }
 0xb14   : > { %16721 = vmatpush3.bf16.msra.mxu0 %v19796_v33 }
 0xb15   : > { %v14471_v10 = vadd.f32 %v14470_v12, %v14469_v61  ;;  %16722 = vmatprep.subr.bf16.mxu0 %v19797_v48  ;;  %v19813_v61 = vld [vmem:[%s26101_s6 + $0x78] sm:$0xff]   ;;  %v14997_v12 = vld [vmem:[%s26102_s7 + $0x6] sm:$0x1] }
 0xb16   : > { %vm14998_vm11 = vcmp.gt.f32.partialorder %v14997_v12, 0.5 }
 0xb17   : > { %v14475_v40 = vpack.c.bf16 %v14471_v10, %v14471_v10  ;;  %v14985_v10 = vld [vmem:[%s26102_s7 + $0x5] sm:$0x1]  ;;  %v14999_v44 = vsel %vm14998_vm11, 1, %v26828_v15 }
 0xb18   : > { %16723 = vmatpush3.bf16.msra.mxu0 %v19798_v14  ;;  %vm14986_vm12 = vcmp.gt.f32.partialorder %v14985_v10, 0.5 }
 0xb19   : > { %16619 = vmatmul.mubr.msk.bf16.vlgmr.msra.gmra.mrb[188].mxu1 %vm14395_vm7, %v14475_v40  ;;  %v14987_v48 = vsel %vm14986_vm12, 1, %v26828_v15 }
 0xb1a   : > { %16731 = vmatpush3.bf16.msra.mxu1 %v19800_v62  ;;  %v16640_v62 = vld [vmem:[%s26102_s7 + $0x4] ss:$0 sm:$0xff] }
 0xb1b   : > { %16732 = vmatprep.subr.bf16.mxu1 %v19801_v26  ;;  %v26934_v26 = vld [vmem:[#allocation175_spill] sm:$0xff] }
 0xb1e   : > { %16733 = vmatpush3.bf16.msra.mxu1 %v19802_v59  ;;  %v15003_v59 = vrot.slane %v14999_v44, %v26934_v26 }
 0xb1f   : > { %16734 = vmatprep.subr.bf16.mxu1 %v19803_v39 }
 0xb20   : > { %vm15004_vm13 = vcmp.eq.s32.totalorder %v15003_v59, 1 }
 0xb22   : > { %16735 = vmatpush3.bf16.msra.mxu1 %v19804_v55 }
 0xb23   : > { %16736 = vmatprep.subr.bf16.mxu1 %v19805_v47  ;;  %v14991_v47 = vrot.slane %v14987_v48, %v26934_v26 }
 0xb25   : > { %vm14992_vm14 = vcmp.eq.s32.totalorder %v14991_v47, 1 }
 0xb26   : > { %16737 = vmatpush3.bf16.msra.mxu1 %v19806_v31 }
 0xb27   : > { %16738 = vmatprep.subr.bf16.mxu1 %v19807_v46 }
 0xb2a   : > { %16739 = vmatpush3.bf16.msra.mxu1 %v19808_v19 }
 0xb8c   : > { %v14533_v53 = vpop.f32.mrb[176].mxu1 }
 0xb8d   : > { %v14535_v13 = vpop.f32.mrb[177].mxu1  ;;  %v14765_v60 = vrot.slane %v14533_v53, 4 }
 0xb8e   : > { %v14537_v23 = vpop.f32.mrb[178].mxu1  ;;  %v14775_v37 = vrot.slane %v14535_v13, 4 }
 0xb8f   : > { %v14538_v8 = vpop.f32.mrb[179].mxu1 }
 0xbac   : > { %v14597_v43 = vpop.f32.mrb[180].mxu1 }
 0xbad   : > { %v14766_v7 = vrot.slane %v14597_v43, 3  ;;  %v14599_v5 = vpop.f32.mrb[181].mxu1 }
 0xbae   : > { %v14776_v22 = vrot.slane %v14599_v5, 3  ;;  %v14601_v27 = vpop.f32.mrb[182].mxu1 }
 0xbaf   : > { %v14768_v58 = vsel %vm14767_vm8, %v14766_v7, %v14765_v60  ;;  %v14602_v51 = vpop.f32.mrb[183].mxu1 }
 0xbb0   : > { %v14777_v42 = vsel %vm14767_vm8, %v14776_v22, %v14775_v37  ;;  %v16641_v37 = vld [vmem:[%s26102_s7 + $0x7] ss:$0 sm:$0xff] }
 0xbcc   : > { %v14661_v21 = vpop.f32.mrb[184].mxu1 }
 0xbcd   : > { %v14769_v52 = vrot.slane %v14661_v21, 2  ;;  %v14663_v45 = vpop.f32.mrb[185].mxu1 }
 0xbce   : > { %v14778_v36 = vrot.slane %v14663_v45, 2  ;;  %v14665_v38 = vpop.f32.mrb[186].mxu1 }
 0xbcf   : > { %v14771_v2 = vsel %vm14770_vm9, %v14769_v52, %v14768_v58  ;;  %v14666_v0 = vpop.f32.mrb[187].mxu1 }
 0xbd0   : > { %v14779_v16 = vsel %vm14770_vm9, %v14778_v36, %v14777_v42 }
 0xbec   : > { %v14725_v32 = vpop.f32.mrb[188].mxu1 }
 0xbed   : > { %v14772_v35 = vrot.slane %v14725_v32, 1  ;;  %v14727_v9 = vpop.f32.mrb[189].mxu1 }
 0xbee   : > { %v14780_v18 = vrot.slane %v14727_v9, 1  ;;  %v14729_v28 = vpop.f32.mrb[190].mxu1 }
 0xbef   : > { %v14774_v49 = vsel %vm14773_vm10, %v14772_v35, %v14771_v2  ;;  %v14730_v29 = vpop.f32.mrb[191].mxu1 }
 0xbf0   : > { %v14784_v30 = vsel %vm13945_vm0, %v25880_v63, %v14774_v49  ;;  %v14781_v11 = vsel %vm14773_vm10, %v14780_v18, %v14779_v16  ;;  %v19809_v63 = vld [vmem:[%s26101_s6 + $0x68] sm:$0xff]  }
 0xbf1   : > { %v14785_v3 = vsel %vm13945_vm0, %v25882_v4, %v14781_v11  ;;  %v14786_v1 = vpack.c.bf16 %v14784_v30, %v14784_v30  ;;  %v19810_v4 = vld [vmem:[%s26101_s6 + $0x28] sm:$0xff]   ;;  %16740 = vmatprep.subr.bf16.mxu1 %v19809_v63 }
 0xbf2   : > { %v14787_v50 = vpack.c.bf16 %v14785_v3, %v14785_v3  ;;  %16741 = vmatpush3.bf16.msra.mxu1 %v19810_v4 }
 0xbf3   : > { %16742 = vmatprep.subr.bf16.mxu1 %v19811_v25 }
 0xbf4   : > { %14953 = vmatprep.mubr.bf16.mxu0 %v14787_v50 }
 0xbf5   : > { %14954 = vmatmul.mubr.bf16.vlgmr.msra.gmra.mrb[112].mxu0 %v14786_v1 }
 0xbf6   : > { %16743 = vmatpush3.bf16.msra.mxu1 %v19812_v57 }
 0xbf7   : > { %16744 = vmatprep.subr.bf16.mxu1 %v19813_v61 }
 0xbfa   : > { %16745 = vmatpush3.bf16.msra.mxu1 %v19814_v54 }
 0xcc8   : > { %v16724_v40 = vpop.f32.mrb[112].mxu0 }
 0xcc9   : > { %v16725_v20 = vpop.f32.mrb[113].mxu0 }
 0xcca   : > { %v16726_v6 = vadd.f32 %v16725_v20, %v16724_v40  ;;  %v16727_v41 = vpop.f32.mrb[114].mxu0 }
 0xccb   : > { %v16728_v33 = vpop.f32.mrb[115].mxu0 }
 0xccc   : > { %v14956_v14 = vadd.f32 %v16726_v6, %v16620_v17 }
 0xcce   : > { %v14966_v39 = vmul.f32 %v16637_v24, %v14956_v14  ;;  %v14978_v55 = vmul.f32 %v16639_v34, %v14956_v14 }
 0xcd0   : > { %v14972_v31 = vadd.f32 %v16638_v56, %v14966_v39  ;;  %v14984_v53 = vadd.f32 %v16640_v62, %v14978_v55 }
 0xcd2   : > { %v14994_v15 = vrot.slane %v14984_v53, 4  ;;  %v15006_v13 = vrot.slane %v14972_v31, 4 }
 0xcd4   : > { %v15008_v23 = vsel %vm15004_vm13, %v14984_v53, %v15006_v13  ;;  %v14996_v43 = vsel %vm14992_vm14, %v14972_v31, %v14994_v15 }
 0xcd5   : > { %v15010_v8 = vrot.slane %v15008_v23, 4  ;;  %v15012_v7 = vpack.c.bf16 %v14996_v43, %v14996_v43 }
 0xcd7   : > { %v15013_v60 = vpack.c.bf16 %v15010_v8, %v15010_v8 }
 0xcd9   : > { %15179 = vmatprep.mubr.bf16.mxu1 %v15013_v60 }
 0xcda   : > { %15180 = vmatmul.mubr.bf16.vlgmr.msra.gmra.mrb[192].mxu1 %v15012_v7 }
 0xdad   : > { %v16746_v5 = vpop.f32.mrb[192].mxu1 }
 0xdae   : > { %v16747_v22 = vpop.f32.mrb[193].mxu1 }
 0xdaf   : > { %v16748_v27 = vadd.f32 %v16747_v22, %v16746_v5  ;;  %v16749_v58 = vpop.f32.mrb[194].mxu1 }
 0xdb0   : > { %v16750_v51 = vpop.f32.mrb[195].mxu1 }
 0xdb1   : > { %v15182_v42 = vadd.f32 %v16748_v27, %v16641_v37 }
 0xdb3   : > { %15187 = vst [vmem:[%s333_s26] sm:$0xf] %v15182_v42 }
 0xdb4 PF: > { %s18_s27 = sadd.s32 1, %s19963_s27  }
 0xdb5   : > { %p15_p5 = scmp.ge.s32.totalorder %s18_s27, 4  }
 0xdb7   :  { %17 = sbr.rel (!%p15_p5) target bundleno = 1 (0x1), region = 86 }

</bundles_post_ra>
